<compile_context>
chip_gen: v7x
topology: tpu7x:2x2x1
jax: 0.10.0
libtpu: 0.0.40
codegen_flags: <defaults>
</compile_context>

<pallas_src>
import math
import functools

import jax
import jax.numpy as jnp
from jax.experimental import pallas as pl
from jax.experimental.pallas import tpu as pltpu

_EPS = 1e-6
_PARALLEL = pltpu.CompilerParams(dimension_semantics=("parallel",))


# -----------------------------------------------------------------------------
# In-kernel helpers
# -----------------------------------------------------------------------------
def _ln_inner(x, g, b):
    """Annotated-transformer LayerNorm: g*(x-mean)/(std+eps)+b, unbiased std."""
    mean = jnp.mean(x, axis=-1, keepdims=True)
    xc = x - mean
    var = jnp.sum(xc * xc, axis=-1, keepdims=True) / (x.shape[-1] - 1)
    return g * xc / (jnp.sqrt(var) + _EPS) + b


def _mh_attn_proj(q, k, v, wo, num_heads, causal):
    """Multi-head attention with the output projection folded into the head loop.

    q: (Tq, D), k/v: (Tk, D), wo: (D, D).
    Returns sum_h softmax(q_h k_h^T / sqrt(Dh)) v_h @ wo[h*Dh:(h+1)*Dh, :].
    (No bias; caller adds bo and the residual.)
    """
    Tq, D = q.shape
    Tk = k.shape[0]
    Dh = D // num_heads
    scale = 1.0 / math.sqrt(Dh)
    if causal:
        rows = jax.lax.broadcasted_iota(jnp.int32, (Tq, Tk), 0)
        cols = jax.lax.broadcasted_iota(jnp.int32, (Tq, Tk), 1)
        neg = jnp.where(cols > rows, -1e9, 0.0).astype(jnp.float32)
    out = None
    for h in range(num_heads):
        sl = slice(h * Dh, (h + 1) * Dh)
        # q_h @ k_h^T without an explicit transpose (contract last dims).
        s = jax.lax.dot_general(q[:, sl], k[:, sl],
                                (((1,), (1,)), ((), ())),
                                preferred_element_type=jnp.float32) * scale
        if causal:
            s = s + neg
        s = s - jnp.max(s, axis=-1, keepdims=True)
        p = jnp.exp(s)
        p = p / jnp.sum(p, axis=-1, keepdims=True)
        oh = jnp.dot(p, v[:, sl], preferred_element_type=jnp.float32)
        ph = jnp.dot(oh, wo[sl, :], preferred_element_type=jnp.float32)
        out = ph if out is None else out + ph
    return out


# -----------------------------------------------------------------------------
# Fused Pallas kernels (one grid step = one batch element)
# -----------------------------------------------------------------------------
def _self_attn_sublayer_kernel(x_ref, g_ref, b_ref, wqkv_ref, bqkv_ref,
                               wo_ref, bo_ref, o_ref, *, num_heads, causal):
    """x + MHA(LN(x), LN(x), LN(x))  — SublayerConnection + self attention."""
    x = x_ref[0]                                                  # (T, D)
    D = x.shape[-1]
    xn = _ln_inner(x, g_ref[...], b_ref[...])
    qkv = jnp.dot(xn, wqkv_ref[...],
                  preferred_element_type=jnp.float32) + bqkv_ref[...]
    q, k, v = qkv[:, :D], qkv[:, D:2 * D], qkv[:, 2 * D:]
    att = _mh_attn_proj(q, k, v, wo_ref[...], num_heads, causal)
    o_ref[0] = x + att + bo_ref[...]


def _cross_attn_sublayer_kernel(x_ref, kv_ref, g_ref, b_ref, wq_ref, bq_ref,
                                wkv_ref, bkv_ref, wo_ref, bo_ref, o_ref,
                                *, num_heads):
    """x + MHA(LN(x), feats, feats)  — MHA_FF / decoder src-attention."""
    x = x_ref[0]                                                  # (Tq, D)
    m = kv_ref[0]                                                 # (Tk, D)
    D = x.shape[-1]
    xn = _ln_inner(x, g_ref[...], b_ref[...])
    q = jnp.dot(xn, wq_ref[...], preferred_element_type=jnp.float32) + bq_ref[...]
    kv = jnp.dot(m, wkv_ref[...], preferred_element_type=jnp.float32) + bkv_ref[...]
    att = _mh_attn_proj(q, kv[:, :D], kv[:, D:], wo_ref[...], num_heads, False)
    o_ref[0] = x + att + bo_ref[...]


def _ffn_sublayer_kernel(x_ref, g_ref, b_ref, w1_ref, b1_ref, w2_ref, b2_ref, o_ref):
    """x + FF2(ReLU(FF1(LN(x))))."""
    x = x_ref[0]
    xn = _ln_inner(x, g_ref[...], b_ref[...])
    h = jnp.maximum(jnp.dot(xn, w1_ref[...],
                            preferred_element_type=jnp.float32) + b1_ref[...], 0.0)
    o_ref[0] = x + jnp.dot(h, w2_ref[...],
                           preferred_element_type=jnp.float32) + b2_ref[...]


def _layernorm_kernel(x_ref, g_ref, b_ref, o_ref):
    o_ref[0] = _ln_inner(x_ref[0], g_ref[...], b_ref[...])


def _linear_relu_kernel(x_ref, w_ref, b_ref, o_ref):
    y = jnp.dot(x_ref[0], w_ref[...], preferred_element_type=jnp.float32) + b_ref[...]
    o_ref[0] = jnp.maximum(y, 0.0)


def _logit_logsoftmax_kernel(x_ref, w_ref, b_ref, o_ref):
    """log_softmax(x @ W + b) without writing the logits to HBM."""
    logits = jnp.dot(x_ref[0], w_ref[...],
                     preferred_element_type=jnp.float32) + b_ref[...]
    m = jnp.max(logits, axis=-1, keepdims=True)
    s = logits - m
    o_ref[0] = s - jnp.log(jnp.sum(jnp.exp(s), axis=-1, keepdims=True))


def _visual_kernel(x_ref, wp_ref, bp_ref, wc_ref, bc_ref, att_ref, fc_ref, lab_ref):
    """patch-embed -> mean-pool -> classifier, all in one kernel."""
    x = x_ref[0]                                                  # (Np, C*P*P)
    att = jnp.dot(x, wp_ref[...], preferred_element_type=jnp.float32) + bp_ref[...]
    att_ref[0] = att
    fc = jnp.mean(att, axis=0, keepdims=True)                     # (1, d_vf)
    fc_ref[0] = fc
    lab_ref[0] = jnp.dot(fc, wc_ref[...],
                         preferred_element_type=jnp.float32) + bc_ref[...]


def _select_prior_kernel(lab_ref, mem_ref, wpl_ref, bpl_ref, g_ref, b_ref,
                         wq_ref, bq_ref, wkv_ref, bkv_ref, wo_ref, bo_ref,
                         wpf_ref, bpf_ref, o_ref, *, num_heads):
    """proj_feat( select_prior( proj_label(labels).unsqueeze(1), memory ) )."""
    lab = lab_ref[0]                                              # (1, num_labels)
    x = jnp.dot(lab, wpl_ref[...],
                preferred_element_type=jnp.float32) + bpl_ref[...]  # label_feats (1, D)
    m = mem_ref[0]                                                # (S, D)
    D = x.shape[-1]
    xn = _ln_inner(x, g_ref[...], b_ref[...])
    q = jnp.dot(xn, wq_ref[...], preferred_element_type=jnp.float32) + bq_ref[...]
    kv = jnp.dot(m, wkv_ref[...], preferred_element_type=jnp.float32) + bkv_ref[...]
    att = _mh_attn_proj(q, kv[:, :D], kv[:, D:], wo_ref[...], num_heads, False)
    prior = x + att + bo_ref[...]
    o_ref[0] = jnp.dot(prior, wpf_ref[...],
                       preferred_element_type=jnp.float32) + bpf_ref[...]  # (1, d_vf)


# -----------------------------------------------------------------------------
# BlockSpec helpers + kernel wrappers
# -----------------------------------------------------------------------------
def _rep_spec(a):
    """Full-array block, same for every grid step (weights / biases / LN params)."""
    nd = a.ndim
    return pl.BlockSpec(a.shape, lambda i, _nd=nd: (0,) * _nd)


def _bat_spec(tail):
    """Block of shape (1, *tail) indexed by the batch grid axis."""
    n = len(tail)
    return pl.BlockSpec((1,) + tuple(tail), lambda i, _n=n: (i,) + (0,) * _n)


def self_attn_sublayer(x, ap, num_heads, causal=False):
    B, T, D = x.shape
    g, b = ap['ln']
    kern = functools.partial(_self_attn_sublayer_kernel,
                             num_heads=num_heads, causal=causal)
    ops = (x, g, b, ap['wqkv'], ap['bqkv'], ap['wo'], ap['bo'])
    return pl.pallas_call(
        kern,
        out_shape=jax.ShapeDtypeStruct((B, T, D), jnp.float32),
        grid=(B,),
        in_specs=[_bat_spec((T, D))] + [_rep_spec(o) for o in ops[1:]],
        out_specs=_bat_spec((T, D)),
        compiler_params=_PARALLEL,
    )(*ops)


def cross_attn_sublayer(x, kv, ap, num_heads):
    B, Tq, D = x.shape
    Tk = kv.shape[1]
    g, b = ap['ln']
    kern = functools.partial(_cross_attn_sublayer_kernel, num_heads=num_heads)
    ops = (x, kv, g, b, ap['wq'], ap['bq'], ap['wkv'], ap['bkv'], ap['wo'], ap['bo'])
    return pl.pallas_call(
        kern,
        out_shape=jax.ShapeDtypeStruct((B, Tq, D), jnp.float32),
        grid=(B,),
        in_specs=[_bat_spec((Tq, D)), _bat_spec((Tk, D))]
                 + [_rep_spec(o) for o in ops[2:]],
        out_specs=_bat_spec((Tq, D)),
        compiler_params=_PARALLEL,
    )(*ops)


def ffn_sublayer(x, fp):
    B, T, D = x.shape
    g, b = fp['ln']
    ops = (x, g, b, fp['w1'], fp['b1'], fp['w2'], fp['b2'])
    return pl.pallas_call(
        _ffn_sublayer_kernel,
        out_shape=jax.ShapeDtypeStruct((B, T, D), jnp.float32),
        grid=(B,),
        in_specs=[_bat_spec((T, D))] + [_rep_spec(o) for o in ops[1:]],
        out_specs=_bat_spec((T, D)),
        compiler_params=_PARALLEL,
    )(*ops)


def layernorm_batched(x, ln):
    B, T, D = x.shape
    g, b = ln
    return pl.pallas_call(
        _layernorm_kernel,
        out_shape=jax.ShapeDtypeStruct((B, T, D), jnp.float32),
        grid=(B,),
        in_specs=[_bat_spec((T, D)), _rep_spec(g), _rep_spec(b)],
        out_specs=_bat_spec((T, D)),
        compiler_params=_PARALLEL,
    )(x, g, b)


def linear_relu_batched(x, w, b):
    B, T, K = x.shape
    N = w.shape[1]
    return pl.pallas_call(
        _linear_relu_kernel,
        out_shape=jax.ShapeDtypeStruct((B, T, N), jnp.float32),
        grid=(B,),
        in_specs=[_bat_spec((T, K)), _rep_spec(w), _rep_spec(b)],
        out_specs=_bat_spec((T, N)),
        compiler_params=_PARALLEL,
    )(x, w, b)


def logit_log_softmax(x, w, b):
    B, T, D = x.shape
    V = w.shape[1]
    return pl.pallas_call(
        _logit_logsoftmax_kernel,
        out_shape=jax.ShapeDtypeStruct((B, T, V), jnp.float32),
        grid=(B,),
        in_specs=[_bat_spec((T, D)), _rep_spec(w), _rep_spec(b)],
        out_specs=_bat_spec((T, V)),
        compiler_params=_PARALLEL,
    )(x, w, b)


def visual_extractor(vp, images, patch):
    """Patch-embed stand-in for the ResNet VisualExtractor (fused kernel)."""
    B, C, H, W = images.shape
    nh, nw = H // patch, W // patch
    x = images.reshape(B, C, nh, patch, nw, patch)
    x = x.transpose(0, 2, 4, 1, 3, 5).reshape(B, nh * nw, C * patch * patch)
    Np, Pd = nh * nw, C * patch * patch
    dvf = vp['wp'].shape[1]
    nl = vp['wc'].shape[1]
    att, fc, lab = pl.pallas_call(
        _visual_kernel,
        out_shape=(jax.ShapeDtypeStruct((B, Np, dvf), jnp.float32),
                   jax.ShapeDtypeStruct((B, 1, dvf), jnp.float32),
                   jax.ShapeDtypeStruct((B, 1, nl), jnp.float32)),
        grid=(B,),
        in_specs=[_bat_spec((Np, Pd)), _rep_spec(vp['wp']), _rep_spec(vp['bp']),
                  _rep_spec(vp['wc']), _rep_spec(vp['bc'])],
        out_specs=(_bat_spec((Np, dvf)), _bat_spec((1, dvf)), _bat_spec((1, nl))),
        compiler_params=_PARALLEL,
    )(x, vp['wp'], vp['bp'], vp['wc'], vp['bc'])
    return att, fc[:, 0, :], lab                 # lab kept (B, 1, nl) for select_prior


def select_prior_block(labels3, memory, sp, num_heads):
    B, _, nl = labels3.shape
    S, D = memory.shape[1], memory.shape[2]
    dvf = sp['wpf'].shape[1]
    g, b = sp['ln']
    kern = functools.partial(_select_prior_kernel, num_heads=num_heads)
    ops = (labels3, memory, sp['wpl'], sp['bpl'], g, b, sp['wq'], sp['bq'],
           sp['wkv'], sp['bkv'], sp['wo'], sp['bo'], sp['wpf'], sp['bpf'])
    return pl.pallas_call(
        kern,
        out_shape=jax.ShapeDtypeStruct((B, 1, dvf), jnp.float32),
        grid=(B,),
        in_specs=[_bat_spec((1, nl)), _bat_spec((S, D))]
                 + [_rep_spec(o) for o in ops[2:]],
        out_specs=_bat_spec((1, dvf)),
        compiler_params=_PARALLEL,
    )(*ops)


# -----------------------------------------------------------------------------
# Model glue (embeddings / positional encoding / layer stacking stay in JAX)
# -----------------------------------------------------------------------------
def positional_encoding(T, D):
    pos = jnp.arange(T, dtype=jnp.float32)[:, None]
    div = jnp.exp(jnp.arange(0, D, 2, dtype=jnp.float32) * (-math.log(10000.0) / D))
    pe = jnp.zeros((T, D), jnp.float32)
    pe = pe.at[:, 0::2].set(jnp.sin(pos * div))
    pe = pe.at[:, 1::2].set(jnp.cos(pos * div))
    return pe


def text_encoder(tp, targets, d_model, num_heads):
    B, T = targets.shape
    x = tp['embed'][targets] * math.sqrt(d_model) + positional_encoding(T, d_model)
    for lp in tp['layers']:
        x = self_attn_sublayer(x, lp['attn'], num_heads, causal=False)
        x = ffn_sublayer(x, lp['ffn'])
    # TODO(synk): reference TextEncoder also emits (z_txt, txt_labels); they are
    # dead in LAMRGModel_v8.forward so they are not computed here.
    return layernorm_batched(x, tp['norm'])


def encoder_decoder(ep, att_feats, targets, d_model, num_heads):
    # att_embed: Linear(d_vf, d_model) + ReLU  (dropout = identity)
    x = linear_relu_batched(att_feats, ep['att_w'], ep['att_b'])
    for lp in ep['enc_layers']:
        x = self_attn_sublayer(x, lp['attn'], num_heads, causal=False)
        x = ffn_sublayer(x, lp['ffn'])
    memory = layernorm_batched(x, ep['enc_norm'])

    B, T = targets.shape
    y = ep['tgt_embed'][targets] * math.sqrt(d_model) + positional_encoding(T, d_model)
    for lp in ep['dec_layers']:
        y = self_attn_sublayer(y, lp['self'], num_heads, causal=True)
        y = cross_attn_sublayer(y, memory, lp['src'], num_heads)
        y = ffn_sublayer(y, lp['ffn'])
    y = layernorm_batched(y, ep['dec_norm'])
    return logit_log_softmax(y, ep['logit_w'], ep['logit_b'])


def lamrg_v8_forward(params, images, targets, cfg):
    d, h = cfg['d_model'], cfg['num_heads']

    # forward_mimic_cxr path (single view)
    att_feats, fc_feats, labels3 = visual_extractor(params['ve'], images, cfg['patch'])
    out_labels = labels3[:, 0, :]                                   # (B, num_labels)

    B = att_feats.shape[0]
    memory = jnp.broadcast_to(params['memory'],
                              (B,) + params['memory'].shape[1:])    # (B, S, d)

    # mode == 'train'
    txt_feats = text_encoder(params['txt'], targets, d, h)
    memory = cross_attn_sublayer(memory, txt_feats, params['prior_memory'], h)

    prior_feat = select_prior_block(labels3, memory, params['select_prior'], h)
    att_feats = jnp.concatenate([att_feats, prior_feat], axis=1)

    output = encoder_decoder(params['ed'], att_feats, targets, d, h)
    return output, out_labels


# -----------------------------------------------------------------------------
# Parameter init (f32, pre-fused QKV / KV weights, biases stored as (1, N))
# -----------------------------------------------------------------------------
def init_linear(key, fan_in, fan_out, kaiming=False):
    kw, kb = jax.random.split(key)
    if kaiming:   # kaiming_normal_ + zero bias
        w = jax.random.normal(kw, (fan_in, fan_out), jnp.float32) * math.sqrt(2.0 / fan_in)
        b = jnp.zeros((1, fan_out), jnp.float32)
    else:         # PyTorch nn.Linear default init
        bound = 1.0 / math.sqrt(fan_in)
        w = jax.random.uniform(kw, (fan_in, fan_out), jnp.float32, -bound, bound)
        b = jax.random.uniform(kb, (1, fan_out), jnp.float32, -bound, bound)
    return w, b


def init_ln(d):
    return (jnp.ones((1, d), jnp.float32), jnp.zeros((1, d), jnp.float32))


def init_self_attn(key, d):
    ks = jax.random.split(key, 4)
    wq, bq = init_linear(ks[0], d, d)
    wk, bk = init_linear(ks[1], d, d)
    wv, bv = init_linear(ks[2], d, d)
    wo, bo = init_linear(ks[3], d, d)
    return {'ln': init_ln(d),
            'wqkv': jnp.concatenate([wq, wk, wv], axis=1),
            'bqkv': jnp.concatenate([bq, bk, bv], axis=1),
            'wo': wo, 'bo': bo}


def init_cross_attn(key, d):
    ks = jax.random.split(key, 4)
    wq, bq = init_linear(ks[0], d, d)
    wk, bk = init_linear(ks[1], d, d)
    wv, bv = init_linear(ks[2], d, d)
    wo, bo = init_linear(ks[3], d, d)
    return {'ln': init_ln(d), 'wq': wq, 'bq': bq,
            'wkv': jnp.concatenate([wk, wv], axis=1),
            'bkv': jnp.concatenate([bk, bv], axis=1),
            'wo': wo, 'bo': bo}


def init_ffn(key, d, dff):
    k1, k2 = jax.random.split(key)
    w1, b1 = init_linear(k1, d, dff)
    w2, b2 = init_linear(k2, dff, d)
    return {'ln': init_ln(d), 'w1': w1, 'b1': b1, 'w2': w2, 'b2': b2}


def init_enc_layer(key, d, dff):
    k1, k2 = jax.random.split(key)
    return {'attn': init_self_attn(k1, d), 'ffn': init_ffn(k2, d, dff)}


def init_dec_layer(key, d, dff):
    k1, k2, k3 = jax.random.split(key, 3)
    return {'self': init_self_attn(k1, d), 'src': init_cross_attn(k2, d),
            'ffn': init_ffn(k3, d, dff)}


def init_memory(num_slots, d_model):
    mem = jnp.eye(num_slots, dtype=jnp.float32)
    if d_model > num_slots:
        mem = jnp.concatenate(
            [mem, jnp.zeros((num_slots, d_model - num_slots), jnp.float32)], axis=-1)
    elif d_model < num_slots:
        mem = mem[:, :d_model]
    return mem[None]   # (1, num_slots, d_model)


def init_params(key, cfg):
    d, dff, dvf = cfg['d_model'], cfg['d_ff'], cfg['d_vf']
    L, V = cfg['num_layers'], cfg['tgt_vocab']
    nl, ns, patch = cfg['num_labels'], cfg['num_slots'], cfg['patch']
    keys = iter(jax.random.split(key, 64))
    pdim = cfg['in_channels'] * patch * patch

    wp, bp = init_linear(next(keys), pdim, dvf)            # visual patch embed
    wc, bc = init_linear(next(keys), dvf, nl)              # visual label classifier

    wpl, bpl = init_linear(next(keys), nl, d, kaiming=True)   # proj_label
    wpf, bpf = init_linear(next(keys), d, dvf)                # proj_feat
    sp = init_cross_attn(next(keys), d)                       # select_prior MHA_FF
    sp.update({'wpl': wpl, 'bpl': bpl, 'wpf': wpf, 'bpf': bpf})

    aw, ab = init_linear(next(keys), dvf, d)                  # att_embed
    lw, lb = init_linear(next(keys), d, V)                    # logit

    return {
        've': {'wp': wp, 'bp': bp, 'wc': wc, 'bc': bc},
        'memory': init_memory(ns, d),
        'txt': {'embed': jax.random.normal(next(keys), (V, d), jnp.float32),
                'layers': [init_enc_layer(next(keys), d, dff) for _ in range(L)],
                'norm': init_ln(d)},
        'prior_memory': init_cross_attn(next(keys), d),
        'select_prior': sp,
        'ed': {'att_w': aw, 'att_b': ab,
               'enc_layers': [init_enc_layer(next(keys), d, dff) for _ in range(L)],
               'enc_norm': init_ln(d),
               'tgt_embed': jax.random.normal(next(keys), (V, d), jnp.float32),
               'dec_layers': [init_dec_layer(next(keys), d, dff) for _ in range(L)],
               'dec_norm': init_ln(d),
               'logit_w': lw, 'logit_b': lb},
    }


# -----------------------------------------------------------------------------
if __name__ == "__main__":
    cfg = dict(d_model=32, d_ff=64, num_layers=2, num_heads=4,
               num_labels=14, num_slots=3, d_vf=48, tgt_vocab=31,
               patch=8, in_channels=3)

    root = jax.random.PRNGKey(0)
    k_params, k_img, k_tgt = jax.random.split(root, 3)

    params = init_params(k_params, cfg)
    images = jax.random.normal(k_img, (2, 3, 16, 16), jnp.float32)     # NCHW
    targets = jax.random.randint(k_tgt, (2, 8), 1, cfg['tgt_vocab'], jnp.int32)

    fwd = jax.jit(functools.partial(lamrg_v8_forward, cfg=cfg))
    output, out_labels = jax.block_until_ready(fwd(params, images, targets))

    assert output.shape == (2, 8, cfg['tgt_vocab'])
    assert out_labels.shape == (2, cfg['num_labels'])
    assert bool(jnp.all(jnp.isfinite(output)))
    assert bool(jnp.all(jnp.isfinite(out_labels)))
    print("KERNEL_OK")
</pallas_src>

<mosaic_0001>
module attributes {stable_mosaic.version = 11 : i64} {
  func.func @_self_attn_sublayer_kernel(%arg0: i32, %arg1: memref<1x8x32xf32, #tpu.memory_space<vmem>>, %arg2: memref<1x32xf32, #tpu.memory_space<vmem>>, %arg3: memref<1x32xf32, #tpu.memory_space<vmem>>, %arg4: memref<32x96xf32, #tpu.memory_space<vmem>>, %arg5: memref<1x96xf32, #tpu.memory_space<vmem>>, %arg6: memref<32x32xf32, #tpu.memory_space<vmem>>, %arg7: memref<1x32xf32, #tpu.memory_space<vmem>>, %arg8: memref<1x8x32xf32, #tpu.memory_space<vmem>>) attributes {dimension_semantics = [#tpu.dimension_semantics<parallel>], iteration_bounds = array<i64: 2>, scalar_prefetch = 0 : i64, scratch_operands = 0 : i64, tpu.core_type = #tpu.core_type<tc>, window_params = [{transform_indices = @transform_0, window_bounds = array<i64: 1, 8, 32>}, {pipeline_mode = #tpu.pipeline_mode<synchronous>, transform_indices = @transform_1, window_bounds = array<i64: 1, 32>}, {pipeline_mode = #tpu.pipeline_mode<synchronous>, transform_indices = @transform_2, window_bounds = array<i64: 1, 32>}, {pipeline_mode = #tpu.pipeline_mode<synchronous>, transform_indices = @transform_3, window_bounds = array<i64: 32, 96>}, {pipeline_mode = #tpu.pipeline_mode<synchronous>, transform_indices = @transform_4, window_bounds = array<i64: 1, 96>}, {pipeline_mode = #tpu.pipeline_mode<synchronous>, transform_indices = @transform_5, window_bounds = array<i64: 32, 32>}, {pipeline_mode = #tpu.pipeline_mode<synchronous>, transform_indices = @transform_6, window_bounds = array<i64: 1, 32>}, {transform_indices = @transform_7, window_bounds = array<i64: 1, 8, 32>}]} {
    %c0 = arith.constant 0 : index
    %c0_0 = arith.constant 0 : index
    %c0_1 = arith.constant 0 : index
    %0 = vector.load %arg1[%c0, %c0_0, %c0_1] : memref<1x8x32xf32, #tpu.memory_space<vmem>>, vector<1x8x32xf32>
    %1 = vector.shape_cast %0 : vector<1x8x32xf32> to vector<8x32xf32>
    %c0_2 = arith.constant 0 : index
    %c0_3 = arith.constant 0 : index
    %2 = vector.load %arg2[%c0_2, %c0_3] : memref<1x32xf32, #tpu.memory_space<vmem>>, vector<1x32xf32>
    %c0_4 = arith.constant 0 : index
    %c0_5 = arith.constant 0 : index
    %3 = vector.load %arg3[%c0_4, %c0_5] : memref<1x32xf32, #tpu.memory_space<vmem>>, vector<1x32xf32>
    %cst = arith.constant dense<0.000000e+00> : vector<8xf32>
    %4 = vector.multi_reduction <add>, %1, %cst [1] : vector<8x32xf32> to vector<8xf32>
    %5 = vector.shape_cast %4 : vector<8xf32> to vector<8x1xf32>
    %cst_6 = arith.constant 3.200000e+01 : f32
    %6 = vector.broadcast %cst_6 : f32 to vector<8x1xf32>
    %7 = arith.divf %5, %6 : vector<8x1xf32>
    %8 = vector.broadcast %7 : vector<8x1xf32> to vector<8x32xf32>
    %9 = arith.subf %1, %8 : vector<8x32xf32>
    %10 = arith.mulf %9, %9 : vector<8x32xf32>
    %cst_7 = arith.constant dense<0.000000e+00> : vector<8xf32>
    %11 = vector.multi_reduction <add>, %10, %cst_7 [1] : vector<8x32xf32> to vector<8xf32>
    %12 = vector.shape_cast %11 : vector<8xf32> to vector<8x1xf32>
    %cst_8 = arith.constant 3.100000e+01 : f32
    %13 = vector.broadcast %cst_8 : f32 to vector<8x1xf32>
    %14 = arith.divf %12, %13 : vector<8x1xf32>
    %15 = vector.broadcast %2 : vector<1x32xf32> to vector<8x32xf32>
    %16 = arith.mulf %15, %9 : vector<8x32xf32>
    %17 = math.sqrt %14 : vector<8x1xf32>
    %cst_9 = arith.constant 9.99999997E-7 : f32
    %18 = vector.broadcast %cst_9 : f32 to vector<8x1xf32>
    %19 = arith.addf %17, %18 : vector<8x1xf32>
    %20 = vector.broadcast %19 : vector<8x1xf32> to vector<8x32xf32>
    %21 = arith.divf %16, %20 : vector<8x32xf32>
    %22 = vector.broadcast %3 : vector<1x32xf32> to vector<8x32xf32>
    %23 = arith.addf %21, %22 : vector<8x32xf32>
    %c0_10 = arith.constant 0 : index
    %c0_11 = arith.constant 0 : index
    %24 = vector.load %arg4[%c0_10, %c0_11] : memref<32x96xf32, #tpu.memory_space<vmem>>, vector<32x96xf32>
    %cst_12 = arith.constant dense<0.000000e+00> : vector<8x96xf32>
    %25 = tpu.matmul %23, %24, %cst_12 {dimension_numbers = #tpu.dot_dimension_numbers<[1], [0], [0], [1], [0, 0, 1, 1], [], []>} : vector<8x32xf32>, vector<32x96xf32>, vector<8x96xf32> -> vector<8x96xf32>
    %c0_13 = arith.constant 0 : index
    %c0_14 = arith.constant 0 : index
    %26 = vector.load %arg5[%c0_13, %c0_14] : memref<1x96xf32, #tpu.memory_space<vmem>>, vector<1x96xf32>
    %27 = vector.broadcast %26 : vector<1x96xf32> to vector<8x96xf32>
    %28 = arith.addf %25, %27 : vector<8x96xf32>
    %29 = vector.extract_strided_slice %28 {offsets = [0, 0], sizes = [8, 32], strides = [1, 1]} : vector<8x96xf32> to vector<8x32xf32>
    %30 = vector.extract_strided_slice %28 {offsets = [0, 32], sizes = [8, 32], strides = [1, 1]} : vector<8x96xf32> to vector<8x32xf32>
    %31 = vector.extract_strided_slice %28 {offsets = [0, 64], sizes = [8, 32], strides = [1, 1]} : vector<8x96xf32> to vector<8x32xf32>
    %c0_15 = arith.constant 0 : index
    %c0_16 = arith.constant 0 : index
    %32 = vector.load %arg6[%c0_15, %c0_16] : memref<32x32xf32, #tpu.memory_space<vmem>>, vector<32x32xf32>
    %33 = vector.extract_strided_slice %29 {offsets = [0, 0], sizes = [8, 8], strides = [1, 1]} : vector<8x32xf32> to vector<8x8xf32>
    %34 = vector.extract_strided_slice %30 {offsets = [0, 0], sizes = [8, 8], strides = [1, 1]} : vector<8x32xf32> to vector<8x8xf32>
    %cst_17 = arith.constant dense<0.000000e+00> : vector<8x8xf32>
    %35 = tpu.matmul %33, %34, %cst_17 {dimension_numbers = #tpu.dot_dimension_numbers<[1], [1], [0], [0], [0, 0, 1, 0], [], []>} : vector<8x8xf32>, vector<8x8xf32>, vector<8x8xf32> -> vector<8x8xf32>
    %cst_18 = arith.constant 0.353553385 : f32
    %36 = vector.broadcast %cst_18 : f32 to vector<8x8xf32>
    %37 = arith.mulf %35, %36 : vector<8x8xf32>
    %cst_19 = arith.constant dense<0xFF800000> : vector<8xf32>
    %38 = vector.multi_reduction <maximumf>, %37, %cst_19 [1] : vector<8x8xf32> to vector<8xf32>
    %39 = vector.shape_cast %38 : vector<8xf32> to vector<8x1xf32>
    %40 = vector.broadcast %39 : vector<8x1xf32> to vector<8x8xf32>
    %41 = arith.subf %37, %40 : vector<8x8xf32>
    %42 = math.exp %41 : vector<8x8xf32>
    %cst_20 = arith.constant dense<0.000000e+00> : vector<8xf32>
    %43 = vector.multi_reduction <add>, %42, %cst_20 [1] : vector<8x8xf32> to vector<8xf32>
    %44 = vector.shape_cast %43 : vector<8xf32> to vector<8x1xf32>
    %45 = vector.broadcast %44 : vector<8x1xf32> to vector<8x8xf32>
    %46 = arith.divf %42, %45 : vector<8x8xf32>
    %47 = vector.extract_strided_slice %31 {offsets = [0, 0], sizes = [8, 8], strides = [1, 1]} : vector<8x32xf32> to vector<8x8xf32>
    %cst_21 = arith.constant dense<0.000000e+00> : vector<8x8xf32>
    %48 = tpu.matmul %46, %47, %cst_21 {dimension_numbers = #tpu.dot_dimension_numbers<[1], [0], [0], [1], [0, 0, 1, 1], [], []>} : vector<8x8xf32>, vector<8x8xf32>, vector<8x8xf32> -> vector<8x8xf32>
    %49 = vector.extract_strided_slice %32 {offsets = [0, 0], sizes = [8, 32], strides = [1, 1]} : vector<32x32xf32> to vector<8x32xf32>
    %cst_22 = arith.constant dense<0.000000e+00> : vector<8x32xf32>
    %50 = tpu.matmul %48, %49, %cst_22 {dimension_numbers = #tpu.dot_dimension_numbers<[1], [0], [0], [1], [0, 0, 1, 1], [], []>} : vector<8x8xf32>, vector<8x32xf32>, vector<8x32xf32> -> vector<8x32xf32>
    %51 = vector.extract_strided_slice %29 {offsets = [0, 8], sizes = [8, 8], strides = [1, 1]} : vector<8x32xf32> to vector<8x8xf32>
    %52 = vector.extract_strided_slice %30 {offsets = [0, 8], sizes = [8, 8], strides = [1, 1]} : vector<8x32xf32> to vector<8x8xf32>
    %cst_23 = arith.constant dense<0.000000e+00> : vector<8x8xf32>
    %53 = tpu.matmul %51, %52, %cst_23 {dimension_numbers = #tpu.dot_dimension_numbers<[1], [1], [0], [0], [0, 0, 1, 0], [], []>} : vector<8x8xf32>, vector<8x8xf32>, vector<8x8xf32> -> vector<8x8xf32>
    %cst_24 = arith.constant 0.353553385 : f32
    %54 = vector.broadcast %cst_24 : f32 to vector<8x8xf32>
    %55 = arith.mulf %53, %54 : vector<8x8xf32>
    %cst_25 = arith.constant dense<0xFF800000> : vector<8xf32>
    %56 = vector.multi_reduction <maximumf>, %55, %cst_25 [1] : vector<8x8xf32> to vector<8xf32>
    %57 = vector.shape_cast %56 : vector<8xf32> to vector<8x1xf32>
    %58 = vector.broadcast %57 : vector<8x1xf32> to vector<8x8xf32>
    %59 = arith.subf %55, %58 : vector<8x8xf32>
    %60 = math.exp %59 : vector<8x8xf32>
    %cst_26 = arith.constant dense<0.000000e+00> : vector<8xf32>
    %61 = vector.multi_reduction <add>, %60, %cst_26 [1] : vector<8x8xf32> to vector<8xf32>
    %62 = vector.shape_cast %61 : vector<8xf32> to vector<8x1xf32>
    %63 = vector.broadcast %62 : vector<8x1xf32> to vector<8x8xf32>
    %64 = arith.divf %60, %63 : vector<8x8xf32>
    %65 = vector.extract_strided_slice %31 {offsets = [0, 8], sizes = [8, 8], strides = [1, 1]} : vector<8x32xf32> to vector<8x8xf32>
    %cst_27 = arith.constant dense<0.000000e+00> : vector<8x8xf32>
    %66 = tpu.matmul %64, %65, %cst_27 {dimension_numbers = #tpu.dot_dimension_numbers<[1], [0], [0], [1], [0, 0, 1, 1], [], []>} : vector<8x8xf32>, vector<8x8xf32>, vector<8x8xf32> -> vector<8x8xf32>
    %67 = vector.extract_strided_slice %32 {offsets = [8, 0], sizes = [8, 32], strides = [1, 1]} : vector<32x32xf32> to vector<8x32xf32>
    %cst_28 = arith.constant dense<0.000000e+00> : vector<8x32xf32>
    %68 = tpu.matmul %66, %67, %cst_28 {dimension_numbers = #tpu.dot_dimension_numbers<[1], [0], [0], [1], [0, 0, 1, 1], [], []>} : vector<8x8xf32>, vector<8x32xf32>, vector<8x32xf32> -> vector<8x32xf32>
    %69 = arith.addf %50, %68 : vector<8x32xf32>
    %70 = vector.extract_strided_slice %29 {offsets = [0, 16], sizes = [8, 8], strides = [1, 1]} : vector<8x32xf32> to vector<8x8xf32>
    %71 = vector.extract_strided_slice %30 {offsets = [0, 16], sizes = [8, 8], strides = [1, 1]} : vector<8x32xf32> to vector<8x8xf32>
    %cst_29 = arith.constant dense<0.000000e+00> : vector<8x8xf32>
    %72 = tpu.matmul %70, %71, %cst_29 {dimension_numbers = #tpu.dot_dimension_numbers<[1], [1], [0], [0], [0, 0, 1, 0], [], []>} : vector<8x8xf32>, vector<8x8xf32>, vector<8x8xf32> -> vector<8x8xf32>
    %cst_30 = arith.constant 0.353553385 : f32
    %73 = vector.broadcast %cst_30 : f32 to vector<8x8xf32>
    %74 = arith.mulf %72, %73 : vector<8x8xf32>
    %cst_31 = arith.constant dense<0xFF800000> : vector<8xf32>
    %75 = vector.multi_reduction <maximumf>, %74, %cst_31 [1] : vector<8x8xf32> to vector<8xf32>
    %76 = vector.shape_cast %75 : vector<8xf32> to vector<8x1xf32>
    %77 = vector.broadcast %76 : vector<8x1xf32> to vector<8x8xf32>
    %78 = arith.subf %74, %77 : vector<8x8xf32>
    %79 = math.exp %78 : vector<8x8xf32>
    %cst_32 = arith.constant dense<0.000000e+00> : vector<8xf32>
    %80 = vector.multi_reduction <add>, %79, %cst_32 [1] : vector<8x8xf32> to vector<8xf32>
    %81 = vector.shape_cast %80 : vector<8xf32> to vector<8x1xf32>
    %82 = vector.broadcast %81 : vector<8x1xf32> to vector<8x8xf32>
    %83 = arith.divf %79, %82 : vector<8x8xf32>
    %84 = vector.extract_strided_slice %31 {offsets = [0, 16], sizes = [8, 8], strides = [1, 1]} : vector<8x32xf32> to vector<8x8xf32>
    %cst_33 = arith.constant dense<0.000000e+00> : vector<8x8xf32>
    %85 = tpu.matmul %83, %84, %cst_33 {dimension_numbers = #tpu.dot_dimension_numbers<[1], [0], [0], [1], [0, 0, 1, 1], [], []>} : vector<8x8xf32>, vector<8x8xf32>, vector<8x8xf32> -> vector<8x8xf32>
    %86 = vector.extract_strided_slice %32 {offsets = [16, 0], sizes = [8, 32], strides = [1, 1]} : vector<32x32xf32> to vector<8x32xf32>
    %cst_34 = arith.constant dense<0.000000e+00> : vector<8x32xf32>
    %87 = tpu.matmul %85, %86, %cst_34 {dimension_numbers = #tpu.dot_dimension_numbers<[1], [0], [0], [1], [0, 0, 1, 1], [], []>} : vector<8x8xf32>, vector<8x32xf32>, vector<8x32xf32> -> vector<8x32xf32>
    %88 = arith.addf %69, %87 : vector<8x32xf32>
    %89 = vector.extract_strided_slice %29 {offsets = [0, 24], sizes = [8, 8], strides = [1, 1]} : vector<8x32xf32> to vector<8x8xf32>
    %90 = vector.extract_strided_slice %30 {offsets = [0, 24], sizes = [8, 8], strides = [1, 1]} : vector<8x32xf32> to vector<8x8xf32>
    %cst_35 = arith.constant dense<0.000000e+00> : vector<8x8xf32>
    %91 = tpu.matmul %89, %90, %cst_35 {dimension_numbers = #tpu.dot_dimension_numbers<[1], [1], [0], [0], [0, 0, 1, 0], [], []>} : vector<8x8xf32>, vector<8x8xf32>, vector<8x8xf32> -> vector<8x8xf32>
    %cst_36 = arith.constant 0.353553385 : f32
    %92 = vector.broadcast %cst_36 : f32 to vector<8x8xf32>
    %93 = arith.mulf %91, %92 : vector<8x8xf32>
    %cst_37 = arith.constant dense<0xFF800000> : vector<8xf32>
    %94 = vector.multi_reduction <maximumf>, %93, %cst_37 [1] : vector<8x8xf32> to vector<8xf32>
    %95 = vector.shape_cast %94 : vector<8xf32> to vector<8x1xf32>
    %96 = vector.broadcast %95 : vector<8x1xf32> to vector<8x8xf32>
    %97 = arith.subf %93, %96 : vector<8x8xf32>
    %98 = math.exp %97 : vector<8x8xf32>
    %cst_38 = arith.constant dense<0.000000e+00> : vector<8xf32>
    %99 = vector.multi_reduction <add>, %98, %cst_38 [1] : vector<8x8xf32> to vector<8xf32>
    %100 = vector.shape_cast %99 : vector<8xf32> to vector<8x1xf32>
    %101 = vector.broadcast %100 : vector<8x1xf32> to vector<8x8xf32>
    %102 = arith.divf %98, %101 : vector<8x8xf32>
    %103 = vector.extract_strided_slice %31 {offsets = [0, 24], sizes = [8, 8], strides = [1, 1]} : vector<8x32xf32> to vector<8x8xf32>
    %cst_39 = arith.constant dense<0.000000e+00> : vector<8x8xf32>
    %104 = tpu.matmul %102, %103, %cst_39 {dimension_numbers = #tpu.dot_dimension_numbers<[1], [0], [0], [1], [0, 0, 1, 1], [], []>} : vector<8x8xf32>, vector<8x8xf32>, vector<8x8xf32> -> vector<8x8xf32>
    %105 = vector.extract_strided_slice %32 {offsets = [24, 0], sizes = [8, 32], strides = [1, 1]} : vector<32x32xf32> to vector<8x32xf32>
    %cst_40 = arith.constant dense<0.000000e+00> : vector<8x32xf32>
    %106 = tpu.matmul %104, %105, %cst_40 {dimension_numbers = #tpu.dot_dimension_numbers<[1], [0], [0], [1], [0, 0, 1, 1], [], []>} : vector<8x8xf32>, vector<8x32xf32>, vector<8x32xf32> -> vector<8x32xf32>
    %107 = arith.addf %88, %106 : vector<8x32xf32>
    %108 = arith.addf %1, %107 : vector<8x32xf32>
    %c0_41 = arith.constant 0 : index
    %c0_42 = arith.constant 0 : index
    %109 = vector.load %arg7[%c0_41, %c0_42] : memref<1x32xf32, #tpu.memory_space<vmem>>, vector<1x32xf32>
    %110 = vector.broadcast %109 : vector<1x32xf32> to vector<8x32xf32>
    %111 = arith.addf %108, %110 : vector<8x32xf32>
    %c0_43 = arith.constant 0 : index
    %c0_44 = arith.constant 0 : index
    %c0_45 = arith.constant 0 : index
    %112 = vector.load %arg8[%c0_43, %c0_44, %c0_45] : memref<1x8x32xf32, #tpu.memory_space<vmem>>, vector<1x8x32xf32>
    %113 = vector.shape_cast %112 : vector<1x8x32xf32> to vector<8x32xf32>
    %114 = vector.shape_cast %111 : vector<8x32xf32> to vector<1x8x32xf32>
    tpu.vector_store %arg8[%c0_43, %c0_44, %c0_45], %114 {strides = array<i32>} : memref<1x8x32xf32, #tpu.memory_space<vmem>>, vector<1x8x32xf32>,
    return
  }
  func.func @transform_0(%arg0: i32) -> (i32, i32, i32) {
    %c0_i32 = arith.constant 0 : i32
    %c0_i32_0 = arith.constant 0 : i32
    %c0_i32_1 = arith.constant 0 : i32
    return %arg0, %c0_i32, %c0_i32_0 : i32, i32, i32
  }
  func.func @transform_1(%arg0: i32) -> (i32, i32) {
    %c0_i32 = arith.constant 0 : i32
    %c0_i32_0 = arith.constant 0 : i32
    %c0_i32_1 = arith.constant 0 : i32
    return %c0_i32, %c0_i32_0 : i32, i32
  }
  func.func @transform_2(%arg0: i32) -> (i32, i32) {
    %c0_i32 = arith.constant 0 : i32
    %c0_i32_0 = arith.constant 0 : i32
    %c0_i32_1 = arith.constant 0 : i32
    return %c0_i32, %c0_i32_0 : i32, i32
  }
  func.func @transform_3(%arg0: i32) -> (i32, i32) {
    %c0_i32 = arith.constant 0 : i32
    %c0_i32_0 = arith.constant 0 : i32
    %c0_i32_1 = arith.constant 0 : i32
    return %c0_i32, %c0_i32_0 : i32, i32
  }
  func.func @transform_4(%arg0: i32) -> (i32, i32) {
    %c0_i32 = arith.constant 0 : i32
    %c0_i32_0 = arith.constant 0 : i32
    %c0_i32_1 = arith.constant 0 : i32
    return %c0_i32, %c0_i32_0 : i32, i32
  }
  func.func @transform_5(%arg0: i32) -> (i32, i32) {
    %c0_i32 = arith.constant 0 : i32
    %c0_i32_0 = arith.constant 0 : i32
    %c0_i32_1 = arith.constant 0 : i32
    return %c0_i32, %c0_i32_0 : i32, i32
  }
  func.func @transform_6(%arg0: i32) -> (i32, i32) {
    %c0_i32 = arith.constant 0 : i32
    %c0_i32_0 = arith.constant 0 : i32
    %c0_i32_1 = arith.constant 0 : i32
    return %c0_i32, %c0_i32_0 : i32, i32
  }
  func.func @transform_7(%arg0: i32) -> (i32, i32, i32) {
    %c0_i32 = arith.constant 0 : i32
    %c0_i32_0 = arith.constant 0 : i32
    %c0_i32_1 = arith.constant 0 : i32
    return %arg0, %c0_i32, %c0_i32_0 : i32, i32, i32
  }
}

module attributes {stable_mosaic.version = 11 : i64} {
  func.func @_ffn_sublayer_kernel(%arg0: i32, %arg1: memref<1x8x32xf32, #tpu.memory_space<vmem>>, %arg2: memref<1x32xf32, #tpu.memory_space<vmem>>, %arg3: memref<1x32xf32, #tpu.memory_space<vmem>>, %arg4: memref<32x64xf32, #tpu.memory_space<vmem>>, %arg5: memref<1x64xf32, #tpu.memory_space<vmem>>, %arg6: memref<64x32xf32, #tpu.memory_space<vmem>>, %arg7: memref<1x32xf32, #tpu.memory_space<vmem>>, %arg8: memref<1x8x32xf32, #tpu.memory_space<vmem>>) attributes {dimension_semantics = [#tpu.dimension_semantics<parallel>], iteration_bounds = array<i64: 2>, scalar_prefetch = 0 : i64, scratch_operands = 0 : i64, tpu.core_type = #tpu.core_type<tc>, window_params = [{transform_indices = @transform_0, window_bounds = array<i64: 1, 8, 32>}, {pipeline_mode = #tpu.pipeline_mode<synchronous>, transform_indices = @transform_1, window_bounds = array<i64: 1, 32>}, {pipeline_mode = #tpu.pipeline_mode<synchronous>, transform_indices = @transform_2, window_bounds = array<i64: 1, 32>}, {pipeline_mode = #tpu.pipeline_mode<synchronous>, transform_indices = @transform_3, window_bounds = array<i64: 32, 64>}, {pipeline_mode = #tpu.pipeline_mode<synchronous>, transform_indices = @transform_4, window_bounds = array<i64: 1, 64>}, {pipeline_mode = #tpu.pipeline_mode<synchronous>, transform_indices = @transform_5, window_bounds = array<i64: 64, 32>}, {pipeline_mode = #tpu.pipeline_mode<synchronous>, transform_indices = @transform_6, window_bounds = array<i64: 1, 32>}, {transform_indices = @transform_7, window_bounds = array<i64: 1, 8, 32>}]} {
    %c0 = arith.constant 0 : index
    %c0_0 = arith.constant 0 : index
    %c0_1 = arith.constant 0 : index
    %0 = vector.load %arg1[%c0, %c0_0, %c0_1] : memref<1x8x32xf32, #tpu.memory_space<vmem>>, vector<1x8x32xf32>
    %1 = vector.shape_cast %0 : vector<1x8x32xf32> to vector<8x32xf32>
    %c0_2 = arith.constant 0 : index
    %c0_3 = arith.constant 0 : index
    %2 = vector.load %arg2[%c0_2, %c0_3] : memref<1x32xf32, #tpu.memory_space<vmem>>, vector<1x32xf32>
    %c0_4 = arith.constant 0 : index
    %c0_5 = arith.constant 0 : index
    %3 = vector.load %arg3[%c0_4, %c0_5] : memref<1x32xf32, #tpu.memory_space<vmem>>, vector<1x32xf32>
    %cst = arith.constant dense<0.000000e+00> : vector<8xf32>
    %4 = vector.multi_reduction <add>, %1, %cst [1] : vector<8x32xf32> to vector<8xf32>
    %5 = vector.shape_cast %4 : vector<8xf32> to vector<8x1xf32>
    %cst_6 = arith.constant 3.200000e+01 : f32
    %6 = vector.broadcast %cst_6 : f32 to vector<8x1xf32>
    %7 = arith.divf %5, %6 : vector<8x1xf32>
    %8 = vector.broadcast %7 : vector<8x1xf32> to vector<8x32xf32>
    %9 = arith.subf %1, %8 : vector<8x32xf32>
    %10 = arith.mulf %9, %9 : vector<8x32xf32>
    %cst_7 = arith.constant dense<0.000000e+00> : vector<8xf32>
    %11 = vector.multi_reduction <add>, %10, %cst_7 [1] : vector<8x32xf32> to vector<8xf32>
    %12 = vector.shape_cast %11 : vector<8xf32> to vector<8x1xf32>
    %cst_8 = arith.constant 3.100000e+01 : f32
    %13 = vector.broadcast %cst_8 : f32 to vector<8x1xf32>
    %14 = arith.divf %12, %13 : vector<8x1xf32>
    %15 = vector.broadcast %2 : vector<1x32xf32> to vector<8x32xf32>
    %16 = arith.mulf %15, %9 : vector<8x32xf32>
    %17 = math.sqrt %14 : vector<8x1xf32>
    %cst_9 = arith.constant 9.99999997E-7 : f32
    %18 = vector.broadcast %cst_9 : f32 to vector<8x1xf32>
    %19 = arith.addf %17, %18 : vector<8x1xf32>
    %20 = vector.broadcast %19 : vector<8x1xf32> to vector<8x32xf32>
    %21 = arith.divf %16, %20 : vector<8x32xf32>
    %22 = vector.broadcast %3 : vector<1x32xf32> to vector<8x32xf32>
    %23 = arith.addf %21, %22 : vector<8x32xf32>
    %c0_10 = arith.constant 0 : index
    %c0_11 = arith.constant 0 : index
    %24 = vector.load %arg4[%c0_10, %c0_11] : memref<32x64xf32, #tpu.memory_space<vmem>>, vector<32x64xf32>
    %cst_12 = arith.constant dense<0.000000e+00> : vector<8x64xf32>
    %25 = tpu.matmul %23, %24, %cst_12 {dimension_numbers = #tpu.dot_dimension_numbers<[1], [0], [0], [1], [0, 0, 1, 1], [], []>} : vector<8x32xf32>, vector<32x64xf32>, vector<8x64xf32> -> vector<8x64xf32>
    %c0_13 = arith.constant 0 : index
    %c0_14 = arith.constant 0 : index
    %26 = vector.load %arg5[%c0_13, %c0_14] : memref<1x64xf32, #tpu.memory_space<vmem>>, vector<1x64xf32>
    %27 = vector.broadcast %26 : vector<1x64xf32> to vector<8x64xf32>
    %28 = arith.addf %25, %27 : vector<8x64xf32>
    %cst_15 = arith.constant 0.000000e+00 : f32
    %29 = vector.broadcast %cst_15 : f32 to vector<8x64xf32>
    %30 = arith.maximumf %28, %29 : vector<8x64xf32>
    %c0_16 = arith.constant 0 : index
    %c0_17 = arith.constant 0 : index
    %31 = vector.load %arg6[%c0_16, %c0_17] : memref<64x32xf32, #tpu.memory_space<vmem>>, vector<64x32xf32>
    %cst_18 = arith.constant dense<0.000000e+00> : vector<8x32xf32>
    %32 = tpu.matmul %30, %31, %cst_18 {dimension_numbers = #tpu.dot_dimension_numbers<[1], [0], [0], [1], [0, 0, 1, 1], [], []>} : vector<8x64xf32>, vector<64x32xf32>, vector<8x32xf32> -> vector<8x32xf32>
    %33 = arith.addf %1, %32 : vector<8x32xf32>
    %c0_19 = arith.constant 0 : index
    %c0_20 = arith.constant 0 : index
    %34 = vector.load %arg7[%c0_19, %c0_20] : memref<1x32xf32, #tpu.memory_space<vmem>>, vector<1x32xf32>
    %35 = vector.broadcast %34 : vector<1x32xf32> to vector<8x32xf32>
    %36 = arith.addf %33, %35 : vector<8x32xf32>
    %c0_21 = arith.constant 0 : index
    %c0_22 = arith.constant 0 : index
    %c0_23 = arith.constant 0 : index
    %37 = vector.load %arg8[%c0_21, %c0_22, %c0_23] : memref<1x8x32xf32, #tpu.memory_space<vmem>>, vector<1x8x32xf32>
    %38 = vector.shape_cast %37 : vector<1x8x32xf32> to vector<8x32xf32>
    %39 = vector.shape_cast %36 : vector<8x32xf32> to vector<1x8x32xf32>
    tpu.vector_store %arg8[%c0_21, %c0_22, %c0_23], %39 {strides = array<i32>} : memref<1x8x32xf32, #tpu.memory_space<vmem>>, vector<1x8x32xf32>,
    return
  }
  func.func @transform_0(%arg0: i32) -> (i32, i32, i32) {
    %c0_i32 = arith.constant 0 : i32
    %c0_i32_0 = arith.constant 0 : i32
    %c0_i32_1 = arith.constant 0 : i32
    return %arg0, %c0_i32, %c0_i32_0 : i32, i32, i32
  }
  func.func @transform_1(%arg0: i32) -> (i32, i32) {
    %c0_i32 = arith.constant 0 : i32
    %c0_i32_0 = arith.constant 0 : i32
    %c0_i32_1 = arith.constant 0 : i32
    return %c0_i32, %c0_i32_0 : i32, i32
  }
  func.func @transform_2(%arg0: i32) -> (i32, i32) {
    %c0_i32 = arith.constant 0 : i32
    %c0_i32_0 = arith.constant 0 : i32
    %c0_i32_1 = arith.constant 0 : i32
    return %c0_i32, %c0_i32_0 : i32, i32
  }
  func.func @transform_3(%arg0: i32) -> (i32, i32) {
    %c0_i32 = arith.constant 0 : i32
    %c0_i32_0 = arith.constant 0 : i32
    %c0_i32_1 = arith.constant 0 : i32
    return %c0_i32, %c0_i32_0 : i32, i32
  }
  func.func @transform_4(%arg0: i32) -> (i32, i32) {
    %c0_i32 = arith.constant 0 : i32
    %c0_i32_0 = arith.constant 0 : i32
    %c0_i32_1 = arith.constant 0 : i32
    return %c0_i32, %c0_i32_0 : i32, i32
  }
  func.func @transform_5(%arg0: i32) -> (i32, i32) {
    %c0_i32 = arith.constant 0 : i32
    %c0_i32_0 = arith.constant 0 : i32
    %c0_i32_1 = arith.constant 0 : i32
    return %c0_i32, %c0_i32_0 : i32, i32
  }
  func.func @transform_6(%arg0: i32) -> (i32, i32) {
    %c0_i32 = arith.constant 0 : i32
    %c0_i32_0 = arith.constant 0 : i32
    %c0_i32_1 = arith.constant 0 : i32
    return %c0_i32, %c0_i32_0 : i32, i32
  }
  func.func @transform_7(%arg0: i32) -> (i32, i32, i32) {
    %c0_i32 = arith.constant 0 : i32
    %c0_i32_0 = arith.constant 0 : i32
    %c0_i32_1 = arith.constant 0 : i32
    return %arg0, %c0_i32, %c0_i32_0 : i32, i32, i32
  }
}

module attributes {stable_mosaic.version = 11 : i64} {
  func.func @_layernorm_kernel(%arg0: i32, %arg1: memref<1x8x32xf32, #tpu.memory_space<vmem>>, %arg2: memref<1x32xf32, #tpu.memory_space<vmem>>, %arg3: memref<1x32xf32, #tpu.memory_space<vmem>>, %arg4: memref<1x8x32xf32, #tpu.memory_space<vmem>>) attributes {dimension_semantics = [#tpu.dimension_semantics<parallel>], iteration_bounds = array<i64: 2>, scalar_prefetch = 0 : i64, scratch_operands = 0 : i64, tpu.core_type = #tpu.core_type<tc>, window_params = [{transform_indices = @transform_0, window_bounds = array<i64: 1, 8, 32>}, {pipeline_mode = #tpu.pipeline_mode<synchronous>, transform_indices = @transform_1, window_bounds = array<i64: 1, 32>}, {pipeline_mode = #tpu.pipeline_mode<synchronous>, transform_indices = @transform_2, window_bounds = array<i64: 1, 32>}, {transform_indices = @transform_3, window_bounds = array<i64: 1, 8, 32>}]} {
    %c0 = arith.constant 0 : index
    %c0_0 = arith.constant 0 : index
    %c0_1 = arith.constant 0 : index
    %0 = vector.load %arg1[%c0, %c0_0, %c0_1] : memref<1x8x32xf32, #tpu.memory_space<vmem>>, vector<1x8x32xf32>
    %1 = vector.shape_cast %0 : vector<1x8x32xf32> to vector<8x32xf32>
    %c0_2 = arith.constant 0 : index
    %c0_3 = arith.constant 0 : index
    %2 = vector.load %arg2[%c0_2, %c0_3] : memref<1x32xf32, #tpu.memory_space<vmem>>, vector<1x32xf32>
    %c0_4 = arith.constant 0 : index
    %c0_5 = arith.constant 0 : index
    %3 = vector.load %arg3[%c0_4, %c0_5] : memref<1x32xf32, #tpu.memory_space<vmem>>, vector<1x32xf32>
    %cst = arith.constant dense<0.000000e+00> : vector<8xf32>
    %4 = vector.multi_reduction <add>, %1, %cst [1] : vector<8x32xf32> to vector<8xf32>
    %5 = vector.shape_cast %4 : vector<8xf32> to vector<8x1xf32>
    %cst_6 = arith.constant 3.200000e+01 : f32
    %6 = vector.broadcast %cst_6 : f32 to vector<8x1xf32>
    %7 = arith.divf %5, %6 : vector<8x1xf32>
    %8 = vector.broadcast %7 : vector<8x1xf32> to vector<8x32xf32>
    %9 = arith.subf %1, %8 : vector<8x32xf32>
    %10 = arith.mulf %9, %9 : vector<8x32xf32>
    %cst_7 = arith.constant dense<0.000000e+00> : vector<8xf32>
    %11 = vector.multi_reduction <add>, %10, %cst_7 [1] : vector<8x32xf32> to vector<8xf32>
    %12 = vector.shape_cast %11 : vector<8xf32> to vector<8x1xf32>
    %cst_8 = arith.constant 3.100000e+01 : f32
    %13 = vector.broadcast %cst_8 : f32 to vector<8x1xf32>
    %14 = arith.divf %12, %13 : vector<8x1xf32>
    %15 = vector.broadcast %2 : vector<1x32xf32> to vector<8x32xf32>
    %16 = arith.mulf %15, %9 : vector<8x32xf32>
    %17 = math.sqrt %14 : vector<8x1xf32>
    %cst_9 = arith.constant 9.99999997E-7 : f32
    %18 = vector.broadcast %cst_9 : f32 to vector<8x1xf32>
    %19 = arith.addf %17, %18 : vector<8x1xf32>
    %20 = vector.broadcast %19 : vector<8x1xf32> to vector<8x32xf32>
    %21 = arith.divf %16, %20 : vector<8x32xf32>
    %22 = vector.broadcast %3 : vector<1x32xf32> to vector<8x32xf32>
    %23 = arith.addf %21, %22 : vector<8x32xf32>
    %c0_10 = arith.constant 0 : index
    %c0_11 = arith.constant 0 : index
    %c0_12 = arith.constant 0 : index
    %24 = vector.load %arg4[%c0_10, %c0_11, %c0_12] : memref<1x8x32xf32, #tpu.memory_space<vmem>>, vector<1x8x32xf32>
    %25 = vector.shape_cast %24 : vector<1x8x32xf32> to vector<8x32xf32>
    %26 = vector.shape_cast %23 : vector<8x32xf32> to vector<1x8x32xf32>
    tpu.vector_store %arg4[%c0_10, %c0_11, %c0_12], %26 {strides = array<i32>} : memref<1x8x32xf32, #tpu.memory_space<vmem>>, vector<1x8x32xf32>,
    return
  }
  func.func @transform_0(%arg0: i32) -> (i32, i32, i32) {
    %c0_i32 = arith.constant 0 : i32
    %c0_i32_0 = arith.constant 0 : i32
    %c0_i32_1 = arith.constant 0 : i32
    return %arg0, %c0_i32, %c0_i32_0 : i32, i32, i32
  }
  func.func @transform_1(%arg0: i32) -> (i32, i32) {
    %c0_i32 = arith.constant 0 : i32
    %c0_i32_0 = arith.constant 0 : i32
    %c0_i32_1 = arith.constant 0 : i32
    return %c0_i32, %c0_i32_0 : i32, i32
  }
  func.func @transform_2(%arg0: i32) -> (i32, i32) {
    %c0_i32 = arith.constant 0 : i32
    %c0_i32_0 = arith.constant 0 : i32
    %c0_i32_1 = arith.constant 0 : i32
    return %c0_i32, %c0_i32_0 : i32, i32
  }
  func.func @transform_3(%arg0: i32) -> (i32, i32, i32) {
    %c0_i32 = arith.constant 0 : i32
    %c0_i32_0 = arith.constant 0 : i32
    %c0_i32_1 = arith.constant 0 : i32
    return %arg0, %c0_i32, %c0_i32_0 : i32, i32, i32
  }
}

module attributes {stable_mosaic.version = 11 : i64} {
  func.func @_cross_attn_sublayer_kernel(%arg0: i32, %arg1: memref<1x3x32xf32, #tpu.memory_space<vmem>>, %arg2: memref<1x8x32xf32, #tpu.memory_space<vmem>>, %arg3: memref<1x32xf32, #tpu.memory_space<vmem>>, %arg4: memref<1x32xf32, #tpu.memory_space<vmem>>, %arg5: memref<32x32xf32, #tpu.memory_space<vmem>>, %arg6: memref<1x32xf32, #tpu.memory_space<vmem>>, %arg7: memref<32x64xf32, #tpu.memory_space<vmem>>, %arg8: memref<1x64xf32, #tpu.memory_space<vmem>>, %arg9: memref<32x32xf32, #tpu.memory_space<vmem>>, %arg10: memref<1x32xf32, #tpu.memory_space<vmem>>, %arg11: memref<1x3x32xf32, #tpu.memory_space<vmem>>) attributes {dimension_semantics = [#tpu.dimension_semantics<parallel>], iteration_bounds = array<i64: 2>, scalar_prefetch = 0 : i64, scratch_operands = 0 : i64, tpu.core_type = #tpu.core_type<tc>, window_params = [{transform_indices = @transform_0, window_bounds = array<i64: 1, 3, 32>}, {transform_indices = @transform_1, window_bounds = array<i64: 1, 8, 32>}, {pipeline_mode = #tpu.pipeline_mode<synchronous>, transform_indices = @transform_2, window_bounds = array<i64: 1, 32>}, {pipeline_mode = #tpu.pipeline_mode<synchronous>, transform_indices = @transform_3, window_bounds = array<i64: 1, 32>}, {pipeline_mode = #tpu.pipeline_mode<synchronous>, transform_indices = @transform_4, window_bounds = array<i64: 32, 32>}, {pipeline_mode = #tpu.pipeline_mode<synchronous>, transform_indices = @transform_5, window_bounds = array<i64: 1, 32>}, {pipeline_mode = #tpu.pipeline_mode<synchronous>, transform_indices = @transform_6, window_bounds = array<i64: 32, 64>}, {pipeline_mode = #tpu.pipeline_mode<synchronous>, transform_indices = @transform_7, window_bounds = array<i64: 1, 64>}, {pipeline_mode = #tpu.pipeline_mode<synchronous>, transform_indices = @transform_8, window_bounds = array<i64: 32, 32>}, {pipeline_mode = #tpu.pipeline_mode<synchronous>, transform_indices = @transform_9, window_bounds = array<i64: 1, 32>}, {transform_indices = @transform_10, window_bounds = array<i64: 1, 3, 32>}]} {
    %c0 = arith.constant 0 : index
    %c0_0 = arith.constant 0 : index
    %c0_1 = arith.constant 0 : index
    %0 = vector.load %arg1[%c0, %c0_0, %c0_1] : memref<1x3x32xf32, #tpu.memory_space<vmem>>, vector<1x3x32xf32>
    %1 = vector.shape_cast %0 : vector<1x3x32xf32> to vector<3x32xf32>
    %c0_2 = arith.constant 0 : index
    %c0_3 = arith.constant 0 : index
    %c0_4 = arith.constant 0 : index
    %2 = vector.load %arg2[%c0_2, %c0_3, %c0_4] : memref<1x8x32xf32, #tpu.memory_space<vmem>>, vector<1x8x32xf32>
    %3 = vector.shape_cast %2 : vector<1x8x32xf32> to vector<8x32xf32>
    %c0_5 = arith.constant 0 : index
    %c0_6 = arith.constant 0 : index
    %4 = vector.load %arg3[%c0_5, %c0_6] : memref<1x32xf32, #tpu.memory_space<vmem>>, vector<1x32xf32>
    %c0_7 = arith.constant 0 : index
    %c0_8 = arith.constant 0 : index
    %5 = vector.load %arg4[%c0_7, %c0_8] : memref<1x32xf32, #tpu.memory_space<vmem>>, vector<1x32xf32>
    %cst = arith.constant dense<0.000000e+00> : vector<3xf32>
    %6 = vector.multi_reduction <add>, %1, %cst [1] : vector<3x32xf32> to vector<3xf32>
    %7 = vector.shape_cast %6 : vector<3xf32> to vector<3x1xf32>
    %cst_9 = arith.constant 3.200000e+01 : f32
    %8 = vector.broadcast %cst_9 : f32 to vector<3x1xf32>
    %9 = arith.divf %7, %8 : vector<3x1xf32>
    %10 = vector.broadcast %9 : vector<3x1xf32> to vector<3x32xf32>
    %11 = arith.subf %1, %10 : vector<3x32xf32>
    %12 = arith.mulf %11, %11 : vector<3x32xf32>
    %cst_10 = arith.constant dense<0.000000e+00> : vector<3xf32>
    %13 = vector.multi_reduction <add>, %12, %cst_10 [1] : vector<3x32xf32> to vector<3xf32>
    %14 = vector.shape_cast %13 : vector<3xf32> to vector<3x1xf32>
    %cst_11 = arith.constant 3.100000e+01 : f32
    %15 = vector.broadcast %cst_11 : f32 to vector<3x1xf32>
    %16 = arith.divf %14, %15 : vector<3x1xf32>
    %17 = vector.broadcast %4 : vector<1x32xf32> to vector<3x32xf32>
    %18 = arith.mulf %17, %11 : vector<3x32xf32>
    %19 = math.sqrt %16 : vector<3x1xf32>
    %cst_12 = arith.constant 9.99999997E-7 : f32
    %20 = vector.broadcast %cst_12 : f32 to vector<3x1xf32>
    %21 = arith.addf %19, %20 : vector<3x1xf32>
    %22 = vector.broadcast %21 : vector<3x1xf32> to vector<3x32xf32>
    %23 = arith.divf %18, %22 : vector<3x32xf32>
    %24 = vector.broadcast %5 : vector<1x32xf32> to vector<3x32xf32>
    %25 = arith.addf %23, %24 : vector<3x32xf32>
    %c0_13 = arith.constant 0 : index
    %c0_14 = arith.constant 0 : index
    %26 = vector.load %arg5[%c0_13, %c0_14] : memref<32x32xf32, #tpu.memory_space<vmem>>, vector<32x32xf32>
    %cst_15 = arith.constant dense<0.000000e+00> : vector<3x32xf32>
    %27 = tpu.matmul %25, %26, %cst_15 {dimension_numbers = #tpu.dot_dimension_numbers<[1], [0], [0], [1], [0, 0, 1, 1], [], []>} : vector<3x32xf32>, vector<32x32xf32>, vector<3x32xf32> -> vector<3x32xf32>
    %c0_16 = arith.constant 0 : index
    %c0_17 = arith.constant 0 : index
    %28 = vector.load %arg6[%c0_16, %c0_17] : memref<1x32xf32, #tpu.memory_space<vmem>>, vector<1x32xf32>
    %29 = vector.broadcast %28 : vector<1x32xf32> to vector<3x32xf32>
    %30 = arith.addf %27, %29 : vector<3x32xf32>
    %c0_18 = arith.constant 0 : index
    %c0_19 = arith.constant 0 : index
    %31 = vector.load %arg7[%c0_18, %c0_19] : memref<32x64xf32, #tpu.memory_space<vmem>>, vector<32x64xf32>
    %cst_20 = arith.constant dense<0.000000e+00> : vector<8x64xf32>
    %32 = tpu.matmul %3, %31, %cst_20 {dimension_numbers = #tpu.dot_dimension_numbers<[1], [0], [0], [1], [0, 0, 1, 1], [], []>} : vector<8x32xf32>, vector<32x64xf32>, vector<8x64xf32> -> vector<8x64xf32>
    %c0_21 = arith.constant 0 : index
    %c0_22 = arith.constant 0 : index
    %33 = vector.load %arg8[%c0_21, %c0_22] : memref<1x64xf32, #tpu.memory_space<vmem>>, vector<1x64xf32>
    %34 = vector.broadcast %33 : vector<1x64xf32> to vector<8x64xf32>
    %35 = arith.addf %32, %34 : vector<8x64xf32>
    %36 = vector.extract_strided_slice %35 {offsets = [0, 0], sizes = [8, 32], strides = [1, 1]} : vector<8x64xf32> to vector<8x32xf32>
    %37 = vector.extract_strided_slice %35 {offsets = [0, 32], sizes = [8, 32], strides = [1, 1]} : vector<8x64xf32> to vector<8x32xf32>
    %c0_23 = arith.constant 0 : index
    %c0_24 = arith.constant 0 : index
    %38 = vector.load %arg9[%c0_23, %c0_24] : memref<32x32xf32, #tpu.memory_space<vmem>>, vector<32x32xf32>
    %39 = vector.extract_strided_slice %30 {offsets = [0, 0], sizes = [3, 8], strides = [1, 1]} : vector<3x32xf32> to vector<3x8xf32>
    %40 = vector.extract_strided_slice %36 {offsets = [0, 0], sizes = [8, 8], strides = [1, 1]} : vector<8x32xf32> to vector<8x8xf32>
    %cst_25 = arith.constant dense<0.000000e+00> : vector<3x8xf32>
    %41 = tpu.matmul %39, %40, %cst_25 {dimension_numbers = #tpu.dot_dimension_numbers<[1], [1], [0], [0], [0, 0, 1, 0], [], []>} : vector<3x8xf32>, vector<8x8xf32>, vector<3x8xf32> -> vector<3x8xf32>
    %cst_26 = arith.constant 0.353553385 : f32
    %42 = vector.broadcast %cst_26 : f32 to vector<3x8xf32>
    %43 = arith.mulf %41, %42 : vector<3x8xf32>
    %cst_27 = arith.constant dense<0xFF800000> : vector<3xf32>
    %44 = vector.multi_reduction <maximumf>, %43, %cst_27 [1] : vector<3x8xf32> to vector<3xf32>
    %45 = vector.shape_cast %44 : vector<3xf32> to vector<3x1xf32>
    %46 = vector.broadcast %45 : vector<3x1xf32> to vector<3x8xf32>
    %47 = arith.subf %43, %46 : vector<3x8xf32>
    %48 = math.exp %47 : vector<3x8xf32>
    %cst_28 = arith.constant dense<0.000000e+00> : vector<3xf32>
    %49 = vector.multi_reduction <add>, %48, %cst_28 [1] : vector<3x8xf32> to vector<3xf32>
    %50 = vector.shape_cast %49 : vector<3xf32> to vector<3x1xf32>
    %51 = vector.broadcast %50 : vector<3x1xf32> to vector<3x8xf32>
    %52 = arith.divf %48, %51 : vector<3x8xf32>
    %53 = vector.extract_strided_slice %37 {offsets = [0, 0], sizes = [8, 8], strides = [1, 1]} : vector<8x32xf32> to vector<8x8xf32>
    %cst_29 = arith.constant dense<0.000000e+00> : vector<3x8xf32>
    %54 = tpu.matmul %52, %53, %cst_29 {dimension_numbers = #tpu.dot_dimension_numbers<[1], [0], [0], [1], [0, 0, 1, 1], [], []>} : vector<3x8xf32>, vector<8x8xf32>, vector<3x8xf32> -> vector<3x8xf32>
    %55 = vector.extract_strided_slice %38 {offsets = [0, 0], sizes = [8, 32], strides = [1, 1]} : vector<32x32xf32> to vector<8x32xf32>
    %cst_30 = arith.constant dense<0.000000e+00> : vector<3x32xf32>
    %56 = tpu.matmul %54, %55, %cst_30 {dimension_numbers = #tpu.dot_dimension_numbers<[1], [0], [0], [1], [0, 0, 1, 1], [], []>} : vector<3x8xf32>, vector<8x32xf32>, vector<3x32xf32> -> vector<3x32xf32>
    %57 = vector.extract_strided_slice %30 {offsets = [0, 8], sizes = [3, 8], strides = [1, 1]} : vector<3x32xf32> to vector<3x8xf32>
    %58 = vector.extract_strided_slice %36 {offsets = [0, 8], sizes = [8, 8], strides = [1, 1]} : vector<8x32xf32> to vector<8x8xf32>
    %cst_31 = arith.constant dense<0.000000e+00> : vector<3x8xf32>
    %59 = tpu.matmul %57, %58, %cst_31 {dimension_numbers = #tpu.dot_dimension_numbers<[1], [1], [0], [0], [0, 0, 1, 0], [], []>} : vector<3x8xf32>, vector<8x8xf32>, vector<3x8xf32> -> vector<3x8xf32>
    %cst_32 = arith.constant 0.353553385 : f32
    %60 = vector.broadcast %cst_32 : f32 to vector<3x8xf32>
    %61 = arith.mulf %59, %60 : vector<3x8xf32>
    %cst_33 = arith.constant dense<0xFF800000> : vector<3xf32>
    %62 = vector.multi_reduction <maximumf>, %61, %cst_33 [1] : vector<3x8xf32> to vector<3xf32>
    %63 = vector.shape_cast %62 : vector<3xf32> to vector<3x1xf32>
    %64 = vector.broadcast %63 : vector<3x1xf32> to vector<3x8xf32>
    %65 = arith.subf %61, %64 : vector<3x8xf32>
    %66 = math.exp %65 : vector<3x8xf32>
    %cst_34 = arith.constant dense<0.000000e+00> : vector<3xf32>
    %67 = vector.multi_reduction <add>, %66, %cst_34 [1] : vector<3x8xf32> to vector<3xf32>
    %68 = vector.shape_cast %67 : vector<3xf32> to vector<3x1xf32>
    %69 = vector.broadcast %68 : vector<3x1xf32> to vector<3x8xf32>
    %70 = arith.divf %66, %69 : vector<3x8xf32>
    %71 = vector.extract_strided_slice %37 {offsets = [0, 8], sizes = [8, 8], strides = [1, 1]} : vector<8x32xf32> to vector<8x8xf32>
    %cst_35 = arith.constant dense<0.000000e+00> : vector<3x8xf32>
    %72 = tpu.matmul %70, %71, %cst_35 {dimension_numbers = #tpu.dot_dimension_numbers<[1], [0], [0], [1], [0, 0, 1, 1], [], []>} : vector<3x8xf32>, vector<8x8xf32>, vector<3x8xf32> -> vector<3x8xf32>
    %73 = vector.extract_strided_slice %38 {offsets = [8, 0], sizes = [8, 32], strides = [1, 1]} : vector<32x32xf32> to vector<8x32xf32>
    %cst_36 = arith.constant dense<0.000000e+00> : vector<3x32xf32>
    %74 = tpu.matmul %72, %73, %cst_36 {dimension_numbers = #tpu.dot_dimension_numbers<[1], [0], [0], [1], [0, 0, 1, 1], [], []>} : vector<3x8xf32>, vector<8x32xf32>, vector<3x32xf32> -> vector<3x32xf32>
    %75 = arith.addf %56, %74 : vector<3x32xf32>
    %76 = vector.extract_strided_slice %30 {offsets = [0, 16], sizes = [3, 8], strides = [1, 1]} : vector<3x32xf32> to vector<3x8xf32>
    %77 = vector.extract_strided_slice %36 {offsets = [0, 16], sizes = [8, 8], strides = [1, 1]} : vector<8x32xf32> to vector<8x8xf32>
    %cst_37 = arith.constant dense<0.000000e+00> : vector<3x8xf32>
    %78 = tpu.matmul %76, %77, %cst_37 {dimension_numbers = #tpu.dot_dimension_numbers<[1], [1], [0], [0], [0, 0, 1, 0], [], []>} : vector<3x8xf32>, vector<8x8xf32>, vector<3x8xf32> -> vector<3x8xf32>
    %cst_38 = arith.constant 0.353553385 : f32
    %79 = vector.broadcast %cst_38 : f32 to vector<3x8xf32>
    %80 = arith.mulf %78, %79 : vector<3x8xf32>
    %cst_39 = arith.constant dense<0xFF800000> : vector<3xf32>
    %81 = vector.multi_reduction <maximumf>, %80, %cst_39 [1] : vector<3x8xf32> to vector<3xf32>
    %82 = vector.shape_cast %81 : vector<3xf32> to vector<3x1xf32>
    %83 = vector.broadcast %82 : vector<3x1xf32> to vector<3x8xf32>
    %84 = arith.subf %80, %83 : vector<3x8xf32>
    %85 = math.exp %84 : vector<3x8xf32>
    %cst_40 = arith.constant dense<0.000000e+00> : vector<3xf32>
    %86 = vector.multi_reduction <add>, %85, %cst_40 [1] : vector<3x8xf32> to vector<3xf32>
    %87 = vector.shape_cast %86 : vector<3xf32> to vector<3x1xf32>
    %88 = vector.broadcast %87 : vector<3x1xf32> to vector<3x8xf32>
    %89 = arith.divf %85, %88 : vector<3x8xf32>
    %90 = vector.extract_strided_slice %37 {offsets = [0, 16], sizes = [8, 8], strides = [1, 1]} : vector<8x32xf32> to vector<8x8xf32>
    %cst_41 = arith.constant dense<0.000000e+00> : vector<3x8xf32>
    %91 = tpu.matmul %89, %90, %cst_41 {dimension_numbers = #tpu.dot_dimension_numbers<[1], [0], [0], [1], [0, 0, 1, 1], [], []>} : vector<3x8xf32>, vector<8x8xf32>, vector<3x8xf32> -> vector<3x8xf32>
    %92 = vector.extract_strided_slice %38 {offsets = [16, 0], sizes = [8, 32], strides = [1, 1]} : vector<32x32xf32> to vector<8x32xf32>
    %cst_42 = arith.constant dense<0.000000e+00> : vector<3x32xf32>
    %93 = tpu.matmul %91, %92, %cst_42 {dimension_numbers = #tpu.dot_dimension_numbers<[1], [0], [0], [1], [0, 0, 1, 1], [], []>} : vector<3x8xf32>, vector<8x32xf32>, vector<3x32xf32> -> vector<3x32xf32>
    %94 = arith.addf %75, %93 : vector<3x32xf32>
    %95 = vector.extract_strided_slice %30 {offsets = [0, 24], sizes = [3, 8], strides = [1, 1]} : vector<3x32xf32> to vector<3x8xf32>
    %96 = vector.extract_strided_slice %36 {offsets = [0, 24], sizes = [8, 8], strides = [1, 1]} : vector<8x32xf32> to vector<8x8xf32>
    %cst_43 = arith.constant dense<0.000000e+00> : vector<3x8xf32>
    %97 = tpu.matmul %95, %96, %cst_43 {dimension_numbers = #tpu.dot_dimension_numbers<[1], [1], [0], [0], [0, 0, 1, 0], [], []>} : vector<3x8xf32>, vector<8x8xf32>, vector<3x8xf32> -> vector<3x8xf32>
    %cst_44 = arith.constant 0.353553385 : f32
    %98 = vector.broadcast %cst_44 : f32 to vector<3x8xf32>
    %99 = arith.mulf %97, %98 : vector<3x8xf32>
    %cst_45 = arith.constant dense<0xFF800000> : vector<3xf32>
    %100 = vector.multi_reduction <maximumf>, %99, %cst_45 [1] : vector<3x8xf32> to vector<3xf32>
    %101 = vector.shape_cast %100 : vector<3xf32> to vector<3x1xf32>
    %102 = vector.broadcast %101 : vector<3x1xf32> to vector<3x8xf32>
    %103 = arith.subf %99, %102 : vector<3x8xf32>
    %104 = math.exp %103 : vector<3x8xf32>
    %cst_46 = arith.constant dense<0.000000e+00> : vector<3xf32>
    %105 = vector.multi_reduction <add>, %104, %cst_46 [1] : vector<3x8xf32> to vector<3xf32>
    %106 = vector.shape_cast %105 : vector<3xf32> to vector<3x1xf32>
    %107 = vector.broadcast %106 : vector<3x1xf32> to vector<3x8xf32>
    %108 = arith.divf %104, %107 : vector<3x8xf32>
    %109 = vector.extract_strided_slice %37 {offsets = [0, 24], sizes = [8, 8], strides = [1, 1]} : vector<8x32xf32> to vector<8x8xf32>
    %cst_47 = arith.constant dense<0.000000e+00> : vector<3x8xf32>
    %110 = tpu.matmul %108, %109, %cst_47 {dimension_numbers = #tpu.dot_dimension_numbers<[1], [0], [0], [1], [0, 0, 1, 1], [], []>} : vector<3x8xf32>, vector<8x8xf32>, vector<3x8xf32> -> vector<3x8xf32>
    %111 = vector.extract_strided_slice %38 {offsets = [24, 0], sizes = [8, 32], strides = [1, 1]} : vector<32x32xf32> to vector<8x32xf32>
    %cst_48 = arith.constant dense<0.000000e+00> : vector<3x32xf32>
    %112 = tpu.matmul %110, %111, %cst_48 {dimension_numbers = #tpu.dot_dimension_numbers<[1], [0], [0], [1], [0, 0, 1, 1], [], []>} : vector<3x8xf32>, vector<8x32xf32>, vector<3x32xf32> -> vector<3x32xf32>
    %113 = arith.addf %94, %112 : vector<3x32xf32>
    %114 = arith.addf %1, %113 : vector<3x32xf32>
    %c0_49 = arith.constant 0 : index
    %c0_50 = arith.constant 0 : index
    %115 = vector.load %arg10[%c0_49, %c0_50] : memref<1x32xf32, #tpu.memory_space<vmem>>, vector<1x32xf32>
    %116 = vector.broadcast %115 : vector<1x32xf32> to vector<3x32xf32>
    %117 = arith.addf %114, %116 : vector<3x32xf32>
    %c0_51 = arith.constant 0 : index
    %c0_52 = arith.constant 0 : index
    %c0_53 = arith.constant 0 : index
    %118 = vector.load %arg11[%c0_51, %c0_52, %c0_53] : memref<1x3x32xf32, #tpu.memory_space<vmem>>, vector<1x3x32xf32>
    %119 = vector.shape_cast %118 : vector<1x3x32xf32> to vector<3x32xf32>
    %120 = vector.shape_cast %117 : vector<3x32xf32> to vector<1x3x32xf32>
    tpu.vector_store %arg11[%c0_51, %c0_52, %c0_53], %120 {strides = array<i32>} : memref<1x3x32xf32, #tpu.memory_space<vmem>>, vector<1x3x32xf32>,
    return
  }
  func.func @transform_0(%arg0: i32) -> (i32, i32, i32) {
    %c0_i32 = arith.constant 0 : i32
    %c0_i32_0 = arith.constant 0 : i32
    %c0_i32_1 = arith.constant 0 : i32
    return %arg0, %c0_i32, %c0_i32_0 : i32, i32, i32
  }
  func.func @transform_1(%arg0: i32) -> (i32, i32, i32) {
    %c0_i32 = arith.constant 0 : i32
    %c0_i32_0 = arith.constant 0 : i32
    %c0_i32_1 = arith.constant 0 : i32
    return %arg0, %c0_i32, %c0_i32_0 : i32, i32, i32
  }
  func.func @transform_2(%arg0: i32) -> (i32, i32) {
    %c0_i32 = arith.constant 0 : i32
    %c0_i32_0 = arith.constant 0 : i32
    %c0_i32_1 = arith.constant 0 : i32
    return %c0_i32, %c0_i32_0 : i32, i32
  }
  func.func @transform_3(%arg0: i32) -> (i32, i32) {
    %c0_i32 = arith.constant 0 : i32
    %c0_i32_0 = arith.constant 0 : i32
    %c0_i32_1 = arith.constant 0 : i32
    return %c0_i32, %c0_i32_0 : i32, i32
  }
  func.func @transform_4(%arg0: i32) -> (i32, i32) {
    %c0_i32 = arith.constant 0 : i32
    %c0_i32_0 = arith.constant 0 : i32
    %c0_i32_1 = arith.constant 0 : i32
    return %c0_i32, %c0_i32_0 : i32, i32
  }
  func.func @transform_5(%arg0: i32) -> (i32, i32) {
    %c0_i32 = arith.constant 0 : i32
    %c0_i32_0 = arith.constant 0 : i32
    %c0_i32_1 = arith.constant 0 : i32
    return %c0_i32, %c0_i32_0 : i32, i32
  }
  func.func @transform_6(%arg0: i32) -> (i32, i32) {
    %c0_i32 = arith.constant 0 : i32
    %c0_i32_0 = arith.constant 0 : i32
    %c0_i32_1 = arith.constant 0 : i32
    return %c0_i32, %c0_i32_0 : i32, i32
  }
  func.func @transform_7(%arg0: i32) -> (i32, i32) {
    %c0_i32 = arith.constant 0 : i32
    %c0_i32_0 = arith.constant 0 : i32
    %c0_i32_1 = arith.constant 0 : i32
    return %c0_i32, %c0_i32_0 : i32, i32
  }
  func.func @transform_8(%arg0: i32) -> (i32, i32) {
    %c0_i32 = arith.constant 0 : i32
    %c0_i32_0 = arith.constant 0 : i32
    %c0_i32_1 = arith.constant 0 : i32
    return %c0_i32, %c0_i32_0 : i32, i32
  }
  func.func @transform_9(%arg0: i32) -> (i32, i32) {
    %c0_i32 = arith.constant 0 : i32
    %c0_i32_0 = arith.constant 0 : i32
    %c0_i32_1 = arith.constant 0 : i32
    return %c0_i32, %c0_i32_0 : i32, i32
  }
  func.func @transform_10(%arg0: i32) -> (i32, i32, i32) {
    %c0_i32 = arith.constant 0 : i32
    %c0_i32_0 = arith.constant 0 : i32
    %c0_i32_1 = arith.constant 0 : i32
    return %arg0, %c0_i32, %c0_i32_0 : i32, i32, i32
  }
}

module attributes {stable_mosaic.version = 11 : i64} {
  func.func @_visual_kernel(%arg0: i32, %arg1: memref<1x4x192xf32, #tpu.memory_space<vmem>>, %arg2: memref<192x48xf32, #tpu.memory_space<vmem>>, %arg3: memref<1x48xf32, #tpu.memory_space<vmem>>, %arg4: memref<48x14xf32, #tpu.memory_space<vmem>>, %arg5: memref<1x14xf32, #tpu.memory_space<vmem>>, %arg6: memref<1x4x48xf32, #tpu.memory_space<vmem>>, %arg7: memref<1x1x48xf32, #tpu.memory_space<vmem>>, %arg8: memref<1x1x14xf32, #tpu.memory_space<vmem>>) attributes {dimension_semantics = [#tpu.dimension_semantics<parallel>], iteration_bounds = array<i64: 2>, scalar_prefetch = 0 : i64, scratch_operands = 0 : i64, tpu.core_type = #tpu.core_type<tc>, window_params = [{transform_indices = @transform_0, window_bounds = array<i64: 1, 4, 192>}, {pipeline_mode = #tpu.pipeline_mode<synchronous>, transform_indices = @transform_1, window_bounds = array<i64: 192, 48>}, {pipeline_mode = #tpu.pipeline_mode<synchronous>, transform_indices = @transform_2, window_bounds = array<i64: 1, 48>}, {pipeline_mode = #tpu.pipeline_mode<synchronous>, transform_indices = @transform_3, window_bounds = array<i64: 48, 14>}, {pipeline_mode = #tpu.pipeline_mode<synchronous>, transform_indices = @transform_4, window_bounds = array<i64: 1, 14>}, {transform_indices = @transform_5, window_bounds = array<i64: 1, 4, 48>}, {transform_indices = @transform_6, window_bounds = array<i64: 1, 1, 48>}, {transform_indices = @transform_7, window_bounds = array<i64: 1, 1, 14>}]} {
    %c0 = arith.constant 0 : index
    %c0_0 = arith.constant 0 : index
    %c0_1 = arith.constant 0 : index
    %0 = vector.load %arg1[%c0, %c0_0, %c0_1] : memref<1x4x192xf32, #tpu.memory_space<vmem>>, vector<1x4x192xf32>
    %1 = vector.shape_cast %0 : vector<1x4x192xf32> to vector<4x192xf32>
    %c0_2 = arith.constant 0 : index
    %c0_3 = arith.constant 0 : index
    %2 = vector.load %arg2[%c0_2, %c0_3] : memref<192x48xf32, #tpu.memory_space<vmem>>, vector<192x48xf32>
    %cst = arith.constant dense<0.000000e+00> : vector<4x48xf32>
    %3 = tpu.matmul %1, %2, %cst {dimension_numbers = #tpu.dot_dimension_numbers<[1], [0], [0], [1], [0, 0, 1, 1], [], []>} : vector<4x192xf32>, vector<192x48xf32>, vector<4x48xf32> -> vector<4x48xf32>
    %c0_4 = arith.constant 0 : index
    %c0_5 = arith.constant 0 : index
    %4 = vector.load %arg3[%c0_4, %c0_5] : memref<1x48xf32, #tpu.memory_space<vmem>>, vector<1x48xf32>
    %5 = vector.broadcast %4 : vector<1x48xf32> to vector<4x48xf32>
    %6 = arith.addf %3, %5 : vector<4x48xf32>
    %c0_6 = arith.constant 0 : index
    %c0_7 = arith.constant 0 : index
    %c0_8 = arith.constant 0 : index
    %7 = vector.load %arg6[%c0_6, %c0_7, %c0_8] : memref<1x4x48xf32, #tpu.memory_space<vmem>>, vector<1x4x48xf32>
    %8 = vector.shape_cast %7 : vector<1x4x48xf32> to vector<4x48xf32>
    %9 = vector.shape_cast %6 : vector<4x48xf32> to vector<1x4x48xf32>
    tpu.vector_store %arg6[%c0_6, %c0_7, %c0_8], %9 {strides = array<i32>} : memref<1x4x48xf32, #tpu.memory_space<vmem>>, vector<1x4x48xf32>,
    %cst_9 = arith.constant dense<0.000000e+00> : vector<48xf32>
    %10 = vector.multi_reduction <add>, %6, %cst_9 [0] : vector<4x48xf32> to vector<48xf32>
    %11 = vector.shape_cast %10 : vector<48xf32> to vector<1x48xf32>
    %cst_10 = arith.constant 4.000000e+00 : f32
    %12 = vector.broadcast %cst_10 : f32 to vector<1x48xf32>
    %13 = arith.divf %11, %12 : vector<1x48xf32>
    %c0_11 = arith.constant 0 : index
    %c0_12 = arith.constant 0 : index
    %c0_13 = arith.constant 0 : index
    %14 = vector.load %arg7[%c0_11, %c0_12, %c0_13] : memref<1x1x48xf32, #tpu.memory_space<vmem>>, vector<1x1x48xf32>
    %15 = vector.shape_cast %14 : vector<1x1x48xf32> to vector<1x48xf32>
    %16 = vector.shape_cast %13 : vector<1x48xf32> to vector<1x1x48xf32>
    tpu.vector_store %arg7[%c0_11, %c0_12, %c0_13], %16 {strides = array<i32>} : memref<1x1x48xf32, #tpu.memory_space<vmem>>, vector<1x1x48xf32>,
    %c0_14 = arith.constant 0 : index
    %c0_15 = arith.constant 0 : index
    %17 = vector.load %arg4[%c0_14, %c0_15] : memref<48x14xf32, #tpu.memory_space<vmem>>, vector<48x14xf32>
    %cst_16 = arith.constant dense<0.000000e+00> : vector<1x14xf32>
    %18 = tpu.matmul %13, %17, %cst_16 {dimension_numbers = #tpu.dot_dimension_numbers<[1], [0], [0], [1], [0, 0, 1, 1], [], []>} : vector<1x48xf32>, vector<48x14xf32>, vector<1x14xf32> -> vector<1x14xf32>
    %c0_17 = arith.constant 0 : index
    %c0_18 = arith.constant 0 : index
    %19 = vector.load %arg5[%c0_17, %c0_18] : memref<1x14xf32, #tpu.memory_space<vmem>>, vector<1x14xf32>
    %20 = arith.addf %18, %19 : vector<1x14xf32>
    %c0_19 = arith.constant 0 : index
    %c0_20 = arith.constant 0 : index
    %c0_21 = arith.constant 0 : index
    %21 = vector.load %arg8[%c0_19, %c0_20, %c0_21] : memref<1x1x14xf32, #tpu.memory_space<vmem>>, vector<1x1x14xf32>
    %22 = vector.shape_cast %21 : vector<1x1x14xf32> to vector<1x14xf32>
    %23 = vector.shape_cast %20 : vector<1x14xf32> to vector<1x1x14xf32>
    tpu.vector_store %arg8[%c0_19, %c0_20, %c0_21], %23 {strides = array<i32>} : memref<1x1x14xf32, #tpu.memory_space<vmem>>, vector<1x1x14xf32>,
    return
  }
  func.func @transform_0(%arg0: i32) -> (i32, i32, i32) {
    %c0_i32 = arith.constant 0 : i32
    %c0_i32_0 = arith.constant 0 : i32
    %c0_i32_1 = arith.constant 0 : i32
    return %arg0, %c0_i32, %c0_i32_0 : i32, i32, i32
  }
  func.func @transform_1(%arg0: i32) -> (i32, i32) {
    %c0_i32 = arith.constant 0 : i32
    %c0_i32_0 = arith.constant 0 : i32
    %c0_i32_1 = arith.constant 0 : i32
    return %c0_i32, %c0_i32_0 : i32, i32
  }
  func.func @transform_2(%arg0: i32) -> (i32, i32) {
    %c0_i32 = arith.constant 0 : i32
    %c0_i32_0 = arith.constant 0 : i32
    %c0_i32_1 = arith.constant 0 : i32
    return %c0_i32, %c0_i32_0 : i32, i32
  }
  func.func @transform_3(%arg0: i32) -> (i32, i32) {
    %c0_i32 = arith.constant 0 : i32
    %c0_i32_0 = arith.constant 0 : i32
    %c0_i32_1 = arith.constant 0 : i32
    return %c0_i32, %c0_i32_0 : i32, i32
  }
  func.func @transform_4(%arg0: i32) -> (i32, i32) {
    %c0_i32 = arith.constant 0 : i32
    %c0_i32_0 = arith.constant 0 : i32
    %c0_i32_1 = arith.constant 0 : i32
    return %c0_i32, %c0_i32_0 : i32, i32
  }
  func.func @transform_5(%arg0: i32) -> (i32, i32, i32) {
    %c0_i32 = arith.constant 0 : i32
    %c0_i32_0 = arith.constant 0 : i32
    %c0_i32_1 = arith.constant 0 : i32
    return %arg0, %c0_i32, %c0_i32_0 : i32, i32, i32
  }
  func.func @transform_6(%arg0: i32) -> (i32, i32, i32) {
    %c0_i32 = arith.constant 0 : i32
    %c0_i32_0 = arith.constant 0 : i32
    %c0_i32_1 = arith.constant 0 : i32
    return %arg0, %c0_i32, %c0_i32_0 : i32, i32, i32
  }
  func.func @transform_7(%arg0: i32) -> (i32, i32, i32) {
    %c0_i32 = arith.constant 0 : i32
    %c0_i32_0 = arith.constant 0 : i32
    %c0_i32_1 = arith.constant 0 : i32
    return %arg0, %c0_i32, %c0_i32_0 : i32, i32, i32
  }
}

module attributes {stable_mosaic.version = 11 : i64} {
  func.func @_select_prior_kernel(%arg0: i32, %arg1: memref<1x1x14xf32, #tpu.memory_space<vmem>>, %arg2: memref<1x3x32xf32, #tpu.memory_space<vmem>>, %arg3: memref<14x32xf32, #tpu.memory_space<vmem>>, %arg4: memref<1x32xf32, #tpu.memory_space<vmem>>, %arg5: memref<1x32xf32, #tpu.memory_space<vmem>>, %arg6: memref<1x32xf32, #tpu.memory_space<vmem>>, %arg7: memref<32x32xf32, #tpu.memory_space<vmem>>, %arg8: memref<1x32xf32, #tpu.memory_space<vmem>>, %arg9: memref<32x64xf32, #tpu.memory_space<vmem>>, %arg10: memref<1x64xf32, #tpu.memory_space<vmem>>, %arg11: memref<32x32xf32, #tpu.memory_space<vmem>>, %arg12: memref<1x32xf32, #tpu.memory_space<vmem>>, %arg13: memref<32x48xf32, #tpu.memory_space<vmem>>, %arg14: memref<1x48xf32, #tpu.memory_space<vmem>>, %arg15: memref<1x1x48xf32, #tpu.memory_space<vmem>>) attributes {dimension_semantics = [#tpu.dimension_semantics<parallel>], iteration_bounds = array<i64: 2>, scalar_prefetch = 0 : i64, scratch_operands = 0 : i64, tpu.core_type = #tpu.core_type<tc>, window_params = [{transform_indices = @transform_0, window_bounds = array<i64: 1, 1, 14>}, {transform_indices = @transform_1, window_bounds = array<i64: 1, 3, 32>}, {pipeline_mode = #tpu.pipeline_mode<synchronous>, transform_indices = @transform_2, window_bounds = array<i64: 14, 32>}, {pipeline_mode = #tpu.pipeline_mode<synchronous>, transform_indices = @transform_3, window_bounds = array<i64: 1, 32>}, {pipeline_mode = #tpu.pipeline_mode<synchronous>, transform_indices = @transform_4, window_bounds = array<i64: 1, 32>}, {pipeline_mode = #tpu.pipeline_mode<synchronous>, transform_indices = @transform_5, window_bounds = array<i64: 1, 32>}, {pipeline_mode = #tpu.pipeline_mode<synchronous>, transform_indices = @transform_6, window_bounds = array<i64: 32, 32>}, {pipeline_mode = #tpu.pipeline_mode<synchronous>, transform_indices = @transform_7, window_bounds = array<i64: 1, 32>}, {pipeline_mode = #tpu.pipeline_mode<synchronous>, transform_indices = @transform_8, window_bounds = array<i64: 32, 64>}, {pipeline_mode = #tpu.pipeline_mode<synchronous>, transform_indices = @transform_9, window_bounds = array<i64: 1, 64>}, {pipeline_mode = #tpu.pipeline_mode<synchronous>, transform_indices = @transform_10, window_bounds = array<i64: 32, 32>}, {pipeline_mode = #tpu.pipeline_mode<synchronous>, transform_indices = @transform_11, window_bounds = array<i64: 1, 32>}, {pipeline_mode = #tpu.pipeline_mode<synchronous>, transform_indices = @transform_12, window_bounds = array<i64: 32, 48>}, {pipeline_mode = #tpu.pipeline_mode<synchronous>, transform_indices = @transform_13, window_bounds = array<i64: 1, 48>}, {transform_indices = @transform_14, window_bounds = array<i64: 1, 1, 48>}]} {
    %c0 = arith.constant 0 : index
    %c0_0 = arith.constant 0 : index
    %c0_1 = arith.constant 0 : index
    %0 = vector.load %arg1[%c0, %c0_0, %c0_1] : memref<1x1x14xf32, #tpu.memory_space<vmem>>, vector<1x1x14xf32>
    %1 = vector.shape_cast %0 : vector<1x1x14xf32> to vector<1x14xf32>
    %c0_2 = arith.constant 0 : index
    %c0_3 = arith.constant 0 : index
    %2 = vector.load %arg3[%c0_2, %c0_3] : memref<14x32xf32, #tpu.memory_space<vmem>>, vector<14x32xf32>
    %cst = arith.constant dense<0.000000e+00> : vector<1x32xf32>
    %3 = tpu.matmul %1, %2, %cst {dimension_numbers = #tpu.dot_dimension_numbers<[1], [0], [0], [1], [0, 0, 1, 1], [], []>} : vector<1x14xf32>, vector<14x32xf32>, vector<1x32xf32> -> vector<1x32xf32>
    %c0_4 = arith.constant 0 : index
    %c0_5 = arith.constant 0 : index
    %4 = vector.load %arg4[%c0_4, %c0_5] : memref<1x32xf32, #tpu.memory_space<vmem>>, vector<1x32xf32>
    %5 = arith.addf %3, %4 : vector<1x32xf32>
    %c0_6 = arith.constant 0 : index
    %c0_7 = arith.constant 0 : index
    %c0_8 = arith.constant 0 : index
    %6 = vector.load %arg2[%c0_6, %c0_7, %c0_8] : memref<1x3x32xf32, #tpu.memory_space<vmem>>, vector<1x3x32xf32>
    %7 = vector.shape_cast %6 : vector<1x3x32xf32> to vector<3x32xf32>
    %c0_9 = arith.constant 0 : index
    %c0_10 = arith.constant 0 : index
    %8 = vector.load %arg5[%c0_9, %c0_10] : memref<1x32xf32, #tpu.memory_space<vmem>>, vector<1x32xf32>
    %c0_11 = arith.constant 0 : index
    %c0_12 = arith.constant 0 : index
    %9 = vector.load %arg6[%c0_11, %c0_12] : memref<1x32xf32, #tpu.memory_space<vmem>>, vector<1x32xf32>
    %cst_13 = arith.constant dense<0.000000e+00> : vector<1xf32>
    %10 = vector.multi_reduction <add>, %5, %cst_13 [1] : vector<1x32xf32> to vector<1xf32>
    %11 = vector.shape_cast %10 : vector<1xf32> to vector<1x1xf32>
    %cst_14 = arith.constant 3.200000e+01 : f32
    %12 = vector.broadcast %cst_14 : f32 to vector<1x1xf32>
    %13 = arith.divf %11, %12 : vector<1x1xf32>
    %14 = vector.broadcast %13 : vector<1x1xf32> to vector<1x32xf32>
    %15 = arith.subf %5, %14 : vector<1x32xf32>
    %16 = arith.mulf %15, %15 : vector<1x32xf32>
    %cst_15 = arith.constant dense<0.000000e+00> : vector<1xf32>
    %17 = vector.multi_reduction <add>, %16, %cst_15 [1] : vector<1x32xf32> to vector<1xf32>
    %18 = vector.shape_cast %17 : vector<1xf32> to vector<1x1xf32>
    %cst_16 = arith.constant 3.100000e+01 : f32
    %19 = vector.broadcast %cst_16 : f32 to vector<1x1xf32>
    %20 = arith.divf %18, %19 : vector<1x1xf32>
    %21 = arith.mulf %8, %15 : vector<1x32xf32>
    %22 = math.sqrt %20 : vector<1x1xf32>
    %cst_17 = arith.constant 9.99999997E-7 : f32
    %23 = vector.broadcast %cst_17 : f32 to vector<1x1xf32>
    %24 = arith.addf %22, %23 : vector<1x1xf32>
    %25 = vector.broadcast %24 : vector<1x1xf32> to vector<1x32xf32>
    %26 = arith.divf %21, %25 : vector<1x32xf32>
    %27 = arith.addf %26, %9 : vector<1x32xf32>
    %c0_18 = arith.constant 0 : index
    %c0_19 = arith.constant 0 : index
    %28 = vector.load %arg7[%c0_18, %c0_19] : memref<32x32xf32, #tpu.memory_space<vmem>>, vector<32x32xf32>
    %cst_20 = arith.constant dense<0.000000e+00> : vector<1x32xf32>
    %29 = tpu.matmul %27, %28, %cst_20 {dimension_numbers = #tpu.dot_dimension_numbers<[1], [0], [0], [1], [0, 0, 1, 1], [], []>} : vector<1x32xf32>, vector<32x32xf32>, vector<1x32xf32> -> vector<1x32xf32>
    %c0_21 = arith.constant 0 : index
    %c0_22 = arith.constant 0 : index
    %30 = vector.load %arg8[%c0_21, %c0_22] : memref<1x32xf32, #tpu.memory_space<vmem>>, vector<1x32xf32>
    %31 = arith.addf %29, %30 : vector<1x32xf32>
    %c0_23 = arith.constant 0 : index
    %c0_24 = arith.constant 0 : index
    %32 = vector.load %arg9[%c0_23, %c0_24] : memref<32x64xf32, #tpu.memory_space<vmem>>, vector<32x64xf32>
    %cst_25 = arith.constant dense<0.000000e+00> : vector<3x64xf32>
    %33 = tpu.matmul %7, %32, %cst_25 {dimension_numbers = #tpu.dot_dimension_numbers<[1], [0], [0], [1], [0, 0, 1, 1], [], []>} : vector<3x32xf32>, vector<32x64xf32>, vector<3x64xf32> -> vector<3x64xf32>
    %c0_26 = arith.constant 0 : index
    %c0_27 = arith.constant 0 : index
    %34 = vector.load %arg10[%c0_26, %c0_27] : memref<1x64xf32, #tpu.memory_space<vmem>>, vector<1x64xf32>
    %35 = vector.broadcast %34 : vector<1x64xf32> to vector<3x64xf32>
    %36 = arith.addf %33, %35 : vector<3x64xf32>
    %37 = vector.extract_strided_slice %36 {offsets = [0, 0], sizes = [3, 32], strides = [1, 1]} : vector<3x64xf32> to vector<3x32xf32>
    %38 = vector.extract_strided_slice %36 {offsets = [0, 32], sizes = [3, 32], strides = [1, 1]} : vector<3x64xf32> to vector<3x32xf32>
    %c0_28 = arith.constant 0 : index
    %c0_29 = arith.constant 0 : index
    %39 = vector.load %arg11[%c0_28, %c0_29] : memref<32x32xf32, #tpu.memory_space<vmem>>, vector<32x32xf32>
    %40 = vector.extract_strided_slice %31 {offsets = [0, 0], sizes = [1, 8], strides = [1, 1]} : vector<1x32xf32> to vector<1x8xf32>
    %41 = vector.extract_strided_slice %37 {offsets = [0, 0], sizes = [3, 8], strides = [1, 1]} : vector<3x32xf32> to vector<3x8xf32>
    %cst_30 = arith.constant dense<0.000000e+00> : vector<1x3xf32>
    %42 = tpu.matmul %40, %41, %cst_30 {dimension_numbers = #tpu.dot_dimension_numbers<[1], [1], [0], [0], [0, 0, 1, 0], [], []>} : vector<1x8xf32>, vector<3x8xf32>, vector<1x3xf32> -> vector<1x3xf32>
    %cst_31 = arith.constant 0.353553385 : f32
    %43 = vector.broadcast %cst_31 : f32 to vector<1x3xf32>
    %44 = arith.mulf %42, %43 : vector<1x3xf32>
    %cst_32 = arith.constant dense<0xFF800000> : vector<1xf32>
    %45 = vector.multi_reduction <maximumf>, %44, %cst_32 [1] : vector<1x3xf32> to vector<1xf32>
    %46 = vector.shape_cast %45 : vector<1xf32> to vector<1x1xf32>
    %47 = vector.broadcast %46 : vector<1x1xf32> to vector<1x3xf32>
    %48 = arith.subf %44, %47 : vector<1x3xf32>
    %49 = math.exp %48 : vector<1x3xf32>
    %cst_33 = arith.constant dense<0.000000e+00> : vector<1xf32>
    %50 = vector.multi_reduction <add>, %49, %cst_33 [1] : vector<1x3xf32> to vector<1xf32>
    %51 = vector.shape_cast %50 : vector<1xf32> to vector<1x1xf32>
    %52 = vector.broadcast %51 : vector<1x1xf32> to vector<1x3xf32>
    %53 = arith.divf %49, %52 : vector<1x3xf32>
    %54 = vector.extract_strided_slice %38 {offsets = [0, 0], sizes = [3, 8], strides = [1, 1]} : vector<3x32xf32> to vector<3x8xf32>
    %cst_34 = arith.constant dense<0.000000e+00> : vector<1x8xf32>
    %55 = tpu.matmul %53, %54, %cst_34 {dimension_numbers = #tpu.dot_dimension_numbers<[1], [0], [0], [1], [0, 0, 1, 1], [], []>} : vector<1x3xf32>, vector<3x8xf32>, vector<1x8xf32> -> vector<1x8xf32>
    %56 = vector.extract_strided_slice %39 {offsets = [0, 0], sizes = [8, 32], strides = [1, 1]} : vector<32x32xf32> to vector<8x32xf32>
    %cst_35 = arith.constant dense<0.000000e+00> : vector<1x32xf32>
    %57 = tpu.matmul %55, %56, %cst_35 {dimension_numbers = #tpu.dot_dimension_numbers<[1], [0], [0], [1], [0, 0, 1, 1], [], []>} : vector<1x8xf32>, vector<8x32xf32>, vector<1x32xf32> -> vector<1x32xf32>
    %58 = vector.extract_strided_slice %31 {offsets = [0, 8], sizes = [1, 8], strides = [1, 1]} : vector<1x32xf32> to vector<1x8xf32>
    %59 = vector.extract_strided_slice %37 {offsets = [0, 8], sizes = [3, 8], strides = [1, 1]} : vector<3x32xf32> to vector<3x8xf32>
    %cst_36 = arith.constant dense<0.000000e+00> : vector<1x3xf32>
    %60 = tpu.matmul %58, %59, %cst_36 {dimension_numbers = #tpu.dot_dimension_numbers<[1], [1], [0], [0], [0, 0, 1, 0], [], []>} : vector<1x8xf32>, vector<3x8xf32>, vector<1x3xf32> -> vector<1x3xf32>
    %cst_37 = arith.constant 0.353553385 : f32
    %61 = vector.broadcast %cst_37 : f32 to vector<1x3xf32>
    %62 = arith.mulf %60, %61 : vector<1x3xf32>
    %cst_38 = arith.constant dense<0xFF800000> : vector<1xf32>
    %63 = vector.multi_reduction <maximumf>, %62, %cst_38 [1] : vector<1x3xf32> to vector<1xf32>
    %64 = vector.shape_cast %63 : vector<1xf32> to vector<1x1xf32>
    %65 = vector.broadcast %64 : vector<1x1xf32> to vector<1x3xf32>
    %66 = arith.subf %62, %65 : vector<1x3xf32>
    %67 = math.exp %66 : vector<1x3xf32>
    %cst_39 = arith.constant dense<0.000000e+00> : vector<1xf32>
    %68 = vector.multi_reduction <add>, %67, %cst_39 [1] : vector<1x3xf32> to vector<1xf32>
    %69 = vector.shape_cast %68 : vector<1xf32> to vector<1x1xf32>
    %70 = vector.broadcast %69 : vector<1x1xf32> to vector<1x3xf32>
    %71 = arith.divf %67, %70 : vector<1x3xf32>
    %72 = vector.extract_strided_slice %38 {offsets = [0, 8], sizes = [3, 8], strides = [1, 1]} : vector<3x32xf32> to vector<3x8xf32>
    %cst_40 = arith.constant dense<0.000000e+00> : vector<1x8xf32>
    %73 = tpu.matmul %71, %72, %cst_40 {dimension_numbers = #tpu.dot_dimension_numbers<[1], [0], [0], [1], [0, 0, 1, 1], [], []>} : vector<1x3xf32>, vector<3x8xf32>, vector<1x8xf32> -> vector<1x8xf32>
    %74 = vector.extract_strided_slice %39 {offsets = [8, 0], sizes = [8, 32], strides = [1, 1]} : vector<32x32xf32> to vector<8x32xf32>
    %cst_41 = arith.constant dense<0.000000e+00> : vector<1x32xf32>
    %75 = tpu.matmul %73, %74, %cst_41 {dimension_numbers = #tpu.dot_dimension_numbers<[1], [0], [0], [1], [0, 0, 1, 1], [], []>} : vector<1x8xf32>, vector<8x32xf32>, vector<1x32xf32> -> vector<1x32xf32>
    %76 = arith.addf %57, %75 : vector<1x32xf32>
    %77 = vector.extract_strided_slice %31 {offsets = [0, 16], sizes = [1, 8], strides = [1, 1]} : vector<1x32xf32> to vector<1x8xf32>
    %78 = vector.extract_strided_slice %37 {offsets = [0, 16], sizes = [3, 8], strides = [1, 1]} : vector<3x32xf32> to vector<3x8xf32>
    %cst_42 = arith.constant dense<0.000000e+00> : vector<1x3xf32>
    %79 = tpu.matmul %77, %78, %cst_42 {dimension_numbers = #tpu.dot_dimension_numbers<[1], [1], [0], [0], [0, 0, 1, 0], [], []>} : vector<1x8xf32>, vector<3x8xf32>, vector<1x3xf32> -> vector<1x3xf32>
    %cst_43 = arith.constant 0.353553385 : f32
    %80 = vector.broadcast %cst_43 : f32 to vector<1x3xf32>
    %81 = arith.mulf %79, %80 : vector<1x3xf32>
    %cst_44 = arith.constant dense<0xFF800000> : vector<1xf32>
    %82 = vector.multi_reduction <maximumf>, %81, %cst_44 [1] : vector<1x3xf32> to vector<1xf32>
    %83 = vector.shape_cast %82 : vector<1xf32> to vector<1x1xf32>
    %84 = vector.broadcast %83 : vector<1x1xf32> to vector<1x3xf32>
    %85 = arith.subf %81, %84 : vector<1x3xf32>
    %86 = math.exp %85 : vector<1x3xf32>
    %cst_45 = arith.constant dense<0.000000e+00> : vector<1xf32>
    %87 = vector.multi_reduction <add>, %86, %cst_45 [1] : vector<1x3xf32> to vector<1xf32>
    %88 = vector.shape_cast %87 : vector<1xf32> to vector<1x1xf32>
    %89 = vector.broadcast %88 : vector<1x1xf32> to vector<1x3xf32>
    %90 = arith.divf %86, %89 : vector<1x3xf32>
    %91 = vector.extract_strided_slice %38 {offsets = [0, 16], sizes = [3, 8], strides = [1, 1]} : vector<3x32xf32> to vector<3x8xf32>
    %cst_46 = arith.constant dense<0.000000e+00> : vector<1x8xf32>
    %92 = tpu.matmul %90, %91, %cst_46 {dimension_numbers = #tpu.dot_dimension_numbers<[1], [0], [0], [1], [0, 0, 1, 1], [], []>} : vector<1x3xf32>, vector<3x8xf32>, vector<1x8xf32> -> vector<1x8xf32>
    %93 = vector.extract_strided_slice %39 {offsets = [16, 0], sizes = [8, 32], strides = [1, 1]} : vector<32x32xf32> to vector<8x32xf32>
    %cst_47 = arith.constant dense<0.000000e+00> : vector<1x32xf32>
    %94 = tpu.matmul %92, %93, %cst_47 {dimension_numbers = #tpu.dot_dimension_numbers<[1], [0], [0], [1], [0, 0, 1, 1], [], []>} : vector<1x8xf32>, vector<8x32xf32>, vector<1x32xf32> -> vector<1x32xf32>
    %95 = arith.addf %76, %94 : vector<1x32xf32>
    %96 = vector.extract_strided_slice %31 {offsets = [0, 24], sizes = [1, 8], strides = [1, 1]} : vector<1x32xf32> to vector<1x8xf32>
    %97 = vector.extract_strided_slice %37 {offsets = [0, 24], sizes = [3, 8], strides = [1, 1]} : vector<3x32xf32> to vector<3x8xf32>
    %cst_48 = arith.constant dense<0.000000e+00> : vector<1x3xf32>
    %98 = tpu.matmul %96, %97, %cst_48 {dimension_numbers = #tpu.dot_dimension_numbers<[1], [1], [0], [0], [0, 0, 1, 0], [], []>} : vector<1x8xf32>, vector<3x8xf32>, vector<1x3xf32> -> vector<1x3xf32>
    %cst_49 = arith.constant 0.353553385 : f32
    %99 = vector.broadcast %cst_49 : f32 to vector<1x3xf32>
    %100 = arith.mulf %98, %99 : vector<1x3xf32>
    %cst_50 = arith.constant dense<0xFF800000> : vector<1xf32>
    %101 = vector.multi_reduction <maximumf>, %100, %cst_50 [1] : vector<1x3xf32> to vector<1xf32>
    %102 = vector.shape_cast %101 : vector<1xf32> to vector<1x1xf32>
    %103 = vector.broadcast %102 : vector<1x1xf32> to vector<1x3xf32>
    %104 = arith.subf %100, %103 : vector<1x3xf32>
    %105 = math.exp %104 : vector<1x3xf32>
    %cst_51 = arith.constant dense<0.000000e+00> : vector<1xf32>
    %106 = vector.multi_reduction <add>, %105, %cst_51 [1] : vector<1x3xf32> to vector<1xf32>
    %107 = vector.shape_cast %106 : vector<1xf32> to vector<1x1xf32>
    %108 = vector.broadcast %107 : vector<1x1xf32> to vector<1x3xf32>
    %109 = arith.divf %105, %108 : vector<1x3xf32>
    %110 = vector.extract_strided_slice %38 {offsets = [0, 24], sizes = [3, 8], strides = [1, 1]} : vector<3x32xf32> to vector<3x8xf32>
    %cst_52 = arith.constant dense<0.000000e+00> : vector<1x8xf32>
    %111 = tpu.matmul %109, %110, %cst_52 {dimension_numbers = #tpu.dot_dimension_numbers<[1], [0], [0], [1], [0, 0, 1, 1], [], []>} : vector<1x3xf32>, vector<3x8xf32>, vector<1x8xf32> -> vector<1x8xf32>
    %112 = vector.extract_strided_slice %39 {offsets = [24, 0], sizes = [8, 32], strides = [1, 1]} : vector<32x32xf32> to vector<8x32xf32>
    %cst_53 = arith.constant dense<0.000000e+00> : vector<1x32xf32>
    %113 = tpu.matmul %111, %112, %cst_53 {dimension_numbers = #tpu.dot_dimension_numbers<[1], [0], [0], [1], [0, 0, 1, 1], [], []>} : vector<1x8xf32>, vector<8x32xf32>, vector<1x32xf32> -> vector<1x32xf32>
    %114 = arith.addf %95, %113 : vector<1x32xf32>
    %115 = arith.addf %5, %114 : vector<1x32xf32>
    %c0_54 = arith.constant 0 : index
    %c0_55 = arith.constant 0 : index
    %116 = vector.load %arg12[%c0_54, %c0_55] : memref<1x32xf32, #tpu.memory_space<vmem>>, vector<1x32xf32>
    %117 = arith.addf %115, %116 : vector<1x32xf32>
    %c0_56 = arith.constant 0 : index
    %c0_57 = arith.constant 0 : index
    %118 = vector.load %arg13[%c0_56, %c0_57] : memref<32x48xf32, #tpu.memory_space<vmem>>, vector<32x48xf32>
    %cst_58 = arith.constant dense<0.000000e+00> : vector<1x48xf32>
    %119 = tpu.matmul %117, %118, %cst_58 {dimension_numbers = #tpu.dot_dimension_numbers<[1], [0], [0], [1], [0, 0, 1, 1], [], []>} : vector<1x32xf32>, vector<32x48xf32>, vector<1x48xf32> -> vector<1x48xf32>
    %c0_59 = arith.constant 0 : index
    %c0_60 = arith.constant 0 : index
    %120 = vector.load %arg14[%c0_59, %c0_60] : memref<1x48xf32, #tpu.memory_space<vmem>>, vector<1x48xf32>
    %121 = arith.addf %119, %120 : vector<1x48xf32>
    %c0_61 = arith.constant 0 : index
    %c0_62 = arith.constant 0 : index
    %c0_63 = arith.constant 0 : index
    %122 = vector.load %arg15[%c0_61, %c0_62, %c0_63] : memref<1x1x48xf32, #tpu.memory_space<vmem>>, vector<1x1x48xf32>
    %123 = vector.shape_cast %122 : vector<1x1x48xf32> to vector<1x48xf32>
    %124 = vector.shape_cast %121 : vector<1x48xf32> to vector<1x1x48xf32>
    tpu.vector_store %arg15[%c0_61, %c0_62, %c0_63], %124 {strides = array<i32>} : memref<1x1x48xf32, #tpu.memory_space<vmem>>, vector<1x1x48xf32>,
    return
  }
  func.func @transform_0(%arg0: i32) -> (i32, i32, i32) {
    %c0_i32 = arith.constant 0 : i32
    %c0_i32_0 = arith.constant 0 : i32
    %c0_i32_1 = arith.constant 0 : i32
    return %arg0, %c0_i32, %c0_i32_0 : i32, i32, i32
  }
  func.func @transform_1(%arg0: i32) -> (i32, i32, i32) {
    %c0_i32 = arith.constant 0 : i32
    %c0_i32_0 = arith.constant 0 : i32
    %c0_i32_1 = arith.constant 0 : i32
    return %arg0, %c0_i32, %c0_i32_0 : i32, i32, i32
  }
  func.func @transform_2(%arg0: i32) -> (i32, i32) {
    %c0_i32 = arith.constant 0 : i32
    %c0_i32_0 = arith.constant 0 : i32
    %c0_i32_1 = arith.constant 0 : i32
    return %c0_i32, %c0_i32_0 : i32, i32
  }
  func.func @transform_3(%arg0: i32) -> (i32, i32) {
    %c0_i32 = arith.constant 0 : i32
    %c0_i32_0 = arith.constant 0 : i32
    %c0_i32_1 = arith.constant 0 : i32
    return %c0_i32, %c0_i32_0 : i32, i32
  }
  func.func @transform_4(%arg0: i32) -> (i32, i32) {
    %c0_i32 = arith.constant 0 : i32
    %c0_i32_0 = arith.constant 0 : i32
    %c0_i32_1 = arith.constant 0 : i32
    return %c0_i32, %c0_i32_0 : i32, i32
  }
  func.func @transform_5(%arg0: i32) -> (i32, i32) {
    %c0_i32 = arith.constant 0 : i32
    %c0_i32_0 = arith.constant 0 : i32
    %c0_i32_1 = arith.constant 0 : i32
    return %c0_i32, %c0_i32_0 : i32, i32
  }
  func.func @transform_6(%arg0: i32) -> (i32, i32) {
    %c0_i32 = arith.constant 0 : i32
    %c0_i32_0 = arith.constant 0 : i32
    %c0_i32_1 = arith.constant 0 : i32
    return %c0_i32, %c0_i32_0 : i32, i32
  }
  func.func @transform_7(%arg0: i32) -> (i32, i32) {
    %c0_i32 = arith.constant 0 : i32
    %c0_i32_0 = arith.constant 0 : i32
    %c0_i32_1 = arith.constant 0 : i32
    return %c0_i32, %c0_i32_0 : i32, i32
  }
  func.func @transform_8(%arg0: i32) -> (i32, i32) {
    %c0_i32 = arith.constant 0 : i32
    %c0_i32_0 = arith.constant 0 : i32
    %c0_i32_1 = arith.constant 0 : i32
    return %c0_i32, %c0_i32_0 : i32, i32
  }
  func.func @transform_9(%arg0: i32) -> (i32, i32) {
    %c0_i32 = arith.constant 0 : i32
    %c0_i32_0 = arith.constant 0 : i32
    %c0_i32_1 = arith.constant 0 : i32
    return %c0_i32, %c0_i32_0 : i32, i32
  }
  func.func @transform_10(%arg0: i32) -> (i32, i32) {
    %c0_i32 = arith.constant 0 : i32
    %c0_i32_0 = arith.constant 0 : i32
    %c0_i32_1 = arith.constant 0 : i32
    return %c0_i32, %c0_i32_0 : i32, i32
  }
  func.func @transform_11(%arg0: i32) -> (i32, i32) {
    %c0_i32 = arith.constant 0 : i32
    %c0_i32_0 = arith.constant 0 : i32
    %c0_i32_1 = arith.constant 0 : i32
    return %c0_i32, %c0_i32_0 : i32, i32
  }
  func.func @transform_12(%arg0: i32) -> (i32, i32) {
    %c0_i32 = arith.constant 0 : i32
    %c0_i32_0 = arith.constant 0 : i32
    %c0_i32_1 = arith.constant 0 : i32
    return %c0_i32, %c0_i32_0 : i32, i32
  }
  func.func @transform_13(%arg0: i32) -> (i32, i32) {
    %c0_i32 = arith.constant 0 : i32
    %c0_i32_0 = arith.constant 0 : i32
    %c0_i32_1 = arith.constant 0 : i32
    return %c0_i32, %c0_i32_0 : i32, i32
  }
  func.func @transform_14(%arg0: i32) -> (i32, i32, i32) {
    %c0_i32 = arith.constant 0 : i32
    %c0_i32_0 = arith.constant 0 : i32
    %c0_i32_1 = arith.constant 0 : i32
    return %arg0, %c0_i32, %c0_i32_0 : i32, i32, i32
  }
}

module attributes {stable_mosaic.version = 11 : i64} {
  func.func @_linear_relu_kernel(%arg0: i32, %arg1: memref<1x5x48xf32, #tpu.memory_space<vmem>>, %arg2: memref<48x32xf32, #tpu.memory_space<vmem>>, %arg3: memref<1x32xf32, #tpu.memory_space<vmem>>, %arg4: memref<1x5x32xf32, #tpu.memory_space<vmem>>) attributes {dimension_semantics = [#tpu.dimension_semantics<parallel>], iteration_bounds = array<i64: 2>, scalar_prefetch = 0 : i64, scratch_operands = 0 : i64, tpu.core_type = #tpu.core_type<tc>, window_params = [{transform_indices = @transform_0, window_bounds = array<i64: 1, 5, 48>}, {pipeline_mode = #tpu.pipeline_mode<synchronous>, transform_indices = @transform_1, window_bounds = array<i64: 48, 32>}, {pipeline_mode = #tpu.pipeline_mode<synchronous>, transform_indices = @transform_2, window_bounds = array<i64: 1, 32>}, {transform_indices = @transform_3, window_bounds = array<i64: 1, 5, 32>}]} {
    %c0 = arith.constant 0 : index
    %c0_0 = arith.constant 0 : index
    %c0_1 = arith.constant 0 : index
    %0 = vector.load %arg1[%c0, %c0_0, %c0_1] : memref<1x5x48xf32, #tpu.memory_space<vmem>>, vector<1x5x48xf32>
    %1 = vector.shape_cast %0 : vector<1x5x48xf32> to vector<5x48xf32>
    %c0_2 = arith.constant 0 : index
    %c0_3 = arith.constant 0 : index
    %2 = vector.load %arg2[%c0_2, %c0_3] : memref<48x32xf32, #tpu.memory_space<vmem>>, vector<48x32xf32>
    %cst = arith.constant dense<0.000000e+00> : vector<5x32xf32>
    %3 = tpu.matmul %1, %2, %cst {dimension_numbers = #tpu.dot_dimension_numbers<[1], [0], [0], [1], [0, 0, 1, 1], [], []>} : vector<5x48xf32>, vector<48x32xf32>, vector<5x32xf32> -> vector<5x32xf32>
    %c0_4 = arith.constant 0 : index
    %c0_5 = arith.constant 0 : index
    %4 = vector.load %arg3[%c0_4, %c0_5] : memref<1x32xf32, #tpu.memory_space<vmem>>, vector<1x32xf32>
    %5 = vector.broadcast %4 : vector<1x32xf32> to vector<5x32xf32>
    %6 = arith.addf %3, %5 : vector<5x32xf32>
    %cst_6 = arith.constant 0.000000e+00 : f32
    %7 = vector.broadcast %cst_6 : f32 to vector<5x32xf32>
    %8 = arith.maximumf %6, %7 : vector<5x32xf32>
    %c0_7 = arith.constant 0 : index
    %c0_8 = arith.constant 0 : index
    %c0_9 = arith.constant 0 : index
    %9 = vector.load %arg4[%c0_7, %c0_8, %c0_9] : memref<1x5x32xf32, #tpu.memory_space<vmem>>, vector<1x5x32xf32>
    %10 = vector.shape_cast %9 : vector<1x5x32xf32> to vector<5x32xf32>
    %11 = vector.shape_cast %8 : vector<5x32xf32> to vector<1x5x32xf32>
    tpu.vector_store %arg4[%c0_7, %c0_8, %c0_9], %11 {strides = array<i32>} : memref<1x5x32xf32, #tpu.memory_space<vmem>>, vector<1x5x32xf32>,
    return
  }
  func.func @transform_0(%arg0: i32) -> (i32, i32, i32) {
    %c0_i32 = arith.constant 0 : i32
    %c0_i32_0 = arith.constant 0 : i32
    %c0_i32_1 = arith.constant 0 : i32
    return %arg0, %c0_i32, %c0_i32_0 : i32, i32, i32
  }
  func.func @transform_1(%arg0: i32) -> (i32, i32) {
    %c0_i32 = arith.constant 0 : i32
    %c0_i32_0 = arith.constant 0 : i32
    %c0_i32_1 = arith.constant 0 : i32
    return %c0_i32, %c0_i32_0 : i32, i32
  }
  func.func @transform_2(%arg0: i32) -> (i32, i32) {
    %c0_i32 = arith.constant 0 : i32
    %c0_i32_0 = arith.constant 0 : i32
    %c0_i32_1 = arith.constant 0 : i32
    return %c0_i32, %c0_i32_0 : i32, i32
  }
  func.func @transform_3(%arg0: i32) -> (i32, i32, i32) {
    %c0_i32 = arith.constant 0 : i32
    %c0_i32_0 = arith.constant 0 : i32
    %c0_i32_1 = arith.constant 0 : i32
    return %arg0, %c0_i32, %c0_i32_0 : i32, i32, i32
  }
}

module attributes {stable_mosaic.version = 11 : i64} {
  func.func @_self_attn_sublayer_kernel(%arg0: i32, %arg1: memref<1x5x32xf32, #tpu.memory_space<vmem>>, %arg2: memref<1x32xf32, #tpu.memory_space<vmem>>, %arg3: memref<1x32xf32, #tpu.memory_space<vmem>>, %arg4: memref<32x96xf32, #tpu.memory_space<vmem>>, %arg5: memref<1x96xf32, #tpu.memory_space<vmem>>, %arg6: memref<32x32xf32, #tpu.memory_space<vmem>>, %arg7: memref<1x32xf32, #tpu.memory_space<vmem>>, %arg8: memref<1x5x32xf32, #tpu.memory_space<vmem>>) attributes {dimension_semantics = [#tpu.dimension_semantics<parallel>], iteration_bounds = array<i64: 2>, scalar_prefetch = 0 : i64, scratch_operands = 0 : i64, tpu.core_type = #tpu.core_type<tc>, window_params = [{transform_indices = @transform_0, window_bounds = array<i64: 1, 5, 32>}, {pipeline_mode = #tpu.pipeline_mode<synchronous>, transform_indices = @transform_1, window_bounds = array<i64: 1, 32>}, {pipeline_mode = #tpu.pipeline_mode<synchronous>, transform_indices = @transform_2, window_bounds = array<i64: 1, 32>}, {pipeline_mode = #tpu.pipeline_mode<synchronous>, transform_indices = @transform_3, window_bounds = array<i64: 32, 96>}, {pipeline_mode = #tpu.pipeline_mode<synchronous>, transform_indices = @transform_4, window_bounds = array<i64: 1, 96>}, {pipeline_mode = #tpu.pipeline_mode<synchronous>, transform_indices = @transform_5, window_bounds = array<i64: 32, 32>}, {pipeline_mode = #tpu.pipeline_mode<synchronous>, transform_indices = @transform_6, window_bounds = array<i64: 1, 32>}, {transform_indices = @transform_7, window_bounds = array<i64: 1, 5, 32>}]} {
    %c0 = arith.constant 0 : index
    %c0_0 = arith.constant 0 : index
    %c0_1 = arith.constant 0 : index
    %0 = vector.load %arg1[%c0, %c0_0, %c0_1] : memref<1x5x32xf32, #tpu.memory_space<vmem>>, vector<1x5x32xf32>
    %1 = vector.shape_cast %0 : vector<1x5x32xf32> to vector<5x32xf32>
    %c0_2 = arith.constant 0 : index
    %c0_3 = arith.constant 0 : index
    %2 = vector.load %arg2[%c0_2, %c0_3] : memref<1x32xf32, #tpu.memory_space<vmem>>, vector<1x32xf32>
    %c0_4 = arith.constant 0 : index
    %c0_5 = arith.constant 0 : index
    %3 = vector.load %arg3[%c0_4, %c0_5] : memref<1x32xf32, #tpu.memory_space<vmem>>, vector<1x32xf32>
    %cst = arith.constant dense<0.000000e+00> : vector<5xf32>
    %4 = vector.multi_reduction <add>, %1, %cst [1] : vector<5x32xf32> to vector<5xf32>
    %5 = vector.shape_cast %4 : vector<5xf32> to vector<5x1xf32>
    %cst_6 = arith.constant 3.200000e+01 : f32
    %6 = vector.broadcast %cst_6 : f32 to vector<5x1xf32>
    %7 = arith.divf %5, %6 : vector<5x1xf32>
    %8 = vector.broadcast %7 : vector<5x1xf32> to vector<5x32xf32>
    %9 = arith.subf %1, %8 : vector<5x32xf32>
    %10 = arith.mulf %9, %9 : vector<5x32xf32>
    %cst_7 = arith.constant dense<0.000000e+00> : vector<5xf32>
    %11 = vector.multi_reduction <add>, %10, %cst_7 [1] : vector<5x32xf32> to vector<5xf32>
    %12 = vector.shape_cast %11 : vector<5xf32> to vector<5x1xf32>
    %cst_8 = arith.constant 3.100000e+01 : f32
    %13 = vector.broadcast %cst_8 : f32 to vector<5x1xf32>
    %14 = arith.divf %12, %13 : vector<5x1xf32>
    %15 = vector.broadcast %2 : vector<1x32xf32> to vector<5x32xf32>
    %16 = arith.mulf %15, %9 : vector<5x32xf32>
    %17 = math.sqrt %14 : vector<5x1xf32>
    %cst_9 = arith.constant 9.99999997E-7 : f32
    %18 = vector.broadcast %cst_9 : f32 to vector<5x1xf32>
    %19 = arith.addf %17, %18 : vector<5x1xf32>
    %20 = vector.broadcast %19 : vector<5x1xf32> to vector<5x32xf32>
    %21 = arith.divf %16, %20 : vector<5x32xf32>
    %22 = vector.broadcast %3 : vector<1x32xf32> to vector<5x32xf32>
    %23 = arith.addf %21, %22 : vector<5x32xf32>
    %c0_10 = arith.constant 0 : index
    %c0_11 = arith.constant 0 : index
    %24 = vector.load %arg4[%c0_10, %c0_11] : memref<32x96xf32, #tpu.memory_space<vmem>>, vector<32x96xf32>
    %cst_12 = arith.constant dense<0.000000e+00> : vector<5x96xf32>
    %25 = tpu.matmul %23, %24, %cst_12 {dimension_numbers = #tpu.dot_dimension_numbers<[1], [0], [0], [1], [0, 0, 1, 1], [], []>} : vector<5x32xf32>, vector<32x96xf32>, vector<5x96xf32> -> vector<5x96xf32>
    %c0_13 = arith.constant 0 : index
    %c0_14 = arith.constant 0 : index
    %26 = vector.load %arg5[%c0_13, %c0_14] : memref<1x96xf32, #tpu.memory_space<vmem>>, vector<1x96xf32>
    %27 = vector.broadcast %26 : vector<1x96xf32> to vector<5x96xf32>
    %28 = arith.addf %25, %27 : vector<5x96xf32>
    %29 = vector.extract_strided_slice %28 {offsets = [0, 0], sizes = [5, 32], strides = [1, 1]} : vector<5x96xf32> to vector<5x32xf32>
    %30 = vector.extract_strided_slice %28 {offsets = [0, 32], sizes = [5, 32], strides = [1, 1]} : vector<5x96xf32> to vector<5x32xf32>
    %31 = vector.extract_strided_slice %28 {offsets = [0, 64], sizes = [5, 32], strides = [1, 1]} : vector<5x96xf32> to vector<5x32xf32>
    %c0_15 = arith.constant 0 : index
    %c0_16 = arith.constant 0 : index
    %32 = vector.load %arg6[%c0_15, %c0_16] : memref<32x32xf32, #tpu.memory_space<vmem>>, vector<32x32xf32>
    %33 = vector.extract_strided_slice %29 {offsets = [0, 0], sizes = [5, 8], strides = [1, 1]} : vector<5x32xf32> to vector<5x8xf32>
    %34 = vector.extract_strided_slice %30 {offsets = [0, 0], sizes = [5, 8], strides = [1, 1]} : vector<5x32xf32> to vector<5x8xf32>
    %cst_17 = arith.constant dense<0.000000e+00> : vector<5x5xf32>
    %35 = tpu.matmul %33, %34, %cst_17 {dimension_numbers = #tpu.dot_dimension_numbers<[1], [1], [0], [0], [0, 0, 1, 0], [], []>} : vector<5x8xf32>, vector<5x8xf32>, vector<5x5xf32> -> vector<5x5xf32>
    %cst_18 = arith.constant 0.353553385 : f32
    %36 = vector.broadcast %cst_18 : f32 to vector<5x5xf32>
    %37 = arith.mulf %35, %36 : vector<5x5xf32>
    %cst_19 = arith.constant dense<0xFF800000> : vector<5xf32>
    %38 = vector.multi_reduction <maximumf>, %37, %cst_19 [1] : vector<5x5xf32> to vector<5xf32>
    %39 = vector.shape_cast %38 : vector<5xf32> to vector<5x1xf32>
    %40 = vector.broadcast %39 : vector<5x1xf32> to vector<5x5xf32>
    %41 = arith.subf %37, %40 : vector<5x5xf32>
    %42 = math.exp %41 : vector<5x5xf32>
    %cst_20 = arith.constant dense<0.000000e+00> : vector<5xf32>
    %43 = vector.multi_reduction <add>, %42, %cst_20 [1] : vector<5x5xf32> to vector<5xf32>
    %44 = vector.shape_cast %43 : vector<5xf32> to vector<5x1xf32>
    %45 = vector.broadcast %44 : vector<5x1xf32> to vector<5x5xf32>
    %46 = arith.divf %42, %45 : vector<5x5xf32>
    %47 = vector.extract_strided_slice %31 {offsets = [0, 0], sizes = [5, 8], strides = [1, 1]} : vector<5x32xf32> to vector<5x8xf32>
    %cst_21 = arith.constant dense<0.000000e+00> : vector<5x8xf32>
    %48 = tpu.matmul %46, %47, %cst_21 {dimension_numbers = #tpu.dot_dimension_numbers<[1], [0], [0], [1], [0, 0, 1, 1], [], []>} : vector<5x5xf32>, vector<5x8xf32>, vector<5x8xf32> -> vector<5x8xf32>
    %49 = vector.extract_strided_slice %32 {offsets = [0, 0], sizes = [8, 32], strides = [1, 1]} : vector<32x32xf32> to vector<8x32xf32>
    %cst_22 = arith.constant dense<0.000000e+00> : vector<5x32xf32>
    %50 = tpu.matmul %48, %49, %cst_22 {dimension_numbers = #tpu.dot_dimension_numbers<[1], [0], [0], [1], [0, 0, 1, 1], [], []>} : vector<5x8xf32>, vector<8x32xf32>, vector<5x32xf32> -> vector<5x32xf32>
    %51 = vector.extract_strided_slice %29 {offsets = [0, 8], sizes = [5, 8], strides = [1, 1]} : vector<5x32xf32> to vector<5x8xf32>
    %52 = vector.extract_strided_slice %30 {offsets = [0, 8], sizes = [5, 8], strides = [1, 1]} : vector<5x32xf32> to vector<5x8xf32>
    %cst_23 = arith.constant dense<0.000000e+00> : vector<5x5xf32>
    %53 = tpu.matmul %51, %52, %cst_23 {dimension_numbers = #tpu.dot_dimension_numbers<[1], [1], [0], [0], [0, 0, 1, 0], [], []>} : vector<5x8xf32>, vector<5x8xf32>, vector<5x5xf32> -> vector<5x5xf32>
    %cst_24 = arith.constant 0.353553385 : f32
    %54 = vector.broadcast %cst_24 : f32 to vector<5x5xf32>
    %55 = arith.mulf %53, %54 : vector<5x5xf32>
    %cst_25 = arith.constant dense<0xFF800000> : vector<5xf32>
    %56 = vector.multi_reduction <maximumf>, %55, %cst_25 [1] : vector<5x5xf32> to vector<5xf32>
    %57 = vector.shape_cast %56 : vector<5xf32> to vector<5x1xf32>
    %58 = vector.broadcast %57 : vector<5x1xf32> to vector<5x5xf32>
    %59 = arith.subf %55, %58 : vector<5x5xf32>
    %60 = math.exp %59 : vector<5x5xf32>
    %cst_26 = arith.constant dense<0.000000e+00> : vector<5xf32>
    %61 = vector.multi_reduction <add>, %60, %cst_26 [1] : vector<5x5xf32> to vector<5xf32>
    %62 = vector.shape_cast %61 : vector<5xf32> to vector<5x1xf32>
    %63 = vector.broadcast %62 : vector<5x1xf32> to vector<5x5xf32>
    %64 = arith.divf %60, %63 : vector<5x5xf32>
    %65 = vector.extract_strided_slice %31 {offsets = [0, 8], sizes = [5, 8], strides = [1, 1]} : vector<5x32xf32> to vector<5x8xf32>
    %cst_27 = arith.constant dense<0.000000e+00> : vector<5x8xf32>
    %66 = tpu.matmul %64, %65, %cst_27 {dimension_numbers = #tpu.dot_dimension_numbers<[1], [0], [0], [1], [0, 0, 1, 1], [], []>} : vector<5x5xf32>, vector<5x8xf32>, vector<5x8xf32> -> vector<5x8xf32>
    %67 = vector.extract_strided_slice %32 {offsets = [8, 0], sizes = [8, 32], strides = [1, 1]} : vector<32x32xf32> to vector<8x32xf32>
    %cst_28 = arith.constant dense<0.000000e+00> : vector<5x32xf32>
    %68 = tpu.matmul %66, %67, %cst_28 {dimension_numbers = #tpu.dot_dimension_numbers<[1], [0], [0], [1], [0, 0, 1, 1], [], []>} : vector<5x8xf32>, vector<8x32xf32>, vector<5x32xf32> -> vector<5x32xf32>
    %69 = arith.addf %50, %68 : vector<5x32xf32>
    %70 = vector.extract_strided_slice %29 {offsets = [0, 16], sizes = [5, 8], strides = [1, 1]} : vector<5x32xf32> to vector<5x8xf32>
    %71 = vector.extract_strided_slice %30 {offsets = [0, 16], sizes = [5, 8], strides = [1, 1]} : vector<5x32xf32> to vector<5x8xf32>
    %cst_29 = arith.constant dense<0.000000e+00> : vector<5x5xf32>
    %72 = tpu.matmul %70, %71, %cst_29 {dimension_numbers = #tpu.dot_dimension_numbers<[1], [1], [0], [0], [0, 0, 1, 0], [], []>} : vector<5x8xf32>, vector<5x8xf32>, vector<5x5xf32> -> vector<5x5xf32>
    %cst_30 = arith.constant 0.353553385 : f32
    %73 = vector.broadcast %cst_30 : f32 to vector<5x5xf32>
    %74 = arith.mulf %72, %73 : vector<5x5xf32>
    %cst_31 = arith.constant dense<0xFF800000> : vector<5xf32>
    %75 = vector.multi_reduction <maximumf>, %74, %cst_31 [1] : vector<5x5xf32> to vector<5xf32>
    %76 = vector.shape_cast %75 : vector<5xf32> to vector<5x1xf32>
    %77 = vector.broadcast %76 : vector<5x1xf32> to vector<5x5xf32>
    %78 = arith.subf %74, %77 : vector<5x5xf32>
    %79 = math.exp %78 : vector<5x5xf32>
    %cst_32 = arith.constant dense<0.000000e+00> : vector<5xf32>
    %80 = vector.multi_reduction <add>, %79, %cst_32 [1] : vector<5x5xf32> to vector<5xf32>
    %81 = vector.shape_cast %80 : vector<5xf32> to vector<5x1xf32>
    %82 = vector.broadcast %81 : vector<5x1xf32> to vector<5x5xf32>
    %83 = arith.divf %79, %82 : vector<5x5xf32>
    %84 = vector.extract_strided_slice %31 {offsets = [0, 16], sizes = [5, 8], strides = [1, 1]} : vector<5x32xf32> to vector<5x8xf32>
    %cst_33 = arith.constant dense<0.000000e+00> : vector<5x8xf32>
    %85 = tpu.matmul %83, %84, %cst_33 {dimension_numbers = #tpu.dot_dimension_numbers<[1], [0], [0], [1], [0, 0, 1, 1], [], []>} : vector<5x5xf32>, vector<5x8xf32>, vector<5x8xf32> -> vector<5x8xf32>
    %86 = vector.extract_strided_slice %32 {offsets = [16, 0], sizes = [8, 32], strides = [1, 1]} : vector<32x32xf32> to vector<8x32xf32>
    %cst_34 = arith.constant dense<0.000000e+00> : vector<5x32xf32>
    %87 = tpu.matmul %85, %86, %cst_34 {dimension_numbers = #tpu.dot_dimension_numbers<[1], [0], [0], [1], [0, 0, 1, 1], [], []>} : vector<5x8xf32>, vector<8x32xf32>, vector<5x32xf32> -> vector<5x32xf32>
    %88 = arith.addf %69, %87 : vector<5x32xf32>
    %89 = vector.extract_strided_slice %29 {offsets = [0, 24], sizes = [5, 8], strides = [1, 1]} : vector<5x32xf32> to vector<5x8xf32>
    %90 = vector.extract_strided_slice %30 {offsets = [0, 24], sizes = [5, 8], strides = [1, 1]} : vector<5x32xf32> to vector<5x8xf32>
    %cst_35 = arith.constant dense<0.000000e+00> : vector<5x5xf32>
    %91 = tpu.matmul %89, %90, %cst_35 {dimension_numbers = #tpu.dot_dimension_numbers<[1], [1], [0], [0], [0, 0, 1, 0], [], []>} : vector<5x8xf32>, vector<5x8xf32>, vector<5x5xf32> -> vector<5x5xf32>
    %cst_36 = arith.constant 0.353553385 : f32
    %92 = vector.broadcast %cst_36 : f32 to vector<5x5xf32>
    %93 = arith.mulf %91, %92 : vector<5x5xf32>
    %cst_37 = arith.constant dense<0xFF800000> : vector<5xf32>
    %94 = vector.multi_reduction <maximumf>, %93, %cst_37 [1] : vector<5x5xf32> to vector<5xf32>
    %95 = vector.shape_cast %94 : vector<5xf32> to vector<5x1xf32>
    %96 = vector.broadcast %95 : vector<5x1xf32> to vector<5x5xf32>
    %97 = arith.subf %93, %96 : vector<5x5xf32>
    %98 = math.exp %97 : vector<5x5xf32>
    %cst_38 = arith.constant dense<0.000000e+00> : vector<5xf32>
    %99 = vector.multi_reduction <add>, %98, %cst_38 [1] : vector<5x5xf32> to vector<5xf32>
    %100 = vector.shape_cast %99 : vector<5xf32> to vector<5x1xf32>
    %101 = vector.broadcast %100 : vector<5x1xf32> to vector<5x5xf32>
    %102 = arith.divf %98, %101 : vector<5x5xf32>
    %103 = vector.extract_strided_slice %31 {offsets = [0, 24], sizes = [5, 8], strides = [1, 1]} : vector<5x32xf32> to vector<5x8xf32>
    %cst_39 = arith.constant dense<0.000000e+00> : vector<5x8xf32>
    %104 = tpu.matmul %102, %103, %cst_39 {dimension_numbers = #tpu.dot_dimension_numbers<[1], [0], [0], [1], [0, 0, 1, 1], [], []>} : vector<5x5xf32>, vector<5x8xf32>, vector<5x8xf32> -> vector<5x8xf32>
    %105 = vector.extract_strided_slice %32 {offsets = [24, 0], sizes = [8, 32], strides = [1, 1]} : vector<32x32xf32> to vector<8x32xf32>
    %cst_40 = arith.constant dense<0.000000e+00> : vector<5x32xf32>
    %106 = tpu.matmul %104, %105, %cst_40 {dimension_numbers = #tpu.dot_dimension_numbers<[1], [0], [0], [1], [0, 0, 1, 1], [], []>} : vector<5x8xf32>, vector<8x32xf32>, vector<5x32xf32> -> vector<5x32xf32>
    %107 = arith.addf %88, %106 : vector<5x32xf32>
    %108 = arith.addf %1, %107 : vector<5x32xf32>
    %c0_41 = arith.constant 0 : index
    %c0_42 = arith.constant 0 : index
    %109 = vector.load %arg7[%c0_41, %c0_42] : memref<1x32xf32, #tpu.memory_space<vmem>>, vector<1x32xf32>
    %110 = vector.broadcast %109 : vector<1x32xf32> to vector<5x32xf32>
    %111 = arith.addf %108, %110 : vector<5x32xf32>
    %c0_43 = arith.constant 0 : index
    %c0_44 = arith.constant 0 : index
    %c0_45 = arith.constant 0 : index
    %112 = vector.load %arg8[%c0_43, %c0_44, %c0_45] : memref<1x5x32xf32, #tpu.memory_space<vmem>>, vector<1x5x32xf32>
    %113 = vector.shape_cast %112 : vector<1x5x32xf32> to vector<5x32xf32>
    %114 = vector.shape_cast %111 : vector<5x32xf32> to vector<1x5x32xf32>
    tpu.vector_store %arg8[%c0_43, %c0_44, %c0_45], %114 {strides = array<i32>} : memref<1x5x32xf32, #tpu.memory_space<vmem>>, vector<1x5x32xf32>,
    return
  }
  func.func @transform_0(%arg0: i32) -> (i32, i32, i32) {
    %c0_i32 = arith.constant 0 : i32
    %c0_i32_0 = arith.constant 0 : i32
    %c0_i32_1 = arith.constant 0 : i32
    return %arg0, %c0_i32, %c0_i32_0 : i32, i32, i32
  }
  func.func @transform_1(%arg0: i32) -> (i32, i32) {
    %c0_i32 = arith.constant 0 : i32
    %c0_i32_0 = arith.constant 0 : i32
    %c0_i32_1 = arith.constant 0 : i32
    return %c0_i32, %c0_i32_0 : i32, i32
  }
  func.func @transform_2(%arg0: i32) -> (i32, i32) {
    %c0_i32 = arith.constant 0 : i32
    %c0_i32_0 = arith.constant 0 : i32
    %c0_i32_1 = arith.constant 0 : i32
    return %c0_i32, %c0_i32_0 : i32, i32
  }
  func.func @transform_3(%arg0: i32) -> (i32, i32) {
    %c0_i32 = arith.constant 0 : i32
    %c0_i32_0 = arith.constant 0 : i32
    %c0_i32_1 = arith.constant 0 : i32
    return %c0_i32, %c0_i32_0 : i32, i32
  }
  func.func @transform_4(%arg0: i32) -> (i32, i32) {
    %c0_i32 = arith.constant 0 : i32
    %c0_i32_0 = arith.constant 0 : i32
    %c0_i32_1 = arith.constant 0 : i32
    return %c0_i32, %c0_i32_0 : i32, i32
  }
  func.func @transform_5(%arg0: i32) -> (i32, i32) {
    %c0_i32 = arith.constant 0 : i32
    %c0_i32_0 = arith.constant 0 : i32
    %c0_i32_1 = arith.constant 0 : i32
    return %c0_i32, %c0_i32_0 : i32, i32
  }
  func.func @transform_6(%arg0: i32) -> (i32, i32) {
    %c0_i32 = arith.constant 0 : i32
    %c0_i32_0 = arith.constant 0 : i32
    %c0_i32_1 = arith.constant 0 : i32
    return %c0_i32, %c0_i32_0 : i32, i32
  }
  func.func @transform_7(%arg0: i32) -> (i32, i32, i32) {
    %c0_i32 = arith.constant 0 : i32
    %c0_i32_0 = arith.constant 0 : i32
    %c0_i32_1 = arith.constant 0 : i32
    return %arg0, %c0_i32, %c0_i32_0 : i32, i32, i32
  }
}

module attributes {stable_mosaic.version = 11 : i64} {
  func.func @_ffn_sublayer_kernel(%arg0: i32, %arg1: memref<1x5x32xf32, #tpu.memory_space<vmem>>, %arg2: memref<1x32xf32, #tpu.memory_space<vmem>>, %arg3: memref<1x32xf32, #tpu.memory_space<vmem>>, %arg4: memref<32x64xf32, #tpu.memory_space<vmem>>, %arg5: memref<1x64xf32, #tpu.memory_space<vmem>>, %arg6: memref<64x32xf32, #tpu.memory_space<vmem>>, %arg7: memref<1x32xf32, #tpu.memory_space<vmem>>, %arg8: memref<1x5x32xf32, #tpu.memory_space<vmem>>) attributes {dimension_semantics = [#tpu.dimension_semantics<parallel>], iteration_bounds = array<i64: 2>, scalar_prefetch = 0 : i64, scratch_operands = 0 : i64, tpu.core_type = #tpu.core_type<tc>, window_params = [{transform_indices = @transform_0, window_bounds = array<i64: 1, 5, 32>}, {pipeline_mode = #tpu.pipeline_mode<synchronous>, transform_indices = @transform_1, window_bounds = array<i64: 1, 32>}, {pipeline_mode = #tpu.pipeline_mode<synchronous>, transform_indices = @transform_2, window_bounds = array<i64: 1, 32>}, {pipeline_mode = #tpu.pipeline_mode<synchronous>, transform_indices = @transform_3, window_bounds = array<i64: 32, 64>}, {pipeline_mode = #tpu.pipeline_mode<synchronous>, transform_indices = @transform_4, window_bounds = array<i64: 1, 64>}, {pipeline_mode = #tpu.pipeline_mode<synchronous>, transform_indices = @transform_5, window_bounds = array<i64: 64, 32>}, {pipeline_mode = #tpu.pipeline_mode<synchronous>, transform_indices = @transform_6, window_bounds = array<i64: 1, 32>}, {transform_indices = @transform_7, window_bounds = array<i64: 1, 5, 32>}]} {
    %c0 = arith.constant 0 : index
    %c0_0 = arith.constant 0 : index
    %c0_1 = arith.constant 0 : index
    %0 = vector.load %arg1[%c0, %c0_0, %c0_1] : memref<1x5x32xf32, #tpu.memory_space<vmem>>, vector<1x5x32xf32>
    %1 = vector.shape_cast %0 : vector<1x5x32xf32> to vector<5x32xf32>
    %c0_2 = arith.constant 0 : index
    %c0_3 = arith.constant 0 : index
    %2 = vector.load %arg2[%c0_2, %c0_3] : memref<1x32xf32, #tpu.memory_space<vmem>>, vector<1x32xf32>
    %c0_4 = arith.constant 0 : index
    %c0_5 = arith.constant 0 : index
    %3 = vector.load %arg3[%c0_4, %c0_5] : memref<1x32xf32, #tpu.memory_space<vmem>>, vector<1x32xf32>
    %cst = arith.constant dense<0.000000e+00> : vector<5xf32>
    %4 = vector.multi_reduction <add>, %1, %cst [1] : vector<5x32xf32> to vector<5xf32>
    %5 = vector.shape_cast %4 : vector<5xf32> to vector<5x1xf32>
    %cst_6 = arith.constant 3.200000e+01 : f32
    %6 = vector.broadcast %cst_6 : f32 to vector<5x1xf32>
    %7 = arith.divf %5, %6 : vector<5x1xf32>
    %8 = vector.broadcast %7 : vector<5x1xf32> to vector<5x32xf32>
    %9 = arith.subf %1, %8 : vector<5x32xf32>
    %10 = arith.mulf %9, %9 : vector<5x32xf32>
    %cst_7 = arith.constant dense<0.000000e+00> : vector<5xf32>
    %11 = vector.multi_reduction <add>, %10, %cst_7 [1] : vector<5x32xf32> to vector<5xf32>
    %12 = vector.shape_cast %11 : vector<5xf32> to vector<5x1xf32>
    %cst_8 = arith.constant 3.100000e+01 : f32
    %13 = vector.broadcast %cst_8 : f32 to vector<5x1xf32>
    %14 = arith.divf %12, %13 : vector<5x1xf32>
    %15 = vector.broadcast %2 : vector<1x32xf32> to vector<5x32xf32>
    %16 = arith.mulf %15, %9 : vector<5x32xf32>
    %17 = math.sqrt %14 : vector<5x1xf32>
    %cst_9 = arith.constant 9.99999997E-7 : f32
    %18 = vector.broadcast %cst_9 : f32 to vector<5x1xf32>
    %19 = arith.addf %17, %18 : vector<5x1xf32>
    %20 = vector.broadcast %19 : vector<5x1xf32> to vector<5x32xf32>
    %21 = arith.divf %16, %20 : vector<5x32xf32>
    %22 = vector.broadcast %3 : vector<1x32xf32> to vector<5x32xf32>
    %23 = arith.addf %21, %22 : vector<5x32xf32>
    %c0_10 = arith.constant 0 : index
    %c0_11 = arith.constant 0 : index
    %24 = vector.load %arg4[%c0_10, %c0_11] : memref<32x64xf32, #tpu.memory_space<vmem>>, vector<32x64xf32>
    %cst_12 = arith.constant dense<0.000000e+00> : vector<5x64xf32>
    %25 = tpu.matmul %23, %24, %cst_12 {dimension_numbers = #tpu.dot_dimension_numbers<[1], [0], [0], [1], [0, 0, 1, 1], [], []>} : vector<5x32xf32>, vector<32x64xf32>, vector<5x64xf32> -> vector<5x64xf32>
    %c0_13 = arith.constant 0 : index
    %c0_14 = arith.constant 0 : index
    %26 = vector.load %arg5[%c0_13, %c0_14] : memref<1x64xf32, #tpu.memory_space<vmem>>, vector<1x64xf32>
    %27 = vector.broadcast %26 : vector<1x64xf32> to vector<5x64xf32>
    %28 = arith.addf %25, %27 : vector<5x64xf32>
    %cst_15 = arith.constant 0.000000e+00 : f32
    %29 = vector.broadcast %cst_15 : f32 to vector<5x64xf32>
    %30 = arith.maximumf %28, %29 : vector<5x64xf32>
    %c0_16 = arith.constant 0 : index
    %c0_17 = arith.constant 0 : index
    %31 = vector.load %arg6[%c0_16, %c0_17] : memref<64x32xf32, #tpu.memory_space<vmem>>, vector<64x32xf32>
    %cst_18 = arith.constant dense<0.000000e+00> : vector<5x32xf32>
    %32 = tpu.matmul %30, %31, %cst_18 {dimension_numbers = #tpu.dot_dimension_numbers<[1], [0], [0], [1], [0, 0, 1, 1], [], []>} : vector<5x64xf32>, vector<64x32xf32>, vector<5x32xf32> -> vector<5x32xf32>
    %33 = arith.addf %1, %32 : vector<5x32xf32>
    %c0_19 = arith.constant 0 : index
    %c0_20 = arith.constant 0 : index
    %34 = vector.load %arg7[%c0_19, %c0_20] : memref<1x32xf32, #tpu.memory_space<vmem>>, vector<1x32xf32>
    %35 = vector.broadcast %34 : vector<1x32xf32> to vector<5x32xf32>
    %36 = arith.addf %33, %35 : vector<5x32xf32>
    %c0_21 = arith.constant 0 : index
    %c0_22 = arith.constant 0 : index
    %c0_23 = arith.constant 0 : index
    %37 = vector.load %arg8[%c0_21, %c0_22, %c0_23] : memref<1x5x32xf32, #tpu.memory_space<vmem>>, vector<1x5x32xf32>
    %38 = vector.shape_cast %37 : vector<1x5x32xf32> to vector<5x32xf32>
    %39 = vector.shape_cast %36 : vector<5x32xf32> to vector<1x5x32xf32>
    tpu.vector_store %arg8[%c0_21, %c0_22, %c0_23], %39 {strides = array<i32>} : memref<1x5x32xf32, #tpu.memory_space<vmem>>, vector<1x5x32xf32>,
    return
  }
  func.func @transform_0(%arg0: i32) -> (i32, i32, i32) {
    %c0_i32 = arith.constant 0 : i32
    %c0_i32_0 = arith.constant 0 : i32
    %c0_i32_1 = arith.constant 0 : i32
    return %arg0, %c0_i32, %c0_i32_0 : i32, i32, i32
  }
  func.func @transform_1(%arg0: i32) -> (i32, i32) {
    %c0_i32 = arith.constant 0 : i32
    %c0_i32_0 = arith.constant 0 : i32
    %c0_i32_1 = arith.constant 0 : i32
    return %c0_i32, %c0_i32_0 : i32, i32
  }
  func.func @transform_2(%arg0: i32) -> (i32, i32) {
    %c0_i32 = arith.constant 0 : i32
    %c0_i32_0 = arith.constant 0 : i32
    %c0_i32_1 = arith.constant 0 : i32
    return %c0_i32, %c0_i32_0 : i32, i32
  }
  func.func @transform_3(%arg0: i32) -> (i32, i32) {
    %c0_i32 = arith.constant 0 : i32
    %c0_i32_0 = arith.constant 0 : i32
    %c0_i32_1 = arith.constant 0 : i32
    return %c0_i32, %c0_i32_0 : i32, i32
  }
  func.func @transform_4(%arg0: i32) -> (i32, i32) {
    %c0_i32 = arith.constant 0 : i32
    %c0_i32_0 = arith.constant 0 : i32
    %c0_i32_1 = arith.constant 0 : i32
    return %c0_i32, %c0_i32_0 : i32, i32
  }
  func.func @transform_5(%arg0: i32) -> (i32, i32) {
    %c0_i32 = arith.constant 0 : i32
    %c0_i32_0 = arith.constant 0 : i32
    %c0_i32_1 = arith.constant 0 : i32
    return %c0_i32, %c0_i32_0 : i32, i32
  }
  func.func @transform_6(%arg0: i32) -> (i32, i32) {
    %c0_i32 = arith.constant 0 : i32
    %c0_i32_0 = arith.constant 0 : i32
    %c0_i32_1 = arith.constant 0 : i32
    return %c0_i32, %c0_i32_0 : i32, i32
  }
  func.func @transform_7(%arg0: i32) -> (i32, i32, i32) {
    %c0_i32 = arith.constant 0 : i32
    %c0_i32_0 = arith.constant 0 : i32
    %c0_i32_1 = arith.constant 0 : i32
    return %arg0, %c0_i32, %c0_i32_0 : i32, i32, i32
  }
}

module attributes {stable_mosaic.version = 11 : i64} {
  func.func @_layernorm_kernel(%arg0: i32, %arg1: memref<1x5x32xf32, #tpu.memory_space<vmem>>, %arg2: memref<1x32xf32, #tpu.memory_space<vmem>>, %arg3: memref<1x32xf32, #tpu.memory_space<vmem>>, %arg4: memref<1x5x32xf32, #tpu.memory_space<vmem>>) attributes {dimension_semantics = [#tpu.dimension_semantics<parallel>], iteration_bounds = array<i64: 2>, scalar_prefetch = 0 : i64, scratch_operands = 0 : i64, tpu.core_type = #tpu.core_type<tc>, window_params = [{transform_indices = @transform_0, window_bounds = array<i64: 1, 5, 32>}, {pipeline_mode = #tpu.pipeline_mode<synchronous>, transform_indices = @transform_1, window_bounds = array<i64: 1, 32>}, {pipeline_mode = #tpu.pipeline_mode<synchronous>, transform_indices = @transform_2, window_bounds = array<i64: 1, 32>}, {transform_indices = @transform_3, window_bounds = array<i64: 1, 5, 32>}]} {
    %c0 = arith.constant 0 : index
    %c0_0 = arith.constant 0 : index
    %c0_1 = arith.constant 0 : index
    %0 = vector.load %arg1[%c0, %c0_0, %c0_1] : memref<1x5x32xf32, #tpu.memory_space<vmem>>, vector<1x5x32xf32>
    %1 = vector.shape_cast %0 : vector<1x5x32xf32> to vector<5x32xf32>
    %c0_2 = arith.constant 0 : index
    %c0_3 = arith.constant 0 : index
    %2 = vector.load %arg2[%c0_2, %c0_3] : memref<1x32xf32, #tpu.memory_space<vmem>>, vector<1x32xf32>
    %c0_4 = arith.constant 0 : index
    %c0_5 = arith.constant 0 : index
    %3 = vector.load %arg3[%c0_4, %c0_5] : memref<1x32xf32, #tpu.memory_space<vmem>>, vector<1x32xf32>
    %cst = arith.constant dense<0.000000e+00> : vector<5xf32>
    %4 = vector.multi_reduction <add>, %1, %cst [1] : vector<5x32xf32> to vector<5xf32>
    %5 = vector.shape_cast %4 : vector<5xf32> to vector<5x1xf32>
    %cst_6 = arith.constant 3.200000e+01 : f32
    %6 = vector.broadcast %cst_6 : f32 to vector<5x1xf32>
    %7 = arith.divf %5, %6 : vector<5x1xf32>
    %8 = vector.broadcast %7 : vector<5x1xf32> to vector<5x32xf32>
    %9 = arith.subf %1, %8 : vector<5x32xf32>
    %10 = arith.mulf %9, %9 : vector<5x32xf32>
    %cst_7 = arith.constant dense<0.000000e+00> : vector<5xf32>
    %11 = vector.multi_reduction <add>, %10, %cst_7 [1] : vector<5x32xf32> to vector<5xf32>
    %12 = vector.shape_cast %11 : vector<5xf32> to vector<5x1xf32>
    %cst_8 = arith.constant 3.100000e+01 : f32
    %13 = vector.broadcast %cst_8 : f32 to vector<5x1xf32>
    %14 = arith.divf %12, %13 : vector<5x1xf32>
    %15 = vector.broadcast %2 : vector<1x32xf32> to vector<5x32xf32>
    %16 = arith.mulf %15, %9 : vector<5x32xf32>
    %17 = math.sqrt %14 : vector<5x1xf32>
    %cst_9 = arith.constant 9.99999997E-7 : f32
    %18 = vector.broadcast %cst_9 : f32 to vector<5x1xf32>
    %19 = arith.addf %17, %18 : vector<5x1xf32>
    %20 = vector.broadcast %19 : vector<5x1xf32> to vector<5x32xf32>
    %21 = arith.divf %16, %20 : vector<5x32xf32>
    %22 = vector.broadcast %3 : vector<1x32xf32> to vector<5x32xf32>
    %23 = arith.addf %21, %22 : vector<5x32xf32>
    %c0_10 = arith.constant 0 : index
    %c0_11 = arith.constant 0 : index
    %c0_12 = arith.constant 0 : index
    %24 = vector.load %arg4[%c0_10, %c0_11, %c0_12] : memref<1x5x32xf32, #tpu.memory_space<vmem>>, vector<1x5x32xf32>
    %25 = vector.shape_cast %24 : vector<1x5x32xf32> to vector<5x32xf32>
    %26 = vector.shape_cast %23 : vector<5x32xf32> to vector<1x5x32xf32>
    tpu.vector_store %arg4[%c0_10, %c0_11, %c0_12], %26 {strides = array<i32>} : memref<1x5x32xf32, #tpu.memory_space<vmem>>, vector<1x5x32xf32>,
    return
  }
  func.func @transform_0(%arg0: i32) -> (i32, i32, i32) {
    %c0_i32 = arith.constant 0 : i32
    %c0_i32_0 = arith.constant 0 : i32
    %c0_i32_1 = arith.constant 0 : i32
    return %arg0, %c0_i32, %c0_i32_0 : i32, i32, i32
  }
  func.func @transform_1(%arg0: i32) -> (i32, i32) {
    %c0_i32 = arith.constant 0 : i32
    %c0_i32_0 = arith.constant 0 : i32
    %c0_i32_1 = arith.constant 0 : i32
    return %c0_i32, %c0_i32_0 : i32, i32
  }
  func.func @transform_2(%arg0: i32) -> (i32, i32) {
    %c0_i32 = arith.constant 0 : i32
    %c0_i32_0 = arith.constant 0 : i32
    %c0_i32_1 = arith.constant 0 : i32
    return %c0_i32, %c0_i32_0 : i32, i32
  }
  func.func @transform_3(%arg0: i32) -> (i32, i32, i32) {
    %c0_i32 = arith.constant 0 : i32
    %c0_i32_0 = arith.constant 0 : i32
    %c0_i32_1 = arith.constant 0 : i32
    return %arg0, %c0_i32, %c0_i32_0 : i32, i32, i32
  }
}

module attributes {stable_mosaic.version = 11 : i64} {
  func.func @_self_attn_sublayer_kernel(%arg0: i32, %arg1: memref<1x8x32xf32, #tpu.memory_space<vmem>>, %arg2: memref<1x32xf32, #tpu.memory_space<vmem>>, %arg3: memref<1x32xf32, #tpu.memory_space<vmem>>, %arg4: memref<32x96xf32, #tpu.memory_space<vmem>>, %arg5: memref<1x96xf32, #tpu.memory_space<vmem>>, %arg6: memref<32x32xf32, #tpu.memory_space<vmem>>, %arg7: memref<1x32xf32, #tpu.memory_space<vmem>>, %arg8: memref<1x8x32xf32, #tpu.memory_space<vmem>>) attributes {dimension_semantics = [#tpu.dimension_semantics<parallel>], iteration_bounds = array<i64: 2>, scalar_prefetch = 0 : i64, scratch_operands = 0 : i64, tpu.core_type = #tpu.core_type<tc>, window_params = [{transform_indices = @transform_0, window_bounds = array<i64: 1, 8, 32>}, {pipeline_mode = #tpu.pipeline_mode<synchronous>, transform_indices = @transform_1, window_bounds = array<i64: 1, 32>}, {pipeline_mode = #tpu.pipeline_mode<synchronous>, transform_indices = @transform_2, window_bounds = array<i64: 1, 32>}, {pipeline_mode = #tpu.pipeline_mode<synchronous>, transform_indices = @transform_3, window_bounds = array<i64: 32, 96>}, {pipeline_mode = #tpu.pipeline_mode<synchronous>, transform_indices = @transform_4, window_bounds = array<i64: 1, 96>}, {pipeline_mode = #tpu.pipeline_mode<synchronous>, transform_indices = @transform_5, window_bounds = array<i64: 32, 32>}, {pipeline_mode = #tpu.pipeline_mode<synchronous>, transform_indices = @transform_6, window_bounds = array<i64: 1, 32>}, {transform_indices = @transform_7, window_bounds = array<i64: 1, 8, 32>}]} {
    %c0 = arith.constant 0 : index
    %c0_0 = arith.constant 0 : index
    %c0_1 = arith.constant 0 : index
    %0 = vector.load %arg1[%c0, %c0_0, %c0_1] : memref<1x8x32xf32, #tpu.memory_space<vmem>>, vector<1x8x32xf32>
    %1 = vector.shape_cast %0 : vector<1x8x32xf32> to vector<8x32xf32>
    %c0_2 = arith.constant 0 : index
    %c0_3 = arith.constant 0 : index
    %2 = vector.load %arg2[%c0_2, %c0_3] : memref<1x32xf32, #tpu.memory_space<vmem>>, vector<1x32xf32>
    %c0_4 = arith.constant 0 : index
    %c0_5 = arith.constant 0 : index
    %3 = vector.load %arg3[%c0_4, %c0_5] : memref<1x32xf32, #tpu.memory_space<vmem>>, vector<1x32xf32>
    %cst = arith.constant dense<0.000000e+00> : vector<8xf32>
    %4 = vector.multi_reduction <add>, %1, %cst [1] : vector<8x32xf32> to vector<8xf32>
    %5 = vector.shape_cast %4 : vector<8xf32> to vector<8x1xf32>
    %cst_6 = arith.constant 3.200000e+01 : f32
    %6 = vector.broadcast %cst_6 : f32 to vector<8x1xf32>
    %7 = arith.divf %5, %6 : vector<8x1xf32>
    %8 = vector.broadcast %7 : vector<8x1xf32> to vector<8x32xf32>
    %9 = arith.subf %1, %8 : vector<8x32xf32>
    %10 = arith.mulf %9, %9 : vector<8x32xf32>
    %cst_7 = arith.constant dense<0.000000e+00> : vector<8xf32>
    %11 = vector.multi_reduction <add>, %10, %cst_7 [1] : vector<8x32xf32> to vector<8xf32>
    %12 = vector.shape_cast %11 : vector<8xf32> to vector<8x1xf32>
    %cst_8 = arith.constant 3.100000e+01 : f32
    %13 = vector.broadcast %cst_8 : f32 to vector<8x1xf32>
    %14 = arith.divf %12, %13 : vector<8x1xf32>
    %15 = vector.broadcast %2 : vector<1x32xf32> to vector<8x32xf32>
    %16 = arith.mulf %15, %9 : vector<8x32xf32>
    %17 = math.sqrt %14 : vector<8x1xf32>
    %cst_9 = arith.constant 9.99999997E-7 : f32
    %18 = vector.broadcast %cst_9 : f32 to vector<8x1xf32>
    %19 = arith.addf %17, %18 : vector<8x1xf32>
    %20 = vector.broadcast %19 : vector<8x1xf32> to vector<8x32xf32>
    %21 = arith.divf %16, %20 : vector<8x32xf32>
    %22 = vector.broadcast %3 : vector<1x32xf32> to vector<8x32xf32>
    %23 = arith.addf %21, %22 : vector<8x32xf32>
    %c0_10 = arith.constant 0 : index
    %c0_11 = arith.constant 0 : index
    %24 = vector.load %arg4[%c0_10, %c0_11] : memref<32x96xf32, #tpu.memory_space<vmem>>, vector<32x96xf32>
    %cst_12 = arith.constant dense<0.000000e+00> : vector<8x96xf32>
    %25 = tpu.matmul %23, %24, %cst_12 {dimension_numbers = #tpu.dot_dimension_numbers<[1], [0], [0], [1], [0, 0, 1, 1], [], []>} : vector<8x32xf32>, vector<32x96xf32>, vector<8x96xf32> -> vector<8x96xf32>
    %c0_13 = arith.constant 0 : index
    %c0_14 = arith.constant 0 : index
    %26 = vector.load %arg5[%c0_13, %c0_14] : memref<1x96xf32, #tpu.memory_space<vmem>>, vector<1x96xf32>
    %27 = vector.broadcast %26 : vector<1x96xf32> to vector<8x96xf32>
    %28 = arith.addf %25, %27 : vector<8x96xf32>
    %29 = vector.extract_strided_slice %28 {offsets = [0, 0], sizes = [8, 32], strides = [1, 1]} : vector<8x96xf32> to vector<8x32xf32>
    %30 = vector.extract_strided_slice %28 {offsets = [0, 32], sizes = [8, 32], strides = [1, 1]} : vector<8x96xf32> to vector<8x32xf32>
    %31 = vector.extract_strided_slice %28 {offsets = [0, 64], sizes = [8, 32], strides = [1, 1]} : vector<8x96xf32> to vector<8x32xf32>
    %c0_15 = arith.constant 0 : index
    %c0_16 = arith.constant 0 : index
    %32 = vector.load %arg6[%c0_15, %c0_16] : memref<32x32xf32, #tpu.memory_space<vmem>>, vector<32x32xf32>
    %33 = tpu.iota {dimensions = array<i32: 0>} : vector<8x8xi32>
    %34 = tpu.iota {dimensions = array<i32: 1>} : vector<8x8xi32>
    %35 = arith.cmpi sgt, %34, %33 : vector<8x8xi32>
    %cst_17 = arith.constant -1.000000e+09 : f32
    %cst_18 = arith.constant 0.000000e+00 : f32
    %36 = vector.broadcast %cst_17 : f32 to vector<8x8xf32>
    %37 = vector.broadcast %cst_18 : f32 to vector<8x8xf32>
    %38 = arith.select %35, %36, %37 : vector<8x8xi1>, vector<8x8xf32>
    %39 = vector.extract_strided_slice %29 {offsets = [0, 0], sizes = [8, 8], strides = [1, 1]} : vector<8x32xf32> to vector<8x8xf32>
    %40 = vector.extract_strided_slice %30 {offsets = [0, 0], sizes = [8, 8], strides = [1, 1]} : vector<8x32xf32> to vector<8x8xf32>
    %cst_19 = arith.constant dense<0.000000e+00> : vector<8x8xf32>
    %41 = tpu.matmul %39, %40, %cst_19 {dimension_numbers = #tpu.dot_dimension_numbers<[1], [1], [0], [0], [0, 0, 1, 0], [], []>} : vector<8x8xf32>, vector<8x8xf32>, vector<8x8xf32> -> vector<8x8xf32>
    %cst_20 = arith.constant 0.353553385 : f32
    %42 = vector.broadcast %cst_20 : f32 to vector<8x8xf32>
    %43 = arith.mulf %41, %42 : vector<8x8xf32>
    %44 = arith.addf %43, %38 : vector<8x8xf32>
    %cst_21 = arith.constant dense<0xFF800000> : vector<8xf32>
    %45 = vector.multi_reduction <maximumf>, %44, %cst_21 [1] : vector<8x8xf32> to vector<8xf32>
    %46 = vector.shape_cast %45 : vector<8xf32> to vector<8x1xf32>
    %47 = vector.broadcast %46 : vector<8x1xf32> to vector<8x8xf32>
    %48 = arith.subf %44, %47 : vector<8x8xf32>
    %49 = math.exp %48 : vector<8x8xf32>
    %cst_22 = arith.constant dense<0.000000e+00> : vector<8xf32>
    %50 = vector.multi_reduction <add>, %49, %cst_22 [1] : vector<8x8xf32> to vector<8xf32>
    %51 = vector.shape_cast %50 : vector<8xf32> to vector<8x1xf32>
    %52 = vector.broadcast %51 : vector<8x1xf32> to vector<8x8xf32>
    %53 = arith.divf %49, %52 : vector<8x8xf32>
    %54 = vector.extract_strided_slice %31 {offsets = [0, 0], sizes = [8, 8], strides = [1, 1]} : vector<8x32xf32> to vector<8x8xf32>
    %cst_23 = arith.constant dense<0.000000e+00> : vector<8x8xf32>
    %55 = tpu.matmul %53, %54, %cst_23 {dimension_numbers = #tpu.dot_dimension_numbers<[1], [0], [0], [1], [0, 0, 1, 1], [], []>} : vector<8x8xf32>, vector<8x8xf32>, vector<8x8xf32> -> vector<8x8xf32>
    %56 = vector.extract_strided_slice %32 {offsets = [0, 0], sizes = [8, 32], strides = [1, 1]} : vector<32x32xf32> to vector<8x32xf32>
    %cst_24 = arith.constant dense<0.000000e+00> : vector<8x32xf32>
    %57 = tpu.matmul %55, %56, %cst_24 {dimension_numbers = #tpu.dot_dimension_numbers<[1], [0], [0], [1], [0, 0, 1, 1], [], []>} : vector<8x8xf32>, vector<8x32xf32>, vector<8x32xf32> -> vector<8x32xf32>
    %58 = vector.extract_strided_slice %29 {offsets = [0, 8], sizes = [8, 8], strides = [1, 1]} : vector<8x32xf32> to vector<8x8xf32>
    %59 = vector.extract_strided_slice %30 {offsets = [0, 8], sizes = [8, 8], strides = [1, 1]} : vector<8x32xf32> to vector<8x8xf32>
    %cst_25 = arith.constant dense<0.000000e+00> : vector<8x8xf32>
    %60 = tpu.matmul %58, %59, %cst_25 {dimension_numbers = #tpu.dot_dimension_numbers<[1], [1], [0], [0], [0, 0, 1, 0], [], []>} : vector<8x8xf32>, vector<8x8xf32>, vector<8x8xf32> -> vector<8x8xf32>
    %cst_26 = arith.constant 0.353553385 : f32
    %61 = vector.broadcast %cst_26 : f32 to vector<8x8xf32>
    %62 = arith.mulf %60, %61 : vector<8x8xf32>
    %63 = arith.addf %62, %38 : vector<8x8xf32>
    %cst_27 = arith.constant dense<0xFF800000> : vector<8xf32>
    %64 = vector.multi_reduction <maximumf>, %63, %cst_27 [1] : vector<8x8xf32> to vector<8xf32>
    %65 = vector.shape_cast %64 : vector<8xf32> to vector<8x1xf32>
    %66 = vector.broadcast %65 : vector<8x1xf32> to vector<8x8xf32>
    %67 = arith.subf %63, %66 : vector<8x8xf32>
    %68 = math.exp %67 : vector<8x8xf32>
    %cst_28 = arith.constant dense<0.000000e+00> : vector<8xf32>
    %69 = vector.multi_reduction <add>, %68, %cst_28 [1] : vector<8x8xf32> to vector<8xf32>
    %70 = vector.shape_cast %69 : vector<8xf32> to vector<8x1xf32>
    %71 = vector.broadcast %70 : vector<8x1xf32> to vector<8x8xf32>
    %72 = arith.divf %68, %71 : vector<8x8xf32>
    %73 = vector.extract_strided_slice %31 {offsets = [0, 8], sizes = [8, 8], strides = [1, 1]} : vector<8x32xf32> to vector<8x8xf32>
    %cst_29 = arith.constant dense<0.000000e+00> : vector<8x8xf32>
    %74 = tpu.matmul %72, %73, %cst_29 {dimension_numbers = #tpu.dot_dimension_numbers<[1], [0], [0], [1], [0, 0, 1, 1], [], []>} : vector<8x8xf32>, vector<8x8xf32>, vector<8x8xf32> -> vector<8x8xf32>
    %75 = vector.extract_strided_slice %32 {offsets = [8, 0], sizes = [8, 32], strides = [1, 1]} : vector<32x32xf32> to vector<8x32xf32>
    %cst_30 = arith.constant dense<0.000000e+00> : vector<8x32xf32>
    %76 = tpu.matmul %74, %75, %cst_30 {dimension_numbers = #tpu.dot_dimension_numbers<[1], [0], [0], [1], [0, 0, 1, 1], [], []>} : vector<8x8xf32>, vector<8x32xf32>, vector<8x32xf32> -> vector<8x32xf32>
    %77 = arith.addf %57, %76 : vector<8x32xf32>
    %78 = vector.extract_strided_slice %29 {offsets = [0, 16], sizes = [8, 8], strides = [1, 1]} : vector<8x32xf32> to vector<8x8xf32>
    %79 = vector.extract_strided_slice %30 {offsets = [0, 16], sizes = [8, 8], strides = [1, 1]} : vector<8x32xf32> to vector<8x8xf32>
    %cst_31 = arith.constant dense<0.000000e+00> : vector<8x8xf32>
    %80 = tpu.matmul %78, %79, %cst_31 {dimension_numbers = #tpu.dot_dimension_numbers<[1], [1], [0], [0], [0, 0, 1, 0], [], []>} : vector<8x8xf32>, vector<8x8xf32>, vector<8x8xf32> -> vector<8x8xf32>
    %cst_32 = arith.constant 0.353553385 : f32
    %81 = vector.broadcast %cst_32 : f32 to vector<8x8xf32>
    %82 = arith.mulf %80, %81 : vector<8x8xf32>
    %83 = arith.addf %82, %38 : vector<8x8xf32>
    %cst_33 = arith.constant dense<0xFF800000> : vector<8xf32>
    %84 = vector.multi_reduction <maximumf>, %83, %cst_33 [1] : vector<8x8xf32> to vector<8xf32>
    %85 = vector.shape_cast %84 : vector<8xf32> to vector<8x1xf32>
    %86 = vector.broadcast %85 : vector<8x1xf32> to vector<8x8xf32>
    %87 = arith.subf %83, %86 : vector<8x8xf32>
    %88 = math.exp %87 : vector<8x8xf32>
    %cst_34 = arith.constant dense<0.000000e+00> : vector<8xf32>
    %89 = vector.multi_reduction <add>, %88, %cst_34 [1] : vector<8x8xf32> to vector<8xf32>
    %90 = vector.shape_cast %89 : vector<8xf32> to vector<8x1xf32>
    %91 = vector.broadcast %90 : vector<8x1xf32> to vector<8x8xf32>
    %92 = arith.divf %88, %91 : vector<8x8xf32>
    %93 = vector.extract_strided_slice %31 {offsets = [0, 16], sizes = [8, 8], strides = [1, 1]} : vector<8x32xf32> to vector<8x8xf32>
    %cst_35 = arith.constant dense<0.000000e+00> : vector<8x8xf32>
    %94 = tpu.matmul %92, %93, %cst_35 {dimension_numbers = #tpu.dot_dimension_numbers<[1], [0], [0], [1], [0, 0, 1, 1], [], []>} : vector<8x8xf32>, vector<8x8xf32>, vector<8x8xf32> -> vector<8x8xf32>
    %95 = vector.extract_strided_slice %32 {offsets = [16, 0], sizes = [8, 32], strides = [1, 1]} : vector<32x32xf32> to vector<8x32xf32>
    %cst_36 = arith.constant dense<0.000000e+00> : vector<8x32xf32>
    %96 = tpu.matmul %94, %95, %cst_36 {dimension_numbers = #tpu.dot_dimension_numbers<[1], [0], [0], [1], [0, 0, 1, 1], [], []>} : vector<8x8xf32>, vector<8x32xf32>, vector<8x32xf32> -> vector<8x32xf32>
    %97 = arith.addf %77, %96 : vector<8x32xf32>
    %98 = vector.extract_strided_slice %29 {offsets = [0, 24], sizes = [8, 8], strides = [1, 1]} : vector<8x32xf32> to vector<8x8xf32>
    %99 = vector.extract_strided_slice %30 {offsets = [0, 24], sizes = [8, 8], strides = [1, 1]} : vector<8x32xf32> to vector<8x8xf32>
    %cst_37 = arith.constant dense<0.000000e+00> : vector<8x8xf32>
    %100 = tpu.matmul %98, %99, %cst_37 {dimension_numbers = #tpu.dot_dimension_numbers<[1], [1], [0], [0], [0, 0, 1, 0], [], []>} : vector<8x8xf32>, vector<8x8xf32>, vector<8x8xf32> -> vector<8x8xf32>
    %cst_38 = arith.constant 0.353553385 : f32
    %101 = vector.broadcast %cst_38 : f32 to vector<8x8xf32>
    %102 = arith.mulf %100, %101 : vector<8x8xf32>
    %103 = arith.addf %102, %38 : vector<8x8xf32>
    %cst_39 = arith.constant dense<0xFF800000> : vector<8xf32>
    %104 = vector.multi_reduction <maximumf>, %103, %cst_39 [1] : vector<8x8xf32> to vector<8xf32>
    %105 = vector.shape_cast %104 : vector<8xf32> to vector<8x1xf32>
    %106 = vector.broadcast %105 : vector<8x1xf32> to vector<8x8xf32>
    %107 = arith.subf %103, %106 : vector<8x8xf32>
    %108 = math.exp %107 : vector<8x8xf32>
    %cst_40 = arith.constant dense<0.000000e+00> : vector<8xf32>
    %109 = vector.multi_reduction <add>, %108, %cst_40 [1] : vector<8x8xf32> to vector<8xf32>
    %110 = vector.shape_cast %109 : vector<8xf32> to vector<8x1xf32>
    %111 = vector.broadcast %110 : vector<8x1xf32> to vector<8x8xf32>
    %112 = arith.divf %108, %111 : vector<8x8xf32>
    %113 = vector.extract_strided_slice %31 {offsets = [0, 24], sizes = [8, 8], strides = [1, 1]} : vector<8x32xf32> to vector<8x8xf32>
    %cst_41 = arith.constant dense<0.000000e+00> : vector<8x8xf32>
    %114 = tpu.matmul %112, %113, %cst_41 {dimension_numbers = #tpu.dot_dimension_numbers<[1], [0], [0], [1], [0, 0, 1, 1], [], []>} : vector<8x8xf32>, vector<8x8xf32>, vector<8x8xf32> -> vector<8x8xf32>
    %115 = vector.extract_strided_slice %32 {offsets = [24, 0], sizes = [8, 32], strides = [1, 1]} : vector<32x32xf32> to vector<8x32xf32>
    %cst_42 = arith.constant dense<0.000000e+00> : vector<8x32xf32>
    %116 = tpu.matmul %114, %115, %cst_42 {dimension_numbers = #tpu.dot_dimension_numbers<[1], [0], [0], [1], [0, 0, 1, 1], [], []>} : vector<8x8xf32>, vector<8x32xf32>, vector<8x32xf32> -> vector<8x32xf32>
    %117 = arith.addf %97, %116 : vector<8x32xf32>
    %118 = arith.addf %1, %117 : vector<8x32xf32>
    %c0_43 = arith.constant 0 : index
    %c0_44 = arith.constant 0 : index
    %119 = vector.load %arg7[%c0_43, %c0_44] : memref<1x32xf32, #tpu.memory_space<vmem>>, vector<1x32xf32>
    %120 = vector.broadcast %119 : vector<1x32xf32> to vector<8x32xf32>
    %121 = arith.addf %118, %120 : vector<8x32xf32>
    %c0_45 = arith.constant 0 : index
    %c0_46 = arith.constant 0 : index
    %c0_47 = arith.constant 0 : index
    %122 = vector.load %arg8[%c0_45, %c0_46, %c0_47] : memref<1x8x32xf32, #tpu.memory_space<vmem>>, vector<1x8x32xf32>
    %123 = vector.shape_cast %122 : vector<1x8x32xf32> to vector<8x32xf32>
    %124 = vector.shape_cast %121 : vector<8x32xf32> to vector<1x8x32xf32>
    tpu.vector_store %arg8[%c0_45, %c0_46, %c0_47], %124 {strides = array<i32>} : memref<1x8x32xf32, #tpu.memory_space<vmem>>, vector<1x8x32xf32>,
    return
  }
  func.func @transform_0(%arg0: i32) -> (i32, i32, i32) {
    %c0_i32 = arith.constant 0 : i32
    %c0_i32_0 = arith.constant 0 : i32
    %c0_i32_1 = arith.constant 0 : i32
    return %arg0, %c0_i32, %c0_i32_0 : i32, i32, i32
  }
  func.func @transform_1(%arg0: i32) -> (i32, i32) {
    %c0_i32 = arith.constant 0 : i32
    %c0_i32_0 = arith.constant 0 : i32
    %c0_i32_1 = arith.constant 0 : i32
    return %c0_i32, %c0_i32_0 : i32, i32
  }
  func.func @transform_2(%arg0: i32) -> (i32, i32) {
    %c0_i32 = arith.constant 0 : i32
    %c0_i32_0 = arith.constant 0 : i32
    %c0_i32_1 = arith.constant 0 : i32
    return %c0_i32, %c0_i32_0 : i32, i32
  }
  func.func @transform_3(%arg0: i32) -> (i32, i32) {
    %c0_i32 = arith.constant 0 : i32
    %c0_i32_0 = arith.constant 0 : i32
    %c0_i32_1 = arith.constant 0 : i32
    return %c0_i32, %c0_i32_0 : i32, i32
  }
  func.func @transform_4(%arg0: i32) -> (i32, i32) {
    %c0_i32 = arith.constant 0 : i32
    %c0_i32_0 = arith.constant 0 : i32
    %c0_i32_1 = arith.constant 0 : i32
    return %c0_i32, %c0_i32_0 : i32, i32
  }
  func.func @transform_5(%arg0: i32) -> (i32, i32) {
    %c0_i32 = arith.constant 0 : i32
    %c0_i32_0 = arith.constant 0 : i32
    %c0_i32_1 = arith.constant 0 : i32
    return %c0_i32, %c0_i32_0 : i32, i32
  }
  func.func @transform_6(%arg0: i32) -> (i32, i32) {
    %c0_i32 = arith.constant 0 : i32
    %c0_i32_0 = arith.constant 0 : i32
    %c0_i32_1 = arith.constant 0 : i32
    return %c0_i32, %c0_i32_0 : i32, i32
  }
  func.func @transform_7(%arg0: i32) -> (i32, i32, i32) {
    %c0_i32 = arith.constant 0 : i32
    %c0_i32_0 = arith.constant 0 : i32
    %c0_i32_1 = arith.constant 0 : i32
    return %arg0, %c0_i32, %c0_i32_0 : i32, i32, i32
  }
}

module attributes {stable_mosaic.version = 11 : i64} {
  func.func @_cross_attn_sublayer_kernel(%arg0: i32, %arg1: memref<1x8x32xf32, #tpu.memory_space<vmem>>, %arg2: memref<1x5x32xf32, #tpu.memory_space<vmem>>, %arg3: memref<1x32xf32, #tpu.memory_space<vmem>>, %arg4: memref<1x32xf32, #tpu.memory_space<vmem>>, %arg5: memref<32x32xf32, #tpu.memory_space<vmem>>, %arg6: memref<1x32xf32, #tpu.memory_space<vmem>>, %arg7: memref<32x64xf32, #tpu.memory_space<vmem>>, %arg8: memref<1x64xf32, #tpu.memory_space<vmem>>, %arg9: memref<32x32xf32, #tpu.memory_space<vmem>>, %arg10: memref<1x32xf32, #tpu.memory_space<vmem>>, %arg11: memref<1x8x32xf32, #tpu.memory_space<vmem>>) attributes {dimension_semantics = [#tpu.dimension_semantics<parallel>], iteration_bounds = array<i64: 2>, scalar_prefetch = 0 : i64, scratch_operands = 0 : i64, tpu.core_type = #tpu.core_type<tc>, window_params = [{transform_indices = @transform_0, window_bounds = array<i64: 1, 8, 32>}, {transform_indices = @transform_1, window_bounds = array<i64: 1, 5, 32>}, {pipeline_mode = #tpu.pipeline_mode<synchronous>, transform_indices = @transform_2, window_bounds = array<i64: 1, 32>}, {pipeline_mode = #tpu.pipeline_mode<synchronous>, transform_indices = @transform_3, window_bounds = array<i64: 1, 32>}, {pipeline_mode = #tpu.pipeline_mode<synchronous>, transform_indices = @transform_4, window_bounds = array<i64: 32, 32>}, {pipeline_mode = #tpu.pipeline_mode<synchronous>, transform_indices = @transform_5, window_bounds = array<i64: 1, 32>}, {pipeline_mode = #tpu.pipeline_mode<synchronous>, transform_indices = @transform_6, window_bounds = array<i64: 32, 64>}, {pipeline_mode = #tpu.pipeline_mode<synchronous>, transform_indices = @transform_7, window_bounds = array<i64: 1, 64>}, {pipeline_mode = #tpu.pipeline_mode<synchronous>, transform_indices = @transform_8, window_bounds = array<i64: 32, 32>}, {pipeline_mode = #tpu.pipeline_mode<synchronous>, transform_indices = @transform_9, window_bounds = array<i64: 1, 32>}, {transform_indices = @transform_10, window_bounds = array<i64: 1, 8, 32>}]} {
    %c0 = arith.constant 0 : index
    %c0_0 = arith.constant 0 : index
    %c0_1 = arith.constant 0 : index
    %0 = vector.load %arg1[%c0, %c0_0, %c0_1] : memref<1x8x32xf32, #tpu.memory_space<vmem>>, vector<1x8x32xf32>
    %1 = vector.shape_cast %0 : vector<1x8x32xf32> to vector<8x32xf32>
    %c0_2 = arith.constant 0 : index
    %c0_3 = arith.constant 0 : index
    %c0_4 = arith.constant 0 : index
    %2 = vector.load %arg2[%c0_2, %c0_3, %c0_4] : memref<1x5x32xf32, #tpu.memory_space<vmem>>, vector<1x5x32xf32>
    %3 = vector.shape_cast %2 : vector<1x5x32xf32> to vector<5x32xf32>
    %c0_5 = arith.constant 0 : index
    %c0_6 = arith.constant 0 : index
    %4 = vector.load %arg3[%c0_5, %c0_6] : memref<1x32xf32, #tpu.memory_space<vmem>>, vector<1x32xf32>
    %c0_7 = arith.constant 0 : index
    %c0_8 = arith.constant 0 : index
    %5 = vector.load %arg4[%c0_7, %c0_8] : memref<1x32xf32, #tpu.memory_space<vmem>>, vector<1x32xf32>
    %cst = arith.constant dense<0.000000e+00> : vector<8xf32>
    %6 = vector.multi_reduction <add>, %1, %cst [1] : vector<8x32xf32> to vector<8xf32>
    %7 = vector.shape_cast %6 : vector<8xf32> to vector<8x1xf32>
    %cst_9 = arith.constant 3.200000e+01 : f32
    %8 = vector.broadcast %cst_9 : f32 to vector<8x1xf32>
    %9 = arith.divf %7, %8 : vector<8x1xf32>
    %10 = vector.broadcast %9 : vector<8x1xf32> to vector<8x32xf32>
    %11 = arith.subf %1, %10 : vector<8x32xf32>
    %12 = arith.mulf %11, %11 : vector<8x32xf32>
    %cst_10 = arith.constant dense<0.000000e+00> : vector<8xf32>
    %13 = vector.multi_reduction <add>, %12, %cst_10 [1] : vector<8x32xf32> to vector<8xf32>
    %14 = vector.shape_cast %13 : vector<8xf32> to vector<8x1xf32>
    %cst_11 = arith.constant 3.100000e+01 : f32
    %15 = vector.broadcast %cst_11 : f32 to vector<8x1xf32>
    %16 = arith.divf %14, %15 : vector<8x1xf32>
    %17 = vector.broadcast %4 : vector<1x32xf32> to vector<8x32xf32>
    %18 = arith.mulf %17, %11 : vector<8x32xf32>
    %19 = math.sqrt %16 : vector<8x1xf32>
    %cst_12 = arith.constant 9.99999997E-7 : f32
    %20 = vector.broadcast %cst_12 : f32 to vector<8x1xf32>
    %21 = arith.addf %19, %20 : vector<8x1xf32>
    %22 = vector.broadcast %21 : vector<8x1xf32> to vector<8x32xf32>
    %23 = arith.divf %18, %22 : vector<8x32xf32>
    %24 = vector.broadcast %5 : vector<1x32xf32> to vector<8x32xf32>
    %25 = arith.addf %23, %24 : vector<8x32xf32>
    %c0_13 = arith.constant 0 : index
    %c0_14 = arith.constant 0 : index
    %26 = vector.load %arg5[%c0_13, %c0_14] : memref<32x32xf32, #tpu.memory_space<vmem>>, vector<32x32xf32>
    %cst_15 = arith.constant dense<0.000000e+00> : vector<8x32xf32>
    %27 = tpu.matmul %25, %26, %cst_15 {dimension_numbers = #tpu.dot_dimension_numbers<[1], [0], [0], [1], [0, 0, 1, 1], [], []>} : vector<8x32xf32>, vector<32x32xf32>, vector<8x32xf32> -> vector<8x32xf32>
    %c0_16 = arith.constant 0 : index
    %c0_17 = arith.constant 0 : index
    %28 = vector.load %arg6[%c0_16, %c0_17] : memref<1x32xf32, #tpu.memory_space<vmem>>, vector<1x32xf32>
    %29 = vector.broadcast %28 : vector<1x32xf32> to vector<8x32xf32>
    %30 = arith.addf %27, %29 : vector<8x32xf32>
    %c0_18 = arith.constant 0 : index
    %c0_19 = arith.constant 0 : index
    %31 = vector.load %arg7[%c0_18, %c0_19] : memref<32x64xf32, #tpu.memory_space<vmem>>, vector<32x64xf32>
    %cst_20 = arith.constant dense<0.000000e+00> : vector<5x64xf32>
    %32 = tpu.matmul %3, %31, %cst_20 {dimension_numbers = #tpu.dot_dimension_numbers<[1], [0], [0], [1], [0, 0, 1, 1], [], []>} : vector<5x32xf32>, vector<32x64xf32>, vector<5x64xf32> -> vector<5x64xf32>
    %c0_21 = arith.constant 0 : index
    %c0_22 = arith.constant 0 : index
    %33 = vector.load %arg8[%c0_21, %c0_22] : memref<1x64xf32, #tpu.memory_space<vmem>>, vector<1x64xf32>
    %34 = vector.broadcast %33 : vector<1x64xf32> to vector<5x64xf32>
    %35 = arith.addf %32, %34 : vector<5x64xf32>
    %36 = vector.extract_strided_slice %35 {offsets = [0, 0], sizes = [5, 32], strides = [1, 1]} : vector<5x64xf32> to vector<5x32xf32>
    %37 = vector.extract_strided_slice %35 {offsets = [0, 32], sizes = [5, 32], strides = [1, 1]} : vector<5x64xf32> to vector<5x32xf32>
    %c0_23 = arith.constant 0 : index
    %c0_24 = arith.constant 0 : index
    %38 = vector.load %arg9[%c0_23, %c0_24] : memref<32x32xf32, #tpu.memory_space<vmem>>, vector<32x32xf32>
    %39 = vector.extract_strided_slice %30 {offsets = [0, 0], sizes = [8, 8], strides = [1, 1]} : vector<8x32xf32> to vector<8x8xf32>
    %40 = vector.extract_strided_slice %36 {offsets = [0, 0], sizes = [5, 8], strides = [1, 1]} : vector<5x32xf32> to vector<5x8xf32>
    %cst_25 = arith.constant dense<0.000000e+00> : vector<8x5xf32>
    %41 = tpu.matmul %39, %40, %cst_25 {dimension_numbers = #tpu.dot_dimension_numbers<[1], [1], [0], [0], [0, 0, 1, 0], [], []>} : vector<8x8xf32>, vector<5x8xf32>, vector<8x5xf32> -> vector<8x5xf32>
    %cst_26 = arith.constant 0.353553385 : f32
    %42 = vector.broadcast %cst_26 : f32 to vector<8x5xf32>
    %43 = arith.mulf %41, %42 : vector<8x5xf32>
    %cst_27 = arith.constant dense<0xFF800000> : vector<8xf32>
    %44 = vector.multi_reduction <maximumf>, %43, %cst_27 [1] : vector<8x5xf32> to vector<8xf32>
    %45 = vector.shape_cast %44 : vector<8xf32> to vector<8x1xf32>
    %46 = vector.broadcast %45 : vector<8x1xf32> to vector<8x5xf32>
    %47 = arith.subf %43, %46 : vector<8x5xf32>
    %48 = math.exp %47 : vector<8x5xf32>
    %cst_28 = arith.constant dense<0.000000e+00> : vector<8xf32>
    %49 = vector.multi_reduction <add>, %48, %cst_28 [1] : vector<8x5xf32> to vector<8xf32>
    %50 = vector.shape_cast %49 : vector<8xf32> to vector<8x1xf32>
    %51 = vector.broadcast %50 : vector<8x1xf32> to vector<8x5xf32>
    %52 = arith.divf %48, %51 : vector<8x5xf32>
    %53 = vector.extract_strided_slice %37 {offsets = [0, 0], sizes = [5, 8], strides = [1, 1]} : vector<5x32xf32> to vector<5x8xf32>
    %cst_29 = arith.constant dense<0.000000e+00> : vector<8x8xf32>
    %54 = tpu.matmul %52, %53, %cst_29 {dimension_numbers = #tpu.dot_dimension_numbers<[1], [0], [0], [1], [0, 0, 1, 1], [], []>} : vector<8x5xf32>, vector<5x8xf32>, vector<8x8xf32> -> vector<8x8xf32>
    %55 = vector.extract_strided_slice %38 {offsets = [0, 0], sizes = [8, 32], strides = [1, 1]} : vector<32x32xf32> to vector<8x32xf32>
    %cst_30 = arith.constant dense<0.000000e+00> : vector<8x32xf32>
    %56 = tpu.matmul %54, %55, %cst_30 {dimension_numbers = #tpu.dot_dimension_numbers<[1], [0], [0], [1], [0, 0, 1, 1], [], []>} : vector<8x8xf32>, vector<8x32xf32>, vector<8x32xf32> -> vector<8x32xf32>
    %57 = vector.extract_strided_slice %30 {offsets = [0, 8], sizes = [8, 8], strides = [1, 1]} : vector<8x32xf32> to vector<8x8xf32>
    %58 = vector.extract_strided_slice %36 {offsets = [0, 8], sizes = [5, 8], strides = [1, 1]} : vector<5x32xf32> to vector<5x8xf32>
    %cst_31 = arith.constant dense<0.000000e+00> : vector<8x5xf32>
    %59 = tpu.matmul %57, %58, %cst_31 {dimension_numbers = #tpu.dot_dimension_numbers<[1], [1], [0], [0], [0, 0, 1, 0], [], []>} : vector<8x8xf32>, vector<5x8xf32>, vector<8x5xf32> -> vector<8x5xf32>
    %cst_32 = arith.constant 0.353553385 : f32
    %60 = vector.broadcast %cst_32 : f32 to vector<8x5xf32>
    %61 = arith.mulf %59, %60 : vector<8x5xf32>
    %cst_33 = arith.constant dense<0xFF800000> : vector<8xf32>
    %62 = vector.multi_reduction <maximumf>, %61, %cst_33 [1] : vector<8x5xf32> to vector<8xf32>
    %63 = vector.shape_cast %62 : vector<8xf32> to vector<8x1xf32>
    %64 = vector.broadcast %63 : vector<8x1xf32> to vector<8x5xf32>
    %65 = arith.subf %61, %64 : vector<8x5xf32>
    %66 = math.exp %65 : vector<8x5xf32>
    %cst_34 = arith.constant dense<0.000000e+00> : vector<8xf32>
    %67 = vector.multi_reduction <add>, %66, %cst_34 [1] : vector<8x5xf32> to vector<8xf32>
    %68 = vector.shape_cast %67 : vector<8xf32> to vector<8x1xf32>
    %69 = vector.broadcast %68 : vector<8x1xf32> to vector<8x5xf32>
    %70 = arith.divf %66, %69 : vector<8x5xf32>
    %71 = vector.extract_strided_slice %37 {offsets = [0, 8], sizes = [5, 8], strides = [1, 1]} : vector<5x32xf32> to vector<5x8xf32>
    %cst_35 = arith.constant dense<0.000000e+00> : vector<8x8xf32>
    %72 = tpu.matmul %70, %71, %cst_35 {dimension_numbers = #tpu.dot_dimension_numbers<[1], [0], [0], [1], [0, 0, 1, 1], [], []>} : vector<8x5xf32>, vector<5x8xf32>, vector<8x8xf32> -> vector<8x8xf32>
    %73 = vector.extract_strided_slice %38 {offsets = [8, 0], sizes = [8, 32], strides = [1, 1]} : vector<32x32xf32> to vector<8x32xf32>
    %cst_36 = arith.constant dense<0.000000e+00> : vector<8x32xf32>
    %74 = tpu.matmul %72, %73, %cst_36 {dimension_numbers = #tpu.dot_dimension_numbers<[1], [0], [0], [1], [0, 0, 1, 1], [], []>} : vector<8x8xf32>, vector<8x32xf32>, vector<8x32xf32> -> vector<8x32xf32>
    %75 = arith.addf %56, %74 : vector<8x32xf32>
    %76 = vector.extract_strided_slice %30 {offsets = [0, 16], sizes = [8, 8], strides = [1, 1]} : vector<8x32xf32> to vector<8x8xf32>
    %77 = vector.extract_strided_slice %36 {offsets = [0, 16], sizes = [5, 8], strides = [1, 1]} : vector<5x32xf32> to vector<5x8xf32>
    %cst_37 = arith.constant dense<0.000000e+00> : vector<8x5xf32>
    %78 = tpu.matmul %76, %77, %cst_37 {dimension_numbers = #tpu.dot_dimension_numbers<[1], [1], [0], [0], [0, 0, 1, 0], [], []>} : vector<8x8xf32>, vector<5x8xf32>, vector<8x5xf32> -> vector<8x5xf32>
    %cst_38 = arith.constant 0.353553385 : f32
    %79 = vector.broadcast %cst_38 : f32 to vector<8x5xf32>
    %80 = arith.mulf %78, %79 : vector<8x5xf32>
    %cst_39 = arith.constant dense<0xFF800000> : vector<8xf32>
    %81 = vector.multi_reduction <maximumf>, %80, %cst_39 [1] : vector<8x5xf32> to vector<8xf32>
    %82 = vector.shape_cast %81 : vector<8xf32> to vector<8x1xf32>
    %83 = vector.broadcast %82 : vector<8x1xf32> to vector<8x5xf32>
    %84 = arith.subf %80, %83 : vector<8x5xf32>
    %85 = math.exp %84 : vector<8x5xf32>
    %cst_40 = arith.constant dense<0.000000e+00> : vector<8xf32>
    %86 = vector.multi_reduction <add>, %85, %cst_40 [1] : vector<8x5xf32> to vector<8xf32>
    %87 = vector.shape_cast %86 : vector<8xf32> to vector<8x1xf32>
    %88 = vector.broadcast %87 : vector<8x1xf32> to vector<8x5xf32>
    %89 = arith.divf %85, %88 : vector<8x5xf32>
    %90 = vector.extract_strided_slice %37 {offsets = [0, 16], sizes = [5, 8], strides = [1, 1]} : vector<5x32xf32> to vector<5x8xf32>
    %cst_41 = arith.constant dense<0.000000e+00> : vector<8x8xf32>
    %91 = tpu.matmul %89, %90, %cst_41 {dimension_numbers = #tpu.dot_dimension_numbers<[1], [0], [0], [1], [0, 0, 1, 1], [], []>} : vector<8x5xf32>, vector<5x8xf32>, vector<8x8xf32> -> vector<8x8xf32>
    %92 = vector.extract_strided_slice %38 {offsets = [16, 0], sizes = [8, 32], strides = [1, 1]} : vector<32x32xf32> to vector<8x32xf32>
    %cst_42 = arith.constant dense<0.000000e+00> : vector<8x32xf32>
    %93 = tpu.matmul %91, %92, %cst_42 {dimension_numbers = #tpu.dot_dimension_numbers<[1], [0], [0], [1], [0, 0, 1, 1], [], []>} : vector<8x8xf32>, vector<8x32xf32>, vector<8x32xf32> -> vector<8x32xf32>
    %94 = arith.addf %75, %93 : vector<8x32xf32>
    %95 = vector.extract_strided_slice %30 {offsets = [0, 24], sizes = [8, 8], strides = [1, 1]} : vector<8x32xf32> to vector<8x8xf32>
    %96 = vector.extract_strided_slice %36 {offsets = [0, 24], sizes = [5, 8], strides = [1, 1]} : vector<5x32xf32> to vector<5x8xf32>
    %cst_43 = arith.constant dense<0.000000e+00> : vector<8x5xf32>
    %97 = tpu.matmul %95, %96, %cst_43 {dimension_numbers = #tpu.dot_dimension_numbers<[1], [1], [0], [0], [0, 0, 1, 0], [], []>} : vector<8x8xf32>, vector<5x8xf32>, vector<8x5xf32> -> vector<8x5xf32>
    %cst_44 = arith.constant 0.353553385 : f32
    %98 = vector.broadcast %cst_44 : f32 to vector<8x5xf32>
    %99 = arith.mulf %97, %98 : vector<8x5xf32>
    %cst_45 = arith.constant dense<0xFF800000> : vector<8xf32>
    %100 = vector.multi_reduction <maximumf>, %99, %cst_45 [1] : vector<8x5xf32> to vector<8xf32>
    %101 = vector.shape_cast %100 : vector<8xf32> to vector<8x1xf32>
    %102 = vector.broadcast %101 : vector<8x1xf32> to vector<8x5xf32>
    %103 = arith.subf %99, %102 : vector<8x5xf32>
    %104 = math.exp %103 : vector<8x5xf32>
    %cst_46 = arith.constant dense<0.000000e+00> : vector<8xf32>
    %105 = vector.multi_reduction <add>, %104, %cst_46 [1] : vector<8x5xf32> to vector<8xf32>
    %106 = vector.shape_cast %105 : vector<8xf32> to vector<8x1xf32>
    %107 = vector.broadcast %106 : vector<8x1xf32> to vector<8x5xf32>
    %108 = arith.divf %104, %107 : vector<8x5xf32>
    %109 = vector.extract_strided_slice %37 {offsets = [0, 24], sizes = [5, 8], strides = [1, 1]} : vector<5x32xf32> to vector<5x8xf32>
    %cst_47 = arith.constant dense<0.000000e+00> : vector<8x8xf32>
    %110 = tpu.matmul %108, %109, %cst_47 {dimension_numbers = #tpu.dot_dimension_numbers<[1], [0], [0], [1], [0, 0, 1, 1], [], []>} : vector<8x5xf32>, vector<5x8xf32>, vector<8x8xf32> -> vector<8x8xf32>
    %111 = vector.extract_strided_slice %38 {offsets = [24, 0], sizes = [8, 32], strides = [1, 1]} : vector<32x32xf32> to vector<8x32xf32>
    %cst_48 = arith.constant dense<0.000000e+00> : vector<8x32xf32>
    %112 = tpu.matmul %110, %111, %cst_48 {dimension_numbers = #tpu.dot_dimension_numbers<[1], [0], [0], [1], [0, 0, 1, 1], [], []>} : vector<8x8xf32>, vector<8x32xf32>, vector<8x32xf32> -> vector<8x32xf32>
    %113 = arith.addf %94, %112 : vector<8x32xf32>
    %114 = arith.addf %1, %113 : vector<8x32xf32>
    %c0_49 = arith.constant 0 : index
    %c0_50 = arith.constant 0 : index
    %115 = vector.load %arg10[%c0_49, %c0_50] : memref<1x32xf32, #tpu.memory_space<vmem>>, vector<1x32xf32>
    %116 = vector.broadcast %115 : vector<1x32xf32> to vector<8x32xf32>
    %117 = arith.addf %114, %116 : vector<8x32xf32>
    %c0_51 = arith.constant 0 : index
    %c0_52 = arith.constant 0 : index
    %c0_53 = arith.constant 0 : index
    %118 = vector.load %arg11[%c0_51, %c0_52, %c0_53] : memref<1x8x32xf32, #tpu.memory_space<vmem>>, vector<1x8x32xf32>
    %119 = vector.shape_cast %118 : vector<1x8x32xf32> to vector<8x32xf32>
    %120 = vector.shape_cast %117 : vector<8x32xf32> to vector<1x8x32xf32>
    tpu.vector_store %arg11[%c0_51, %c0_52, %c0_53], %120 {strides = array<i32>} : memref<1x8x32xf32, #tpu.memory_space<vmem>>, vector<1x8x32xf32>,
    return
  }
  func.func @transform_0(%arg0: i32) -> (i32, i32, i32) {
    %c0_i32 = arith.constant 0 : i32
    %c0_i32_0 = arith.constant 0 : i32
    %c0_i32_1 = arith.constant 0 : i32
    return %arg0, %c0_i32, %c0_i32_0 : i32, i32, i32
  }
  func.func @transform_1(%arg0: i32) -> (i32, i32, i32) {
    %c0_i32 = arith.constant 0 : i32
    %c0_i32_0 = arith.constant 0 : i32
    %c0_i32_1 = arith.constant 0 : i32
    return %arg0, %c0_i32, %c0_i32_0 : i32, i32, i32
  }
  func.func @transform_2(%arg0: i32) -> (i32, i32) {
    %c0_i32 = arith.constant 0 : i32
    %c0_i32_0 = arith.constant 0 : i32
    %c0_i32_1 = arith.constant 0 : i32
    return %c0_i32, %c0_i32_0 : i32, i32
  }
  func.func @transform_3(%arg0: i32) -> (i32, i32) {
    %c0_i32 = arith.constant 0 : i32
    %c0_i32_0 = arith.constant 0 : i32
    %c0_i32_1 = arith.constant 0 : i32
    return %c0_i32, %c0_i32_0 : i32, i32
  }
  func.func @transform_4(%arg0: i32) -> (i32, i32) {
    %c0_i32 = arith.constant 0 : i32
    %c0_i32_0 = arith.constant 0 : i32
    %c0_i32_1 = arith.constant 0 : i32
    return %c0_i32, %c0_i32_0 : i32, i32
  }
  func.func @transform_5(%arg0: i32) -> (i32, i32) {
    %c0_i32 = arith.constant 0 : i32
    %c0_i32_0 = arith.constant 0 : i32
    %c0_i32_1 = arith.constant 0 : i32
    return %c0_i32, %c0_i32_0 : i32, i32
  }
  func.func @transform_6(%arg0: i32) -> (i32, i32) {
    %c0_i32 = arith.constant 0 : i32
    %c0_i32_0 = arith.constant 0 : i32
    %c0_i32_1 = arith.constant 0 : i32
    return %c0_i32, %c0_i32_0 : i32, i32
  }
  func.func @transform_7(%arg0: i32) -> (i32, i32) {
    %c0_i32 = arith.constant 0 : i32
    %c0_i32_0 = arith.constant 0 : i32
    %c0_i32_1 = arith.constant 0 : i32
    return %c0_i32, %c0_i32_0 : i32, i32
  }
  func.func @transform_8(%arg0: i32) -> (i32, i32) {
    %c0_i32 = arith.constant 0 : i32
    %c0_i32_0 = arith.constant 0 : i32
    %c0_i32_1 = arith.constant 0 : i32
    return %c0_i32, %c0_i32_0 : i32, i32
  }
  func.func @transform_9(%arg0: i32) -> (i32, i32) {
    %c0_i32 = arith.constant 0 : i32
    %c0_i32_0 = arith.constant 0 : i32
    %c0_i32_1 = arith.constant 0 : i32
    return %c0_i32, %c0_i32_0 : i32, i32
  }
  func.func @transform_10(%arg0: i32) -> (i32, i32, i32) {
    %c0_i32 = arith.constant 0 : i32
    %c0_i32_0 = arith.constant 0 : i32
    %c0_i32_1 = arith.constant 0 : i32
    return %arg0, %c0_i32, %c0_i32_0 : i32, i32, i32
  }
}

module attributes {stable_mosaic.version = 11 : i64} {
  func.func @_logit_logsoftmax_kernel(%arg0: i32, %arg1: memref<1x8x32xf32, #tpu.memory_space<vmem>>, %arg2: memref<32x31xf32, #tpu.memory_space<vmem>>, %arg3: memref<1x31xf32, #tpu.memory_space<vmem>>, %arg4: memref<1x8x31xf32, #tpu.memory_space<vmem>>) attributes {dimension_semantics = [#tpu.dimension_semantics<parallel>], iteration_bounds = array<i64: 2>, scalar_prefetch = 0 : i64, scratch_operands = 0 : i64, tpu.core_type = #tpu.core_type<tc>, window_params = [{transform_indices = @transform_0, window_bounds = array<i64: 1, 8, 32>}, {pipeline_mode = #tpu.pipeline_mode<synchronous>, transform_indices = @transform_1, window_bounds = array<i64: 32, 31>}, {pipeline_mode = #tpu.pipeline_mode<synchronous>, transform_indices = @transform_2, window_bounds = array<i64: 1, 31>}, {transform_indices = @transform_3, window_bounds = array<i64: 1, 8, 31>}]} {
    %c0 = arith.constant 0 : index
    %c0_0 = arith.constant 0 : index
    %c0_1 = arith.constant 0 : index
    %0 = vector.load %arg1[%c0, %c0_0, %c0_1] : memref<1x8x32xf32, #tpu.memory_space<vmem>>, vector<1x8x32xf32>
    %1 = vector.shape_cast %0 : vector<1x8x32xf32> to vector<8x32xf32>
    %c0_2 = arith.constant 0 : index
    %c0_3 = arith.constant 0 : index
    %2 = vector.load %arg2[%c0_2, %c0_3] : memref<32x31xf32, #tpu.memory_space<vmem>>, vector<32x31xf32>
    %cst = arith.constant dense<0.000000e+00> : vector<8x31xf32>
    %3 = tpu.matmul %1, %2, %cst {dimension_numbers = #tpu.dot_dimension_numbers<[1], [0], [0], [1], [0, 0, 1, 1], [], []>} : vector<8x32xf32>, vector<32x31xf32>, vector<8x31xf32> -> vector<8x31xf32>
    %c0_4 = arith.constant 0 : index
    %c0_5 = arith.constant 0 : index
    %4 = vector.load %arg3[%c0_4, %c0_5] : memref<1x31xf32, #tpu.memory_space<vmem>>, vector<1x31xf32>
    %5 = vector.broadcast %4 : vector<1x31xf32> to vector<8x31xf32>
    %6 = arith.addf %3, %5 : vector<8x31xf32>
    %cst_6 = arith.constant dense<0xFF800000> : vector<8xf32>
    %7 = vector.multi_reduction <maximumf>, %6, %cst_6 [1] : vector<8x31xf32> to vector<8xf32>
    %8 = vector.shape_cast %7 : vector<8xf32> to vector<8x1xf32>
    %9 = vector.broadcast %8 : vector<8x1xf32> to vector<8x31xf32>
    %10 = arith.subf %6, %9 : vector<8x31xf32>
    %11 = math.exp %10 : vector<8x31xf32>
    %cst_7 = arith.constant dense<0.000000e+00> : vector<8xf32>
    %12 = vector.multi_reduction <add>, %11, %cst_7 [1] : vector<8x31xf32> to vector<8xf32>
    %13 = vector.shape_cast %12 : vector<8xf32> to vector<8x1xf32>
    %14 = math.log %13 : vector<8x1xf32>
    %15 = vector.broadcast %14 : vector<8x1xf32> to vector<8x31xf32>
    %16 = arith.subf %10, %15 : vector<8x31xf32>
    %c0_8 = arith.constant 0 : index
    %c0_9 = arith.constant 0 : index
    %c0_10 = arith.constant 0 : index
    %17 = vector.load %arg4[%c0_8, %c0_9, %c0_10] : memref<1x8x31xf32, #tpu.memory_space<vmem>>, vector<1x8x31xf32>
    %18 = vector.shape_cast %17 : vector<1x8x31xf32> to vector<8x31xf32>
    %19 = vector.shape_cast %16 : vector<8x31xf32> to vector<1x8x31xf32>
    tpu.vector_store %arg4[%c0_8, %c0_9, %c0_10], %19 {strides = array<i32>} : memref<1x8x31xf32, #tpu.memory_space<vmem>>, vector<1x8x31xf32>,
    return
  }
  func.func @transform_0(%arg0: i32) -> (i32, i32, i32) {
    %c0_i32 = arith.constant 0 : i32
    %c0_i32_0 = arith.constant 0 : i32
    %c0_i32_1 = arith.constant 0 : i32
    return %arg0, %c0_i32, %c0_i32_0 : i32, i32, i32
  }
  func.func @transform_1(%arg0: i32) -> (i32, i32) {
    %c0_i32 = arith.constant 0 : i32
    %c0_i32_0 = arith.constant 0 : i32
    %c0_i32_1 = arith.constant 0 : i32
    return %c0_i32, %c0_i32_0 : i32, i32
  }
  func.func @transform_2(%arg0: i32) -> (i32, i32) {
    %c0_i32 = arith.constant 0 : i32
    %c0_i32_0 = arith.constant 0 : i32
    %c0_i32_1 = arith.constant 0 : i32
    return %c0_i32, %c0_i32_0 : i32, i32
  }
  func.func @transform_3(%arg0: i32) -> (i32, i32, i32) {
    %c0_i32 = arith.constant 0 : i32
    %c0_i32_0 = arith.constant 0 : i32
    %c0_i32_1 = arith.constant 0 : i32
    return %arg0, %c0_i32, %c0_i32_0 : i32, i32, i32
  }
}

</mosaic_0001>

<bundles_post_ra>
// kernel: lamrg_v8_forward.27
= control target key start
LH: loop header
LB: loop body
LE: loop exit
PB: predicated region body
PF: predicated region fallthrough
CT: control target
= control target key end

     0   :  { %s311_s12 = smov 0   ;;  %s344_s0 = inlined_call_operand.vmem [shape: f32[2,8,32], index: 0, kind: input, shape index: {}]   ;;  %s345_s1 = inlined_call_operand.vmem [shape: f32[1,32], index: 1, kind: input, shape index: {}]   ;;  %s346_s2 = inlined_call_operand.vmem [shape: f32[1,32], index: 2, kind: input, shape index: {}]   ;;  %s347_s3 = inlined_call_operand.vmem [shape: f32[2,8,32], index: 3, kind: output, shape index: {}]  }
   0x1 LB: > { %s260_s13 = sadd.s32 4294967295, %s289_s12   ;;  %p264_p0 = scmp.ge.s32.totalorder %s289_s12, 1  ;;  %s289_s12 = sphi %s311_s12, %s13_s12  }
   0x2   : > { %p136_p1 = scmp.lt.s32.totalorder %s289_s12, 3 }
   0x4   : > { %p137_p2 = pnand %p264_p0, %p136_p1 }
   0x5   : > { %p158_p3 = scmp.lt.s32.totalorder (!%p137_p2), %s260_s13, 1  ;;  %vm169_vm0 = vcmask (!%p137_p2), 261120   ;;  %v267_v15 = vld [vmem:[%s345_s1] ss:$0 sm:$0xff] (!%p137_p2) }
   0x6   : > { %140 = sbr.rel (%p137_p2) target bundleno = 344 (0x158), region = 32  ;;  %v268_v18 = vld [vmem:[%s346_s2] ss:$0 sm:$0xff] (!%p137_p2) }
   0xd   : > { %s349_s13 = smov (!%p158_p3, %s260_s13), 1 }
   0xe   : > { %s265_s14 = sshll.u32 %s349_s13, 3 }
   0xf   : > { %s161_s17 = scalar_lea.vmem %s344_s0, %s265_s14  ;;  %s165_s24 = scalar_lea.vmem %s347_s3, %s265_s14 }
  0x10   : > { %v166_v0 = vld [vmem:[%s161_s17] sm:$0xff] }
  0x11   : > { %v170_v1 = vsel %vm169_vm0, %v166_v0, 0.0 }
  0x12   : > { %171 = vadd.xlane.f32.xlu0 %v170_v1 }
  0x9f   : > { %v172_v2 = vpop.xlane.xlu0 %171 }
  0xa0   : > { %v174_v3 = vmul.f32 0.03125, %v172_v2 }
  0xa2   : > { %v175_v4 = vsub.f32 %v166_v0, %v174_v3 }
  0xa4   : > { %v176_v5 = vmul.f32 %v175_v4, %v175_v4  ;;  %v188_v16 = vmul.f32 %v267_v15, %v175_v4 }
  0xa6   : > { %v177_v6 = vsel %vm169_vm0, %v176_v5, 0.0 }
  0xa7   : > { %178 = vadd.xlane.f32.xlu0 %v177_v6 }
 0x134   : > { %v179_v7 = vpop.xlane.xlu0 %178 }
 0x135   : > { %v181_v8 = vmul.f32 0.032258064, %v179_v7 }
 0x137   : > { %279 = vrsqrt.f32 %v181_v8  ;;  %vm191_vm1 = vcmp.eq.f32.partialorder %v181_v8, inf  ;;  %v194_v11 = vand.u32 2147483648, %v181_v8  ;;  %vm193_vm2 = vcmp.eq.f32.partialorder %v181_v8, 0.0 }
 0x141   : > { %v280_v9 = vpop.eup %279 }
 0x142   : > { %v190_v10 = vmul.f32 %v280_v9, %v181_v8 }
 0x144   : > { %v192_v12 = vsel %vm191_vm1, %v181_v8, %v190_v10 }
 0x145   : > { %v195_v13 = vsel %vm193_vm2, %v194_v11, %v192_v12 }
 0x146   : > { %v196_v14 = vadd.f32 1e-06, %v195_v13 }
 0x148   : > { %281 = vrcp.f32 %v196_v14 }
 0x152   : > { %v282_v17 = vpop.eup %281 }
 0x153   : > { %v198_v19 = vmul.f32 %v282_v17, %v188_v16 }
 0x155   : > { %v205_v20 = vadd.f32 %v268_v18, %v198_v19 }
 0x157   : > { %206 = vst.msk [vmem:[%s165_s24] sm:$0xff] %vm169_vm0, %v205_v20 }
 0x158 PF: > { %s13_s12 = sadd.s32 1, %s289_s12  }
 0x159   : > { %p10_p4 = scmp.ge.s32.totalorder %s13_s12, 4  }
 0x15b   :  { %12 = sbr.rel (!%p10_p4) target bundleno = 1 (0x1), region = 62 }

// kernel: lamrg_v8_forward.24
= control target key start
LH: loop header
LB: loop body
LE: loop exit
PB: predicated region body
PF: predicated region fallthrough
CT: control target
= control target key end

     0   :  { %s687_s24 = smov 0   ;;  %s768_s0 = inlined_call_operand.vmem [shape: f32[2,8,32], index: 0, kind: input, shape index: {}]   ;;  %s769_s1 = inlined_call_operand.vmem [shape: f32[1,32], index: 1, kind: input, shape index: {}]   ;;  %s770_s2 = inlined_call_operand.vmem [shape: f32[1,32], index: 2, kind: input, shape index: {}]   ;;  %s771_s3 = inlined_call_operand.vmem [shape: f32[32,64], index: 3, kind: input, shape index: {}]   ;;  %s772_s4 = inlined_call_operand.vmem [shape: f32[1,64], index: 4, kind: input, shape index: {}]   ;;  %s773_s5 = inlined_call_operand.vmem [shape: f32[64,32], index: 5, kind: input, shape index: {}]   ;;  %s774_s6 = inlined_call_operand.vmem [shape: f32[1,32], index: 6, kind: input, shape index: {}]   ;;  %s775_s7 = inlined_call_operand.vmem [shape: f32[2,8,32], index: 7, kind: output, shape index: {}]  }
   0x1 LB: > { %s544_s25 = sadd.s32 4294967295, %s642_s24   ;;  %p548_p0 = scmp.ge.s32.totalorder %s642_s24, 1  ;;  %s642_s24 = sphi %s687_s24, %s17_s24  }
   0x2   : > { %p236_p1 = scmp.lt.s32.totalorder %s642_s24, 3 }
   0x4   : > { %p237_p2 = pnand %p548_p0, %p236_p1 }
   0x5   : > { %p266_p3 = scmp.lt.s32.totalorder (!%p237_p2), %s544_s25, 1  ;;  %vm277_vm0 = vcmask (!%p237_p2), 261120   ;;  %v314_v7 = vld [vmem:[%s771_s3] sm:$0xff] (!%p237_p2)  ;;  %v315_v8 = vld [vmem:[%s771_s3 + $0x8] sm:$0xff] (!%p237_p2)  ;;  %v316_v9 = vld [vmem:[%s771_s3 + $0x10] sm:$0xff] (!%p237_p2)  ;;  %v644_v10 = vmov (!%p237_p2), 0.0|0.0  }
   0x6   : > { %240 = sbr.rel (%p237_p2) target bundleno = 776 (0x308), region = 48  ;;  %603 = vmatprep.subr.bf16.mxu0 (!%p237_p2), %v644_v10  ;;  %v604_v11 = vpack.c.bf16 (!%p237_p2), %v315_v8, %v314_v7  ;;  %v317_v12 = vld [vmem:[%s771_s3 + $0x18] sm:$0xff] (!%p237_p2)  ;;  %vm645_vm1 = vmmov (!%p237_p2), 0   ;;  %v646_v13 = vmov (!%p237_p2), 0.0   ;;  %609 = vmatprep.subr.bf16.mxu1 (!%p237_p2), %v644_v10  ;;  %v399_v15 = vld [vmem:[%s773_s5] sm:$0xff] (!%p237_p2)  ;;  %v400_v16 = vld [vmem:[%s773_s5 + $0x8] sm:$0xff] (!%p237_p2) }
   0x7   : > { %581 = vmatprep.mubr.msk.f32.mxu0 (!%p237_p2), %vm645_vm1, %v646_v13  ;;  %600 = vmatprep.mubr.msk.f32.mxu1 (!%p237_p2), %vm645_vm1, %v646_v13  ;;  %v607_v14 = vpack.c.bf16 (!%p237_p2), %v317_v12, %v316_v9  ;;  %v401_v17 = vld [vmem:[%s773_s5 + $0x10] sm:$0xff] (!%p237_p2)  ;;  %v610_v18 = vpack.c.bf16 (!%p237_p2), %v400_v16, %v399_v15  ;;  %v402_v19 = vld [vmem:[%s773_s5 + $0x18] sm:$0xff] (!%p237_p2)  ;;  %v403_v21 = vld [vmem:[%s773_s5 + $0x20] sm:$0xff] (!%p237_p2)  ;;  %vm407_vm4 = vcmask (!%p237_p2), 523264  }
   0x8   : > { %605 = vmatpush3.bf16.msra.mxu0 (!%p237_p2), %v604_v11  ;;  %v613_v20 = vpack.c.bf16 (!%p237_p2), %v402_v19, %v401_v17  ;;  %v404_v22 = vld [vmem:[%s773_s5 + $0x28] sm:$0xff] (!%p237_p2)  ;;  %v551_v32 = vld [vmem:[%s769_s1] ss:$0 sm:$0xff] (!%p237_p2)  ;;  %v405_v38 = vld [vmem:[%s773_s5 + $0x30] sm:$0xff] (!%p237_p2) }
   0x9   : > { %606 = vmatprep.subr.bf16.mxu0 (!%p237_p2), %v644_v10  ;;  %611 = vmatpush3.bf16.msra.mxu1 (!%p237_p2), %v610_v18  ;;  %v616_v23 = vpack.c.bf16 (!%p237_p2), %v404_v22, %v403_v21  ;;  %v552_v35 = vld [vmem:[%s770_s2] ss:$0 sm:$0xff] (!%p237_p2)  ;;  %v406_v39 = vld [vmem:[%s773_s5 + $0x38] sm:$0xff] (!%p237_p2) }
   0xa   : > { %612 = vmatprep.subr.bf16.mxu1 (!%p237_p2), %v644_v10  ;;  %v619_v40 = vpack.c.bf16 (!%p237_p2), %v406_v39, %v405_v38  ;;  %v553_v41 = vld [vmem:[%s772_s4] ss:$0 sm:$0xff] (!%p237_p2) }
   0xb   : > { %v556_v47 = vld [vmem:[%s774_s6] ss:$0 sm:$0xff] (!%p237_p2) }
   0xc   : > { %608 = vmatpush3.bf16.msra.mxu0 (!%p237_p2), %v607_v14 }
   0xd   : > { %s777_s25 = smov (!%p266_p3, %s544_s25), 1  ;;  %614 = vmatpush3.bf16.msra.mxu1 %v613_v20 }
   0xe   : > { %s549_s26 = sshll.u32 %s777_s25, 3  ;;  %615 = vmatprep.subr.bf16.mxu1 %v644_v10 }
   0xf   : > { %s269_s29 = scalar_lea.vmem %s768_s0, %s549_s26  ;;  %s273_s21 = scalar_lea.vmem %s775_s7, %s549_s26 }
  0x10   : > { %v703_v0 = vld [vmem:[%s269_s29] sm:$0xff] }
  0x11   : > { %v278_v1 = vsel %vm277_vm0, %v703_v0, 0.0  ;;  %617 = vmatpush3.bf16.msra.mxu1 %v616_v23 }
  0x12   : > { %279 = vadd.xlane.f32.xlu0 %v278_v1  ;;  %618 = vmatprep.subr.bf16.mxu1 %v644_v10 }
  0x15   : > { %620 = vmatpush3.bf16.msra.mxu1 %v619_v40 }
  0x9f   : > { %v280_v2 = vpop.xlane.xlu0 %279 }
  0xa0   : > { %v282_v3 = vmul.f32 0.03125, %v280_v2 }
  0xa2   : > { %v283_v4 = vsub.f32 %v703_v0, %v282_v3 }
  0xa4   : > { %v284_v5 = vmul.f32 %v283_v4, %v283_v4  ;;  %v296_v33 = vmul.f32 %v551_v32, %v283_v4 }
  0xa6   : > { %v285_v6 = vsel %vm277_vm0, %v284_v5, 0.0 }
  0xa7   : > { %286 = vadd.xlane.f32.xlu0 %v285_v6 }
 0x134   : > { %v287_v24 = vpop.xlane.xlu0 %286 }
 0x135   : > { %v289_v25 = vmul.f32 0.032258064, %v287_v24 }
 0x137   : > { %632 = vrsqrt.f32 %v289_v25  ;;  %vm299_vm2 = vcmp.eq.f32.partialorder %v289_v25, inf  ;;  %v302_v28 = vand.u32 2147483648, %v289_v25  ;;  %vm301_vm3 = vcmp.eq.f32.partialorder %v289_v25, 0.0 }
 0x141   : > { %v633_v26 = vpop.eup %632 }
 0x142   : > { %v298_v27 = vmul.f32 %v633_v26, %v289_v25 }
 0x144   : > { %v300_v29 = vsel %vm299_vm2, %v289_v25, %v298_v27 }
 0x145   : > { %v303_v30 = vsel %vm301_vm3, %v302_v28, %v300_v29 }
 0x146   : > { %v304_v31 = vadd.f32 1e-06, %v303_v30 }
 0x148   : > { %634 = vrcp.f32 %v304_v31 }
 0x152   : > { %v635_v34 = vpop.eup %634 }
 0x153   : > { %v306_v36 = vmul.f32 %v635_v34, %v296_v33 }
 0x155   : > { %v313_v37 = vadd.f32 %v552_v35, %v306_v36 }
 0x157   : > { %582 = vmatmul.mubr.msk.f32.vlgmr.msra.gmra.mrb[0].mxu0 %vm277_vm0, %v313_v37 }
 0x22a   : > { %v394_v42 = vpop.f32.mrb[0].mxu0 }
 0x22b   : > { %v395_v43 = vadd.f32 %v553_v41, %v394_v42  ;;  %v583_v44 = vpop.f32.mrb[1].mxu0 }
 0x22d   : > { %v398_v45 = vmax.f32 %v395_v43, 0.0 }
 0x22f   : > { %601 = vmatmul.mubr.msk.f32.vlgmr.msra.gmra.mrb[0].mxu1 %vm407_vm4, %v398_v45 }
 0x302   : > { %v477_v46 = vpop.f32.mrb[0].mxu1 }
 0x303   : > { %v481_v48 = vadd.f32 %v477_v46, %v703_v0  ;;  %v602_v49 = vpop.f32.mrb[1].mxu1 }
 0x305   : > { %v489_v50 = vadd.f32 %v556_v47, %v481_v48 }
 0x307   : > { %490 = vst.msk [vmem:[%s273_s21] sm:$0xff] %vm277_vm0, %v489_v50 }
 0x308 PF: > { %s17_s24 = sadd.s32 1, %s642_s24  }
 0x309   : > { %p14_p4 = scmp.ge.s32.totalorder %s17_s24, 4  }
 0x30b   :  { %16 = sbr.rel (!%p14_p4) target bundleno = 1 (0x1), region = 78 }

// kernel: lamrg_v8_forward.23
= control target key start
LH: loop header
LB: loop body
LE: loop exit
PB: predicated region body
PF: predicated region fallthrough
CT: control target
= control target key end

     0   :  { %s1663_s24 = smov 0   ;;  %s1808_s0 = inlined_call_operand.vmem [shape: f32[2,8,32], index: 0, kind: input, shape index: {}]   ;;  %s1809_s1 = inlined_call_operand.vmem [shape: f32[1,32], index: 1, kind: input, shape index: {}]   ;;  %s1810_s2 = inlined_call_operand.vmem [shape: f32[1,32], index: 2, kind: input, shape index: {}]   ;;  %s1811_s3 = inlined_call_operand.vmem [shape: f32[32,96], index: 3, kind: input, shape index: {}]   ;;  %s1812_s4 = inlined_call_operand.vmem [shape: f32[1,96], index: 4, kind: input, shape index: {}]   ;;  %s1813_s5 = inlined_call_operand.vmem [shape: f32[32,32], index: 5, kind: input, shape index: {}]   ;;  %s1814_s6 = inlined_call_operand.vmem [shape: f32[1,32], index: 6, kind: input, shape index: {}]   ;;  %s1815_s7 = inlined_call_operand.vmem [shape: f32[2,8,32], index: 7, kind: output, shape index: {}]  }
   0x1 LB: > { %s1423_s25 = sadd.s32 4294967295, %s1607_s24   ;;  %p1427_p0 = scmp.ge.s32.totalorder %s1607_s24, 1  ;;  %s1607_s24 = sphi %s1663_s24, %s17_s24  }
   0x2   : > { %p236_p1 = scmp.lt.s32.totalorder %s1607_s24, 3 }
   0x4   : > { %p237_p2 = pnand %p1427_p0, %p236_p1 }
   0x5   : > { %p266_p3 = scmp.lt.s32.totalorder (!%p237_p2), %s1423_s25, 1  ;;  %vm277_vm0 = vcmask (!%p237_p2), 261120   ;;  %v314_v7 = vld [vmem:[%s1811_s3] sm:$0xff] (!%p237_p2)  ;;  %v315_v8 = vld [vmem:[%s1811_s3 + $0x8] sm:$0xff] (!%p237_p2)  ;;  %v316_v9 = vld [vmem:[%s1811_s3 + $0x10] sm:$0xff] (!%p237_p2)  ;;  %v1609_v10 = vmov (!%p237_p2), 0.0|0.0  }
   0x6   : > { %240 = sbr.rel (%p237_p2) target bundleno = 2914 (0xb62), region = 48  ;;  %1553 = vmatprep.subr.bf16.mxu0 (!%p237_p2), %v1609_v10  ;;  %v1554_v11 = vpack.c.bf16 (!%p237_p2), %v315_v8, %v314_v7  ;;  %v317_v12 = vld [vmem:[%s1811_s3 + $0x18] sm:$0xff] (!%p237_p2)  ;;  %vm1610_vm1 = vmmov (!%p237_p2), 0   ;;  %v1611_v13 = vmov (!%p237_p2), 0.0   ;;  %v1430_v23 = vld [vmem:[%s1809_s1] ss:$0 sm:$0xff] (!%p237_p2) }
   0x7   : > { %1490 = vmatprep.mubr.msk.f32.mxu0 (!%p237_p2), %vm1610_vm1, %v1611_v13  ;;  %1493 = vmatprep.subr.mxu1 (!%p237_p2), %v1611_v13  ;;  %v1557_v14 = vpack.c.bf16 (!%p237_p2), %v317_v12, %v316_v9  ;;  %v1431_v26 = vld [vmem:[%s1810_s2] ss:$0 sm:$0xff] (!%p237_p2)  ;;  %s1612_s21 = smov (!%p237_p2), 120   ;;  %s1613_s22 = smov (!%p237_p2), 96   ;;  %vm405_vm4 = vcmask (!%p237_p2), 64512   ;;  %v399_v54 = vld [vmem:[%s1813_s5 + $0x8] sm:$0xff] (!%p237_p2) }
   0x8   : > { %1495 = vmatprep.mubr.msk.f32.mxu1 (!%p237_p2), %vm1610_vm1, %v1611_v13  ;;  %1555 = vmatpush3.bf16.msra.mxu0 (!%p237_p2), %v1554_v11  ;;  %v1432_v29 = vld [vmem:[%s1812_s4] ss:$0 sm:$0xff] (!%p237_p2)  ;;  %s1614_s23 = smov (!%p237_p2), 88   ;;  %s1615_s27 = smov (!%p237_p2), 56  }
   0x9   : > { %1556 = vmatprep.subr.bf16.mxu0 (!%p237_p2), %v1609_v10  ;;  %s1616_s28 = smov (!%p237_p2), 64   ;;  %s1618_s30 = smov (!%p237_p2), 112   ;;  %v398_v63 = vld [vmem:[%s1813_s5] sm:$0xff] (!%p237_p2) }
   0xa   : > { %s1619_s12 = smov (!%p237_p2), 48   ;;  %s1620_s13 = smov (!%p237_p2), 104  }
   0xb   : > { %s1621_s14 = smov (!%p237_p2), 72   ;;  %s1622_s17 = smov (!%p237_p2), 40  }
   0xc   : > { %1558 = vmatpush3.bf16.msra.mxu0 (!%p237_p2), %v1557_v14 }
   0xd   : > { %s1817_s25 = smov (!%p266_p3, %s1423_s25), 1  ;;  %1503 = vmatprep.subr.mxu0 %v1611_v13 }
   0xe   : > { %s1428_s26 = sshll.u32 %s1817_s25, 3 }
   0xf   : > { %s269_s29 = scalar_lea.vmem %s1808_s0, %s1428_s26 }
  0x10   : > { %v1679_v0 = vld [vmem:[%s269_s29] sm:$0xff]  ;;  %s1617_s29 = smov 80  }
  0x11   : > { %v278_v1 = vsel %vm277_vm0, %v1679_v0, 0.0 }
  0x12   : > { %279 = vadd.xlane.f32.xlu0 %v278_v1 }
  0x9f   : > { %v280_v2 = vpop.xlane.xlu0 %279 }
  0xa0   : > { %v282_v3 = vmul.f32 0.03125, %v280_v2 }
  0xa2   : > { %v283_v4 = vsub.f32 %v1679_v0, %v282_v3 }
  0xa4   : > { %v284_v5 = vmul.f32 %v283_v4, %v283_v4  ;;  %v296_v24 = vmul.f32 %v1430_v23, %v283_v4 }
  0xa6   : > { %v285_v6 = vsel %vm277_vm0, %v284_v5, 0.0 }
  0xa7   : > { %286 = vadd.xlane.f32.xlu0 %v285_v6 }
 0x134   : > { %v287_v15 = vpop.xlane.xlu0 %286 }
 0x135   : > { %v289_v16 = vmul.f32 0.032258064, %v287_v15 }
 0x137   : > { %1581 = vrsqrt.f32 %v289_v16  ;;  %vm299_vm2 = vcmp.eq.f32.partialorder %v289_v16, inf  ;;  %v302_v19 = vand.u32 2147483648, %v289_v16  ;;  %vm301_vm3 = vcmp.eq.f32.partialorder %v289_v16, 0.0 }
 0x141   : > { %v1582_v17 = vpop.eup %1581 }
 0x142   : > { %v298_v18 = vmul.f32 %v1582_v17, %v289_v16 }
 0x144   : > { %v300_v20 = vsel %vm299_vm2, %v289_v16, %v298_v18 }
 0x145   : > { %v303_v21 = vsel %vm301_vm3, %v302_v19, %v300_v20 }
 0x146   : > { %v304_v22 = vadd.f32 1e-06, %v303_v21 }
 0x148   : > { %1583 = vrcp.f32 %v304_v22 }
 0x152   : > { %v1584_v25 = vpop.eup %1583 }
 0x153   : > { %v306_v27 = vmul.f32 %v1584_v25, %v296_v24 }
 0x155   : > { %v313_v28 = vadd.f32 %v1431_v26, %v306_v27 }
 0x157   : > { %1491 = vmatmul.mubr.msk.f32.vlgmr.msra.gmra.mrb[0].mxu0 %vm277_vm0, %v313_v28  ;;  %v400_v28 = vld [vmem:[%s1813_s5 + $0x10] sm:$0xff] }
 0x158   : > { %1505 = vmatprep.mubr.msk.f32.mxu0 %vm1610_vm1, %v1611_v13 }
 0x22a   : > { %v394_v30 = vpop.f32.mrb[0].mxu0 }
 0x22b   : > { %v1715_v31 = vadd.f32 %v1432_v29, %v394_v30  ;;  %v1492_v32 = vpop.f32.mrb[1].mxu0 }
 0x22d   : > { %568 = vrot.lane.b32.xlu0 %v1715_v31, %s1612_s21  ;;  %403 = vrot.lane.b32.xlu1 %v1715_v31, %s1613_s22 }
 0x231   : > { %570 = vrot.lane.b32.xlu1 %v1715_v31, %s1614_s23 }
 0x29f   : > { %v404_v33 = vpop.permute.xlu1 %403  ;;  %v569_v35 = vpop.permute.xlu0 %568 }
 0x2a0   : > { %1494 = vmatpush3.xpose.msk.msra.mxu1 %vm405_vm4, %v404_v33 }
 0x2a1   : > { %1498 = vmatprep.subr.mxu1 %v1611_v13 }
 0x2a3   : > { %1496 = vmatmul.mubr.msk.f32.vlgmr.msra.gmra.mrb[0].mxu1 %vm405_vm4, %v1715_v31  ;;  %v571_v34 = vpop.permute.xlu1 %570 }
 0x2a4   : > { %1504 = vmatpush3.xpose.msk.msra.mxu0 %vm405_vm4, %v571_v34  ;;  %1500 = vmatprep.mubr.msk.f32.mxu1 %vm1610_vm1, %v1611_v13 }
 0x2a5   : > { %1513 = vmatprep.subr.mxu0 %v1611_v13 }
 0x2a7   : > { %1506 = vmatmul.mubr.msk.f32.vlgmr.msra.gmra.mrb[2].mxu0 %vm405_vm4, %v569_v35 }
 0x2a8   : > { %1515 = vmatprep.mubr.msk.f32.mxu0 %vm1610_vm1, %v1611_v13  ;;  %1514 = vmatpush3.msra.mxu0 %v399_v54 }
 0x2a9   : > { %1523 = vmatprep.subr.mxu0 %v1611_v13 }
 0x376   : > { %v476_v36 = vpop.f32.mrb[0].mxu1 }
 0x377   : > { %v480_v37 = vmul.f32 0.35355338, %v476_v36  ;;  %v1497_v38 = vpop.f32.mrb[1].mxu1 }
 0x379   : > { %v481_v39 = vsel %vm405_vm4, %v480_v37, -inf }
 0x37a   : > { %482 = vmax.xlane.f32.xlu1 %v481_v39  ;;  %v642_v40 = vpop.f32.mrb[2].mxu0 }
 0x37b   : > { %v646_v41 = vmul.f32 0.35355338, %v642_v40  ;;  %v1507_v42 = vpop.f32.mrb[3].mxu0 }
 0x37d   : > { %v647_v43 = vsel %vm405_vm4, %v646_v41, -inf }
 0x37e   : > { %648 = vmax.xlane.f32.xlu0 %v647_v43 }
 0x394   : > { %658 = vrot.lane.b32.xlu0 %v1715_v31, %s1615_s27  ;;  %s273_s27 = scalar_lea.vmem %s1815_s7, %s1428_s26 }
 0x407   : > { %v483_v44 = vpop.xlane.xlu1 %482 }
 0x408   : > { %v484_v45 = vsub.f32 %v480_v37, %v483_v44 }
 0x40a   : > { %v485_v46 = vmul.f32 1.442695, %v484_v45 }
 0x40b   : > { %v649_v47 = vpop.xlane.xlu0 %648 }
 0x40c   : > { %1585 = vpow2.f32 %v485_v46  ;;  %v650_v48 = vsub.f32 %v646_v41, %v649_v47 }
 0x40e   : > { %v651_v49 = vmul.f32 1.442695, %v650_v48 }
 0x40f   : > { %v659_v60 = vpop.permute.xlu0 %658 }
 0x410   : > { %1587 = vpow2.f32 %v651_v49 }
 0x416   : > { %v1586_v50 = vpop.eup %1585 }
 0x417   : > { %v487_v51 = vsel %vm405_vm4, %v1586_v50, 0.0 }
 0x418   : > { %488 = vadd.xlane.f32.xlu1 %v487_v51 }
 0x41a   : > { %v1588_v52 = vpop.eup %1587 }
 0x41b   : > { %v653_v53 = vsel %vm405_vm4, %v1588_v52, 0.0 }
 0x41c   : > { %654 = vadd.xlane.f32.xlu1 %v653_v53 }
 0x42d   : > { %492 = vrot.lane.b32.xlu1 %v1715_v31, %s1616_s28 }
 0x431   : > { %882 = vrot.lane.b32.xlu1 %v1715_v31, %s1617_s29 }
 0x435   : > { %880 = vrot.lane.b32.xlu1 %v1715_v31, %s1618_s30 }
 0x4a5   : > { %v489_v55 = vpop.xlane.xlu1 %488 }
 0x4a6   : > { %1589 = vrcp.f32 %v489_v55 }
 0x4a9   : > { %v655_v56 = vpop.xlane.xlu1 %654 }
 0x4aa   : > { %1591 = vrcp.f32 %v655_v56 }
 0x4ad   : > { %v493_v57 = vpop.permute.xlu1 %492 }
 0x4ae   : > { %1499 = vmatpush3.msra.mxu1 %v493_v57 }
 0x4af   : > { %1508 = vmatprep.subr.mxu1 %v1611_v13 }
 0x4b0   : > { %v1590_v58 = vpop.eup %1589 }
 0x4b1   : > { %v491_v59 = vmul.f32 %v1590_v58, %v1586_v50  ;;  %v883_v3 = vpop.permute.xlu1 %882 }
 0x4b3   : > { %1501 = vmatmul.mubr.msk.f32.vlgmr.msra.gmra.mrb[2].mxu1 %vm405_vm4, %v491_v59 }
 0x4b4   : > { %v1592_v61 = vpop.eup %1591  ;;  %1509 = vmatpush3.msra.mxu1 %v659_v60  ;;  %1510 = vmatprep.mubr.msk.f32.mxu1 %vm1610_vm1, %v1611_v13 }
 0x4b5   : > { %v657_v62 = vmul.f32 %v1592_v61, %v1588_v52  ;;  %1518 = vmatprep.subr.mxu1 %v1611_v13  ;;  %v881_v6 = vpop.permute.xlu1 %880  ;;  %v1450_v52 = vld [vmem:[%s1814_s6] ss:$0 sm:$0xff] }
 0x4b7   : > { %1511 = vmatmul.mubr.msk.f32.vlgmr.msra.gmra.mrb[4].mxu1 %vm405_vm4, %v657_v62 }
 0x4b8   : > { %1520 = vmatprep.mubr.msk.f32.mxu1 %vm1610_vm1, %v1611_v13  ;;  %1519 = vmatpush3.msra.mxu1 %v398_v63 }
 0x4b9   : > { %1528 = vmatprep.subr.mxu1 %v1611_v13 }
 0x586   : > { %v564_v1 = vpop.f32.mrb[2].mxu1 }
 0x587   : > { %v1502_v2 = vpop.f32.mrb[3].mxu1  ;;  %1521 = vmatmul.mubr.msk.f32.vlgmr.msra.gmra.mrb[6].mxu1 %vm405_vm4, %v564_v1 }
 0x588   : > { %1530 = vmatprep.mubr.msk.f32.mxu1 %vm1610_vm1, %v1611_v13 }
 0x58a   : > { %v730_v4 = vpop.f32.mrb[4].mxu1 }
 0x58b   : > { %v1512_v5 = vpop.f32.mrb[5].mxu1  ;;  %1516 = vmatmul.mubr.msk.f32.vlgmr.msra.gmra.mrb[4].mxu0 %vm405_vm4, %v730_v4 }
 0x58c   : > { %1524 = vmatpush3.xpose.msk.msra.mxu0 %vm405_vm4, %v883_v3  ;;  %1525 = vmatprep.mubr.msk.f32.mxu0 %vm1610_vm1, %v1611_v13 }
 0x58d   : > { %1533 = vmatprep.subr.mxu0 %v1611_v13 }
 0x58f   : > { %1526 = vmatmul.mubr.msk.f32.vlgmr.msra.gmra.mrb[6].mxu0 %vm405_vm4, %v881_v6 }
 0x590   : > { %1535 = vmatprep.mubr.msk.f32.mxu0 %vm1610_vm1, %v1611_v13  ;;  %1534 = vmatpush3.msra.mxu0 %v400_v28 }
 0x591   : > { %1543 = vmatprep.subr.mxu0 %v1611_v13 }
 0x65a   : > { %v876_v7 = vpop.f32.mrb[6].mxu1 }
 0x65b   : > { %v1522_v8 = vpop.f32.mrb[7].mxu1 }
 0x65e   : > { %v803_v9 = vpop.f32.mrb[4].mxu0 }
 0x65f   : > { %v877_v10 = vadd.f32 %v876_v7, %v803_v9  ;;  %v1517_v11 = vpop.f32.mrb[5].mxu0 }
 0x662   : > { %v954_v12 = vpop.f32.mrb[6].mxu0 }
 0x663   : > { %v958_v14 = vmul.f32 0.35355338, %v954_v12  ;;  %v1527_v15 = vpop.f32.mrb[7].mxu0 }
 0x665   : > { %v959_v16 = vsel %vm405_vm4, %v958_v14, -inf }
 0x666   : > { %960 = vmax.xlane.f32.xlu1 %v959_v16 }
 0x677   : > { %970 = vrot.lane.b32.xlu1 %v1715_v31, %s1619_s12 }
 0x67b   : > { %1120 = vrot.lane.b32.xlu1 %v1715_v31, %s1620_s13 }
 0x6f3   : > { %v961_v17 = vpop.xlane.xlu1 %960 }
 0x6f4   : > { %v962_v18 = vsub.f32 %v958_v14, %v961_v17 }
 0x6f6   : > { %v963_v19 = vmul.f32 1.442695, %v962_v18 }
 0x6f7   : > { %v971_v20 = vpop.permute.xlu1 %970 }
 0x6f8   : > { %1593 = vpow2.f32 %v963_v19  ;;  %1529 = vmatpush3.msra.mxu1 %v971_v20 }
 0x6f9   : > { %1538 = vmatprep.subr.mxu1 %v1611_v13 }
 0x6fb   : > { %v1121_v27 = vpop.permute.xlu1 %1120 }
 0x702   : > { %v1594_v21 = vpop.eup %1593 }
 0x703   : > { %v965_v22 = vsel %vm405_vm4, %v1594_v21, 0.0 }
 0x704   : > { %966 = vadd.xlane.f32.xlu0 %v965_v22 }
 0x71a   : > { %1122 = vrot.lane.b32.xlu0 %v1715_v31, %s1621_s14 }
 0x791   : > { %v967_v23 = vpop.xlane.xlu0 %966 }
 0x792   : > { %1595 = vrcp.f32 %v967_v23 }
 0x795   : > { %v1123_v26 = vpop.permute.xlu0 %1122 }
 0x79c   : > { %v1596_v24 = vpop.eup %1595 }
 0x79d   : > { %v969_v25 = vmul.f32 %v1596_v24, %v1594_v21 }
 0x79f   : > { %1531 = vmatmul.mubr.msk.f32.vlgmr.msra.gmra.mrb[8].mxu1 %vm405_vm4, %v969_v25 }
 0x7a0   : > { %1539 = vmatpush3.xpose.msk.msra.mxu1 %vm405_vm4, %v1123_v26  ;;  %1540 = vmatprep.mubr.msk.f32.mxu1 %vm1610_vm1, %v1611_v13 }
 0x7a1   : > { %1548 = vmatprep.subr.mxu1 %v1611_v13 }
 0x7a3   : > { %1541 = vmatmul.mubr.msk.f32.vlgmr.msra.gmra.mrb[10].mxu1 %vm405_vm4, %v1121_v27 }
 0x7a4   : > { %1550 = vmatprep.mubr.msk.f32.mxu1 %vm1610_vm1, %v1611_v13 }
 0x872   : > { %v1042_v29 = vpop.f32.mrb[8].mxu1 }
 0x873   : > { %v1532_v30 = vpop.f32.mrb[9].mxu1  ;;  %1536 = vmatmul.mubr.msk.f32.vlgmr.msra.gmra.mrb[8].mxu0 %vm405_vm4, %v1042_v29 }
 0x874   : > { %1545 = vmatprep.mubr.msk.f32.mxu0 %vm1610_vm1, %v1611_v13  ;;  %v401_v13 = vld [vmem:[%s1813_s5 + $0x18] sm:$0xff] }
 0x875   : > { %1549 = vmatpush3.msra.mxu1 %v401_v13 }
 0x876   : > { %v1194_v32 = vpop.f32.mrb[10].mxu1 }
 0x877   : > { %v1198_v33 = vmul.f32 0.35355338, %v1194_v32  ;;  %v1542_v34 = vpop.f32.mrb[11].mxu1 }
 0x879   : > { %v1199_v35 = vsel %vm405_vm4, %v1198_v33, -inf }
 0x87a   : > { %1200 = vmax.xlane.f32.xlu1 %v1199_v35 }
 0x907   : > { %v1201_v36 = vpop.xlane.xlu1 %1200 }
 0x908   : > { %v1202_v37 = vsub.f32 %v1198_v33, %v1201_v36 }
 0x90a   : > { %v1203_v38 = vmul.f32 1.442695, %v1202_v37 }
 0x90c   : > { %1597 = vpow2.f32 %v1203_v38 }
 0x916   : > { %v1598_v39 = vpop.eup %1597 }
 0x917   : > { %v1205_v40 = vsel %vm405_vm4, %v1598_v39, 0.0 }
 0x918   : > { %1206 = vadd.xlane.f32.xlu0 %v1205_v40 }
 0x92e   : > { %1210 = vrot.lane.b32.xlu0 %v1715_v31, %s1622_s17 }
 0x946   : > { %v1115_v41 = vpop.f32.mrb[8].mxu0 }
 0x947   : > { %v1119_v42 = vadd.f32 %v1115_v41, %v877_v10  ;;  %v1537_v43 = vpop.f32.mrb[9].mxu0 }
 0x9a5   : > { %v1207_v44 = vpop.xlane.xlu0 %1206 }
 0x9a6   : > { %1599 = vrcp.f32 %v1207_v44 }
 0x9a9   : > { %v1211_v45 = vpop.permute.xlu0 %1210 }
 0x9aa   : > { %1544 = vmatpush3.msra.mxu0 %v1211_v45 }
 0x9b0   : > { %v1600_v46 = vpop.eup %1599 }
 0x9b1   : > { %v1209_v47 = vmul.f32 %v1600_v46, %v1598_v39 }
 0x9b3   : > { %1546 = vmatmul.mubr.msk.f32.vlgmr.msra.gmra.mrb[10].mxu0 %vm405_vm4, %v1209_v47 }
 0xa86   : > { %v1282_v48 = vpop.f32.mrb[10].mxu0 }
 0xa87   : > { %v1547_v49 = vpop.f32.mrb[11].mxu0  ;;  %1551 = vmatmul.mubr.msk.f32.vlgmr.msra.gmra.mrb[12].mxu1 %vm405_vm4, %v1282_v48 }
 0xb5a   : > { %v1355_v31 = vpop.f32.mrb[12].mxu1 }
 0xb5b   : > { %v1359_v50 = vadd.f32 %v1355_v31, %v1119_v42  ;;  %v1552_v51 = vpop.f32.mrb[13].mxu1 }
 0xb5d   : > { %v1360_v53 = vadd.f32 %v1359_v50, %v1679_v0 }
 0xb5f   : > { %v1368_v54 = vadd.f32 %v1450_v52, %v1360_v53 }
 0xb61   : > { %1369 = vst.msk [vmem:[%s273_s27] sm:$0xff] %vm277_vm0, %v1368_v54 }
 0xb62 PF: > { %s17_s24 = sadd.s32 1, %s1607_s24  }
 0xb63   : > { %p14_p4 = scmp.ge.s32.totalorder %s17_s24, 4  }
 0xb65   :  { %16 = sbr.rel (!%p14_p4) target bundleno = 1 (0x1), region = 78 }

// kernel: lamrg_v8_forward.28
= control target key start
LH: loop header
LB: loop body
LE: loop exit
PB: predicated region body
PF: predicated region fallthrough
CT: control target
= control target key end

     0   :  { %s1891_s13 = smov 0   ;;  %s2060_s0 = inlined_call_operand.vmem [shape: f32[2,3,32], index: 0, kind: input, shape index: {}]   ;;  %s2061_s1 = inlined_call_operand.vmem [shape: f32[2,8,32], index: 1, kind: input, shape index: {}]   ;;  %s2062_s2 = inlined_call_operand.vmem [shape: f32[1,32], index: 2, kind: input, shape index: {}]   ;;  %s2063_s3 = inlined_call_operand.vmem [shape: f32[1,32], index: 3, kind: input, shape index: {}]   ;;  %s2064_s4 = inlined_call_operand.vmem [shape: f32[32,32], index: 4, kind: input, shape index: {}]   ;;  %s2065_s5 = inlined_call_operand.vmem [shape: f32[1,32], index: 5, kind: input, shape index: {}]   ;;  %s2066_s6 = inlined_call_operand.vmem [shape: f32[32,64], index: 6, kind: input, shape index: {}]   ;;  %s2067_s7 = inlined_call_operand.vmem [shape: f32[1,64], index: 7, kind: input, shape index: {}]   ;;  %s2068_s8 = inlined_call_operand.vmem [shape: f32[32,32], index: 8, kind: input, shape index: {}]   ;;  %s2069_s9 = inlined_call_operand.vmem [shape: f32[1,32], index: 9, kind: input, shape index: {}]   ;;  %s2070_s10 = inlined_call_operand.vmem [shape: f32[2,3,32], index: 10, kind: output, shape index: {}]  }
   0x1 LB: > { %s1619_s14 = sadd.s32 4294967295, %s1824_s13   ;;  %p1623_p0 = scmp.ge.s32.totalorder %s1824_s13, 1  ;;  %s1824_s13 = sphi %s1891_s13, %s20_s13  }
   0x2   : > { %p320_p1 = scmp.lt.s32.totalorder %s1824_s13, 3 }
   0x4   : > { %p321_p2 = pnand %p1623_p0, %p320_p1 }
   0x5   : > { %p360_p3 = scmp.lt.s32.totalorder (!%p321_p2), %s1619_s14, 1  ;;  %vm376_vm0 = vcmask (!%p321_p2), 256000   ;;  %v498_v7 = vld [vmem:[%s2066_s6] sm:$0xff] (!%p321_p2)  ;;  %v499_v8 = vld [vmem:[%s2066_s6 + $0x8] sm:$0xff] (!%p321_p2)  ;;  %v500_v9 = vld [vmem:[%s2066_s6 + $0x10] sm:$0xff] (!%p321_p2)  ;;  %v1826_v10 = vmov (!%p321_p2), 0.0|0.0  }
   0x6   : > { %324 = sbr.rel (%p321_p2) target bundleno = 2907 (0xb5b), region = 60  ;;  %1774 = vmatprep.subr.bf16.mxu1 (!%p321_p2), %v1826_v10  ;;  %v1775_v11 = vpack.c.bf16 (!%p321_p2), %v499_v8, %v498_v7  ;;  %1768 = vmatprep.subr.bf16.mxu0 (!%p321_p2), %v1826_v10  ;;  %v501_v12 = vld [vmem:[%s2066_s6 + $0x18] sm:$0xff] (!%p321_p2)  ;;  %v413_v13 = vld [vmem:[%s2064_s4] sm:$0xff] (!%p321_p2)  ;;  %v414_v14 = vld [vmem:[%s2064_s4 + $0x8] sm:$0xff] (!%p321_p2)  ;;  %vm1827_vm1 = vmmov (!%p321_p2), 0   ;;  %v1828_v16 = vmov (!%p321_p2), 0.0  }
   0x7   : > { %v1769_v15 = vpack.c.bf16 (!%p321_p2), %v414_v14, %v413_v13  ;;  %1705 = vmatprep.mubr.msk.f32.mxu1 (!%p321_p2), %vm1827_vm1, %v1828_v16  ;;  %v415_v17 = vld [vmem:[%s2064_s4 + $0x10] sm:$0xff] (!%p321_p2)  ;;  %v416_v18 = vld [vmem:[%s2064_s4 + $0x18] sm:$0xff] (!%p321_p2)  ;;  %1694 = vmatprep.mubr.msk.f32.mxu0 (!%p321_p2), %vm1827_vm1, %v1828_v16  ;;  %v1778_v19 = vpack.c.bf16 (!%p321_p2), %v501_v12, %v500_v9  ;;  %vm424_vm2 = vcmask (!%p321_p2), 261120   ;;  %v1627_v30 = vld [vmem:[%s2062_s2] ss:$0 sm:$0xff] (!%p321_p2)  ;;  %vm586_vm5 = vcmask (!%p321_p2), 64512  }
   0x8   : > { %1776 = vmatpush3.bf16.msra.mxu1 (!%p321_p2), %v1775_v11  ;;  %v1772_v20 = vpack.c.bf16 (!%p321_p2), %v416_v18, %v415_v17  ;;  %v1628_v33 = vld [vmem:[%s2063_s3] ss:$0 sm:$0xff] (!%p321_p2)  ;;  %s1829_s28 = smov (!%p321_p2), 120   ;;  %vm664_vm6 = vcmask (!%p321_p2), 59392   ;;  %s1831_s12 = smov (!%p321_p2), 112  }
   0x9   : > { %1777 = vmatprep.subr.bf16.mxu1 (!%p321_p2), %v1826_v10  ;;  %1770 = vmatpush3.bf16.msra.mxu0 (!%p321_p2), %v1769_v15  ;;  %v1631_v36 = vld [vmem:[%s2067_s7] ss:$0 sm:$0xff] (!%p321_p2)  ;;  %s1832_s16 = smov (!%p321_p2), 88   ;;  %s1834_s22 = smov (!%p321_p2), 104  }
   0xa   : > { %1771 = vmatprep.subr.bf16.mxu0 (!%p321_p2), %v1826_v10  ;;  %v1629_v40 = vld [vmem:[%s2065_s5] ss:$0 sm:$0xff] (!%p321_p2)  ;;  %s1835_s25 = smov (!%p321_p2), 72  }
   0xb   : > { %v582_v10 = vld [vmem:[%s2068_s8] sm:$0xff] (!%p321_p2) }
   0xc   : > { %1779 = vmatpush3.bf16.msra.mxu1 (!%p321_p2), %v1778_v19 }
   0xd   : > { %s2072_s14 = smov (!%p360_p3, %s1619_s14), 1  ;;  %1773 = vmatpush3.bf16.msra.mxu0 %v1772_v20  ;;  %1713 = vmatprep.subr.mxu1 %v1828_v16 }
   0xe   : > { %s1624_s15 = sshll.u32 %s2072_s14, 2  ;;  %s1625_s11 = sshll.u32 %s2072_s14, 3  ;;  %1708 = vmatprep.subr.mxu0 %v1828_v16 }
   0xf   : > { %s363_s18 = scalar_lea.vmem %s2060_s0, %s1624_s15  ;;  %s367_s21 = scalar_lea.vmem %s2061_s1, %s1625_s11 }
  0x10   : > { %v1907_v0 = vld [vmem:[%s363_s18] sm:$0x7]  ;;  %s1830_s11 = smov 96  }
  0x11   : > { %v377_v1 = vsel %vm376_vm0, %v1907_v0, 0.0  ;;  %v373_v21 = vld [vmem:[%s367_s21] sm:$0xff]  ;;  %s1833_s21 = smov 80  }
  0x12   : > { %378 = vadd.xlane.f32.xlu0 %v377_v1  ;;  %1706 = vmatmul.mubr.msk.f32.vlgmr.msra.gmra.mrb[0].mxu1 %vm424_vm2, %v373_v21 }
  0x13   : > { %1715 = vmatprep.mubr.msk.f32.mxu1 %vm1827_vm1, %v1828_v16 }
  0x9f   : > { %v379_v2 = vpop.xlane.xlu0 %378 }
  0xa0   : > { %v381_v3 = vmul.f32 0.03125, %v379_v2 }
  0xa2   : > { %v382_v4 = vsub.f32 %v1907_v0, %v381_v3 }
  0xa4   : > { %v383_v5 = vmul.f32 %v382_v4, %v382_v4  ;;  %v395_v31 = vmul.f32 %v1627_v30, %v382_v4 }
  0xa6   : > { %v384_v6 = vsel %vm376_vm0, %v383_v5, 0.0  ;;  %v583_v5 = vld [vmem:[%s2068_s8 + $0x8] sm:$0xff] }
  0xa7   : > { %385 = vadd.xlane.f32.xlu0 %v384_v6 }
  0xe5   : > { %v578_v37 = vpop.f32.mrb[0].mxu1 }
  0xe6   : > { %v1962_v38 = vadd.f32 %v1631_v36, %v578_v37  ;;  %v1707_v39 = vpop.f32.mrb[1].mxu1 }
  0xe7   : > { %v584_v39 = vld [vmem:[%s2068_s8 + $0x10] sm:$0xff] }
  0xe8   : > { %754 = vrot.lane.b32.xlu1 %v1962_v38, %s1829_s28 }
 0x134   : > { %v386_v22 = vpop.xlane.xlu0 %385 }
 0x135   : > { %v388_v23 = vmul.f32 0.032258064, %v386_v22 }
 0x137   : > { %1798 = vrsqrt.f32 %v388_v23  ;;  %vm398_vm3 = vcmp.eq.f32.partialorder %v388_v23, inf  ;;  %v401_v26 = vand.u32 2147483648, %v388_v23  ;;  %vm400_vm4 = vcmp.eq.f32.partialorder %v388_v23, 0.0 }
 0x141   : > { %v1799_v24 = vpop.eup %1798 }
 0x142   : > { %v397_v25 = vmul.f32 %v1799_v24, %v388_v23 }
 0x144   : > { %v399_v27 = vsel %vm398_vm3, %v388_v23, %v397_v25 }
 0x145   : > { %v402_v28 = vsel %vm400_vm4, %v401_v26, %v399_v27 }
 0x146   : > { %v403_v29 = vadd.f32 1e-06, %v402_v28 }
 0x148   : > { %1800 = vrcp.f32 %v403_v29 }
 0x152   : > { %v1801_v32 = vpop.eup %1800 }
 0x153   : > { %v405_v34 = vmul.f32 %v1801_v32, %v395_v31 }
 0x155   : > { %v412_v35 = vadd.f32 %v1628_v33, %v405_v34 }
 0x157   : > { %1695 = vmatmul.mubr.msk.f32.vlgmr.msra.gmra.mrb[0].mxu0 %vm424_vm2, %v412_v35 }
 0x158   : > { %1710 = vmatprep.mubr.msk.f32.mxu0 %vm1827_vm1, %v1828_v16  ;;  %1709 = vmatpush3.xpose.msk.msra.mxu0 %vm586_vm5, %v1962_v38 }
 0x159   : > { %1718 = vmatprep.subr.mxu0 %v1828_v16 }
 0x15a   : > { %v755_v44 = vpop.permute.xlu1 %754 }
 0x22a   : > { %v494_v41 = vpop.f32.mrb[0].mxu0 }
 0x22b   : > { %v1971_v42 = vadd.f32 %v1629_v40, %v494_v41  ;;  %v1696_v43 = vpop.f32.mrb[1].mxu0 }
 0x22d   : > { %752 = vrot.lane.b32.xlu1 %v1971_v42, %s1829_s28  ;;  %1711 = vmatmul.mubr.msk.f32.vlgmr.msra.gmra.mrb[2].mxu0 %vm586_vm5, %v1971_v42 }
 0x22e   : > { %1719 = vmatpush3.xpose.msk.msra.mxu0 %vm586_vm5, %v755_v44  ;;  %1720 = vmatprep.mubr.msk.f32.mxu0 %vm1827_vm1, %v1828_v16 }
 0x22f   : > { %1728 = vmatprep.subr.mxu0 %v1828_v16 }
 0x29f   : > { %v753_v45 = vpop.permute.xlu1 %752 }
 0x2a0   : > { %1721 = vmatmul.mubr.msk.f32.vlgmr.msra.gmra.mrb[4].mxu0 %vm586_vm5, %v753_v45 }
 0x2a1   : > { %1730 = vmatprep.mubr.msk.f32.mxu0 %vm1827_vm1, %v1828_v16  ;;  %1729 = vmatpush3.msra.mxu0 %v583_v5 }
 0x2a2   : > { %1738 = vmatprep.subr.mxu0 %v1828_v16 }
 0x300   : > { %v659_v46 = vpop.f32.mrb[2].mxu0 }
 0x301   : > { %v663_v47 = vmul.f32 0.35355338, %v659_v46  ;;  %v1712_v48 = vpop.f32.mrb[3].mxu0 }
 0x303   : > { %v665_v49 = vsel %vm664_vm6, %v663_v47, -inf }
 0x304   : > { %666 = vmax.xlane.f32.xlu0 %v665_v49 }
 0x31a   : > { %676 = vrot.lane.b32.xlu0 %v1962_v38, %s1830_s11 }
 0x373   : > { %v826_v50 = vpop.f32.mrb[4].mxu0 }
 0x374   : > { %v830_v51 = vmul.f32 0.35355338, %v826_v50  ;;  %v1722_v52 = vpop.f32.mrb[5].mxu0 }
 0x376   : > { %v831_v53 = vsel %vm664_vm6, %v830_v51, -inf }
 0x377   : > { %832 = vmax.xlane.f32.xlu1 %v831_v53 }
 0x388   : > { %1066 = vrot.lane.b32.xlu1 %v1962_v38, %s1831_s12 }
 0x391   : > { %v667_v54 = vpop.xlane.xlu0 %666 }
 0x392   : > { %v668_v55 = vsub.f32 %v663_v47, %v667_v54 }
 0x394   : > { %v669_v56 = vmul.f32 1.442695, %v668_v55 }
 0x395   : > { %v677_v57 = vpop.permute.xlu0 %676 }
 0x396   : > { %1802 = vpow2.f32 %v669_v56  ;;  %1714 = vmatpush3.msra.mxu1 %v677_v57 }
 0x397   : > { %1723 = vmatprep.subr.mxu1 %v1828_v16 }
 0x3a0   : > { %v1803_v58 = vpop.eup %1802 }
 0x3a1   : > { %v671_v59 = vsel %vm664_vm6, %v1803_v58, 0.0 }
 0x3a2   : > { %672 = vadd.xlane.f32.xlu0 %v671_v59 }
 0x404   : > { %v833_v60 = vpop.xlane.xlu1 %832 }
 0x405   : > { %v834_v61 = vsub.f32 %v830_v51, %v833_v60 }
 0x407   : > { %v835_v62 = vmul.f32 1.442695, %v834_v61 }
 0x408   : > { %v1067_v14 = vpop.permute.xlu1 %1066 }
 0x409   : > { %1804 = vpow2.f32 %v835_v62  ;;  %v1649_v62 = vld [vmem:[%s2069_s9] ss:$0 sm:$0xff] }
 0x413   : > { %v1805_v63 = vpop.eup %1804 }
 0x414   : > { %v837_v1 = vsel %vm664_vm6, %v1805_v63, 0.0 }
 0x415   : > { %838 = vadd.xlane.f32.xlu0 %v837_v1 }
 0x42b   : > { %842 = vrot.lane.b32.xlu0 %v1962_v38, %s1832_s16 }
 0x42f   : > { %v673_v2 = vpop.xlane.xlu0 %672  ;;  %1064 = vrot.lane.b32.xlu0 %v1971_v42, %s1831_s12  ;;  %s371_s12 = scalar_lea.vmem %s2070_s10, %s1624_s15 }
 0x430   : > { %1806 = vrcp.f32 %v673_v2 }
 0x43a   : > { %v1807_v3 = vpop.eup %1806 }
 0x43b   : > { %v675_v4 = vmul.f32 %v1807_v3, %v1803_v58 }
 0x43d   : > { %1716 = vmatmul.mubr.msk.f32.vlgmr.msra.gmra.mrb[2].mxu1 %vm586_vm5, %v675_v4 }
 0x43e   : > { %1725 = vmatprep.mubr.msk.f32.mxu1 %vm1827_vm1, %v1828_v16 }
 0x4a2   : > { %v839_v6 = vpop.xlane.xlu0 %838 }
 0x4a3   : > { %1808 = vrcp.f32 %v839_v6 }
 0x4a6   : > { %v843_v7 = vpop.permute.xlu0 %842 }
 0x4a7   : > { %1724 = vmatpush3.msra.mxu1 %v843_v7 }
 0x4a8   : > { %1733 = vmatprep.subr.mxu1 %v1828_v16 }
 0x4aa   : > { %v1065_v17 = vpop.permute.xlu0 %1064 }
 0x4ad   : > { %v1809_v8 = vpop.eup %1808 }
 0x4ae   : > { %v841_v9 = vmul.f32 %v1809_v8, %v1805_v63 }
 0x4b0   : > { %1726 = vmatmul.mubr.msk.f32.vlgmr.msra.gmra.mrb[4].mxu1 %vm586_vm5, %v841_v9 }
 0x4b1   : > { %1734 = vmatpush3.msra.mxu1 %v582_v10  ;;  %1735 = vmatprep.mubr.msk.f32.mxu1 %vm1827_vm1, %v1828_v16 }
 0x4b2   : > { %1743 = vmatprep.subr.mxu1 %v1828_v16 }
 0x510   : > { %v748_v11 = vpop.f32.mrb[2].mxu1 }
 0x511   : > { %v1717_v12 = vpop.f32.mrb[3].mxu1  ;;  %1736 = vmatmul.mubr.msk.f32.vlgmr.msra.gmra.mrb[6].mxu1 %vm586_vm5, %v748_v11 }
 0x512   : > { %1745 = vmatprep.mubr.msk.f32.mxu1 %vm1827_vm1, %v1828_v16 }
 0x583   : > { %v914_v13 = vpop.f32.mrb[4].mxu1 }
 0x584   : > { %v1727_v15 = vpop.f32.mrb[5].mxu1  ;;  %1731 = vmatmul.mubr.msk.f32.vlgmr.msra.gmra.mrb[6].mxu0 %vm586_vm5, %v914_v13 }
 0x585   : > { %1739 = vmatpush3.xpose.msk.msra.mxu0 %vm586_vm5, %v1067_v14  ;;  %1740 = vmatprep.mubr.msk.f32.mxu0 %vm1827_vm1, %v1828_v16 }
 0x586   : > { %1748 = vmatprep.subr.mxu0 %v1828_v16 }
 0x588   : > { %1741 = vmatmul.mubr.msk.f32.vlgmr.msra.gmra.mrb[8].mxu0 %vm586_vm5, %v1065_v17 }
 0x589   : > { %1750 = vmatprep.mubr.msk.f32.mxu0 %vm1827_vm1, %v1828_v16  ;;  %1749 = vmatpush3.msra.mxu0 %v584_v39 }
 0x58a   : > { %1758 = vmatprep.subr.mxu0 %v1828_v16 }
 0x5e4   : > { %v1060_v18 = vpop.f32.mrb[6].mxu1 }
 0x5e5   : > { %v1737_v19 = vpop.f32.mrb[7].mxu1 }
 0x657   : > { %v987_v20 = vpop.f32.mrb[6].mxu0 }
 0x658   : > { %v1061_v21 = vadd.f32 %v1060_v18, %v987_v20  ;;  %v1732_v22 = vpop.f32.mrb[7].mxu0 }
 0x65b   : > { %v1138_v23 = vpop.f32.mrb[8].mxu0 }
 0x65c   : > { %v1142_v24 = vmul.f32 0.35355338, %v1138_v23  ;;  %v1742_v25 = vpop.f32.mrb[9].mxu0 }
 0x65e   : > { %v1143_v26 = vsel %vm664_vm6, %v1142_v24, -inf }
 0x65f   : > { %1144 = vmax.xlane.f32.xlu0 %v1143_v26 }
 0x675   : > { %1154 = vrot.lane.b32.xlu0 %v1962_v38, %s1833_s21 }
 0x679   : > { %1304 = vrot.lane.b32.xlu0 %v1971_v42, %s1834_s22 }
 0x6ec   : > { %v1145_v27 = vpop.xlane.xlu0 %1144 }
 0x6ed   : > { %v1146_v28 = vsub.f32 %v1142_v24, %v1145_v27 }
 0x6ef   : > { %v1147_v29 = vmul.f32 1.442695, %v1146_v28 }
 0x6f0   : > { %v1155_v30 = vpop.permute.xlu0 %1154 }
 0x6f1   : > { %1810 = vpow2.f32 %v1147_v29  ;;  %1744 = vmatpush3.msra.mxu1 %v1155_v30 }
 0x6f2   : > { %1753 = vmatprep.subr.mxu1 %v1828_v16 }
 0x6f4   : > { %v1305_v37 = vpop.permute.xlu0 %1304 }
 0x6fb   : > { %v1811_v31 = vpop.eup %1810 }
 0x6fc   : > { %v1149_v32 = vsel %vm664_vm6, %v1811_v31, 0.0 }
 0x6fd   : > { %1150 = vadd.xlane.f32.xlu1 %v1149_v32 }
 0x70e   : > { %1306 = vrot.lane.b32.xlu1 %v1962_v38, %s1834_s22 }
 0x78a   : > { %v1151_v33 = vpop.xlane.xlu1 %1150 }
 0x78b   : > { %1812 = vrcp.f32 %v1151_v33 }
 0x78e   : > { %v1307_v36 = vpop.permute.xlu1 %1306 }
 0x795   : > { %v1813_v34 = vpop.eup %1812 }
 0x796   : > { %v1153_v35 = vmul.f32 %v1813_v34, %v1811_v31 }
 0x798   : > { %1746 = vmatmul.mubr.msk.f32.vlgmr.msra.gmra.mrb[8].mxu1 %vm586_vm5, %v1153_v35 }
 0x799   : > { %1754 = vmatpush3.xpose.msk.msra.mxu1 %vm586_vm5, %v1307_v36  ;;  %1755 = vmatprep.mubr.msk.f32.mxu1 %vm1827_vm1, %v1828_v16 }
 0x79a   : > { %1763 = vmatprep.subr.mxu1 %v1828_v16 }
 0x79c   : > { %1756 = vmatmul.mubr.msk.f32.vlgmr.msra.gmra.mrb[10].mxu1 %vm586_vm5, %v1305_v37 }
 0x79d   : > { %1765 = vmatprep.mubr.msk.f32.mxu1 %vm1827_vm1, %v1828_v16 }
 0x86b   : > { %v1226_v40 = vpop.f32.mrb[8].mxu1 }
 0x86c   : > { %v1747_v41 = vpop.f32.mrb[9].mxu1  ;;  %1751 = vmatmul.mubr.msk.f32.vlgmr.msra.gmra.mrb[10].mxu0 %vm586_vm5, %v1226_v40 }
 0x86d   : > { %1760 = vmatprep.mubr.msk.f32.mxu0 %vm1827_vm1, %v1828_v16  ;;  %v585_v16 = vld [vmem:[%s2068_s8 + $0x18] sm:$0xff] }
 0x86e   : > { %1764 = vmatpush3.msra.mxu1 %v585_v16 }
 0x86f   : > { %v1378_v42 = vpop.f32.mrb[10].mxu1 }
 0x870   : > { %v1382_v43 = vmul.f32 0.35355338, %v1378_v42  ;;  %v1757_v44 = vpop.f32.mrb[11].mxu1 }
 0x872   : > { %v1383_v45 = vsel %vm664_vm6, %v1382_v43, -inf }
 0x873   : > { %1384 = vmax.xlane.f32.xlu0 %v1383_v45 }
 0x889   : > { %1394 = vrot.lane.b32.xlu0 %v1962_v38, %s1835_s25 }
 0x900   : > { %v1385_v46 = vpop.xlane.xlu0 %1384 }
 0x901   : > { %v1386_v47 = vsub.f32 %v1382_v43, %v1385_v46 }
 0x903   : > { %v1387_v48 = vmul.f32 1.442695, %v1386_v47 }
 0x904   : > { %v1395_v49 = vpop.permute.xlu0 %1394 }
 0x905   : > { %1814 = vpow2.f32 %v1387_v48  ;;  %1759 = vmatpush3.msra.mxu0 %v1395_v49 }
 0x90f   : > { %v1815_v50 = vpop.eup %1814 }
 0x910   : > { %v1389_v51 = vsel %vm664_vm6, %v1815_v50, 0.0 }
 0x911   : > { %1390 = vadd.xlane.f32.xlu1 %v1389_v51 }
 0x93f   : > { %v1299_v52 = vpop.f32.mrb[10].mxu0 }
 0x940   : > { %v1303_v53 = vadd.f32 %v1299_v52, %v1061_v21  ;;  %v1752_v54 = vpop.f32.mrb[11].mxu0 }
 0x99e   : > { %v1391_v38 = vpop.xlane.xlu1 %1390 }
 0x99f   : > { %1816 = vrcp.f32 %v1391_v38 }
 0x9a9   : > { %v1817_v55 = vpop.eup %1816 }
 0x9aa   : > { %v1393_v56 = vmul.f32 %v1817_v55, %v1815_v50 }
 0x9ac   : > { %1761 = vmatmul.mubr.msk.f32.vlgmr.msra.gmra.mrb[12].mxu0 %vm586_vm5, %v1393_v56 }
 0xa7f   : > { %v1466_v57 = vpop.f32.mrb[12].mxu0 }
 0xa80   : > { %v1762_v58 = vpop.f32.mrb[13].mxu0  ;;  %1766 = vmatmul.mubr.msk.f32.vlgmr.msra.gmra.mrb[12].mxu1 %vm586_vm5, %v1466_v57 }
 0xb53   : > { %v1539_v59 = vpop.f32.mrb[12].mxu1 }
 0xb54   : > { %v1543_v60 = vadd.f32 %v1539_v59, %v1303_v53  ;;  %v1767_v61 = vpop.f32.mrb[13].mxu1 }
 0xb56   : > { %v1544_v63 = vadd.f32 %v1543_v60, %v1907_v0 }
 0xb58   : > { %v1552_v1 = vadd.f32 %v1649_v62, %v1544_v63 }
 0xb5a   : > { %1553 = vst.msk [vmem:[%s371_s12] sm:$0x7] %vm376_vm0, %v1552_v1 }
 0xb5b PF: > { %s20_s13 = sadd.s32 1, %s1824_s13  }
 0xb5c   : > { %p17_p4 = scmp.ge.s32.totalorder %s20_s13, 4  }
 0xb5e   :  { %19 = sbr.rel (!%p17_p4) target bundleno = 1 (0x1), region = 93 }

// kernel: lamrg_v8_forward.30
= control target key start
LH: loop header
LB: loop body
LE: loop exit
PB: predicated region body
PF: predicated region fallthrough
CT: control target
= control target key end

     0   :  { %s394_s12 = smov 0   ;;  %s432_s0 = inlined_call_operand.vmem [shape: f32[2,5,48], index: 0, kind: input, shape index: {}]   ;;  %s433_s1 = inlined_call_operand.vmem [shape: f32[48,32], index: 1, kind: input, shape index: {}]   ;;  %s434_s2 = inlined_call_operand.vmem [shape: f32[1,32], index: 2, kind: input, shape index: {}]   ;;  %s435_s3 = inlined_call_operand.vmem [shape: f32[2,5,32], index: 3, kind: output, shape index: {}]  }
   0x1 LB: > { %s310_s13 = sadd.s32 4294967295, %s369_s12   ;;  %p314_p0 = scmp.ge.s32.totalorder %s369_s12, 1  ;;  %s369_s12 = sphi %s394_s12, %s13_s12  }
   0x2   : > { %p136_p1 = scmp.lt.s32.totalorder %s369_s12, 3 }
   0x4   : > { %p137_p2 = pnand %p314_p0, %p136_p1 }
   0x5   : > { %v167_v0 = vld [vmem:[%s433_s1] sm:$0xff] (!%p137_p2)  ;;  %v168_v1 = vld [vmem:[%s433_s1 + $0x8] sm:$0xff] (!%p137_p2)  ;;  %v169_v2 = vld [vmem:[%s433_s1 + $0x10] sm:$0xff] (!%p137_p2)  ;;  %v371_v3 = vmov (!%p137_p2), 0.0|0.0   ;;  %vm372_vm0 = vmmov (!%p137_p2), 0   ;;  %v373_v6 = vmov (!%p137_p2), 0.0  }
   0x6   : > { %140 = sbr.rel (%p137_p2) target bundleno = 236 (0xec), region = 32  ;;  %343 = vmatprep.subr.bf16.mxu0 (!%p137_p2), %v371_v3  ;;  %v344_v4 = vpack.c.bf16 (!%p137_p2), %v168_v1, %v167_v0  ;;  %v170_v5 = vld [vmem:[%s433_s1 + $0x18] sm:$0xff] (!%p137_p2)  ;;  %340 = vmatprep.mubr.msk.f32.mxu0 (!%p137_p2), %vm372_vm0, %v373_v6  ;;  %p158_p3 = scmp.lt.s32.totalorder (!%p137_p2), %s310_s13, 1  ;;  %v171_v8 = vld [vmem:[%s433_s1 + $0x20] sm:$0xff] (!%p137_p2)  ;;  %v172_v9 = vld [vmem:[%s433_s1 + $0x28] sm:$0xff] (!%p137_p2)  ;;  %vm180_vm1 = vcmask (!%p137_p2), 392192  }
   0x7   : > { %v347_v7 = vpack.c.bf16 (!%p137_p2), %v170_v5, %v169_v2  ;;  %v350_v10 = vpack.c.bf16 (!%p137_p2), %v172_v9, %v171_v8  ;;  %v317_v12 = vld [vmem:[%s434_s2] ss:$0 sm:$0xff] (!%p137_p2)  ;;  %vm255_vm2 = vcmask (!%p137_p2), 258048  }
   0x8   : > { %345 = vmatpush3.bf16.msra.mxu0 (!%p137_p2), %v344_v4 }
   0x9   : > { %346 = vmatprep.subr.bf16.mxu0 (!%p137_p2), %v371_v3 }
   0xc   : > { %348 = vmatpush3.bf16.msra.mxu0 (!%p137_p2), %v347_v7 }
   0xd   : > { %s437_s13 = smov (!%p158_p3, %s310_s13), 1  ;;  %349 = vmatprep.subr.bf16.mxu0 %v371_v3 }
   0xe   : > { %s315_s26 = sshll.u32 %s437_s13, 3 }
   0xf   : > { %s161_s29 = scalar_lea.vmem %s432_s0, %s315_s26  ;;  %s165_s7 = scalar_lea.vmem %s435_s3, %s315_s26 }
  0x10   : > { %351 = vmatpush3.bf16.msra.mxu0 %v350_v10  ;;  %v166_v11 = vld [vmem:[%s161_s29] sm:$0x1f] }
  0x13   : > { %341 = vmatmul.mubr.msk.f32.vlgmr.msra.gmra.mrb[0].mxu0 %vm180_vm1, %v166_v11 }
  0xe6   : > { %v250_v13 = vpop.f32.mrb[0].mxu0 }
  0xe7   : > { %v251_v14 = vadd.f32 %v317_v12, %v250_v13  ;;  %v342_v15 = vpop.f32.mrb[1].mxu0 }
  0xe9   : > { %v254_v16 = vmax.f32 %v251_v14, 0.0 }
  0xeb   : > { %256 = vst.msk [vmem:[%s165_s7] sm:$0x1f] %vm255_vm2, %v254_v16 }
  0xec PF: > { %s13_s12 = sadd.s32 1, %s369_s12  }
  0xed   : > { %p10_p4 = scmp.ge.s32.totalorder %s13_s12, 4  }
  0xef   :  { %12 = sbr.rel (!%p10_p4) target bundleno = 1 (0x1), region = 62 }

// kernel: lamrg_v8_forward.22
= control target key start
LH: loop header
LB: loop body
LE: loop exit
PB: predicated region body
PF: predicated region fallthrough
CT: control target
= control target key end

     0   :  { %13 = vsyncpa [#allocation3], 0  ;;  %s1070_s0 = inlined_call_operand.vmem [shape: f32[2,4,192], index: 0, kind: input, shape index: {}]   ;;  %s1071_s1 = inlined_call_operand.vmem [shape: f32[192,48], index: 1, kind: input, shape index: {}]   ;;  %s1072_s2 = inlined_call_operand.vmem [shape: f32[1,48], index: 2, kind: input, shape index: {}]   ;;  %s1073_s3 = inlined_call_operand.vmem [shape: f32[48,14], index: 3, kind: input, shape index: {}]   ;;  %s1074_s4 = inlined_call_operand.vmem [shape: f32[1,14], index: 4, kind: input, shape index: {}]   ;;  %s1075_s5 = inlined_call_operand.vmem [shape: f32[2,4,48], index: 5, kind: output, shape index: {0}]   ;;  %s1076_s6 = inlined_call_operand.hbm [shape: f32[2,1,48], index: 6, kind: output, shape index: {1}]   ;;  %s1077_s7 = inlined_call_operand.vmem [shape: f32[2,1,14], index: 7, kind: output, shape index: {2}]  }
   0x1   :  { %15 = vsyncpa [#allocation3 + $0x1], 0  ;;  %s854_s24 = smov 0   ;;  %s856_s25 = smov 0  }
   0x2   :  { %s858_s26 = smov 0   ;;  %s860_s27 = smov 0  }
   0x3 LB: > { %s875_s28 = sadd.s32 4294967295, %s808_s27   ;;  %s622_s29 = sadd.s32 4294967294, %s808_s27   ;;  %s808_s27 = sphi %s860_s27, %s1083_s27   ;;  %s804_s26 = sphi %s858_s26, %s1082_s26   ;;  %s800_s25 = sphi %s856_s25, %s1081_s25   ;;  %s796_s24 = sphi %s854_s24, %s1080_s24  }
   0x4   : > { %s879_s30 = sadd.s32 1, %s808_s27   ;;  %s164_s8 = sadd.s32 1, %s804_s26 }
   0x5   : > { %s161_s9 = ssub.s32 %s808_s27, %s879_s30  ;;  %p174_p0 = scmp.ne.s32.totalorder %s804_s26, %s800_s25 }
   0x6   : > { %p162_p1 = scmp.eq.s32.totalorder %s161_s9, 0  ;;  %p175_p2 = scmp.eq.s32.totalorder %s875_s28, 1 }
   0x7   : > { %p180_p3 = scmp.ne.s32.totalorder %s800_s25, %s796_s24  ;;  %p181_p4 = scmp.eq.s32.totalorder %s622_s29, 1 }
   0x8   : > { %s890_s10 = scalar_select %p162_p1, %s804_s26, %s164_s8  }
   0x9   : > { %p892_p5 = por %p175_p2, %p174_p0  ;;  %p896_p6 = por %p181_p4, %p180_p3 }
   0xa   : > { %p625_p7 = scmp.ge.s32.totalorder %s808_s27, 1  ;;  %p245_p8 = scmp.lt.s32.totalorder %s808_s27, 3 }
   0xc   : > { %p246_p9 = pnand %p625_p7, %p245_p8 }
   0xd   : > { %v296_v0 = vld [vmem:[%s1071_s1] sm:$0xff] (!%p246_p9)  ;;  %v297_v1 = vld [vmem:[%s1071_s1 + $0x8] sm:$0xff] (!%p246_p9)  ;;  %v298_v2 = vld [vmem:[%s1071_s1 + $0x10] sm:$0xff] (!%p246_p9)  ;;  %p283_p10 = scmp.lt.s32.totalorder (!%p246_p9), %s875_s28, 1  ;;  %v810_v3 = vmov (!%p246_p9), 0.0|0.0   ;;  %vm329_vm0 = vcmask (!%p246_p9), 523264  }
   0xe   : > { %249 = sbr.rel (%p246_p9) target bundleno = 507 (0x1fb), region = 40  ;;  %658 = vmatprep.subr.bf16.mxu0 (!%p246_p9), %v810_v3  ;;  %v659_v4 = vpack.c.bf16 (!%p246_p9), %v297_v1, %v296_v0  ;;  %v299_v5 = vld [vmem:[%s1071_s1 + $0x18] sm:$0xff] (!%p246_p9)  ;;  %694 = vmatprep.subr.bf16.mxu1 (!%p246_p9), %v810_v3  ;;  %v300_v7 = vld [vmem:[%s1071_s1 + $0x20] sm:$0xff] (!%p246_p9)  ;;  %v301_v8 = vld [vmem:[%s1071_s1 + $0x28] sm:$0xff] (!%p246_p9)  ;;  %vm811_vm1 = vmmov (!%p246_p9), 0   ;;  %v812_v48 = vmov (!%p246_p9), 0.0  }
   0xf   : > { %v662_v6 = vpack.c.bf16 (!%p246_p9), %v299_v5, %v298_v2  ;;  %v665_v9 = vpack.c.bf16 (!%p246_p9), %v301_v8, %v300_v7  ;;  %v302_v10 = vld [vmem:[%s1071_s1 + $0x30] sm:$0xff] (!%p246_p9)  ;;  %v303_v11 = vld [vmem:[%s1071_s1 + $0x38] sm:$0xff] (!%p246_p9)  ;;  %v304_v15 = vld [vmem:[%s1071_s1 + $0x40] sm:$0xff] (!%p246_p9)  ;;  %655 = vmatprep.mubr.msk.f32.mxu1 (!%p246_p9), %vm811_vm1, %v812_v48  ;;  %vm402_vm2 = vcmask (!%p246_p9), 388096   ;;  %s276_s18 = sand.u32 (!%p246_p9), 1, %s800_s25   ;;  %vm422_vm3 = vcmask (!%p246_p9), 392192  }
  0x10   : > { %660 = vmatpush1.bf16.msra.mxu0 (!%p246_p9), %v659_v4  ;;  %v668_v14 = vpack.c.bf16 (!%p246_p9), %v303_v11, %v302_v10  ;;  %v305_v16 = vld [vmem:[%s1071_s1 + $0x48] sm:$0xff] (!%p246_p9)  ;;  %v306_v18 = vld [vmem:[%s1071_s1 + $0x50] sm:$0xff] (!%p246_p9)  ;;  %v307_v19 = vld [vmem:[%s1071_s1 + $0x58] sm:$0xff] (!%p246_p9)  ;;  %vm413_vm4 = vcmask (!%p246_p9), 385024   ;;  %s277_s19 = scalar_lea.vmem (!%p246_p9), [#allocation2], %s276_s18  ;;  %s632_s20 = sshll.u32 (!%p246_p9), %s875_s28, 4 }
  0x11   : > { %661 = vmatprep.subr.bf16.mxu0 (!%p246_p9), %v810_v3  ;;  %v671_v17 = vpack.c.bf16 (!%p246_p9), %v305_v16, %v304_v15  ;;  %v674_v20 = vpack.c.bf16 (!%p246_p9), %v307_v19, %v306_v18  ;;  %v308_v21 = vld [vmem:[%s1071_s1 + $0x60] sm:$0xff] (!%p246_p9)  ;;  %v309_v22 = vld [vmem:[%s1071_s1 + $0x68] sm:$0xff] (!%p246_p9)  ;;  %v310_v24 = vld [vmem:[%s1071_s1 + $0x70] sm:$0xff] (!%p246_p9)  ;;  %s521_s22 = sshll.u32 (!%p246_p9), %s277_s19, 4  ;;  %s1027_s8 = scalar_lea.hbm (!%p246_p9), %s1076_s6, %s632_s20  ;;  %s522_s22 = int_to_ptr.vmem [resolvable:$true] %s521_s22 }
  0x12   : > { %v677_v23 = vpack.c.bf16 (!%p246_p9), %v309_v22, %v308_v21  ;;  %v311_v25 = vld [vmem:[%s1071_s1 + $0x78] sm:$0xff] (!%p246_p9)  ;;  %v312_v27 = vld [vmem:[%s1071_s1 + $0x80] sm:$0xff] (!%p246_p9)  ;;  %v313_v28 = vld [vmem:[%s1071_s1 + $0x88] sm:$0xff] (!%p246_p9)  ;;  %s746_s13 = scalar_lea.vmem (!%p246_p9), %s522_s22, 16  ;;  %s813_s14 = smov (!%p246_p9), [#allocation2]  }
  0x13   : > { %v680_v26 = vpack.c.bf16 (!%p246_p9), %v311_v25, %v310_v24  ;;  %v683_v29 = vpack.c.bf16 (!%p246_p9), %v313_v28, %v312_v27  ;;  %v314_v30 = vld [vmem:[%s1071_s1 + $0x90] sm:$0xff] (!%p246_p9)  ;;  %v315_v31 = vld [vmem:[%s1071_s1 + $0x98] sm:$0xff] (!%p246_p9)  ;;  %v316_v33 = vld [vmem:[%s1071_s1 + $0xa0] sm:$0xff] (!%p246_p9)  ;;  %p747_p11 = scmp.ne.s32.totalorder (!%p246_p9), %s522_s22, %s746_s13 }
  0x14   : > { %663 = vmatpush1.bf16.msra.mxu0 (!%p246_p9), %v662_v6  ;;  %v686_v32 = vpack.c.bf16 (!%p246_p9), %v315_v31, %v314_v30  ;;  %v317_v34 = vld [vmem:[%s1071_s1 + $0xa8] sm:$0xff] (!%p246_p9)  ;;  %v318_v36 = vld [vmem:[%s1071_s1 + $0xb0] sm:$0xff] (!%p246_p9)  ;;  %v319_v37 = vld [vmem:[%s1071_s1 + $0xb8] sm:$0xff] (!%p246_p9) }
  0x15   : > { %s918_s21 = scalar_select %p283_p10, %s875_s28, 1  ;;  %664 = vmatprep.subr.bf16.mxu0 %v810_v3  ;;  %v689_v35 = vpack.c.bf16 %v317_v34, %v316_v33  ;;  %v692_v38 = vpack.c.bf16 %v319_v37, %v318_v36  ;;  %v415_v39 = vld [vmem:[%s1073_s3] sm:$0xff]  ;;  %v416_v40 = vld [vmem:[%s1073_s3 + $0x8] sm:$0xff]  ;;  %v417_v42 = vld [vmem:[%s1073_s3 + $0x10] sm:$0xff] }
  0x16   : > { %v695_v41 = vpack.c.bf16 %v416_v40, %v415_v39  ;;  %v418_v43 = vld [vmem:[%s1073_s3 + $0x18] sm:$0xff]  ;;  %v419_v45 = vld [vmem:[%s1073_s3 + $0x20] sm:$0xff]  ;;  %v420_v46 = vld [vmem:[%s1073_s3 + $0x28] sm:$0xff]  ;;  %p748_p12 = pnand %p747_p11, %p892_p5 }
  0x17   : > { %s635_s9 = sshll.u32 %s918_s21, 3  ;;  %v698_v44 = vpack.c.bf16 %v418_v43, %v417_v42  ;;  %v701_v47 = vpack.c.bf16 %v420_v46, %v419_v45  ;;  %v629_v49 = vld [vmem:[%s1072_s2] ss:$0 sm:$0xff] }
  0x18   : > { %s287_s15 = scalar_lea.vmem %s1070_s0, %s635_s9  ;;  %666 = vmatpush1.bf16.msra.mxu0 %v665_v9  ;;  %696 = vmatpush3.bf16.msra.mxu1 %v695_v41  ;;  %s628_s9 = sshll.u32 %s918_s21, 2 }
  0x19   : > { %v295_v12 = vld [vmem:[%s287_s15] sm:$0xff]  ;;  %667 = vmatprep.subr.bf16.mxu0 %v810_v3  ;;  %697 = vmatprep.subr.bf16.mxu1 %v810_v3  ;;  %s291_s17 = scalar_lea.vmem %s1075_s5, %s628_s9  ;;  %s503_s9 = scalar_lea.sflag [#allocation3], %s276_s18 }
  0x1a   : > { %v328_v13 = vcombine.high %v295_v12, %v295_v12  ;;  %p749_p13 = pneg %p748_p12  ;;  %s750_s15 = sshll.u32 %s813_s14, 4  ;;  %s751_s15 = int_to_ptr.vmem [resolvable:$false] %s750_s15 }
  0x1b   : > { %s752_s16 = scalar_lea.vmem %s751_s15, 32  ;;  %p753_p0 = scmp.lt.s32.totalorder %s522_s22, %s751_s15 }
  0x1c   : > { %630 = vmatprep.mubr.msk.f32.mxu0 %vm329_vm0, %v328_v13  ;;  %669 = vmatpush1.bf16.msra.mxu0 %v668_v14  ;;  %p754_p1 = scmp.lt.s32.totalorder %s752_s16, %s746_s13 }
  0x1d   : > { %670 = vmatprep.subr.bf16.mxu0 %v810_v3  ;;  %699 = vmatpush3.bf16.msra.mxu1 %v698_v44 }
  0x1e   : > { %700 = vmatprep.subr.bf16.mxu1 %v810_v3  ;;  %p755_p2 = por %p754_p1, %p753_p0 }
  0x20   : > { %672 = vmatpush1.bf16.msra.mxu0 %v671_v17  ;;  %p756_p3 = pnand %p755_p2, %p749_p13 }
  0x21   : > { %673 = vmatprep.subr.bf16.mxu0 %v810_v3  ;;  %702 = vmatpush3.bf16.msra.mxu1 %v701_v47 }
  0x24   : > { %675 = vmatpush1.bf16.msra.mxu0 %v674_v20 }
  0x25   : > { %676 = vmatprep.subr.bf16.mxu0 %v810_v3 }
  0x28   : > { %678 = vmatpush1.bf16.msra.mxu0 %v677_v23 }
  0x29   : > { %679 = vmatprep.subr.bf16.mxu0 %v810_v3 }
  0x2c   : > { %681 = vmatpush1.bf16.msra.mxu0 %v680_v26 }
  0x2d   : > { %682 = vmatprep.subr.bf16.mxu0 %v810_v3 }
  0x30   : > { %684 = vmatpush1.bf16.msra.mxu0 %v683_v29 }
  0x31   : > { %685 = vmatprep.subr.bf16.mxu0 %v810_v3 }
  0x34   : > { %687 = vmatpush1.bf16.msra.mxu0 %v686_v32 }
  0x35   : > { %688 = vmatprep.subr.bf16.mxu0 %v810_v3 }
  0x38   : > { %690 = vmatpush1.bf16.msra.mxu0 %v689_v35 }
  0x39   : > { %691 = vmatprep.subr.bf16.mxu0 %v810_v3 }
  0x3c   : > { %693 = vmatpush1.bf16.msra.mxu0 %v692_v38 }
  0x3f   : > { %397 = vmatmul.mubr.f32.vlgmr.msra.gmra.mrb[0].mxu0 %v295_v12 }
 0x112   : > { %v398_v50 = vpop.f32.mrb[0].mxu0 }
 0x113   : > { %v399_v51 = vadd.f32 %v629_v49, %v398_v50  ;;  %v400_v52 = vpop.f32.mrb[1].mxu0 }
 0x115   : > { %403 = vst.msk [vmem:[%s291_s17] sm:$0xf] %vm402_vm2, %v399_v51  ;;  %v404_v53 = vsel %vm402_vm2, %v399_v51, 0.0 }
 0x116   : > { %v405_v54 = vrot.slane %v404_v53, 4 }
 0x118   : > { %v406_v55 = vadd.f32 %v405_v54, %v404_v53 }
 0x11a   : > { %v407_v56 = vrot.slane %v406_v55, 2 }
 0x11c   : > { %v408_v57 = vadd.f32 %v407_v56, %v406_v55 }
 0x11e   : > { %v409_v58 = vrot.slane %v408_v57, 1 }
 0x120   : > { %v410_v59 = vadd.f32 %v409_v58, %v408_v57 }
 0x122   : > { %v412_v60 = vmul.f32 0.25, %v410_v59 }
 0x124   : > { %656 = vmatmul.mubr.msk.f32.vlgmr.msra.gmra.mrb[0].mxu1 %vm422_vm3, %v412_v60  ;;  %414 = vst.msk [vmem:[%s277_s19] sm:$0x1] %vm413_vm4, %v412_v60 }
 0x125   : > { %759 = shalt.err (!%p756_p3)
}
 0x126   : > { %s760_s28 = scalar_lea.hbm %s1027_s8, 16  ;;  %s764_s19 = scalar_lea.hbm %s1076_s6, 32 }
 0x127   : > { %p761_p4 = scmp.ne.s32.totalorder %s1027_s8, %s760_s28  ;;  %p765_p9 = scmp.lt.u32.totalorder %s1027_s8, %s1076_s6 }
 0x128   : > { %p766_p10 = scmp.lt.u32.totalorder %s764_s19, %s760_s28  ;;  %p768_p12 = scmp.lt.u32.totalorder %s760_s28, %s1027_s8 }
 0x129   : > { %p762_p7 = pnand %p761_p4, %p892_p5 }
 0x12a   : > { %p767_p11 = por %p766_p10, %p765_p9 }
 0x12b   : > { %p763_p8 = pneg %p762_p7 }
 0x12c   : > { %p769_p13 = por %p768_p12, %p767_p11 }
 0x12e   : > { %p770_p0 = pnand %p769_p13, %p763_p8 }
 0x130   : > { %773 = shalt.err (!%p770_p0)
}
 0x131   : > { %703 = dma.vmem_to_hbm [thread:$0]  (%p892_p5), %s522_s22, 16, %s1027_s8, %s503_s9   ;;  %v421_v61 = vld [vmem:[%s1074_s4] sm:$0x1]  ;;  %vm496_vm5 = vcmask 106496  }
 0x132   : > { %s294_s16 = scalar_lea.vmem %s1077_s7, %s918_s21 }
 0x1f7   : > { %v492_v62 = vpop.f32.mrb[0].mxu1 }
 0x1f8   : > { %v493_v63 = vadd.f32 %v492_v62, %v421_v61  ;;  %v657_v0 = vpop.f32.mrb[1].mxu1 }
 0x1fa   : > { %497 = vst.msk [vmem:[%s294_s16] sm:$0x1] %vm496_vm5, %v493_v63 }
 0x1fb PF: > { %p709_p1 = scmp.ge.s32.totalorder %s808_s27, 2  ;;  %s543_s11 = sand.u32 1, %s796_s24  }
 0x1fc   : > { %s544_s22 = scalar_lea.sflag [#allocation3], %s543_s11 }
 0x1fd   : > { %p706_p5 = pnand %p709_p1, %p896_p6 }
 0x1ff   : > { %791 = dma.done.wait (!%p706_p5), %s544_s22, 16  }
 0x200   : > { %793 = vsyncadd (!%p706_p5), %s544_s22, 4294967280  ;;  %p18_p2 = scmp.ge.s32.totalorder %s879_s30, 4   ;;  %s1080_s24 = smov %s800_s25 }
 0x201   : > { %s1081_s25 = smov %s804_s26  ;;  %s1082_s26 = smov %s890_s10 }
 0x202   : > { %s1083_s27 = smov %s879_s30  ;;  %20 = sbr.rel (!%p18_p2) target bundleno = 3 (0x3), region = 99 }
 0x209   :  { %554 = vsyncpa [#allocation3], 1 }
 0x20a   :  { %556 = vsyncpa [#allocation3 + $0x1], 1 }

// kernel: lamrg_v8_forward.29
= control target key start
LH: loop header
LB: loop body
LE: loop exit
PB: predicated region body
PF: predicated region fallthrough
CT: control target
= control target key end

     0   :  { %s2186_s29 = smov 0   ;;  %s2389_s0 = inlined_call_operand.vmem [shape: f32[2,1,14], index: 0, kind: input, shape index: {}]   ;;  %s2390_s1 = inlined_call_operand.vmem [shape: f32[2,3,32], index: 1, kind: input, shape index: {}]   ;;  %s2391_s2 = inlined_call_operand.vmem [shape: f32[14,32], index: 2, kind: input, shape index: {}]   ;;  %s2392_s3 = inlined_call_operand.vmem [shape: f32[1,32], index: 3, kind: input, shape index: {}]   ;;  %s2393_s4 = inlined_call_operand.vmem [shape: f32[1,32], index: 4, kind: input, shape index: {}]   ;;  %s2394_s5 = inlined_call_operand.vmem [shape: f32[1,32], index: 5, kind: input, shape index: {}]   ;;  %s2395_s6 = inlined_call_operand.vmem [shape: f32[32,32], index: 6, kind: input, shape index: {}]   ;;  %s2396_s7 = inlined_call_operand.vmem [shape: f32[1,32], index: 7, kind: input, shape index: {}]   ;;  %s2397_s8 = inlined_call_operand.vmem [shape: f32[32,64], index: 8, kind: input, shape index: {}]   ;;  %s2398_s9 = inlined_call_operand.vmem [shape: f32[1,64], index: 9, kind: input, shape index: {}]   ;;  %s2399_s10 = inlined_call_operand.vmem [shape: f32[32,32], index: 10, kind: input, shape index: {}]   ;;  %s2400_s11 = inlined_call_operand.vmem [shape: f32[1,32], index: 11, kind: input, shape index: {}]   ;;  %s2401_s12 = inlined_call_operand.vmem [shape: f32[32,48], index: 12, kind: input, shape index: {}]   ;;  %s2402_s13 = inlined_call_operand.vmem [shape: f32[1,48], index: 13, kind: input, shape index: {}]   ;;  %s2403_s14 = inlined_call_operand.vmem [shape: f32[2,1,48], index: 14, kind: output, shape index: {}]  }
   0x1 LB: > { %s1855_s30 = sadd.s32 4294967295, %s2098_s29   ;;  %p1859_p0 = scmp.ge.s32.totalorder %s2098_s29, 1  ;;  %s2098_s29 = sphi %s2186_s29, %s24_s29  }
   0x2   : > { %p419_p1 = scmp.lt.s32.totalorder %s2098_s29, 3 }
   0x4   : > { %p420_p2 = pnand %p1859_p0, %p419_p1 }
   0x5   : > { %v476_v0 = vld [vmem:[%s2391_s2] sm:$0xff] (!%p420_p2)  ;;  %v477_v1 = vld [vmem:[%s2391_s2 + $0x8] sm:$0x3f] (!%p420_p2)  ;;  %vm483_vm0 = vcmask (!%p420_p2), 1045504   ;;  %v2100_v2 = vmov (!%p420_p2), 0.0|0.0   ;;  %vm2101_vm1 = vmmov (!%p420_p2), 1  }
   0x6   : > { %423 = sbr.rel (%p420_p2) target bundleno = 3334 (0xd06), region = 76  ;;  %2031 = vmatprep.subr.bf16.mxu0 (!%p420_p2), %v2100_v2  ;;  %v2032_v3 = vpack.c.bf16 (!%p420_p2), %v477_v1, %v476_v0  ;;  %vm2033_vm2 = vmpackc.low (!%p420_p2), %vm483_vm0, %vm2101_vm1  ;;  %p465_p3 = scmp.lt.s32.totalorder (!%p420_p2), %s1855_s30, 1  ;;  %2035 = vmatprep.subr.bf16.mxu1 (!%p420_p2), %v2100_v2  ;;  %vm2102_vm3 = vmmov (!%p420_p2), 0   ;;  %v2103_v4 = vmov (!%p420_p2), 0.0   ;;  %vm479_vm4 = vcmask (!%p420_p2), 113664   ;;  %v664_v16 = vld [vmem:[%s2397_s8] sm:$0xff] (!%p420_p2) }
   0x7   : > { %1935 = vmatprep.mubr.msk.f32.mxu0 (!%p420_p2), %vm2102_vm3, %v2103_v4  ;;  %1946 = vmatprep.mubr.msk.f32.mxu1 (!%p420_p2), %vm2102_vm3, %v2103_v4  ;;  %v478_v6 = vld [vmem:[%s2392_s3] sm:$0x1] (!%p420_p2)  ;;  %vm560_vm5 = vcmask (!%p420_p2), 253952   ;;  %v665_v17 = vld [vmem:[%s2397_s8 + $0x8] sm:$0xff] (!%p420_p2)  ;;  %v666_v18 = vld [vmem:[%s2397_s8 + $0x10] sm:$0xff] (!%p420_p2)  ;;  %vm590_vm6 = vcmask (!%p420_p2), 261120  }
   0x8   : > { %2034 = vmatpush3.bf16.msk.msra.mxu0 (!%p420_p2), %vm2033_vm2, %v2032_v3  ;;  %v2042_v19 = vpack.c.bf16 (!%p420_p2), %v665_v17, %v664_v16  ;;  %v667_v20 = vld [vmem:[%s2397_s8 + $0x18] sm:$0xff] (!%p420_p2)  ;;  %v585_v21 = vld [vmem:[%s2395_s6] sm:$0xff] (!%p420_p2)  ;;  %v586_v22 = vld [vmem:[%s2395_s6 + $0x8] sm:$0xff] (!%p420_p2)  ;;  %vm752_vm9 = vcmask (!%p420_p2), 64512   ;;  %vm830_vm10 = vcmask (!%p420_p2), 16384   ;;  %s2105_s25 = smov (!%p420_p2), 96  }
   0x9   : > { %2041 = vmatprep.subr.bf16.mxu0 (!%p420_p2), %v2100_v2  ;;  %v2036_v23 = vpack.c.bf16 (!%p420_p2), %v586_v22, %v585_v21  ;;  %v587_v24 = vld [vmem:[%s2395_s6 + $0x10] sm:$0xff] (!%p420_p2)  ;;  %v588_v25 = vld [vmem:[%s2395_s6 + $0x18] sm:$0xff] (!%p420_p2)  ;;  %v2045_v26 = vpack.c.bf16 (!%p420_p2), %v667_v20, %v666_v18  ;;  %v558_v37 = vld [vmem:[%s2393_s4] sm:$0x1] (!%p420_p2)  ;;  %s2106_s26 = smov (!%p420_p2), 112   ;;  %vm848_vm11 = vcmask (!%p420_p2), 1042432  }
   0xa   : > { %v2039_v27 = vpack.c.bf16 (!%p420_p2), %v588_v25, %v587_v24  ;;  %v559_v40 = vld [vmem:[%s2394_s5] sm:$0x1] (!%p420_p2)  ;;  %s2107_s27 = smov (!%p420_p2), 88   ;;  %vm844_vm12 = vcmask (!%p420_p2), 23552   ;;  %s2108_s18 = smov (!%p420_p2), 80   ;;  %vm1797_vm13 = vcmask (!%p420_p2), 385024  }
   0xb   : > { %2037 = vmatpush3.bf16.msra.mxu1 (!%p420_p2), %v2036_v23  ;;  %v1864_v43 = vld [vmem:[%s2398_s9] ss:$0 sm:$0xff] (!%p420_p2)  ;;  %s2109_s19 = smov (!%p420_p2), 104  }
   0xc   : > { %2038 = vmatprep.subr.bf16.mxu1 (!%p420_p2), %v2100_v2  ;;  %v589_v47 = vld [vmem:[%s2396_s7] sm:$0x1] (!%p420_p2) }
   0xd   : > { %s2405_s30 = smov (!%p465_p3, %s1855_s30), 1 }
   0xe   : > { %s467_s21 = scalar_lea.vmem %s2389_s0, %s2405_s30  ;;  %s1860_s22 = sshll.u32 %s2405_s30, 2 }
   0xf   : > { %v475_v5 = vld [vmem:[%s467_s21] sm:$0x1]  ;;  %s471_s15 = scalar_lea.vmem %s2390_s1, %s1860_s22  ;;  %2040 = vmatpush3.bf16.msra.mxu1 %v2039_v27  ;;  %s2104_s22 = smov 120  }
  0x10   : > { %1936 = vmatmul.mubr.msk.f32.vlgmr.msra.gmra.mrb[0].mxu0 %vm479_vm4, %v475_v5  ;;  %v557_v28 = vld [vmem:[%s471_s15] sm:$0x7]  ;;  %1960 = vmatprep.subr.mxu1 %v2103_v4 }
  0x11   : > { %1957 = vmatprep.mubr.msk.f32.mxu0 %vm2102_vm3, %v2103_v4  ;;  %2043 = vmatpush3.bf16.msra.mxu0 %v2042_v19  ;;  %v748_v19 = vld [vmem:[%s2399_s10] sm:$0xff] }
  0x12   : > { %2044 = vmatprep.subr.bf16.mxu0 %v2100_v2 }
  0x15   : > { %2046 = vmatpush3.bf16.msra.mxu0 %v2045_v26 }
  0x16   : > { %1965 = vmatprep.subr.mxu0 %v2103_v4 }
  0x18   : > { %1958 = vmatmul.mubr.msk.f32.vlgmr.msra.gmra.mrb[2].mxu0 %vm590_vm6, %v557_v28 }
  0x19   : > { %1967 = vmatprep.mubr.msk.f32.mxu0 %vm2102_vm3, %v2103_v4 }
  0xe3   : > { %v553_v7 = vpop.f32.mrb[0].mxu0 }
  0xe4   : > { %v2218_v8 = vadd.f32 %v553_v7, %v478_v6  ;;  %v1937_v9 = vpop.f32.mrb[1].mxu0 }
  0xe6   : > { %v561_v10 = vsel %vm560_vm5, %v2218_v8, 0.0 }
  0xe7   : > { %562 = vadd.xlane.f32.xlu0 %v561_v10 }
  0xeb   : > { %v744_v44 = vpop.f32.mrb[2].mxu0 }
  0xec   : > { %v2269_v45 = vadd.f32 %v1864_v43, %v744_v44  ;;  %v1959_v46 = vpop.f32.mrb[3].mxu0 }
  0xee   : > { %923 = vrot.lane.b32.xlu1 %v2269_v45, %s2104_s22 }
 0x160   : > { %v924_v51 = vpop.permute.xlu1 %923 }
 0x174   : > { %v563_v11 = vpop.xlane.xlu0 %562 }
 0x175   : > { %v565_v12 = vmul.f32 0.03125, %v563_v11 }
 0x177   : > { %v566_v13 = vsub.f32 %v2218_v8, %v565_v12 }
 0x179   : > { %v567_v14 = vmul.f32 %v566_v13, %v566_v13  ;;  %v573_v38 = vmul.f32 %v566_v13, %v558_v37 }
 0x17b   : > { %v568_v15 = vsel %vm560_vm5, %v567_v14, 0.0  ;;  %v749_v14 = vld [vmem:[%s2399_s10 + $0x8] sm:$0xff] }
 0x17c   : > { %569 = vadd.xlane.f32.xlu0 %v568_v15 }
 0x209   : > { %v570_v29 = vpop.xlane.xlu0 %569 }
 0x20a   : > { %v572_v30 = vmul.f32 0.032258064, %v570_v29 }
 0x20c   : > { %2072 = vrsqrt.f32 %v572_v30  ;;  %vm576_vm7 = vcmp.eq.f32.partialorder %v572_v30, inf  ;;  %v579_v33 = vand.u32 2147483648, %v572_v30  ;;  %vm578_vm8 = vcmp.eq.f32.partialorder %v572_v30, 0.0 }
 0x216   : > { %v2073_v31 = vpop.eup %2072 }
 0x217   : > { %v575_v32 = vmul.f32 %v2073_v31, %v572_v30 }
 0x219   : > { %v577_v34 = vsel %vm576_vm7, %v572_v30, %v575_v32 }
 0x21a   : > { %v580_v35 = vsel %vm578_vm8, %v579_v33, %v577_v34 }
 0x21b   : > { %v581_v36 = vadd.f32 1e-06, %v580_v35 }
 0x21d   : > { %2074 = vrcp.f32 %v581_v36 }
 0x227   : > { %v2075_v39 = vpop.eup %2074 }
 0x228   : > { %v583_v41 = vmul.f32 %v2075_v39, %v573_v38 }
 0x22a   : > { %v584_v42 = vadd.f32 %v583_v41, %v559_v40 }
 0x22c   : > { %1947 = vmatmul.mubr.msk.f32.vlgmr.msra.gmra.mrb[0].mxu1 %vm590_vm6, %v584_v42 }
 0x22d   : > { %1962 = vmatprep.mubr.msk.f32.mxu1 %vm2102_vm3, %v2103_v4  ;;  %1961 = vmatpush3.xpose.msk.msra.mxu1 %vm752_vm9, %v2269_v45 }
 0x22e   : > { %1970 = vmatprep.subr.mxu1 %v2103_v4 }
 0x2ff   : > { %v660_v48 = vpop.f32.mrb[0].mxu1 }
 0x300   : > { %v2278_v49 = vadd.f32 %v660_v48, %v589_v47  ;;  %v1948_v50 = vpop.f32.mrb[1].mxu1  ;;  %v750_v47 = vld [vmem:[%s2399_s10 + $0x10] sm:$0xff] }
 0x302   : > { %921 = vrot.lane.b32.xlu1 %v2278_v49, %s2104_s22  ;;  %1963 = vmatmul.mubr.msk.f32.vlgmr.msra.gmra.mrb[2].mxu1 %vm752_vm9, %v2278_v49  ;;  %s2110_s22 = smov 72  }
 0x303   : > { %1971 = vmatpush3.xpose.msk.msra.mxu1 %vm752_vm9, %v924_v51  ;;  %1972 = vmatprep.mubr.msk.f32.mxu1 %vm2102_vm3, %v2103_v4 }
 0x304   : > { %1980 = vmatprep.subr.mxu1 %v2103_v4 }
 0x374   : > { %v922_v52 = vpop.permute.xlu1 %921 }
 0x375   : > { %1973 = vmatmul.mubr.msk.f32.vlgmr.msra.gmra.mrb[4].mxu1 %vm752_vm9, %v922_v52 }
 0x376   : > { %1982 = vmatprep.mubr.msk.f32.mxu1 %vm2102_vm3, %v2103_v4  ;;  %1981 = vmatpush3.msra.mxu1 %v749_v14 }
 0x377   : > { %1990 = vmatprep.subr.mxu1 %v2103_v4 }
 0x3d5   : > { %v825_v53 = vpop.f32.mrb[2].mxu1 }
 0x3d6   : > { %v829_v54 = vmul.f32 0.35355338, %v825_v53  ;;  %v1964_v55 = vpop.f32.mrb[3].mxu1 }
 0x3d8   : > { %v831_v56 = vsel %vm830_vm10, %v829_v54, -inf }
 0x3d9   : > { %832 = vmax.xlane.f32.xlu0 %v831_v56 }
 0x3ef   : > { %842 = vrot.lane.b32.xlu0 %v2269_v45, %s2105_s25  ;;  %s474_s25 = scalar_lea.vmem %s2403_s14, %s2405_s30 }
 0x448   : > { %v995_v57 = vpop.f32.mrb[4].mxu1 }
 0x449   : > { %v999_v58 = vmul.f32 0.35355338, %v995_v57  ;;  %v1974_v59 = vpop.f32.mrb[5].mxu1 }
 0x44b   : > { %v1000_v60 = vsel %vm830_vm10, %v999_v58, -inf }
 0x44c   : > { %1001 = vmax.xlane.f32.xlu1 %v1000_v60  ;;  %v751_v60 = vld [vmem:[%s2399_s10 + $0x18] sm:$0xff] }
 0x45d   : > { %1236 = vrot.lane.b32.xlu1 %v2269_v45, %s2106_s26 }
 0x466   : > { %v833_v61 = vpop.xlane.xlu0 %832 }
 0x467   : > { %v834_v62 = vsub.f32 %v829_v54, %v833_v61 }
 0x469   : > { %v835_v63 = vmul.f32 1.442695, %v834_v62 }
 0x46a   : > { %v843_v0 = vpop.permute.xlu0 %842 }
 0x46b   : > { %2076 = vpow2.f32 %v835_v63  ;;  %1966 = vmatpush3.msk.msra.mxu0 %vm848_vm11, %v843_v0 }
 0x46c   : > { %1975 = vmatprep.subr.mxu0 %v2103_v4 }
 0x475   : > { %v2077_v1 = vpop.eup %2076 }
 0x476   : > { %v837_v3 = vsel %vm830_vm10, %v2077_v1, 0.0 }
 0x477   : > { %838 = vadd.xlane.f32.xlu0 %v837_v3 }
 0x4d9   : > { %v1002_v5 = vpop.xlane.xlu1 %1001 }
 0x4da   : > { %v1003_v6 = vsub.f32 %v999_v58, %v1002_v5 }
 0x4dc   : > { %v1004_v7 = vmul.f32 1.442695, %v1003_v6  ;;  %v1719_v6 = vld [vmem:[%s2401_s12] sm:$0xff] }
 0x4dd   : > { %v1237_v23 = vpop.permute.xlu1 %1236 }
 0x4de   : > { %2078 = vpow2.f32 %v1004_v7  ;;  %v1720_v7 = vld [vmem:[%s2401_s12 + $0x8] sm:$0xff] }
 0x4e8   : > { %v2079_v9 = vpop.eup %2078 }
 0x4e9   : > { %v1006_v10 = vsel %vm830_vm10, %v2079_v9, 0.0 }
 0x4ea   : > { %1007 = vadd.xlane.f32.xlu0 %v1006_v10  ;;  %v1722_v10 = vld [vmem:[%s2401_s12 + $0x18] sm:$0xff] }
 0x500   : > { %1011 = vrot.lane.b32.xlu0 %v2269_v45, %s2107_s27 }
 0x504   : > { %v839_v11 = vpop.xlane.xlu0 %838  ;;  %1234 = vrot.lane.b32.xlu0 %v2278_v49, %s2106_s26 }
 0x505   : > { %2080 = vrcp.f32 %v839_v11 }
 0x50f   : > { %v2081_v12 = vpop.eup %2080 }
 0x510   : > { %v841_v13 = vmul.f32 %v2081_v12, %v2077_v1 }
 0x512   : > { %1968 = vmatmul.mubr.msk.f32.vlgmr.msra.gmra.mrb[4].mxu0 %vm844_vm12, %v841_v13 }
 0x513   : > { %1977 = vmatprep.mubr.msk.f32.mxu0 %vm2102_vm3, %v2103_v4 }
 0x577   : > { %v1008_v15 = vpop.xlane.xlu0 %1007 }
 0x578   : > { %2082 = vrcp.f32 %v1008_v15  ;;  %v1717_v15 = vld [vmem:[%s2400_s11] sm:$0x1] }
 0x57b   : > { %v1012_v16 = vpop.permute.xlu0 %1011 }
 0x57c   : > { %1976 = vmatpush3.msk.msra.mxu0 %vm848_vm11, %v1012_v16 }
 0x57d   : > { %1985 = vmatprep.subr.mxu0 %v2103_v4 }
 0x57f   : > { %v1235_v25 = vpop.permute.xlu0 %1234 }
 0x582   : > { %v2083_v17 = vpop.eup %2082 }
 0x583   : > { %v1010_v18 = vmul.f32 %v2083_v17, %v2079_v9  ;;  %v2048_v9 = vpack.c.bf16 %v1720_v7, %v1719_v6  ;;  %v1723_v17 = vld [vmem:[%s2402_s13] sm:$0x1] }
 0x585   : > { %1978 = vmatmul.mubr.msk.f32.vlgmr.msra.gmra.mrb[6].mxu0 %vm844_vm12, %v1010_v18 }
 0x586   : > { %1986 = vmatpush3.msra.mxu0 %v748_v19  ;;  %1987 = vmatprep.mubr.msk.f32.mxu0 %vm2102_vm3, %v2103_v4 }
 0x587   : > { %1995 = vmatprep.subr.mxu0 %v2103_v4 }
 0x5e5   : > { %v917_v20 = vpop.f32.mrb[4].mxu0 }
 0x5e6   : > { %v1969_v21 = vpop.f32.mrb[5].mxu0  ;;  %1988 = vmatmul.mubr.msk.f32.vlgmr.msra.gmra.mrb[8].mxu0 %vm752_vm9, %v917_v20 }
 0x5e7   : > { %1997 = vmatprep.mubr.msk.f32.mxu0 %vm2102_vm3, %v2103_v4 }
 0x658   : > { %v1084_v22 = vpop.f32.mrb[6].mxu0 }
 0x659   : > { %v1979_v24 = vpop.f32.mrb[7].mxu0  ;;  %1983 = vmatmul.mubr.msk.f32.vlgmr.msra.gmra.mrb[6].mxu1 %vm752_vm9, %v1084_v22 }
 0x65a   : > { %1991 = vmatpush3.xpose.msk.msra.mxu1 %vm752_vm9, %v1237_v23  ;;  %1992 = vmatprep.mubr.msk.f32.mxu1 %vm2102_vm3, %v2103_v4 }
 0x65b   : > { %2000 = vmatprep.subr.mxu1 %v2103_v4 }
 0x65d   : > { %1993 = vmatmul.mubr.msk.f32.vlgmr.msra.gmra.mrb[8].mxu1 %vm752_vm9, %v1235_v25 }
 0x65e   : > { %2002 = vmatprep.mubr.msk.f32.mxu1 %vm2102_vm3, %v2103_v4  ;;  %2001 = vmatpush3.msra.mxu1 %v750_v47 }
 0x65f   : > { %2010 = vmatprep.subr.mxu1 %v2103_v4 }
 0x6b9   : > { %v1230_v26 = vpop.f32.mrb[8].mxu0 }
 0x6ba   : > { %v1989_v27 = vpop.f32.mrb[9].mxu0 }
 0x72c   : > { %v1157_v28 = vpop.f32.mrb[6].mxu1 }
 0x72d   : > { %v1231_v29 = vadd.f32 %v1230_v26, %v1157_v28  ;;  %v1984_v30 = vpop.f32.mrb[7].mxu1 }
 0x730   : > { %v1308_v31 = vpop.f32.mrb[8].mxu1 }
 0x731   : > { %v1312_v32 = vmul.f32 0.35355338, %v1308_v31  ;;  %v1994_v33 = vpop.f32.mrb[9].mxu1 }
 0x733   : > { %v1313_v34 = vsel %vm830_vm10, %v1312_v32, -inf }
 0x734   : > { %1314 = vmax.xlane.f32.xlu0 %v1313_v34 }
 0x74a   : > { %1324 = vrot.lane.b32.xlu0 %v2269_v45, %s2108_s18 }
 0x74e   : > { %1475 = vrot.lane.b32.xlu0 %v2278_v49, %s2109_s19 }
 0x7c1   : > { %v1315_v35 = vpop.xlane.xlu0 %1314 }
 0x7c2   : > { %v1316_v36 = vsub.f32 %v1312_v32, %v1315_v35 }
 0x7c4   : > { %v1317_v37 = vmul.f32 1.442695, %v1316_v36 }
 0x7c5   : > { %v1325_v38 = vpop.permute.xlu0 %1324 }
 0x7c6   : > { %2084 = vpow2.f32 %v1317_v37  ;;  %1996 = vmatpush3.msk.msra.mxu0 %vm848_vm11, %v1325_v38 }
 0x7c7   : > { %2005 = vmatprep.subr.mxu0 %v2103_v4 }
 0x7c9   : > { %v1476_v46 = vpop.permute.xlu0 %1475 }
 0x7d0   : > { %v2085_v39 = vpop.eup %2084 }
 0x7d1   : > { %v1319_v40 = vsel %vm830_vm10, %v2085_v39, 0.0 }
 0x7d2   : > { %1320 = vadd.xlane.f32.xlu1 %v1319_v40 }
 0x7e3   : > { %1477 = vrot.lane.b32.xlu1 %v2269_v45, %s2109_s19 }
 0x85f   : > { %v1321_v41 = vpop.xlane.xlu1 %1320 }
 0x860   : > { %2086 = vrcp.f32 %v1321_v41 }
 0x863   : > { %v1478_v44 = vpop.permute.xlu1 %1477 }
 0x86a   : > { %v2087_v42 = vpop.eup %2086 }
 0x86b   : > { %v1323_v43 = vmul.f32 %v2087_v42, %v2085_v39 }
 0x86d   : > { %1998 = vmatmul.mubr.msk.f32.vlgmr.msra.gmra.mrb[10].mxu0 %vm844_vm12, %v1323_v43 }
 0x86e   : > { %2006 = vmatpush3.xpose.msk.msra.mxu0 %vm752_vm9, %v1478_v44  ;;  %2007 = vmatprep.mubr.msk.f32.mxu0 %vm2102_vm3, %v2103_v4 }
 0x86f   : > { %2015 = vmatprep.subr.mxu0 %v2103_v4 }
 0x871   : > { %2008 = vmatmul.mubr.msk.f32.vlgmr.msra.gmra.mrb[12].mxu0 %vm752_vm9, %v1476_v46 }
 0x872   : > { %2017 = vmatprep.mubr.msk.f32.mxu0 %vm2102_vm3, %v2103_v4  ;;  %2016 = vmatpush3.msra.mxu0 %v751_v60 }
 0x940   : > { %v1397_v48 = vpop.f32.mrb[10].mxu0 }
 0x941   : > { %v1999_v49 = vpop.f32.mrb[11].mxu0  ;;  %2003 = vmatmul.mubr.msk.f32.vlgmr.msra.gmra.mrb[10].mxu1 %vm752_vm9, %v1397_v48 }
 0x942   : > { %2012 = vmatprep.mubr.msk.f32.mxu1 %vm2102_vm3, %v2103_v4 }
 0x944   : > { %v1549_v50 = vpop.f32.mrb[12].mxu0 }
 0x945   : > { %v1553_v51 = vmul.f32 0.35355338, %v1549_v50  ;;  %v2009_v52 = vpop.f32.mrb[13].mxu0 }
 0x947   : > { %v1554_v53 = vsel %vm830_vm10, %v1553_v51, -inf }
 0x948   : > { %1555 = vmax.xlane.f32.xlu0 %v1554_v53 }
 0x95e   : > { %1565 = vrot.lane.b32.xlu0 %v2269_v45, %s2110_s22 }
 0x9d5   : > { %v1556_v54 = vpop.xlane.xlu0 %1555 }
 0x9d6   : > { %v1557_v55 = vsub.f32 %v1553_v51, %v1556_v54 }
 0x9d8   : > { %v1558_v56 = vmul.f32 1.442695, %v1557_v55 }
 0x9d9   : > { %v1566_v57 = vpop.permute.xlu0 %1565 }
 0x9da   : > { %2088 = vpow2.f32 %v1558_v56  ;;  %2011 = vmatpush3.msk.msra.mxu1 %vm848_vm11, %v1566_v57 }
 0x9db   : > { %2047 = vmatprep.subr.bf16.mxu1 %v2100_v2 }
 0x9e4   : > { %v2089_v58 = vpop.eup %2088 }
 0x9e5   : > { %v1560_v59 = vsel %vm830_vm10, %v2089_v58, 0.0 }
 0x9e6   : > { %1561 = vadd.xlane.f32.xlu1 %v1560_v59 }
 0xa14   : > { %v1470_v61 = vpop.f32.mrb[10].mxu1 }
 0xa15   : > { %v1474_v45 = vadd.f32 %v1470_v61, %v1231_v29  ;;  %v2004_v62 = vpop.f32.mrb[11].mxu1 }
 0xa73   : > { %v1562_v63 = vpop.xlane.xlu1 %1561 }
 0xa74   : > { %2090 = vrcp.f32 %v1562_v63 }
 0xa7e   : > { %v2091_v0 = vpop.eup %2090 }
 0xa7f   : > { %v1564_v1 = vmul.f32 %v2091_v0, %v2089_v58 }
 0xa81   : > { %2013 = vmatmul.mubr.msk.f32.vlgmr.msra.gmra.mrb[12].mxu1 %vm844_vm12, %v1564_v1 }
 0xa82   : > { %2028 = vmatprep.mubr.msk.f32.mxu1 %vm2102_vm3, %v2103_v4  ;;  %2049 = vmatpush3.bf16.msra.mxu1 %v2048_v9  ;;  %v1721_v4 = vld [vmem:[%s2401_s12 + $0x10] sm:$0xff] }
 0xa83   : > { %2050 = vmatprep.subr.bf16.mxu1 %v2100_v2  ;;  %v2051_v11 = vpack.c.bf16 %v1722_v10, %v1721_v4 }
 0xa86   : > { %2052 = vmatpush3.bf16.msra.mxu1 %v2051_v11 }
 0xb54   : > { %v1638_v3 = vpop.f32.mrb[12].mxu1 }
 0xb55   : > { %v2014_v5 = vpop.f32.mrb[13].mxu1  ;;  %2018 = vmatmul.mubr.msk.f32.vlgmr.msra.gmra.mrb[14].mxu0 %vm752_vm9, %v1638_v3 }
 0xc28   : > { %v1711_v12 = vpop.f32.mrb[14].mxu0 }
 0xc29   : > { %v1715_v13 = vadd.f32 %v1711_v12, %v1474_v45  ;;  %v2019_v14 = vpop.f32.mrb[15].mxu0 }
 0xc2b   : > { %v1716_v16 = vadd.f32 %v1715_v13, %v2218_v8 }
 0xc2d   : > { %v1718_v2 = vadd.f32 %v1717_v15, %v1716_v16 }
 0xc2f   : > { %2029 = vmatmul.mubr.msk.f32.vlgmr.msra.gmra.mrb[14].mxu1 %vm590_vm6, %v1718_v2 }
 0xd02   : > { %v1793_v18 = vpop.f32.mrb[14].mxu1 }
 0xd03   : > { %v1794_v19 = vadd.f32 %v1793_v18, %v1723_v17  ;;  %v2030_v20 = vpop.f32.mrb[15].mxu1 }
 0xd05   : > { %1798 = vst.msk [vmem:[%s474_s25] sm:$0x1] %vm1797_vm13, %v1794_v19 }
 0xd06 PF: > { %s24_s29 = sadd.s32 1, %s2098_s29  }
 0xd07   : > { %p21_p4 = scmp.ge.s32.totalorder %s24_s29, 4  }
 0xd09   :  { %23 = sbr.rel (!%p21_p4) target bundleno = 1 (0x1), region = 109 }

// kernel: lamrg_v8_forward.31
= control target key start
LH: loop header
LB: loop body
LE: loop exit
PB: predicated region body
PF: predicated region fallthrough
CT: control target
= control target key end

     0   :  { %s1675_s24 = smov 0   ;;  %s1823_s0 = inlined_call_operand.vmem [shape: f32[2,5,32], index: 0, kind: input, shape index: {}]   ;;  %s1824_s1 = inlined_call_operand.vmem [shape: f32[1,32], index: 1, kind: input, shape index: {}]   ;;  %s1825_s2 = inlined_call_operand.vmem [shape: f32[1,32], index: 2, kind: input, shape index: {}]   ;;  %s1826_s3 = inlined_call_operand.vmem [shape: f32[32,96], index: 3, kind: input, shape index: {}]   ;;  %s1827_s4 = inlined_call_operand.vmem [shape: f32[1,96], index: 4, kind: input, shape index: {}]   ;;  %s1828_s5 = inlined_call_operand.vmem [shape: f32[32,32], index: 5, kind: input, shape index: {}]   ;;  %s1829_s6 = inlined_call_operand.vmem [shape: f32[1,32], index: 6, kind: input, shape index: {}]   ;;  %s1830_s7 = inlined_call_operand.vmem [shape: f32[2,5,32], index: 7, kind: output, shape index: {}]  }
   0x1 LB: > { %s1431_s25 = sadd.s32 4294967295, %s1619_s24   ;;  %p1435_p0 = scmp.ge.s32.totalorder %s1619_s24, 1  ;;  %s1619_s24 = sphi %s1675_s24, %s17_s24  }
   0x2   : > { %p236_p1 = scmp.lt.s32.totalorder %s1619_s24, 3 }
   0x4   : > { %p237_p2 = pnand %p1435_p0, %p236_p1 }
   0x5   : > { %p266_p3 = scmp.lt.s32.totalorder (!%p237_p2), %s1431_s25, 1  ;;  %vm277_vm0 = vcmask (!%p237_p2), 258048   ;;  %v314_v7 = vld [vmem:[%s1826_s3] sm:$0xff] (!%p237_p2)  ;;  %v315_v8 = vld [vmem:[%s1826_s3 + $0x8] sm:$0xff] (!%p237_p2)  ;;  %v316_v9 = vld [vmem:[%s1826_s3 + $0x10] sm:$0xff] (!%p237_p2)  ;;  %v1621_v10 = vmov (!%p237_p2), 0.0|0.0  }
   0x6   : > { %240 = sbr.rel (%p237_p2) target bundleno = 2914 (0xb62), region = 48  ;;  %1565 = vmatprep.subr.bf16.mxu0 (!%p237_p2), %v1621_v10  ;;  %v1566_v11 = vpack.c.bf16 (!%p237_p2), %v315_v8, %v314_v7  ;;  %v317_v12 = vld [vmem:[%s1826_s3 + $0x18] sm:$0xff] (!%p237_p2)  ;;  %vm1622_vm1 = vmmov (!%p237_p2), 0   ;;  %v1623_v13 = vmov (!%p237_p2), 0.0   ;;  %v1438_v23 = vld [vmem:[%s1824_s1] ss:$0 sm:$0xff] (!%p237_p2) }
   0x7   : > { %1502 = vmatprep.mubr.msk.f32.mxu0 (!%p237_p2), %vm1622_vm1, %v1623_v13  ;;  %1505 = vmatprep.subr.mxu1 (!%p237_p2), %v1623_v13  ;;  %v1569_v14 = vpack.c.bf16 (!%p237_p2), %v317_v12, %v316_v9  ;;  %v1439_v26 = vld [vmem:[%s1825_s2] ss:$0 sm:$0xff] (!%p237_p2)  ;;  %vm325_vm4 = vcmask (!%p237_p2), 261120   ;;  %s1624_s21 = smov (!%p237_p2), 120   ;;  %s1625_s22 = smov (!%p237_p2), 96   ;;  %vm406_vm5 = vcmask (!%p237_p2), 64512  }
   0x8   : > { %1507 = vmatprep.mubr.msk.f32.mxu1 (!%p237_p2), %vm1622_vm1, %v1623_v13  ;;  %1567 = vmatpush3.bf16.msra.mxu0 (!%p237_p2), %v1566_v11  ;;  %v1440_v29 = vld [vmem:[%s1827_s4] ss:$0 sm:$0xff] (!%p237_p2)  ;;  %s1626_s23 = smov (!%p237_p2), 88   ;;  %vm482_vm6 = vcmask (!%p237_p2), 36864   ;;  %s1627_s27 = smov (!%p237_p2), 56   ;;  %v400_v54 = vld [vmem:[%s1828_s5 + $0x8] sm:$0xff] (!%p237_p2) }
   0x9   : > { %1568 = vmatprep.subr.bf16.mxu0 (!%p237_p2), %v1621_v10  ;;  %s1628_s28 = smov (!%p237_p2), 64   ;;  %s1630_s30 = smov (!%p237_p2), 112   ;;  %vm500_vm7 = vcmask (!%p237_p2), 1044480   ;;  %vm496_vm8 = vcmask (!%p237_p2), 39936   ;;  %v399_v63 = vld [vmem:[%s1828_s5] sm:$0xff] (!%p237_p2) }
   0xa   : > { %s1631_s12 = smov (!%p237_p2), 48   ;;  %s1632_s13 = smov (!%p237_p2), 104  }
   0xb   : > { %s1633_s14 = smov (!%p237_p2), 72   ;;  %s1634_s17 = smov (!%p237_p2), 40  }
   0xc   : > { %1570 = vmatpush3.bf16.msra.mxu0 (!%p237_p2), %v1569_v14 }
   0xd   : > { %s1832_s25 = smov (!%p266_p3, %s1431_s25), 1  ;;  %1515 = vmatprep.subr.mxu0 %v1623_v13 }
   0xe   : > { %s1436_s26 = sshll.u32 %s1832_s25, 3 }
   0xf   : > { %s269_s29 = scalar_lea.vmem %s1823_s0, %s1436_s26 }
  0x10   : > { %v1691_v0 = vld [vmem:[%s269_s29] sm:$0x1f]  ;;  %s1629_s29 = smov 80  }
  0x11   : > { %v278_v1 = vsel %vm277_vm0, %v1691_v0, 0.0 }
  0x12   : > { %279 = vadd.xlane.f32.xlu0 %v278_v1 }
  0x9f   : > { %v280_v2 = vpop.xlane.xlu0 %279 }
  0xa0   : > { %v282_v3 = vmul.f32 0.03125, %v280_v2 }
  0xa2   : > { %v283_v4 = vsub.f32 %v1691_v0, %v282_v3 }
  0xa4   : > { %v284_v5 = vmul.f32 %v283_v4, %v283_v4  ;;  %v296_v24 = vmul.f32 %v1438_v23, %v283_v4 }
  0xa6   : > { %v285_v6 = vsel %vm277_vm0, %v284_v5, 0.0 }
  0xa7   : > { %286 = vadd.xlane.f32.xlu0 %v285_v6 }
 0x134   : > { %v287_v15 = vpop.xlane.xlu0 %286 }
 0x135   : > { %v289_v16 = vmul.f32 0.032258064, %v287_v15 }
 0x137   : > { %1593 = vrsqrt.f32 %v289_v16  ;;  %vm299_vm2 = vcmp.eq.f32.partialorder %v289_v16, inf  ;;  %v302_v19 = vand.u32 2147483648, %v289_v16  ;;  %vm301_vm3 = vcmp.eq.f32.partialorder %v289_v16, 0.0 }
 0x141   : > { %v1594_v17 = vpop.eup %1593 }
 0x142   : > { %v298_v18 = vmul.f32 %v1594_v17, %v289_v16 }
 0x144   : > { %v300_v20 = vsel %vm299_vm2, %v289_v16, %v298_v18 }
 0x145   : > { %v303_v21 = vsel %vm301_vm3, %v302_v19, %v300_v20 }
 0x146   : > { %v304_v22 = vadd.f32 1e-06, %v303_v21 }
 0x148   : > { %1595 = vrcp.f32 %v304_v22 }
 0x152   : > { %v1596_v25 = vpop.eup %1595 }
 0x153   : > { %v306_v27 = vmul.f32 %v1596_v25, %v296_v24 }
 0x155   : > { %v313_v28 = vadd.f32 %v1439_v26, %v306_v27 }
 0x157   : > { %1503 = vmatmul.mubr.msk.f32.vlgmr.msra.gmra.mrb[0].mxu0 %vm325_vm4, %v313_v28  ;;  %v401_v28 = vld [vmem:[%s1828_s5 + $0x10] sm:$0xff] }
 0x158   : > { %1517 = vmatprep.mubr.msk.f32.mxu0 %vm1622_vm1, %v1623_v13 }
 0x22a   : > { %v395_v30 = vpop.f32.mrb[0].mxu0 }
 0x22b   : > { %v1726_v31 = vadd.f32 %v1440_v29, %v395_v30  ;;  %v1504_v32 = vpop.f32.mrb[1].mxu0 }
 0x22d   : > { %573 = vrot.lane.b32.xlu0 %v1726_v31, %s1624_s21  ;;  %404 = vrot.lane.b32.xlu1 %v1726_v31, %s1625_s22 }
 0x231   : > { %575 = vrot.lane.b32.xlu1 %v1726_v31, %s1626_s23 }
 0x29f   : > { %v405_v33 = vpop.permute.xlu1 %404  ;;  %v574_v35 = vpop.permute.xlu0 %573 }
 0x2a0   : > { %1506 = vmatpush3.xpose.msk.msra.mxu1 %vm406_vm5, %v405_v33 }
 0x2a1   : > { %1510 = vmatprep.subr.mxu1 %v1623_v13 }
 0x2a3   : > { %1508 = vmatmul.mubr.msk.f32.vlgmr.msra.gmra.mrb[0].mxu1 %vm406_vm5, %v1726_v31  ;;  %v576_v34 = vpop.permute.xlu1 %575 }
 0x2a4   : > { %1516 = vmatpush3.xpose.msk.msra.mxu0 %vm406_vm5, %v576_v34  ;;  %1512 = vmatprep.mubr.msk.f32.mxu1 %vm1622_vm1, %v1623_v13 }
 0x2a5   : > { %1525 = vmatprep.subr.mxu0 %v1623_v13 }
 0x2a7   : > { %1518 = vmatmul.mubr.msk.f32.vlgmr.msra.gmra.mrb[2].mxu0 %vm406_vm5, %v574_v35 }
 0x2a8   : > { %1527 = vmatprep.mubr.msk.f32.mxu0 %vm1622_vm1, %v1623_v13  ;;  %1526 = vmatpush3.msra.mxu0 %v400_v54 }
 0x2a9   : > { %1535 = vmatprep.subr.mxu0 %v1623_v13 }
 0x376   : > { %v477_v36 = vpop.f32.mrb[0].mxu1 }
 0x377   : > { %v481_v37 = vmul.f32 0.35355338, %v477_v36  ;;  %v1509_v38 = vpop.f32.mrb[1].mxu1 }
 0x379   : > { %v483_v39 = vsel %vm482_vm6, %v481_v37, -inf }
 0x37a   : > { %484 = vmax.xlane.f32.xlu1 %v483_v39  ;;  %v647_v40 = vpop.f32.mrb[2].mxu0 }
 0x37b   : > { %v651_v41 = vmul.f32 0.35355338, %v647_v40  ;;  %v1519_v42 = vpop.f32.mrb[3].mxu0 }
 0x37d   : > { %v652_v43 = vsel %vm482_vm6, %v651_v41, -inf }
 0x37e   : > { %653 = vmax.xlane.f32.xlu0 %v652_v43 }
 0x394   : > { %663 = vrot.lane.b32.xlu0 %v1726_v31, %s1627_s27  ;;  %s273_s27 = scalar_lea.vmem %s1830_s7, %s1436_s26 }
 0x407   : > { %v485_v44 = vpop.xlane.xlu1 %484 }
 0x408   : > { %v486_v45 = vsub.f32 %v481_v37, %v485_v44 }
 0x40a   : > { %v487_v46 = vmul.f32 1.442695, %v486_v45 }
 0x40b   : > { %v654_v47 = vpop.xlane.xlu0 %653 }
 0x40c   : > { %1597 = vpow2.f32 %v487_v46  ;;  %v655_v48 = vsub.f32 %v651_v41, %v654_v47 }
 0x40e   : > { %v656_v49 = vmul.f32 1.442695, %v655_v48 }
 0x40f   : > { %v664_v60 = vpop.permute.xlu0 %663 }
 0x410   : > { %1599 = vpow2.f32 %v656_v49 }
 0x416   : > { %v1598_v50 = vpop.eup %1597 }
 0x417   : > { %v489_v51 = vsel %vm482_vm6, %v1598_v50, 0.0 }
 0x418   : > { %490 = vadd.xlane.f32.xlu1 %v489_v51 }
 0x41a   : > { %v1600_v52 = vpop.eup %1599 }
 0x41b   : > { %v658_v53 = vsel %vm482_vm6, %v1600_v52, 0.0 }
 0x41c   : > { %659 = vadd.xlane.f32.xlu1 %v658_v53 }
 0x42d   : > { %494 = vrot.lane.b32.xlu1 %v1726_v31, %s1628_s28 }
 0x431   : > { %888 = vrot.lane.b32.xlu1 %v1726_v31, %s1629_s29 }
 0x435   : > { %886 = vrot.lane.b32.xlu1 %v1726_v31, %s1630_s30 }
 0x4a5   : > { %v491_v55 = vpop.xlane.xlu1 %490 }
 0x4a6   : > { %1601 = vrcp.f32 %v491_v55 }
 0x4a9   : > { %v660_v56 = vpop.xlane.xlu1 %659 }
 0x4aa   : > { %1603 = vrcp.f32 %v660_v56 }
 0x4ad   : > { %v495_v57 = vpop.permute.xlu1 %494 }
 0x4ae   : > { %1511 = vmatpush3.msk.msra.mxu1 %vm500_vm7, %v495_v57 }
 0x4af   : > { %1520 = vmatprep.subr.mxu1 %v1623_v13 }
 0x4b0   : > { %v1602_v58 = vpop.eup %1601 }
 0x4b1   : > { %v493_v59 = vmul.f32 %v1602_v58, %v1598_v50  ;;  %v889_v3 = vpop.permute.xlu1 %888 }
 0x4b3   : > { %1513 = vmatmul.mubr.msk.f32.vlgmr.msra.gmra.mrb[2].mxu1 %vm496_vm8, %v493_v59 }
 0x4b4   : > { %v1604_v61 = vpop.eup %1603  ;;  %1521 = vmatpush3.msk.msra.mxu1 %vm500_vm7, %v664_v60  ;;  %1522 = vmatprep.mubr.msk.f32.mxu1 %vm1622_vm1, %v1623_v13 }
 0x4b5   : > { %v662_v62 = vmul.f32 %v1604_v61, %v1600_v52  ;;  %1530 = vmatprep.subr.mxu1 %v1623_v13  ;;  %v887_v6 = vpop.permute.xlu1 %886  ;;  %v1462_v52 = vld [vmem:[%s1829_s6] ss:$0 sm:$0xff] }
 0x4b7   : > { %1523 = vmatmul.mubr.msk.f32.vlgmr.msra.gmra.mrb[4].mxu1 %vm496_vm8, %v662_v62 }
 0x4b8   : > { %1532 = vmatprep.mubr.msk.f32.mxu1 %vm1622_vm1, %v1623_v13  ;;  %1531 = vmatpush3.msra.mxu1 %v399_v63 }
 0x4b9   : > { %1540 = vmatprep.subr.mxu1 %v1623_v13 }
 0x586   : > { %v569_v1 = vpop.f32.mrb[2].mxu1 }
 0x587   : > { %v1514_v2 = vpop.f32.mrb[3].mxu1  ;;  %1533 = vmatmul.mubr.msk.f32.vlgmr.msra.gmra.mrb[6].mxu1 %vm406_vm5, %v569_v1 }
 0x588   : > { %1542 = vmatprep.mubr.msk.f32.mxu1 %vm1622_vm1, %v1623_v13 }
 0x58a   : > { %v736_v4 = vpop.f32.mrb[4].mxu1 }
 0x58b   : > { %v1524_v5 = vpop.f32.mrb[5].mxu1  ;;  %1528 = vmatmul.mubr.msk.f32.vlgmr.msra.gmra.mrb[4].mxu0 %vm406_vm5, %v736_v4 }
 0x58c   : > { %1536 = vmatpush3.xpose.msk.msra.mxu0 %vm406_vm5, %v889_v3  ;;  %1537 = vmatprep.mubr.msk.f32.mxu0 %vm1622_vm1, %v1623_v13 }
 0x58d   : > { %1545 = vmatprep.subr.mxu0 %v1623_v13 }
 0x58f   : > { %1538 = vmatmul.mubr.msk.f32.vlgmr.msra.gmra.mrb[6].mxu0 %vm406_vm5, %v887_v6 }
 0x590   : > { %1547 = vmatprep.mubr.msk.f32.mxu0 %vm1622_vm1, %v1623_v13  ;;  %1546 = vmatpush3.msra.mxu0 %v401_v28 }
 0x591   : > { %1555 = vmatprep.subr.mxu0 %v1623_v13 }
 0x65a   : > { %v882_v7 = vpop.f32.mrb[6].mxu1 }
 0x65b   : > { %v1534_v8 = vpop.f32.mrb[7].mxu1 }
 0x65e   : > { %v809_v9 = vpop.f32.mrb[4].mxu0 }
 0x65f   : > { %v883_v10 = vadd.f32 %v882_v7, %v809_v9  ;;  %v1529_v11 = vpop.f32.mrb[5].mxu0 }
 0x662   : > { %v960_v12 = vpop.f32.mrb[6].mxu0 }
 0x663   : > { %v964_v14 = vmul.f32 0.35355338, %v960_v12  ;;  %v1539_v15 = vpop.f32.mrb[7].mxu0 }
 0x665   : > { %v965_v16 = vsel %vm482_vm6, %v964_v14, -inf }
 0x666   : > { %966 = vmax.xlane.f32.xlu1 %v965_v16 }
 0x677   : > { %976 = vrot.lane.b32.xlu1 %v1726_v31, %s1631_s12 }
 0x67b   : > { %1127 = vrot.lane.b32.xlu1 %v1726_v31, %s1632_s13 }
 0x6f3   : > { %v967_v17 = vpop.xlane.xlu1 %966 }
 0x6f4   : > { %v968_v18 = vsub.f32 %v964_v14, %v967_v17 }
 0x6f6   : > { %v969_v19 = vmul.f32 1.442695, %v968_v18 }
 0x6f7   : > { %v977_v20 = vpop.permute.xlu1 %976 }
 0x6f8   : > { %1605 = vpow2.f32 %v969_v19  ;;  %1541 = vmatpush3.msk.msra.mxu1 %vm500_vm7, %v977_v20 }
 0x6f9   : > { %1550 = vmatprep.subr.mxu1 %v1623_v13 }
 0x6fb   : > { %v1128_v27 = vpop.permute.xlu1 %1127 }
 0x702   : > { %v1606_v21 = vpop.eup %1605 }
 0x703   : > { %v971_v22 = vsel %vm482_vm6, %v1606_v21, 0.0 }
 0x704   : > { %972 = vadd.xlane.f32.xlu0 %v971_v22 }
 0x71a   : > { %1129 = vrot.lane.b32.xlu0 %v1726_v31, %s1633_s14 }
 0x791   : > { %v973_v23 = vpop.xlane.xlu0 %972 }
 0x792   : > { %1607 = vrcp.f32 %v973_v23 }
 0x795   : > { %v1130_v26 = vpop.permute.xlu0 %1129 }
 0x79c   : > { %v1608_v24 = vpop.eup %1607 }
 0x79d   : > { %v975_v25 = vmul.f32 %v1608_v24, %v1606_v21 }
 0x79f   : > { %1543 = vmatmul.mubr.msk.f32.vlgmr.msra.gmra.mrb[8].mxu1 %vm496_vm8, %v975_v25 }
 0x7a0   : > { %1551 = vmatpush3.xpose.msk.msra.mxu1 %vm406_vm5, %v1130_v26  ;;  %1552 = vmatprep.mubr.msk.f32.mxu1 %vm1622_vm1, %v1623_v13 }
 0x7a1   : > { %1560 = vmatprep.subr.mxu1 %v1623_v13 }
 0x7a3   : > { %1553 = vmatmul.mubr.msk.f32.vlgmr.msra.gmra.mrb[10].mxu1 %vm406_vm5, %v1128_v27 }
 0x7a4   : > { %1562 = vmatprep.mubr.msk.f32.mxu1 %vm1622_vm1, %v1623_v13 }
 0x872   : > { %v1049_v29 = vpop.f32.mrb[8].mxu1 }
 0x873   : > { %v1544_v30 = vpop.f32.mrb[9].mxu1  ;;  %1548 = vmatmul.mubr.msk.f32.vlgmr.msra.gmra.mrb[8].mxu0 %vm406_vm5, %v1049_v29 }
 0x874   : > { %1557 = vmatprep.mubr.msk.f32.mxu0 %vm1622_vm1, %v1623_v13  ;;  %v402_v13 = vld [vmem:[%s1828_s5 + $0x18] sm:$0xff] }
 0x875   : > { %1561 = vmatpush3.msra.mxu1 %v402_v13 }
 0x876   : > { %v1201_v32 = vpop.f32.mrb[10].mxu1 }
 0x877   : > { %v1205_v33 = vmul.f32 0.35355338, %v1201_v32  ;;  %v1554_v34 = vpop.f32.mrb[11].mxu1 }
 0x879   : > { %v1206_v35 = vsel %vm482_vm6, %v1205_v33, -inf }
 0x87a   : > { %1207 = vmax.xlane.f32.xlu1 %v1206_v35 }
 0x907   : > { %v1208_v36 = vpop.xlane.xlu1 %1207 }
 0x908   : > { %v1209_v37 = vsub.f32 %v1205_v33, %v1208_v36 }
 0x90a   : > { %v1210_v38 = vmul.f32 1.442695, %v1209_v37 }
 0x90c   : > { %1609 = vpow2.f32 %v1210_v38 }
 0x916   : > { %v1610_v39 = vpop.eup %1609 }
 0x917   : > { %v1212_v40 = vsel %vm482_vm6, %v1610_v39, 0.0 }
 0x918   : > { %1213 = vadd.xlane.f32.xlu0 %v1212_v40 }
 0x92e   : > { %1217 = vrot.lane.b32.xlu0 %v1726_v31, %s1634_s17 }
 0x946   : > { %v1122_v41 = vpop.f32.mrb[8].mxu0 }
 0x947   : > { %v1126_v42 = vadd.f32 %v1122_v41, %v883_v10  ;;  %v1549_v43 = vpop.f32.mrb[9].mxu0 }
 0x9a5   : > { %v1214_v44 = vpop.xlane.xlu0 %1213 }
 0x9a6   : > { %1611 = vrcp.f32 %v1214_v44 }
 0x9a9   : > { %v1218_v45 = vpop.permute.xlu0 %1217 }
 0x9aa   : > { %1556 = vmatpush3.msk.msra.mxu0 %vm500_vm7, %v1218_v45 }
 0x9b0   : > { %v1612_v46 = vpop.eup %1611 }
 0x9b1   : > { %v1216_v47 = vmul.f32 %v1612_v46, %v1610_v39 }
 0x9b3   : > { %1558 = vmatmul.mubr.msk.f32.vlgmr.msra.gmra.mrb[10].mxu0 %vm496_vm8, %v1216_v47 }
 0xa86   : > { %v1290_v48 = vpop.f32.mrb[10].mxu0 }
 0xa87   : > { %v1559_v31 = vpop.f32.mrb[11].mxu0  ;;  %1563 = vmatmul.mubr.msk.f32.vlgmr.msra.gmra.mrb[12].mxu1 %vm406_vm5, %v1290_v48 }
 0xb5a   : > { %v1363_v49 = vpop.f32.mrb[12].mxu1 }
 0xb5b   : > { %v1367_v50 = vadd.f32 %v1363_v49, %v1126_v42  ;;  %v1564_v51 = vpop.f32.mrb[13].mxu1 }
 0xb5d   : > { %v1368_v53 = vadd.f32 %v1367_v50, %v1691_v0 }
 0xb5f   : > { %v1376_v54 = vadd.f32 %v1462_v52, %v1368_v53 }
 0xb61   : > { %1377 = vst.msk [vmem:[%s273_s27] sm:$0x1f] %vm277_vm0, %v1376_v54 }
 0xb62 PF: > { %s17_s24 = sadd.s32 1, %s1619_s24  }
 0xb63   : > { %p14_p4 = scmp.ge.s32.totalorder %s17_s24, 4  }
 0xb65   :  { %16 = sbr.rel (!%p14_p4) target bundleno = 1 (0x1), region = 78 }

// kernel: lamrg_v8_forward.35
= control target key start
LH: loop header
LB: loop body
LE: loop exit
PB: predicated region body
PF: predicated region fallthrough
CT: control target
= control target key end

     0   :  { %s311_s12 = smov 0   ;;  %s344_s0 = inlined_call_operand.vmem [shape: f32[2,5,32], index: 0, kind: input, shape index: {}]   ;;  %s345_s1 = inlined_call_operand.vmem [shape: f32[1,32], index: 1, kind: input, shape index: {}]   ;;  %s346_s2 = inlined_call_operand.vmem [shape: f32[1,32], index: 2, kind: input, shape index: {}]   ;;  %s347_s3 = inlined_call_operand.vmem [shape: f32[2,5,32], index: 3, kind: output, shape index: {}]  }
   0x1 LB: > { %s260_s13 = sadd.s32 4294967295, %s289_s12   ;;  %p264_p0 = scmp.ge.s32.totalorder %s289_s12, 1  ;;  %s289_s12 = sphi %s311_s12, %s13_s12  }
   0x2   : > { %p136_p1 = scmp.lt.s32.totalorder %s289_s12, 3 }
   0x4   : > { %p137_p2 = pnand %p264_p0, %p136_p1 }
   0x5   : > { %p158_p3 = scmp.lt.s32.totalorder (!%p137_p2), %s260_s13, 1  ;;  %vm169_vm0 = vcmask (!%p137_p2), 258048   ;;  %v267_v15 = vld [vmem:[%s345_s1] ss:$0 sm:$0xff] (!%p137_p2) }
   0x6   : > { %140 = sbr.rel (%p137_p2) target bundleno = 344 (0x158), region = 32  ;;  %v268_v18 = vld [vmem:[%s346_s2] ss:$0 sm:$0xff] (!%p137_p2) }
   0xd   : > { %s349_s13 = smov (!%p158_p3, %s260_s13), 1 }
   0xe   : > { %s265_s14 = sshll.u32 %s349_s13, 3 }
   0xf   : > { %s161_s17 = scalar_lea.vmem %s344_s0, %s265_s14  ;;  %s165_s24 = scalar_lea.vmem %s347_s3, %s265_s14 }
  0x10   : > { %v166_v0 = vld [vmem:[%s161_s17] sm:$0x1f] }
  0x11   : > { %v170_v1 = vsel %vm169_vm0, %v166_v0, 0.0 }
  0x12   : > { %171 = vadd.xlane.f32.xlu0 %v170_v1 }
  0x9f   : > { %v172_v2 = vpop.xlane.xlu0 %171 }
  0xa0   : > { %v174_v3 = vmul.f32 0.03125, %v172_v2 }
  0xa2   : > { %v175_v4 = vsub.f32 %v166_v0, %v174_v3 }
  0xa4   : > { %v176_v5 = vmul.f32 %v175_v4, %v175_v4  ;;  %v188_v16 = vmul.f32 %v267_v15, %v175_v4 }
  0xa6   : > { %v177_v6 = vsel %vm169_vm0, %v176_v5, 0.0 }
  0xa7   : > { %178 = vadd.xlane.f32.xlu0 %v177_v6 }
 0x134   : > { %v179_v7 = vpop.xlane.xlu0 %178 }
 0x135   : > { %v181_v8 = vmul.f32 0.032258064, %v179_v7 }
 0x137   : > { %279 = vrsqrt.f32 %v181_v8  ;;  %vm191_vm1 = vcmp.eq.f32.partialorder %v181_v8, inf  ;;  %v194_v11 = vand.u32 2147483648, %v181_v8  ;;  %vm193_vm2 = vcmp.eq.f32.partialorder %v181_v8, 0.0 }
 0x141   : > { %v280_v9 = vpop.eup %279 }
 0x142   : > { %v190_v10 = vmul.f32 %v280_v9, %v181_v8 }
 0x144   : > { %v192_v12 = vsel %vm191_vm1, %v181_v8, %v190_v10 }
 0x145   : > { %v195_v13 = vsel %vm193_vm2, %v194_v11, %v192_v12 }
 0x146   : > { %v196_v14 = vadd.f32 1e-06, %v195_v13 }
 0x148   : > { %281 = vrcp.f32 %v196_v14 }
 0x152   : > { %v282_v17 = vpop.eup %281 }
 0x153   : > { %v198_v19 = vmul.f32 %v282_v17, %v188_v16 }
 0x155   : > { %v205_v20 = vadd.f32 %v268_v18, %v198_v19 }
 0x157   : > { %206 = vst.msk [vmem:[%s165_s24] sm:$0x1f] %vm169_vm0, %v205_v20 }
 0x158 PF: > { %s13_s12 = sadd.s32 1, %s289_s12  }
 0x159   : > { %p10_p4 = scmp.ge.s32.totalorder %s13_s12, 4  }
 0x15b   :  { %12 = sbr.rel (!%p10_p4) target bundleno = 1 (0x1), region = 62 }

// kernel: lamrg_v8_forward.32
= control target key start
LH: loop header
LB: loop body
LE: loop exit
PB: predicated region body
PF: predicated region fallthrough
CT: control target
= control target key end

     0   :  { %s688_s24 = smov 0   ;;  %s768_s0 = inlined_call_operand.vmem [shape: f32[2,5,32], index: 0, kind: input, shape index: {}]   ;;  %s769_s1 = inlined_call_operand.vmem [shape: f32[1,32], index: 1, kind: input, shape index: {}]   ;;  %s770_s2 = inlined_call_operand.vmem [shape: f32[1,32], index: 2, kind: input, shape index: {}]   ;;  %s771_s3 = inlined_call_operand.vmem [shape: f32[32,64], index: 3, kind: input, shape index: {}]   ;;  %s772_s4 = inlined_call_operand.vmem [shape: f32[1,64], index: 4, kind: input, shape index: {}]   ;;  %s773_s5 = inlined_call_operand.vmem [shape: f32[64,32], index: 5, kind: input, shape index: {}]   ;;  %s774_s6 = inlined_call_operand.vmem [shape: f32[1,32], index: 6, kind: input, shape index: {}]   ;;  %s775_s7 = inlined_call_operand.vmem [shape: f32[2,5,32], index: 7, kind: output, shape index: {}]  }
   0x1 LB: > { %s545_s25 = sadd.s32 4294967295, %s643_s24   ;;  %p549_p0 = scmp.ge.s32.totalorder %s643_s24, 1  ;;  %s643_s24 = sphi %s688_s24, %s17_s24  }
   0x2   : > { %p236_p1 = scmp.lt.s32.totalorder %s643_s24, 3 }
   0x4   : > { %p237_p2 = pnand %p549_p0, %p236_p1 }
   0x5   : > { %p266_p3 = scmp.lt.s32.totalorder (!%p237_p2), %s545_s25, 1  ;;  %vm277_vm0 = vcmask (!%p237_p2), 258048   ;;  %v314_v7 = vld [vmem:[%s771_s3] sm:$0xff] (!%p237_p2)  ;;  %v315_v8 = vld [vmem:[%s771_s3 + $0x8] sm:$0xff] (!%p237_p2)  ;;  %v316_v9 = vld [vmem:[%s771_s3 + $0x10] sm:$0xff] (!%p237_p2)  ;;  %v645_v10 = vmov (!%p237_p2), 0.0|0.0  }
   0x6   : > { %240 = sbr.rel (%p237_p2) target bundleno = 776 (0x308), region = 48  ;;  %604 = vmatprep.subr.bf16.mxu0 (!%p237_p2), %v645_v10  ;;  %v605_v11 = vpack.c.bf16 (!%p237_p2), %v315_v8, %v314_v7  ;;  %v317_v12 = vld [vmem:[%s771_s3 + $0x18] sm:$0xff] (!%p237_p2)  ;;  %vm646_vm1 = vmmov (!%p237_p2), 0   ;;  %v647_v13 = vmov (!%p237_p2), 0.0   ;;  %610 = vmatprep.subr.bf16.mxu1 (!%p237_p2), %v645_v10  ;;  %v400_v15 = vld [vmem:[%s773_s5] sm:$0xff] (!%p237_p2)  ;;  %v401_v16 = vld [vmem:[%s773_s5 + $0x8] sm:$0xff] (!%p237_p2) }
   0x7   : > { %582 = vmatprep.mubr.msk.f32.mxu0 (!%p237_p2), %vm646_vm1, %v647_v13  ;;  %601 = vmatprep.mubr.msk.f32.mxu1 (!%p237_p2), %vm646_vm1, %v647_v13  ;;  %v608_v14 = vpack.c.bf16 (!%p237_p2), %v317_v12, %v316_v9  ;;  %v402_v17 = vld [vmem:[%s773_s5 + $0x10] sm:$0xff] (!%p237_p2)  ;;  %v611_v18 = vpack.c.bf16 (!%p237_p2), %v401_v16, %v400_v15  ;;  %v403_v19 = vld [vmem:[%s773_s5 + $0x18] sm:$0xff] (!%p237_p2)  ;;  %v404_v21 = vld [vmem:[%s773_s5 + $0x20] sm:$0xff] (!%p237_p2)  ;;  %vm325_vm4 = vcmask (!%p237_p2), 261120   ;;  %vm408_vm5 = vcmask (!%p237_p2), 523264  }
   0x8   : > { %606 = vmatpush3.bf16.msra.mxu0 (!%p237_p2), %v605_v11  ;;  %v614_v20 = vpack.c.bf16 (!%p237_p2), %v403_v19, %v402_v17  ;;  %v405_v22 = vld [vmem:[%s773_s5 + $0x28] sm:$0xff] (!%p237_p2)  ;;  %v552_v32 = vld [vmem:[%s769_s1] ss:$0 sm:$0xff] (!%p237_p2)  ;;  %v406_v38 = vld [vmem:[%s773_s5 + $0x30] sm:$0xff] (!%p237_p2) }
   0x9   : > { %607 = vmatprep.subr.bf16.mxu0 (!%p237_p2), %v645_v10  ;;  %612 = vmatpush3.bf16.msra.mxu1 (!%p237_p2), %v611_v18  ;;  %v617_v23 = vpack.c.bf16 (!%p237_p2), %v405_v22, %v404_v21  ;;  %v553_v35 = vld [vmem:[%s770_s2] ss:$0 sm:$0xff] (!%p237_p2)  ;;  %v407_v39 = vld [vmem:[%s773_s5 + $0x38] sm:$0xff] (!%p237_p2) }
   0xa   : > { %613 = vmatprep.subr.bf16.mxu1 (!%p237_p2), %v645_v10  ;;  %v620_v40 = vpack.c.bf16 (!%p237_p2), %v407_v39, %v406_v38  ;;  %v554_v41 = vld [vmem:[%s772_s4] ss:$0 sm:$0xff] (!%p237_p2) }
   0xb   : > { %v557_v47 = vld [vmem:[%s774_s6] ss:$0 sm:$0xff] (!%p237_p2) }
   0xc   : > { %609 = vmatpush3.bf16.msra.mxu0 (!%p237_p2), %v608_v14 }
   0xd   : > { %s777_s25 = smov (!%p266_p3, %s545_s25), 1  ;;  %615 = vmatpush3.bf16.msra.mxu1 %v614_v20 }
   0xe   : > { %s550_s26 = sshll.u32 %s777_s25, 3  ;;  %616 = vmatprep.subr.bf16.mxu1 %v645_v10 }
   0xf   : > { %s269_s29 = scalar_lea.vmem %s768_s0, %s550_s26  ;;  %s273_s21 = scalar_lea.vmem %s775_s7, %s550_s26 }
  0x10   : > { %v704_v0 = vld [vmem:[%s269_s29] sm:$0x1f] }
  0x11   : > { %v278_v1 = vsel %vm277_vm0, %v704_v0, 0.0  ;;  %618 = vmatpush3.bf16.msra.mxu1 %v617_v23 }
  0x12   : > { %279 = vadd.xlane.f32.xlu0 %v278_v1  ;;  %619 = vmatprep.subr.bf16.mxu1 %v645_v10 }
  0x15   : > { %621 = vmatpush3.bf16.msra.mxu1 %v620_v40 }
  0x9f   : > { %v280_v2 = vpop.xlane.xlu0 %279 }
  0xa0   : > { %v282_v3 = vmul.f32 0.03125, %v280_v2 }
  0xa2   : > { %v283_v4 = vsub.f32 %v704_v0, %v282_v3 }
  0xa4   : > { %v284_v5 = vmul.f32 %v283_v4, %v283_v4  ;;  %v296_v33 = vmul.f32 %v552_v32, %v283_v4 }
  0xa6   : > { %v285_v6 = vsel %vm277_vm0, %v284_v5, 0.0 }
  0xa7   : > { %286 = vadd.xlane.f32.xlu0 %v285_v6 }
 0x134   : > { %v287_v24 = vpop.xlane.xlu0 %286 }
 0x135   : > { %v289_v25 = vmul.f32 0.032258064, %v287_v24 }
 0x137   : > { %633 = vrsqrt.f32 %v289_v25  ;;  %vm299_vm2 = vcmp.eq.f32.partialorder %v289_v25, inf  ;;  %v302_v28 = vand.u32 2147483648, %v289_v25  ;;  %vm301_vm3 = vcmp.eq.f32.partialorder %v289_v25, 0.0 }
 0x141   : > { %v634_v26 = vpop.eup %633 }
 0x142   : > { %v298_v27 = vmul.f32 %v634_v26, %v289_v25 }
 0x144   : > { %v300_v29 = vsel %vm299_vm2, %v289_v25, %v298_v27 }
 0x145   : > { %v303_v30 = vsel %vm301_vm3, %v302_v28, %v300_v29 }
 0x146   : > { %v304_v31 = vadd.f32 1e-06, %v303_v30 }
 0x148   : > { %635 = vrcp.f32 %v304_v31 }
 0x152   : > { %v636_v34 = vpop.eup %635 }
 0x153   : > { %v306_v36 = vmul.f32 %v636_v34, %v296_v33 }
 0x155   : > { %v313_v37 = vadd.f32 %v553_v35, %v306_v36 }
 0x157   : > { %583 = vmatmul.mubr.msk.f32.vlgmr.msra.gmra.mrb[0].mxu0 %vm325_vm4, %v313_v37 }
 0x22a   : > { %v395_v42 = vpop.f32.mrb[0].mxu0 }
 0x22b   : > { %v396_v43 = vadd.f32 %v554_v41, %v395_v42  ;;  %v584_v44 = vpop.f32.mrb[1].mxu0 }
 0x22d   : > { %v399_v45 = vmax.f32 %v396_v43, 0.0 }
 0x22f   : > { %602 = vmatmul.mubr.msk.f32.vlgmr.msra.gmra.mrb[0].mxu1 %vm408_vm5, %v399_v45 }
 0x302   : > { %v478_v46 = vpop.f32.mrb[0].mxu1 }
 0x303   : > { %v482_v48 = vadd.f32 %v478_v46, %v704_v0  ;;  %v603_v49 = vpop.f32.mrb[1].mxu1 }
 0x305   : > { %v490_v50 = vadd.f32 %v557_v47, %v482_v48 }
 0x307   : > { %491 = vst.msk [vmem:[%s273_s21] sm:$0x1f] %vm277_vm0, %v490_v50 }
 0x308 PF: > { %s17_s24 = sadd.s32 1, %s643_s24  }
 0x309   : > { %p14_p4 = scmp.ge.s32.totalorder %s17_s24, 4  }
 0x30b   :  { %16 = sbr.rel (!%p14_p4) target bundleno = 1 (0x1), region = 78 }

// kernel: lamrg_v8_forward.43
= control target key start
LH: loop header
LB: loop body
LE: loop exit
PB: predicated region body
PF: predicated region fallthrough
CT: control target
= control target key end

     0   :  { %8 = vsyncpa [#allocation3], 0  ;;  %s625_s0 = inlined_call_operand.vmem [shape: f32[2,8,32], index: 0, kind: input, shape index: {}]   ;;  %s626_s1 = inlined_call_operand.vmem [shape: f32[32,31], index: 1, kind: input, shape index: {}]   ;;  %s627_s2 = inlined_call_operand.vmem [shape: f32[1,31], index: 2, kind: input, shape index: {}]   ;;  %s628_s3 = inlined_call_operand.hbm [shape: f32[2,8,31], index: 3, kind: output, shape index: {}]  }
   0x1   :  { %10 = vsyncpa [#allocation3 + $0x1], 0  ;;  %s507_s12 = smov 0   ;;  %s509_s13 = smov 0  }
   0x2   :  { %s511_s14 = smov 0   ;;  %s513_s15 = smov 0  }
   0x3 LB: > { %s528_s16 = sadd.s32 4294967295, %s481_s15   ;;  %s339_s17 = sadd.s32 4294967294, %s481_s15   ;;  %s481_s15 = sphi %s513_s15, %s634_s15   ;;  %s477_s14 = sphi %s511_s14, %s633_s14   ;;  %s473_s13 = sphi %s509_s13, %s632_s13   ;;  %s469_s12 = sphi %s507_s12, %s631_s12  }
   0x4   : > { %s532_s18 = sadd.s32 1, %s481_s15   ;;  %s91_s19 = sadd.s32 1, %s477_s14 }
   0x5   : > { %s88_s20 = ssub.s32 %s481_s15, %s532_s18  ;;  %p101_p0 = scmp.ne.s32.totalorder %s477_s14, %s473_s13 }
   0x6   : > { %p89_p1 = scmp.eq.s32.totalorder %s88_s20, 0  ;;  %p102_p2 = scmp.eq.s32.totalorder %s528_s16, 1 }
   0x7   : > { %p107_p3 = scmp.ne.s32.totalorder %s473_s13, %s469_s12  ;;  %p108_p4 = scmp.eq.s32.totalorder %s339_s17, 1 }
   0x8   : > { %s543_s21 = scalar_select %p89_p1, %s477_s14, %s91_s19  }
   0x9   : > { %p545_p5 = por %p102_p2, %p101_p0  ;;  %p549_p6 = por %p108_p4, %p107_p3 }
   0xa   : > { %p342_p7 = scmp.ge.s32.totalorder %s481_s15, 1  ;;  %p139_p8 = scmp.lt.s32.totalorder %s481_s15, 3 }
   0xc   : > { %p140_p9 = pnand %p342_p7, %p139_p8 }
   0xd   : > { %v167_v0 = vld [vmem:[%s626_s1] sm:$0xff] (!%p140_p9)  ;;  %v168_v1 = vld [vmem:[%s626_s1 + $0x8] sm:$0xff] (!%p140_p9)  ;;  %v169_v2 = vld [vmem:[%s626_s1 + $0x10] sm:$0xff] (!%p140_p9)  ;;  %v483_v3 = vmov (!%p140_p9), 0.0|0.0   ;;  %vm484_vm0 = vmmov (!%p140_p9), 0   ;;  %v485_v6 = vmov (!%p140_p9), 0.0  }
   0xe   : > { %143 = sbr.rel (%p140_p9) target bundleno = 570 (0x23a), region = 32  ;;  %367 = vmatprep.subr.bf16.mxu0 (!%p140_p9), %v483_v3  ;;  %v368_v4 = vpack.c.bf16 (!%p140_p9), %v168_v1, %v167_v0  ;;  %v170_v5 = vld [vmem:[%s626_s1 + $0x18] sm:$0xff] (!%p140_p9)  ;;  %364 = vmatprep.mubr.msk.f32.mxu0 (!%p140_p9), %vm484_vm0, %v485_v6  ;;  %p162_p10 = scmp.lt.s32.totalorder (!%p140_p9), %s528_s16, 1  ;;  %vm178_vm1 = vcmask (!%p140_p9), 261120   ;;  %v345_v9 = vld [vmem:[%s627_s2] ss:$0 sm:$0xff] (!%p140_p9) }
   0xf   : > { %v371_v7 = vpack.c.bf16 (!%p140_p9), %v170_v5, %v169_v2  ;;  %vm252_vm2 = vcmask (!%p140_p9), 252928   ;;  %s159_s17 = sand.u32 (!%p140_p9), 1, %s473_s13   ;;  %s348_s20 = sshll.u32 (!%p140_p9), %s528_s16, 7 }
  0x10   : > { %369 = vmatpush3.bf16.msra.mxu0 (!%p140_p9), %v368_v4  ;;  %s343_s19 = sshll.u32 (!%p140_p9), %s159_s17, 3  ;;  %s582_s28 = scalar_lea.hbm (!%p140_p9), %s628_s3, %s348_s20 }
  0x11   : > { %370 = vmatprep.subr.bf16.mxu0 (!%p140_p9), %v483_v3  ;;  %s161_s24 = scalar_lea.vmem (!%p140_p9), [#allocation2], %s343_s19  ;;  %s267_s29 = scalar_lea.sflag (!%p140_p9), [#allocation3], %s159_s17 }
  0x12   : > { %s280_s25 = sshll.u32 (!%p140_p9), %s161_s24, 4  ;;  %s584_s25 = int_to_ptr.vmem [resolvable:$true] %s280_s25 }
  0x13   : > { %s419_s30 = scalar_lea.vmem (!%p140_p9), %s584_s25, 128 }
  0x14   : > { %372 = vmatpush3.bf16.msra.mxu0 (!%p140_p9), %v371_v7  ;;  %p420_p11 = scmp.ne.s32.totalorder (!%p140_p9), %s584_s25, %s419_s30 }
  0x15   : > { %s163_s5 = scalar_select %p162_p10, %s528_s16, 1 }
  0x16   : > { %p421_p12 = pnand %p420_p11, %p545_p5  ;;  %s486_s16 = smov [#allocation2]  }
  0x17   : > { %s344_s6 = sshll.u32 %s163_s5, 3  ;;  %s423_s4 = sshll.u32 %s486_s16, 4  ;;  %s424_s4 = int_to_ptr.vmem [resolvable:$false] %s423_s4 }
  0x18   : > { %s165_s9 = scalar_lea.vmem %s625_s0, %s344_s6  ;;  %p422_p13 = pneg %p421_p12 }
  0x19   : > { %v166_v8 = vld [vmem:[%s165_s9] sm:$0xff]  ;;  %s425_s5 = scalar_lea.vmem %s424_s4, 256  ;;  %p426_p0 = scmp.lt.s32.totalorder %s584_s25, %s424_s4 }
  0x1a   : > { %365 = vmatmul.mubr.msk.f32.vlgmr.msra.gmra.mrb[0].mxu0 %vm178_vm1, %v166_v8  ;;  %p427_p1 = scmp.lt.s32.totalorder %s425_s5, %s419_s30 }
  0x1c   : > { %p428_p2 = por %p427_p1, %p426_p0 }
  0x1e   : > { %p429_p3 = pnand %p428_p2, %p422_p13 }
  0xed   : > { %v248_v10 = vpop.f32.mrb[0].mxu0 }
  0xee   : > { %v249_v11 = vadd.f32 %v345_v9, %v248_v10  ;;  %v366_v12 = vpop.f32.mrb[1].mxu0 }
  0xf0   : > { %v253_v13 = vsel %vm252_vm2, %v249_v11, -inf }
  0xf1   : > { %254 = vmax.xlane.f32.xlu0 %v253_v13 }
 0x17e   : > { %v255_v14 = vpop.xlane.xlu0 %254 }
 0x17f   : > { %v256_v15 = vsub.f32 %v249_v11, %v255_v14 }
 0x181   : > { %v257_v16 = vmul.f32 1.442695, %v256_v15 }
 0x183   : > { %415 = vpow2.f32 %v257_v16 }
 0x18d   : > { %v416_v17 = vpop.eup %415 }
 0x18e   : > { %v259_v18 = vsel %vm252_vm2, %v416_v17, 0.0 }
 0x18f   : > { %260 = vadd.xlane.f32.xlu0 %v259_v18 }
 0x21c   : > { %v261_v19 = vpop.xlane.xlu0 %260 }
 0x21d   : > { %417 = vlog2.f32 %v261_v19 }
 0x227   : > { %v418_v20 = vpop.eup %417 }
 0x228   : > { %v263_v21 = vmul.f32 0.6931472, %v418_v20 }
 0x22a   : > { %v264_v22 = vsub.f32 %v256_v15, %v263_v21 }
 0x22c   : > { %265 = vst.msk [vmem:[%s161_s24] sm:$0xff] %vm252_vm2, %v264_v22 }
 0x22d   : > { %432 = shalt.err (!%p429_p3)
}
 0x22e   : > { %s433_s6 = scalar_lea.hbm %s582_s28, 128  ;;  %s437_s9 = scalar_lea.hbm %s628_s3, 256 }
 0x22f   : > { %p434_p4 = scmp.ne.s32.totalorder %s582_s28, %s433_s6  ;;  %p438_p9 = scmp.lt.u32.totalorder %s582_s28, %s628_s3 }
 0x230   : > { %p439_p10 = scmp.lt.u32.totalorder %s437_s9, %s433_s6  ;;  %p441_p12 = scmp.lt.u32.totalorder %s433_s6, %s582_s28 }
 0x231   : > { %p435_p7 = pnand %p434_p4, %p545_p5 }
 0x232   : > { %p440_p11 = por %p439_p10, %p438_p9 }
 0x233   : > { %p436_p8 = pneg %p435_p7 }
 0x234   : > { %p442_p13 = por %p441_p12, %p440_p11 }
 0x236   : > { %p443_p0 = pnand %p442_p13, %p436_p8 }
 0x238   : > { %446 = shalt.err (!%p443_p0)
}
 0x239   : > { %373 = dma.vmem_to_hbm [thread:$0]  (%p545_p5), %s584_s25, 128, %s582_s28, %s267_s29  }
 0x23a PF: > { %p379_p1 = scmp.ge.s32.totalorder %s481_s15, 2  ;;  %s292_s17 = sand.u32 1, %s469_s12  }
 0x23b   : > { %s293_s19 = scalar_lea.sflag [#allocation3], %s292_s17 }
 0x23c   : > { %p376_p2 = pnand %p379_p1, %p549_p6 }
 0x23e   : > { %464 = dma.done.wait (!%p376_p2), %s293_s19, 128  }
 0x23f   : > { %466 = vsyncadd (!%p376_p2), %s293_s19, 4294967168  ;;  %p13_p3 = scmp.ge.s32.totalorder %s532_s18, 4   ;;  %s631_s12 = smov %s473_s13 }
 0x240   : > { %s632_s13 = smov %s477_s14  ;;  %s633_s14 = smov %s543_s21 }
 0x241   : > { %s634_s15 = smov %s532_s18  ;;  %15 = sbr.rel (!%p13_p3) target bundleno = 3 (0x3), region = 67 }
 0x248   :  { %298 = vsyncpa [#allocation3], 1 }
 0x249   :  { %300 = vsyncpa [#allocation3 + $0x1], 1 }

// kernel: lamrg_v8_forward.36
= control target key start
LH: loop header
LB: loop body
LE: loop exit
PB: predicated region body
PF: predicated region fallthrough
CT: control target
= control target key end

     0   :  { %s1673_s24 = smov 0   ;;  %s1825_s0 = inlined_call_operand.vmem [shape: f32[2,8,32], index: 0, kind: input, shape index: {}]   ;;  %s1826_s1 = inlined_call_operand.vmem [shape: f32[1,32], index: 1, kind: input, shape index: {}]   ;;  %s1827_s2 = inlined_call_operand.vmem [shape: f32[1,32], index: 2, kind: input, shape index: {}]   ;;  %s1828_s3 = inlined_call_operand.vmem [shape: f32[32,96], index: 3, kind: input, shape index: {}]   ;;  %s1829_s4 = inlined_call_operand.vmem [shape: f32[1,96], index: 4, kind: input, shape index: {}]   ;;  %s1830_s5 = inlined_call_operand.vmem [shape: f32[32,32], index: 5, kind: input, shape index: {}]   ;;  %s1831_s6 = inlined_call_operand.vmem [shape: f32[1,32], index: 6, kind: input, shape index: {}]   ;;  %s1832_s7 = inlined_call_operand.vmem [shape: f32[2,8,32], index: 7, kind: output, shape index: {}]  }
   0x1 LB: > { %s1433_s25 = sadd.s32 4294967295, %s1617_s24   ;;  %p1437_p0 = scmp.ge.s32.totalorder %s1617_s24, 1  ;;  %s1617_s24 = sphi %s1673_s24, %s17_s24  }
   0x2   : > { %p236_p1 = scmp.lt.s32.totalorder %s1617_s24, 3 }
   0x4   : > { %p237_p2 = pnand %p1437_p0, %p236_p1 }
   0x5   : > { %p266_p3 = scmp.lt.s32.totalorder (!%p237_p2), %s1433_s25, 1  ;;  %vm277_vm0 = vcmask (!%p237_p2), 261120   ;;  %v314_v7 = vld [vmem:[%s1828_s3] sm:$0xff] (!%p237_p2)  ;;  %v315_v8 = vld [vmem:[%s1828_s3 + $0x8] sm:$0xff] (!%p237_p2)  ;;  %v316_v9 = vld [vmem:[%s1828_s3 + $0x10] sm:$0xff] (!%p237_p2)  ;;  %v1619_v10 = vmov (!%p237_p2), 0.0|0.0   ;;  %v402_v36 = vlaneseq (!%p237_p2) }
   0x6   : > { %240 = sbr.rel (%p237_p2) target bundleno = 2920 (0xb68), region = 48  ;;  %1563 = vmatprep.subr.bf16.mxu0 (!%p237_p2), %v1619_v10  ;;  %v1564_v11 = vpack.c.bf16 (!%p237_p2), %v315_v8, %v314_v7  ;;  %v317_v12 = vld [vmem:[%s1828_s3 + $0x18] sm:$0xff] (!%p237_p2)  ;;  %vm1620_vm1 = vmmov (!%p237_p2), 0   ;;  %v1621_v13 = vmov (!%p237_p2), 0.0   ;;  %v1440_v23 = vld [vmem:[%s1826_s1] ss:$0 sm:$0xff] (!%p237_p2) }
   0x7   : > { %1500 = vmatprep.mubr.msk.f32.mxu0 (!%p237_p2), %vm1620_vm1, %v1621_v13  ;;  %1503 = vmatprep.subr.mxu1 (!%p237_p2), %v1621_v13  ;;  %v1567_v14 = vpack.c.bf16 (!%p237_p2), %v317_v12, %v316_v9  ;;  %v1441_v26 = vld [vmem:[%s1827_s2] ss:$0 sm:$0xff] (!%p237_p2)  ;;  %s1622_s21 = smov (!%p237_p2), 120   ;;  %s1623_s22 = smov (!%p237_p2), 96   ;;  %vm411_vm4 = vcmask (!%p237_p2), 64512   ;;  %v403_v37 = vshrl.u32 (!%p237_p2), %v402_v36, 7 }
   0x8   : > { %1505 = vmatprep.mubr.msk.f32.mxu1 (!%p237_p2), %vm1620_vm1, %v1621_v13  ;;  %1565 = vmatpush3.bf16.msra.mxu0 (!%p237_p2), %v1564_v11  ;;  %v1442_v29 = vld [vmem:[%s1829_s4] ss:$0 sm:$0xff] (!%p237_p2)  ;;  %s1624_s23 = smov (!%p237_p2), 88   ;;  %v405_v38 = vand.u32 (!%p237_p2), 127, %v402_v36  ;;  %s1625_s27 = smov (!%p237_p2), 56   ;;  %v399_v60 = vld [vmem:[%s1830_s5 + $0x8] sm:$0xff] (!%p237_p2) }
   0x9   : > { %1566 = vmatprep.subr.bf16.mxu0 (!%p237_p2), %v1619_v10  ;;  %s1626_s28 = smov (!%p237_p2), 64   ;;  %s1628_s30 = smov (!%p237_p2), 112   ;;  %v400_v36 = vld [vmem:[%s1830_s5 + $0x10] sm:$0xff] (!%p237_p2) }
   0xa   : > { %vm406_vm5 = vcmp.gt.s32.totalorder (!%p237_p2), %v405_v38, %v403_v37  ;;  %s1629_s12 = smov (!%p237_p2), 48   ;;  %s1630_s13 = smov (!%p237_p2), 104  }
   0xb   : > { %v1742_v40 = vsel (!%p237_p2), %vm406_vm5, -1e+09, %v1621_v13  ;;  %s1631_s14 = smov (!%p237_p2), 72   ;;  %s1632_s17 = smov (!%p237_p2), 40  }
   0xc   : > { %1568 = vmatpush3.bf16.msra.mxu0 (!%p237_p2), %v1567_v14 }
   0xd   : > { %s1834_s25 = smov (!%p266_p3, %s1433_s25), 1  ;;  %1513 = vmatprep.subr.mxu0 %v1621_v13 }
   0xe   : > { %s1438_s26 = sshll.u32 %s1834_s25, 3 }
   0xf   : > { %s269_s29 = scalar_lea.vmem %s1825_s0, %s1438_s26 }
  0x10   : > { %v1689_v0 = vld [vmem:[%s269_s29] sm:$0xff]  ;;  %s1627_s29 = smov 80  }
  0x11   : > { %v278_v1 = vsel %vm277_vm0, %v1689_v0, 0.0 }
  0x12   : > { %279 = vadd.xlane.f32.xlu0 %v278_v1 }
  0x9f   : > { %v280_v2 = vpop.xlane.xlu0 %279 }
  0xa0   : > { %v282_v3 = vmul.f32 0.03125, %v280_v2 }
  0xa2   : > { %v283_v4 = vsub.f32 %v1689_v0, %v282_v3 }
  0xa4   : > { %v284_v5 = vmul.f32 %v283_v4, %v283_v4  ;;  %v296_v24 = vmul.f32 %v1440_v23, %v283_v4 }
  0xa6   : > { %v285_v6 = vsel %vm277_vm0, %v284_v5, 0.0 }
  0xa7   : > { %286 = vadd.xlane.f32.xlu0 %v285_v6  ;;  %v398_v6 = vld [vmem:[%s1830_s5] sm:$0xff] }
 0x134   : > { %v287_v15 = vpop.xlane.xlu0 %286 }
 0x135   : > { %v289_v16 = vmul.f32 0.032258064, %v287_v15 }
 0x137   : > { %1591 = vrsqrt.f32 %v289_v16  ;;  %vm299_vm2 = vcmp.eq.f32.partialorder %v289_v16, inf  ;;  %v302_v19 = vand.u32 2147483648, %v289_v16  ;;  %vm301_vm3 = vcmp.eq.f32.partialorder %v289_v16, 0.0 }
 0x141   : > { %v1592_v17 = vpop.eup %1591 }
 0x142   : > { %v298_v18 = vmul.f32 %v1592_v17, %v289_v16 }
 0x144   : > { %v300_v20 = vsel %vm299_vm2, %v289_v16, %v298_v18 }
 0x145   : > { %v303_v21 = vsel %vm301_vm3, %v302_v19, %v300_v20 }
 0x146   : > { %v304_v22 = vadd.f32 1e-06, %v303_v21 }
 0x148   : > { %1593 = vrcp.f32 %v304_v22 }
 0x152   : > { %v1594_v25 = vpop.eup %1593 }
 0x153   : > { %v306_v27 = vmul.f32 %v1594_v25, %v296_v24 }
 0x155   : > { %v313_v28 = vadd.f32 %v1441_v26, %v306_v27 }
 0x157   : > { %1501 = vmatmul.mubr.msk.f32.vlgmr.msra.gmra.mrb[0].mxu0 %vm277_vm0, %v313_v28 }
 0x158   : > { %1515 = vmatprep.mubr.msk.f32.mxu0 %vm1620_vm1, %v1621_v13 }
 0x22a   : > { %v394_v30 = vpop.f32.mrb[0].mxu0 }
 0x22b   : > { %v1725_v31 = vadd.f32 %v1442_v29, %v394_v30  ;;  %v1502_v32 = vpop.f32.mrb[1].mxu0 }
 0x22d   : > { %575 = vrot.lane.b32.xlu0 %v1725_v31, %s1622_s21  ;;  %409 = vrot.lane.b32.xlu1 %v1725_v31, %s1623_s22 }
 0x231   : > { %577 = vrot.lane.b32.xlu1 %v1725_v31, %s1624_s23 }
 0x29f   : > { %v410_v33 = vpop.permute.xlu1 %409  ;;  %v576_v35 = vpop.permute.xlu0 %575 }
 0x2a0   : > { %1504 = vmatpush3.xpose.msk.msra.mxu1 %vm411_vm4, %v410_v33 }
 0x2a1   : > { %1508 = vmatprep.subr.mxu1 %v1621_v13 }
 0x2a3   : > { %1506 = vmatmul.mubr.msk.f32.vlgmr.msra.gmra.mrb[0].mxu1 %vm411_vm4, %v1725_v31  ;;  %v578_v34 = vpop.permute.xlu1 %577 }
 0x2a4   : > { %1514 = vmatpush3.xpose.msk.msra.mxu0 %vm411_vm4, %v578_v34  ;;  %1510 = vmatprep.mubr.msk.f32.mxu1 %vm1620_vm1, %v1621_v13 }
 0x2a5   : > { %1523 = vmatprep.subr.mxu0 %v1621_v13 }
 0x2a7   : > { %1516 = vmatmul.mubr.msk.f32.vlgmr.msra.gmra.mrb[2].mxu0 %vm411_vm4, %v576_v35 }
 0x2a8   : > { %1525 = vmatprep.mubr.msk.f32.mxu0 %vm1620_vm1, %v1621_v13  ;;  %1524 = vmatpush3.msra.mxu0 %v399_v60  ;;  %v1460_v60 = vld [vmem:[%s1831_s6] ss:$0 sm:$0xff] }
 0x2a9   : > { %1533 = vmatprep.subr.mxu0 %v1621_v13 }
 0x376   : > { %v482_v39 = vpop.f32.mrb[0].mxu1 }
 0x377   : > { %v486_v41 = vmul.f32 0.35355338, %v482_v39  ;;  %v1507_v42 = vpop.f32.mrb[1].mxu1 }
 0x379   : > { %v487_v43 = vadd.f32 %v486_v41, %v1742_v40 }
 0x37a   : > { %v649_v44 = vpop.f32.mrb[2].mxu0 }
 0x37b   : > { %v653_v45 = vmul.f32 0.35355338, %v649_v44  ;;  %v1517_v46 = vpop.f32.mrb[3].mxu0  ;;  %v488_v47 = vsel %vm411_vm4, %v487_v43, -inf }
 0x37c   : > { %489 = vmax.xlane.f32.xlu1 %v488_v47 }
 0x37d   : > { %v654_v48 = vadd.f32 %v653_v45, %v1742_v40 }
 0x37f   : > { %v655_v49 = vsel %vm411_vm4, %v654_v48, -inf }
 0x380   : > { %656 = vmax.xlane.f32.xlu0 %v655_v49 }
 0x396   : > { %666 = vrot.lane.b32.xlu0 %v1725_v31, %s1625_s27  ;;  %s273_s27 = scalar_lea.vmem %s1832_s7, %s1438_s26 }
 0x409   : > { %v490_v50 = vpop.xlane.xlu1 %489 }
 0x40a   : > { %v491_v51 = vsub.f32 %v487_v43, %v490_v50 }
 0x40c   : > { %v492_v52 = vmul.f32 1.442695, %v491_v51 }
 0x40d   : > { %v657_v53 = vpop.xlane.xlu0 %656 }
 0x40e   : > { %1595 = vpow2.f32 %v492_v52  ;;  %v658_v54 = vsub.f32 %v654_v48, %v657_v53 }
 0x410   : > { %v659_v55 = vmul.f32 1.442695, %v658_v54 }
 0x411   : > { %v667_v3 = vpop.permute.xlu0 %666 }
 0x412   : > { %1597 = vpow2.f32 %v659_v55 }
 0x418   : > { %v1596_v56 = vpop.eup %1595 }
 0x419   : > { %v494_v57 = vsel %vm411_vm4, %v1596_v56, 0.0 }
 0x41a   : > { %495 = vadd.xlane.f32.xlu1 %v494_v57 }
 0x41c   : > { %v1598_v58 = vpop.eup %1597 }
 0x41d   : > { %v661_v59 = vsel %vm411_vm4, %v1598_v58, 0.0 }
 0x41e   : > { %662 = vadd.xlane.f32.xlu1 %v661_v59 }
 0x42f   : > { %499 = vrot.lane.b32.xlu1 %v1725_v31, %s1626_s28 }
 0x433   : > { %890 = vrot.lane.b32.xlu1 %v1725_v31, %s1627_s29 }
 0x437   : > { %888 = vrot.lane.b32.xlu1 %v1725_v31, %s1628_s30 }
 0x4a7   : > { %v496_v61 = vpop.xlane.xlu1 %495 }
 0x4a8   : > { %1599 = vrcp.f32 %v496_v61 }
 0x4ab   : > { %v663_v62 = vpop.xlane.xlu1 %662 }
 0x4ac   : > { %1601 = vrcp.f32 %v663_v62 }
 0x4af   : > { %v500_v63 = vpop.permute.xlu1 %499 }
 0x4b0   : > { %1509 = vmatpush3.msra.mxu1 %v500_v63 }
 0x4b1   : > { %1518 = vmatprep.subr.mxu1 %v1621_v13 }
 0x4b2   : > { %v1600_v1 = vpop.eup %1599 }
 0x4b3   : > { %v498_v2 = vmul.f32 %v1600_v1, %v1596_v56  ;;  %v891_v9 = vpop.permute.xlu1 %890 }
 0x4b5   : > { %1511 = vmatmul.mubr.msk.f32.vlgmr.msra.gmra.mrb[2].mxu1 %vm411_vm4, %v498_v2 }
 0x4b6   : > { %v1602_v4 = vpop.eup %1601  ;;  %1519 = vmatpush3.msra.mxu1 %v667_v3  ;;  %1520 = vmatprep.mubr.msk.f32.mxu1 %vm1620_vm1, %v1621_v13 }
 0x4b7   : > { %v665_v5 = vmul.f32 %v1602_v4, %v1598_v58  ;;  %1528 = vmatprep.subr.mxu1 %v1621_v13  ;;  %v889_v12 = vpop.permute.xlu1 %888 }
 0x4b9   : > { %1521 = vmatmul.mubr.msk.f32.vlgmr.msra.gmra.mrb[4].mxu1 %vm411_vm4, %v665_v5 }
 0x4ba   : > { %1530 = vmatprep.mubr.msk.f32.mxu1 %vm1620_vm1, %v1621_v13  ;;  %1529 = vmatpush3.msra.mxu1 %v398_v6 }
 0x4bb   : > { %1538 = vmatprep.subr.mxu1 %v1621_v13 }
 0x588   : > { %v571_v7 = vpop.f32.mrb[2].mxu1 }
 0x589   : > { %v1512_v8 = vpop.f32.mrb[3].mxu1  ;;  %1531 = vmatmul.mubr.msk.f32.vlgmr.msra.gmra.mrb[6].mxu1 %vm411_vm4, %v571_v7 }
 0x58a   : > { %1540 = vmatprep.mubr.msk.f32.mxu1 %vm1620_vm1, %v1621_v13 }
 0x58c   : > { %v738_v10 = vpop.f32.mrb[4].mxu1 }
 0x58d   : > { %v1522_v11 = vpop.f32.mrb[5].mxu1  ;;  %1526 = vmatmul.mubr.msk.f32.vlgmr.msra.gmra.mrb[4].mxu0 %vm411_vm4, %v738_v10 }
 0x58e   : > { %1534 = vmatpush3.xpose.msk.msra.mxu0 %vm411_vm4, %v891_v9  ;;  %1535 = vmatprep.mubr.msk.f32.mxu0 %vm1620_vm1, %v1621_v13 }
 0x58f   : > { %1543 = vmatprep.subr.mxu0 %v1621_v13 }
 0x591   : > { %1536 = vmatmul.mubr.msk.f32.vlgmr.msra.gmra.mrb[6].mxu0 %vm411_vm4, %v889_v12 }
 0x592   : > { %1545 = vmatprep.mubr.msk.f32.mxu0 %vm1620_vm1, %v1621_v13  ;;  %1544 = vmatpush3.msra.mxu0 %v400_v36 }
 0x593   : > { %1553 = vmatprep.subr.mxu0 %v1621_v13 }
 0x65c   : > { %v884_v14 = vpop.f32.mrb[6].mxu1 }
 0x65d   : > { %v1532_v15 = vpop.f32.mrb[7].mxu1 }
 0x660   : > { %v811_v16 = vpop.f32.mrb[4].mxu0 }
 0x661   : > { %v885_v17 = vadd.f32 %v884_v14, %v811_v16  ;;  %v1527_v18 = vpop.f32.mrb[5].mxu0 }
 0x664   : > { %v962_v19 = vpop.f32.mrb[6].mxu0 }
 0x665   : > { %v966_v20 = vmul.f32 0.35355338, %v962_v19  ;;  %v1537_v21 = vpop.f32.mrb[7].mxu0 }
 0x667   : > { %v967_v22 = vadd.f32 %v966_v20, %v1742_v40 }
 0x669   : > { %v968_v23 = vsel %vm411_vm4, %v967_v22, -inf }
 0x66a   : > { %969 = vmax.xlane.f32.xlu1 %v968_v23 }
 0x67b   : > { %979 = vrot.lane.b32.xlu1 %v1725_v31, %s1629_s12 }
 0x67f   : > { %1129 = vrot.lane.b32.xlu1 %v1725_v31, %s1630_s13 }
 0x6f7   : > { %v970_v24 = vpop.xlane.xlu1 %969 }
 0x6f8   : > { %v971_v25 = vsub.f32 %v967_v22, %v970_v24 }
 0x6fa   : > { %v972_v26 = vmul.f32 1.442695, %v971_v25 }
 0x6fb   : > { %v980_v27 = vpop.permute.xlu1 %979 }
 0x6fc   : > { %1603 = vpow2.f32 %v972_v26  ;;  %1539 = vmatpush3.msra.mxu1 %v980_v27 }
 0x6fd   : > { %1548 = vmatprep.subr.mxu1 %v1621_v13 }
 0x6ff   : > { %v1130_v35 = vpop.permute.xlu1 %1129 }
 0x706   : > { %v1604_v28 = vpop.eup %1603 }
 0x707   : > { %v974_v29 = vsel %vm411_vm4, %v1604_v28, 0.0 }
 0x708   : > { %975 = vadd.xlane.f32.xlu0 %v974_v29 }
 0x71e   : > { %1131 = vrot.lane.b32.xlu0 %v1725_v31, %s1631_s14 }
 0x795   : > { %v976_v30 = vpop.xlane.xlu0 %975 }
 0x796   : > { %1605 = vrcp.f32 %v976_v30 }
 0x799   : > { %v1132_v34 = vpop.permute.xlu0 %1131 }
 0x7a0   : > { %v1606_v32 = vpop.eup %1605 }
 0x7a1   : > { %v978_v33 = vmul.f32 %v1606_v32, %v1604_v28 }
 0x7a3   : > { %1541 = vmatmul.mubr.msk.f32.vlgmr.msra.gmra.mrb[8].mxu1 %vm411_vm4, %v978_v33 }
 0x7a4   : > { %1549 = vmatpush3.xpose.msk.msra.mxu1 %vm411_vm4, %v1132_v34  ;;  %1550 = vmatprep.mubr.msk.f32.mxu1 %vm1620_vm1, %v1621_v13 }
 0x7a5   : > { %1558 = vmatprep.subr.mxu1 %v1621_v13 }
 0x7a7   : > { %1551 = vmatmul.mubr.msk.f32.vlgmr.msra.gmra.mrb[10].mxu1 %vm411_vm4, %v1130_v35 }
 0x7a8   : > { %1560 = vmatprep.mubr.msk.f32.mxu1 %vm1620_vm1, %v1621_v13 }
 0x876   : > { %v1051_v37 = vpop.f32.mrb[8].mxu1 }
 0x877   : > { %v1542_v38 = vpop.f32.mrb[9].mxu1  ;;  %1546 = vmatmul.mubr.msk.f32.vlgmr.msra.gmra.mrb[8].mxu0 %vm411_vm4, %v1051_v37 }
 0x878   : > { %1555 = vmatprep.mubr.msk.f32.mxu0 %vm1620_vm1, %v1621_v13  ;;  %v401_v13 = vld [vmem:[%s1830_s5 + $0x18] sm:$0xff] }
 0x879   : > { %1559 = vmatpush3.msra.mxu1 %v401_v13 }
 0x87a   : > { %v1203_v39 = vpop.f32.mrb[10].mxu1 }
 0x87b   : > { %v1207_v41 = vmul.f32 0.35355338, %v1203_v39  ;;  %v1552_v42 = vpop.f32.mrb[11].mxu1 }
 0x87d   : > { %v1208_v43 = vadd.f32 %v1207_v41, %v1742_v40 }
 0x87f   : > { %v1209_v44 = vsel %vm411_vm4, %v1208_v43, -inf }
 0x880   : > { %1210 = vmax.xlane.f32.xlu1 %v1209_v44 }
 0x90d   : > { %v1211_v45 = vpop.xlane.xlu1 %1210 }
 0x90e   : > { %v1212_v46 = vsub.f32 %v1208_v43, %v1211_v45 }
 0x910   : > { %v1213_v47 = vmul.f32 1.442695, %v1212_v46 }
 0x912   : > { %1607 = vpow2.f32 %v1213_v47 }
 0x91c   : > { %v1608_v48 = vpop.eup %1607 }
 0x91d   : > { %v1215_v49 = vsel %vm411_vm4, %v1608_v48, 0.0 }
 0x91e   : > { %1216 = vadd.xlane.f32.xlu0 %v1215_v49 }
 0x934   : > { %1220 = vrot.lane.b32.xlu0 %v1725_v31, %s1632_s17 }
 0x94a   : > { %v1124_v40 = vpop.f32.mrb[8].mxu0 }
 0x94b   : > { %v1128_v50 = vadd.f32 %v1124_v40, %v885_v17  ;;  %v1547_v51 = vpop.f32.mrb[9].mxu0 }
 0x9ab   : > { %v1217_v52 = vpop.xlane.xlu0 %1216 }
 0x9ac   : > { %1609 = vrcp.f32 %v1217_v52 }
 0x9af   : > { %v1221_v53 = vpop.permute.xlu0 %1220 }
 0x9b0   : > { %1554 = vmatpush3.msra.mxu0 %v1221_v53 }
 0x9b6   : > { %v1610_v54 = vpop.eup %1609 }
 0x9b7   : > { %v1219_v55 = vmul.f32 %v1610_v54, %v1608_v48 }
 0x9b9   : > { %1556 = vmatmul.mubr.msk.f32.vlgmr.msra.gmra.mrb[10].mxu0 %vm411_vm4, %v1219_v55 }
 0xa8c   : > { %v1292_v56 = vpop.f32.mrb[10].mxu0 }
 0xa8d   : > { %v1557_v57 = vpop.f32.mrb[11].mxu0  ;;  %1561 = vmatmul.mubr.msk.f32.vlgmr.msra.gmra.mrb[12].mxu1 %vm411_vm4, %v1292_v56 }
 0xb60   : > { %v1365_v31 = vpop.f32.mrb[12].mxu1 }
 0xb61   : > { %v1369_v58 = vadd.f32 %v1365_v31, %v1128_v50  ;;  %v1562_v59 = vpop.f32.mrb[13].mxu1 }
 0xb63   : > { %v1370_v61 = vadd.f32 %v1369_v58, %v1689_v0 }
 0xb65   : > { %v1378_v62 = vadd.f32 %v1460_v60, %v1370_v61 }
 0xb67   : > { %1379 = vst.msk [vmem:[%s273_s27] sm:$0xff] %vm277_vm0, %v1378_v62 }
 0xb68 PF: > { %s17_s24 = sadd.s32 1, %s1617_s24  }
 0xb69   : > { %p14_p4 = scmp.ge.s32.totalorder %s17_s24, 4  }
 0xb6b   :  { %16 = sbr.rel (!%p14_p4) target bundleno = 1 (0x1), region = 78 }

// kernel: lamrg_v8_forward.37
= control target key start
LH: loop header
LB: loop body
LE: loop exit
PB: predicated region body
PF: predicated region fallthrough
CT: control target
= control target key end

     0   :  { %s1899_s13 = smov 0   ;;  %s2069_s0 = inlined_call_operand.vmem [shape: f32[2,8,32], index: 0, kind: input, shape index: {}]   ;;  %s2070_s1 = inlined_call_operand.vmem [shape: f32[2,5,32], index: 1, kind: input, shape index: {}]   ;;  %s2071_s2 = inlined_call_operand.vmem [shape: f32[1,32], index: 2, kind: input, shape index: {}]   ;;  %s2072_s3 = inlined_call_operand.vmem [shape: f32[1,32], index: 3, kind: input, shape index: {}]   ;;  %s2073_s4 = inlined_call_operand.vmem [shape: f32[32,32], index: 4, kind: input, shape index: {}]   ;;  %s2074_s5 = inlined_call_operand.vmem [shape: f32[1,32], index: 5, kind: input, shape index: {}]   ;;  %s2075_s6 = inlined_call_operand.vmem [shape: f32[32,64], index: 6, kind: input, shape index: {}]   ;;  %s2076_s7 = inlined_call_operand.vmem [shape: f32[1,64], index: 7, kind: input, shape index: {}]   ;;  %s2077_s8 = inlined_call_operand.vmem [shape: f32[32,32], index: 8, kind: input, shape index: {}]   ;;  %s2078_s9 = inlined_call_operand.vmem [shape: f32[1,32], index: 9, kind: input, shape index: {}]   ;;  %s2079_s10 = inlined_call_operand.vmem [shape: f32[2,8,32], index: 10, kind: output, shape index: {}]  }
   0x1 LB: > { %s1623_s14 = sadd.s32 4294967295, %s1832_s13   ;;  %p1627_p0 = scmp.ge.s32.totalorder %s1832_s13, 1  ;;  %s1832_s13 = sphi %s1899_s13, %s20_s13  }
   0x2   : > { %p320_p1 = scmp.lt.s32.totalorder %s1832_s13, 3 }
   0x4   : > { %p321_p2 = pnand %p1627_p0, %p320_p1 }
   0x5   : > { %p360_p3 = scmp.lt.s32.totalorder (!%p321_p2), %s1623_s14, 1  ;;  %vm376_vm0 = vcmask (!%p321_p2), 261120   ;;  %v497_v7 = vld [vmem:[%s2075_s6] sm:$0xff] (!%p321_p2)  ;;  %v498_v8 = vld [vmem:[%s2075_s6 + $0x8] sm:$0xff] (!%p321_p2)  ;;  %v499_v9 = vld [vmem:[%s2075_s6 + $0x10] sm:$0xff] (!%p321_p2)  ;;  %v1834_v10 = vmov (!%p321_p2), 0.0|0.0  }
   0x6   : > { %324 = sbr.rel (%p321_p2) target bundleno = 2907 (0xb5b), region = 60  ;;  %1782 = vmatprep.subr.bf16.mxu1 (!%p321_p2), %v1834_v10  ;;  %v1783_v11 = vpack.c.bf16 (!%p321_p2), %v498_v8, %v497_v7  ;;  %1776 = vmatprep.subr.bf16.mxu0 (!%p321_p2), %v1834_v10  ;;  %v500_v12 = vld [vmem:[%s2075_s6 + $0x18] sm:$0xff] (!%p321_p2)  ;;  %v413_v13 = vld [vmem:[%s2073_s4] sm:$0xff] (!%p321_p2)  ;;  %v414_v14 = vld [vmem:[%s2073_s4 + $0x8] sm:$0xff] (!%p321_p2)  ;;  %vm1835_vm1 = vmmov (!%p321_p2), 0   ;;  %v1836_v16 = vmov (!%p321_p2), 0.0  }
   0x7   : > { %v1777_v15 = vpack.c.bf16 (!%p321_p2), %v414_v14, %v413_v13  ;;  %1713 = vmatprep.mubr.msk.f32.mxu1 (!%p321_p2), %vm1835_vm1, %v1836_v16  ;;  %v415_v17 = vld [vmem:[%s2073_s4 + $0x10] sm:$0xff] (!%p321_p2)  ;;  %v416_v18 = vld [vmem:[%s2073_s4 + $0x18] sm:$0xff] (!%p321_p2)  ;;  %1702 = vmatprep.mubr.msk.f32.mxu0 (!%p321_p2), %vm1835_vm1, %v1836_v16  ;;  %v1786_v19 = vpack.c.bf16 (!%p321_p2), %v500_v12, %v499_v9  ;;  %v1631_v30 = vld [vmem:[%s2071_s2] ss:$0 sm:$0xff] (!%p321_p2)  ;;  %vm585_vm4 = vcmask (!%p321_p2), 64512   ;;  %s1837_s26 = smov (!%p321_p2), 120  }
   0x8   : > { %1784 = vmatpush3.bf16.msra.mxu1 (!%p321_p2), %v1783_v11  ;;  %v1780_v20 = vpack.c.bf16 (!%p321_p2), %v416_v18, %v415_v17  ;;  %v1632_v33 = vld [vmem:[%s2072_s3] ss:$0 sm:$0xff] (!%p321_p2)  ;;  %vm663_vm5 = vcmask (!%p321_p2), 39936   ;;  %s1838_s29 = smov (!%p321_p2), 96   ;;  %s1839_s30 = smov (!%p321_p2), 112   ;;  %vm680_vm6 = vcmask (!%p321_p2), 1044480  }
   0x9   : > { %1785 = vmatprep.subr.bf16.mxu1 (!%p321_p2), %v1834_v10  ;;  %1778 = vmatpush3.bf16.msra.mxu0 (!%p321_p2), %v1777_v15  ;;  %v1635_v36 = vld [vmem:[%s2076_s7] ss:$0 sm:$0xff] (!%p321_p2)  ;;  %s1840_s11 = smov (!%p321_p2), 88   ;;  %s1843_s22 = smov (!%p321_p2), 72  }
   0xa   : > { %1779 = vmatprep.subr.bf16.mxu0 (!%p321_p2), %v1834_v10  ;;  %v1633_v40 = vld [vmem:[%s2074_s5] ss:$0 sm:$0xff] (!%p321_p2) }
   0xb   : > { %v581_v10 = vld [vmem:[%s2077_s8] sm:$0xff] (!%p321_p2) }
   0xc   : > { %1787 = vmatpush3.bf16.msra.mxu1 (!%p321_p2), %v1786_v19 }
   0xd   : > { %s2081_s14 = smov (!%p360_p3, %s1623_s14), 1  ;;  %1781 = vmatpush3.bf16.msra.mxu0 %v1780_v20  ;;  %1721 = vmatprep.subr.mxu1 %v1836_v16 }
   0xe   : > { %s1907_s15 = sshll.u32 %s2081_s14, 3  ;;  %1716 = vmatprep.subr.mxu0 %v1836_v16 }
   0xf   : > { %s363_s18 = scalar_lea.vmem %s2069_s0, %s1907_s15  ;;  %s367_s19 = scalar_lea.vmem %s2070_s1, %s1907_s15 }
  0x10   : > { %v1913_v0 = vld [vmem:[%s363_s18] sm:$0xff]  ;;  %s1841_s18 = smov 80  }
  0x11   : > { %v377_v1 = vsel %vm376_vm0, %v1913_v0, 0.0  ;;  %v373_v21 = vld [vmem:[%s367_s19] sm:$0x1f]  ;;  %s1842_s19 = smov 104  }
  0x12   : > { %378 = vadd.xlane.f32.xlu0 %v377_v1  ;;  %1714 = vmatmul.mubr.msk.f32.vlgmr.msra.gmra.mrb[0].mxu1 %vm376_vm0, %v373_v21 }
  0x13   : > { %1723 = vmatprep.mubr.msk.f32.mxu1 %vm1835_vm1, %v1836_v16 }
  0x9f   : > { %v379_v2 = vpop.xlane.xlu0 %378 }
  0xa0   : > { %v381_v3 = vmul.f32 0.03125, %v379_v2 }
  0xa2   : > { %v382_v4 = vsub.f32 %v1913_v0, %v381_v3 }
  0xa4   : > { %v383_v5 = vmul.f32 %v382_v4, %v382_v4  ;;  %v395_v31 = vmul.f32 %v1631_v30, %v382_v4 }
  0xa6   : > { %v384_v6 = vsel %vm376_vm0, %v383_v5, 0.0  ;;  %v582_v5 = vld [vmem:[%s2077_s8 + $0x8] sm:$0xff] }
  0xa7   : > { %385 = vadd.xlane.f32.xlu0 %v384_v6 }
  0xe5   : > { %v577_v37 = vpop.f32.mrb[0].mxu1 }
  0xe6   : > { %v1968_v38 = vadd.f32 %v1635_v36, %v577_v37  ;;  %v1715_v39 = vpop.f32.mrb[1].mxu1 }
  0xe7   : > { %v583_v39 = vld [vmem:[%s2077_s8 + $0x10] sm:$0xff] }
  0xe8   : > { %755 = vrot.lane.b32.xlu1 %v1968_v38, %s1837_s26 }
 0x134   : > { %v386_v22 = vpop.xlane.xlu0 %385 }
 0x135   : > { %v388_v23 = vmul.f32 0.032258064, %v386_v22 }
 0x137   : > { %1806 = vrsqrt.f32 %v388_v23  ;;  %vm398_vm2 = vcmp.eq.f32.partialorder %v388_v23, inf  ;;  %v401_v26 = vand.u32 2147483648, %v388_v23  ;;  %vm400_vm3 = vcmp.eq.f32.partialorder %v388_v23, 0.0 }
 0x141   : > { %v1807_v24 = vpop.eup %1806 }
 0x142   : > { %v397_v25 = vmul.f32 %v1807_v24, %v388_v23 }
 0x144   : > { %v399_v27 = vsel %vm398_vm2, %v388_v23, %v397_v25 }
 0x145   : > { %v402_v28 = vsel %vm400_vm3, %v401_v26, %v399_v27 }
 0x146   : > { %v403_v29 = vadd.f32 1e-06, %v402_v28 }
 0x148   : > { %1808 = vrcp.f32 %v403_v29 }
 0x152   : > { %v1809_v32 = vpop.eup %1808 }
 0x153   : > { %v405_v34 = vmul.f32 %v1809_v32, %v395_v31 }
 0x155   : > { %v412_v35 = vadd.f32 %v1632_v33, %v405_v34 }
 0x157   : > { %1703 = vmatmul.mubr.msk.f32.vlgmr.msra.gmra.mrb[0].mxu0 %vm376_vm0, %v412_v35 }
 0x158   : > { %1718 = vmatprep.mubr.msk.f32.mxu0 %vm1835_vm1, %v1836_v16  ;;  %1717 = vmatpush3.xpose.msk.msra.mxu0 %vm585_vm4, %v1968_v38 }
 0x159   : > { %1726 = vmatprep.subr.mxu0 %v1836_v16 }
 0x15a   : > { %v756_v44 = vpop.permute.xlu1 %755 }
 0x22a   : > { %v493_v41 = vpop.f32.mrb[0].mxu0 }
 0x22b   : > { %v1977_v42 = vadd.f32 %v1633_v40, %v493_v41  ;;  %v1704_v43 = vpop.f32.mrb[1].mxu0 }
 0x22d   : > { %753 = vrot.lane.b32.xlu1 %v1977_v42, %s1837_s26  ;;  %1719 = vmatmul.mubr.msk.f32.vlgmr.msra.gmra.mrb[2].mxu0 %vm585_vm4, %v1977_v42 }
 0x22e   : > { %1727 = vmatpush3.xpose.msk.msra.mxu0 %vm585_vm4, %v756_v44  ;;  %1728 = vmatprep.mubr.msk.f32.mxu0 %vm1835_vm1, %v1836_v16 }
 0x22f   : > { %1736 = vmatprep.subr.mxu0 %v1836_v16 }
 0x29f   : > { %v754_v45 = vpop.permute.xlu1 %753 }
 0x2a0   : > { %1729 = vmatmul.mubr.msk.f32.vlgmr.msra.gmra.mrb[4].mxu0 %vm585_vm4, %v754_v45 }
 0x2a1   : > { %1738 = vmatprep.mubr.msk.f32.mxu0 %vm1835_vm1, %v1836_v16  ;;  %1737 = vmatpush3.msra.mxu0 %v582_v5 }
 0x2a2   : > { %1746 = vmatprep.subr.mxu0 %v1836_v16 }
 0x300   : > { %v658_v46 = vpop.f32.mrb[2].mxu0 }
 0x301   : > { %v662_v47 = vmul.f32 0.35355338, %v658_v46  ;;  %v1720_v48 = vpop.f32.mrb[3].mxu0 }
 0x303   : > { %v664_v49 = vsel %vm663_vm5, %v662_v47, -inf }
 0x304   : > { %665 = vmax.xlane.f32.xlu0 %v664_v49 }
 0x31a   : > { %675 = vrot.lane.b32.xlu0 %v1968_v38, %s1838_s29  ;;  %s371_s29 = scalar_lea.vmem %s2079_s10, %s1907_s15 }
 0x373   : > { %v827_v50 = vpop.f32.mrb[4].mxu0 }
 0x374   : > { %v831_v51 = vmul.f32 0.35355338, %v827_v50  ;;  %v1730_v52 = vpop.f32.mrb[5].mxu0 }
 0x376   : > { %v832_v53 = vsel %vm663_vm5, %v831_v51, -inf }
 0x377   : > { %833 = vmax.xlane.f32.xlu1 %v832_v53 }
 0x388   : > { %1068 = vrot.lane.b32.xlu1 %v1968_v38, %s1839_s30 }
 0x391   : > { %v666_v54 = vpop.xlane.xlu0 %665 }
 0x392   : > { %v667_v55 = vsub.f32 %v662_v47, %v666_v54 }
 0x394   : > { %v668_v56 = vmul.f32 1.442695, %v667_v55 }
 0x395   : > { %v676_v57 = vpop.permute.xlu0 %675 }
 0x396   : > { %1810 = vpow2.f32 %v668_v56  ;;  %1722 = vmatpush3.msk.msra.mxu1 %vm680_vm6, %v676_v57 }
 0x397   : > { %1731 = vmatprep.subr.mxu1 %v1836_v16 }
 0x3a0   : > { %v1811_v58 = vpop.eup %1810 }
 0x3a1   : > { %v670_v59 = vsel %vm663_vm5, %v1811_v58, 0.0 }
 0x3a2   : > { %671 = vadd.xlane.f32.xlu0 %v670_v59 }
 0x404   : > { %v834_v60 = vpop.xlane.xlu1 %833 }
 0x405   : > { %v835_v61 = vsub.f32 %v831_v51, %v834_v60 }
 0x407   : > { %v836_v62 = vmul.f32 1.442695, %v835_v61 }
 0x408   : > { %v1069_v14 = vpop.permute.xlu1 %1068 }
 0x409   : > { %1812 = vpow2.f32 %v836_v62  ;;  %v1657_v62 = vld [vmem:[%s2078_s9] ss:$0 sm:$0xff] }
 0x413   : > { %v1813_v63 = vpop.eup %1812 }
 0x414   : > { %v838_v1 = vsel %vm663_vm5, %v1813_v63, 0.0 }
 0x415   : > { %839 = vadd.xlane.f32.xlu0 %v838_v1 }
 0x42b   : > { %843 = vrot.lane.b32.xlu0 %v1968_v38, %s1840_s11 }
 0x42f   : > { %v672_v2 = vpop.xlane.xlu0 %671  ;;  %1066 = vrot.lane.b32.xlu0 %v1977_v42, %s1839_s30 }
 0x430   : > { %1814 = vrcp.f32 %v672_v2 }
 0x43a   : > { %v1815_v3 = vpop.eup %1814 }
 0x43b   : > { %v674_v4 = vmul.f32 %v1815_v3, %v1811_v58 }
 0x43d   : > { %1724 = vmatmul.mubr.msk.f32.vlgmr.msra.gmra.mrb[2].mxu1 %vm663_vm5, %v674_v4 }
 0x43e   : > { %1733 = vmatprep.mubr.msk.f32.mxu1 %vm1835_vm1, %v1836_v16 }
 0x4a2   : > { %v840_v6 = vpop.xlane.xlu0 %839 }
 0x4a3   : > { %1816 = vrcp.f32 %v840_v6 }
 0x4a6   : > { %v844_v7 = vpop.permute.xlu0 %843 }
 0x4a7   : > { %1732 = vmatpush3.msk.msra.mxu1 %vm680_vm6, %v844_v7 }
 0x4a8   : > { %1741 = vmatprep.subr.mxu1 %v1836_v16 }
 0x4aa   : > { %v1067_v17 = vpop.permute.xlu0 %1066 }
 0x4ad   : > { %v1817_v8 = vpop.eup %1816 }
 0x4ae   : > { %v842_v9 = vmul.f32 %v1817_v8, %v1813_v63 }
 0x4b0   : > { %1734 = vmatmul.mubr.msk.f32.vlgmr.msra.gmra.mrb[4].mxu1 %vm663_vm5, %v842_v9 }
 0x4b1   : > { %1742 = vmatpush3.msra.mxu1 %v581_v10  ;;  %1743 = vmatprep.mubr.msk.f32.mxu1 %vm1835_vm1, %v1836_v16 }
 0x4b2   : > { %1751 = vmatprep.subr.mxu1 %v1836_v16 }
 0x510   : > { %v749_v11 = vpop.f32.mrb[2].mxu1 }
 0x511   : > { %v1725_v12 = vpop.f32.mrb[3].mxu1  ;;  %1744 = vmatmul.mubr.msk.f32.vlgmr.msra.gmra.mrb[6].mxu1 %vm585_vm4, %v749_v11 }
 0x512   : > { %1753 = vmatprep.mubr.msk.f32.mxu1 %vm1835_vm1, %v1836_v16 }
 0x583   : > { %v916_v13 = vpop.f32.mrb[4].mxu1 }
 0x584   : > { %v1735_v15 = vpop.f32.mrb[5].mxu1  ;;  %1739 = vmatmul.mubr.msk.f32.vlgmr.msra.gmra.mrb[6].mxu0 %vm585_vm4, %v916_v13 }
 0x585   : > { %1747 = vmatpush3.xpose.msk.msra.mxu0 %vm585_vm4, %v1069_v14  ;;  %1748 = vmatprep.mubr.msk.f32.mxu0 %vm1835_vm1, %v1836_v16 }
 0x586   : > { %1756 = vmatprep.subr.mxu0 %v1836_v16 }
 0x588   : > { %1749 = vmatmul.mubr.msk.f32.vlgmr.msra.gmra.mrb[8].mxu0 %vm585_vm4, %v1067_v17 }
 0x589   : > { %1758 = vmatprep.mubr.msk.f32.mxu0 %vm1835_vm1, %v1836_v16  ;;  %1757 = vmatpush3.msra.mxu0 %v583_v39 }
 0x58a   : > { %1766 = vmatprep.subr.mxu0 %v1836_v16 }
 0x5e4   : > { %v1062_v18 = vpop.f32.mrb[6].mxu1 }
 0x5e5   : > { %v1745_v19 = vpop.f32.mrb[7].mxu1 }
 0x657   : > { %v989_v20 = vpop.f32.mrb[6].mxu0 }
 0x658   : > { %v1063_v21 = vadd.f32 %v1062_v18, %v989_v20  ;;  %v1740_v22 = vpop.f32.mrb[7].mxu0 }
 0x65b   : > { %v1140_v23 = vpop.f32.mrb[8].mxu0 }
 0x65c   : > { %v1144_v24 = vmul.f32 0.35355338, %v1140_v23  ;;  %v1750_v25 = vpop.f32.mrb[9].mxu0 }
 0x65e   : > { %v1145_v26 = vsel %vm663_vm5, %v1144_v24, -inf }
 0x65f   : > { %1146 = vmax.xlane.f32.xlu0 %v1145_v26 }
 0x675   : > { %1156 = vrot.lane.b32.xlu0 %v1968_v38, %s1841_s18 }
 0x679   : > { %1307 = vrot.lane.b32.xlu0 %v1977_v42, %s1842_s19 }
 0x6ec   : > { %v1147_v27 = vpop.xlane.xlu0 %1146 }
 0x6ed   : > { %v1148_v28 = vsub.f32 %v1144_v24, %v1147_v27 }
 0x6ef   : > { %v1149_v29 = vmul.f32 1.442695, %v1148_v28 }
 0x6f0   : > { %v1157_v30 = vpop.permute.xlu0 %1156 }
 0x6f1   : > { %1818 = vpow2.f32 %v1149_v29  ;;  %1752 = vmatpush3.msk.msra.mxu1 %vm680_vm6, %v1157_v30 }
 0x6f2   : > { %1761 = vmatprep.subr.mxu1 %v1836_v16 }
 0x6f4   : > { %v1308_v37 = vpop.permute.xlu0 %1307 }
 0x6fb   : > { %v1819_v31 = vpop.eup %1818 }
 0x6fc   : > { %v1151_v32 = vsel %vm663_vm5, %v1819_v31, 0.0 }
 0x6fd   : > { %1152 = vadd.xlane.f32.xlu1 %v1151_v32 }
 0x70e   : > { %1309 = vrot.lane.b32.xlu1 %v1968_v38, %s1842_s19 }
 0x78a   : > { %v1153_v33 = vpop.xlane.xlu1 %1152 }
 0x78b   : > { %1820 = vrcp.f32 %v1153_v33 }
 0x78e   : > { %v1310_v36 = vpop.permute.xlu1 %1309 }
 0x795   : > { %v1821_v34 = vpop.eup %1820 }
 0x796   : > { %v1155_v35 = vmul.f32 %v1821_v34, %v1819_v31 }
 0x798   : > { %1754 = vmatmul.mubr.msk.f32.vlgmr.msra.gmra.mrb[8].mxu1 %vm663_vm5, %v1155_v35 }
 0x799   : > { %1762 = vmatpush3.xpose.msk.msra.mxu1 %vm585_vm4, %v1310_v36  ;;  %1763 = vmatprep.mubr.msk.f32.mxu1 %vm1835_vm1, %v1836_v16 }
 0x79a   : > { %1771 = vmatprep.subr.mxu1 %v1836_v16 }
 0x79c   : > { %1764 = vmatmul.mubr.msk.f32.vlgmr.msra.gmra.mrb[10].mxu1 %vm585_vm4, %v1308_v37 }
 0x79d   : > { %1773 = vmatprep.mubr.msk.f32.mxu1 %vm1835_vm1, %v1836_v16 }
 0x86b   : > { %v1229_v40 = vpop.f32.mrb[8].mxu1 }
 0x86c   : > { %v1755_v41 = vpop.f32.mrb[9].mxu1  ;;  %1759 = vmatmul.mubr.msk.f32.vlgmr.msra.gmra.mrb[10].mxu0 %vm585_vm4, %v1229_v40 }
 0x86d   : > { %1768 = vmatprep.mubr.msk.f32.mxu0 %vm1835_vm1, %v1836_v16  ;;  %v584_v16 = vld [vmem:[%s2077_s8 + $0x18] sm:$0xff] }
 0x86e   : > { %1772 = vmatpush3.msra.mxu1 %v584_v16 }
 0x86f   : > { %v1381_v42 = vpop.f32.mrb[10].mxu1 }
 0x870   : > { %v1385_v43 = vmul.f32 0.35355338, %v1381_v42  ;;  %v1765_v44 = vpop.f32.mrb[11].mxu1 }
 0x872   : > { %v1386_v45 = vsel %vm663_vm5, %v1385_v43, -inf }
 0x873   : > { %1387 = vmax.xlane.f32.xlu0 %v1386_v45 }
 0x889   : > { %1397 = vrot.lane.b32.xlu0 %v1968_v38, %s1843_s22 }
 0x900   : > { %v1388_v46 = vpop.xlane.xlu0 %1387 }
 0x901   : > { %v1389_v47 = vsub.f32 %v1385_v43, %v1388_v46 }
 0x903   : > { %v1390_v48 = vmul.f32 1.442695, %v1389_v47 }
 0x904   : > { %v1398_v49 = vpop.permute.xlu0 %1397 }
 0x905   : > { %1822 = vpow2.f32 %v1390_v48  ;;  %1767 = vmatpush3.msk.msra.mxu0 %vm680_vm6, %v1398_v49 }
 0x90f   : > { %v1823_v50 = vpop.eup %1822 }
 0x910   : > { %v1392_v51 = vsel %vm663_vm5, %v1823_v50, 0.0 }
 0x911   : > { %1393 = vadd.xlane.f32.xlu1 %v1392_v51 }
 0x93f   : > { %v1302_v52 = vpop.f32.mrb[10].mxu0 }
 0x940   : > { %v1306_v53 = vadd.f32 %v1302_v52, %v1063_v21  ;;  %v1760_v38 = vpop.f32.mrb[11].mxu0 }
 0x99e   : > { %v1394_v54 = vpop.xlane.xlu1 %1393 }
 0x99f   : > { %1824 = vrcp.f32 %v1394_v54 }
 0x9a9   : > { %v1825_v55 = vpop.eup %1824 }
 0x9aa   : > { %v1396_v56 = vmul.f32 %v1825_v55, %v1823_v50 }
 0x9ac   : > { %1769 = vmatmul.mubr.msk.f32.vlgmr.msra.gmra.mrb[12].mxu0 %vm663_vm5, %v1396_v56 }
 0xa7f   : > { %v1470_v57 = vpop.f32.mrb[12].mxu0 }
 0xa80   : > { %v1770_v58 = vpop.f32.mrb[13].mxu0  ;;  %1774 = vmatmul.mubr.msk.f32.vlgmr.msra.gmra.mrb[12].mxu1 %vm585_vm4, %v1470_v57 }
 0xb53   : > { %v1543_v59 = vpop.f32.mrb[12].mxu1 }
 0xb54   : > { %v1547_v60 = vadd.f32 %v1543_v59, %v1306_v53  ;;  %v1775_v61 = vpop.f32.mrb[13].mxu1 }
 0xb56   : > { %v1548_v63 = vadd.f32 %v1547_v60, %v1913_v0 }
 0xb58   : > { %v1556_v1 = vadd.f32 %v1657_v62, %v1548_v63 }
 0xb5a   : > { %1557 = vst.msk [vmem:[%s371_s29] sm:$0xff] %vm376_vm0, %v1556_v1 }
 0xb5b PF: > { %s20_s13 = sadd.s32 1, %s1832_s13  }
 0xb5c   : > { %p17_p4 = scmp.ge.s32.totalorder %s20_s13, 4  }
 0xb5e   :  { %19 = sbr.rel (!%p17_p4) target bundleno = 1 (0x1), region = 93 }

</bundles_post_ra>
